<compile_context>
chip_gen: v7x
topology: tpu7x:2x2x1
jax: 0.10.0
libtpu: 0.0.40
codegen_flags: <defaults>
</compile_context>

<pallas_src>
import jax
import jax.numpy as jnp
from jax.experimental import pallas as pl
from jax.experimental.pallas import tpu as pltpu

B = 128        # batch (fixed by .view(128, -1) and init_hidden)
T = 10         # seq len (750 / 75)
I = 30         # LSTM input size
IP = 32        # padded input size
H = 75         # LSTM hidden size
HP = 128       # padded hidden size (lane aligned)
NOUT = 2       # dense output size
NOUTP = 128    # padded dense output size (lane-dense store)
NC = 2         # grid programs (both TensorCores on v7x)
BB = B // NC   # batch rows handled per program


def _sigmoid(x):
    # One EUP op instead of exp + divide.
    return 0.5 * jnp.tanh(0.5 * x) + 0.5


def _lstm_dense_kernel(x_ref, wih_ref, whh_ref, b_ref, wd_ref, bd_ref,
                       out_ref, gx_scr, gates_scr, h_scr, c_scr, z_scr):
    """One batch block (BB rows): LSTM recurrence + fused tanh->Linear->sigmoid.

    x_ref   : (T*BB, IP)    bf16  row t*BB+b = x[b, t, :] (zero padded 30->32)
    wih_ref : (IP, 4*HP)    bf16  W_ih^T, gate-blocked, zero padded
    whh_ref : (HP, 4*HP)    bf16  W_hh^T, gate-blocked, zero padded
    b_ref   : (1, 4*HP)     f32   b_ih + b_hh, gate-blocked, zero padded
    wd_ref  : (T*HP, NOUTP) bf16  dense W^T, time-blocked, zero padded
    bd_ref  : (1, NOUTP)    f32
    out_ref : (BB, NOUTP)   f32
    """
    # Hoisted input projection for every timestep of this batch block:
    # rows [t*BB:(t+1)*BB] hold x_t @ W_ih^T + (b_ih + b_hh).
    gx_scr[...] = (jnp.dot(x_ref[...], wih_ref[...],
                           preferred_element_type=jnp.float32)
                   + b_ref[...])

    h_scr[...] = jnp.zeros_like(h_scr)
    c_scr[...] = jnp.zeros_like(c_scr)
    z_scr[...] = jnp.zeros_like(z_scr)

    # Static unrolled recurrence (T = 10). Only h @ W_hh and the gate
    # elementwise math remain on the serial critical path.
    for t in range(T):
        gx_t = gx_scr[t * BB:(t + 1) * BB, :]
        if t == 0:
            gates_scr[...] = gx_t            # h == 0: skip the recurrent matmul
        else:
            h_bf = h_scr[...].astype(jnp.bfloat16)
            gates_scr[...] = gx_t + jnp.dot(
                h_bf, whh_ref[...], preferred_element_type=jnp.float32)

        # Gate-by-gate (8-vreg working sets) to stay out of spill territory.
        i_g = _sigmoid(gates_scr[:, 0 * HP:1 * HP])
        f_g = _sigmoid(gates_scr[:, 1 * HP:2 * HP])
        g_g = jnp.tanh(gates_scr[:, 2 * HP:3 * HP])
        o_g = _sigmoid(gates_scr[:, 3 * HP:4 * HP])

        c_new = f_g * c_scr[...] + i_g * g_g
        h_new = o_g * jnp.tanh(c_new)
        c_scr[...] = c_new
        h_scr[...] = h_new

        # Fused dense head: z += tanh(h_t) @ Wd_t  (lane-dense, padded N=128).
        z_scr[...] += jnp.dot(jnp.tanh(h_new).astype(jnp.bfloat16),
                              wd_ref[t * HP:(t + 1) * HP, :],
                              preferred_element_type=jnp.float32)

    out_ref[...] = _sigmoid(z_scr[...] + bd_ref[...])


@jax.jit
def lstm_forward(x, w_ih, w_hh, b_ih, b_hh, w_dense, b_dense):
    """x: (B, T, I) f32. Weights in PyTorch layout:
       w_ih (4H, I), w_hh (4H, H), b_ih/b_hh (4H,), w_dense (2, 750), b_dense (2,)."""
    f32, bf16 = jnp.float32, jnp.bfloat16

    # --- pack / pad parameters into lane-aligned slabs (plain-JAX glue) ---
    # x: per-program, time-major rows: row i*T*BB + t*BB + b <- x[i*BB+b, t, :];
    # pad feature dim 30 -> 32; cast matmul operand to bf16.
    x_r = (x.astype(f32).reshape(NC, BB, T, I)
           .transpose(0, 2, 1, 3).reshape(NC * T * BB, I))
    x_p = jnp.zeros((NC * T * BB, IP), bf16).at[:, :I].set(x_r.astype(bf16))

    # gate-blocked W_ih^T / W_hh^T / (b_ih + b_hh), zero padded 75 -> 128.
    wih_p = jnp.zeros((IP, 4 * HP), bf16)
    whh_p = jnp.zeros((HP, 4 * HP), bf16)
    b_p = jnp.zeros((1, 4 * HP), f32)
    b_sum = (b_ih + b_hh).astype(f32)
    for g in range(4):
        wih_p = wih_p.at[:I, g * HP:g * HP + H].set(
            w_ih[g * H:(g + 1) * H, :].T.astype(bf16))
        whh_p = whh_p.at[:H, g * HP:g * HP + H].set(
            w_hh[g * H:(g + 1) * H, :].T.astype(bf16))
        b_p = b_p.at[0, g * HP:g * HP + H].set(b_sum[g * H:(g + 1) * H])

    # time-blocked dense W^T: (T*HP, NOUTP); row t*HP+k <- w_dense[:, t*H+k].
    wd_p = jnp.zeros((T * HP, NOUTP), bf16)
    for t in range(T):
        wd_p = wd_p.at[t * HP:t * HP + H, :NOUT].set(
            w_dense[:, t * H:(t + 1) * H].T.astype(bf16))
    bd_p = jnp.zeros((1, NOUTP), f32).at[0, :NOUT].set(b_dense.astype(f32))

    flops = 2 * B * T * (IP + HP) * 4 * HP + 2 * B * T * HP * NOUTP
    transcendentals = 6 * B * T * HP + B * NOUTP
    bytes_accessed = (x_p.size * 2 + wih_p.size * 2 + whh_p.size * 2
                      + b_p.size * 4 + wd_p.size * 2 + bd_p.size * 4
                      + B * NOUTP * 4)

    out_p = pl.pallas_call(
        _lstm_dense_kernel,
        out_shape=jax.ShapeDtypeStruct((B, NOUTP), f32),
        grid_spec=pltpu.PrefetchScalarGridSpec(
            num_scalar_prefetch=0,
            grid=(NC,),
            in_specs=[
                pl.BlockSpec((T * BB, IP), lambda i: (i, 0)),      # x block
                pl.BlockSpec((IP, 4 * HP), lambda i: (0, 0)),      # W_ih^T
                pl.BlockSpec((HP, 4 * HP), lambda i: (0, 0)),      # W_hh^T
                pl.BlockSpec((1, 4 * HP), lambda i: (0, 0)),       # gate bias
                pl.BlockSpec((T * HP, NOUTP), lambda i: (0, 0)),   # dense W^T
                pl.BlockSpec((1, NOUTP), lambda i: (0, 0)),        # dense bias
            ],
            out_specs=pl.BlockSpec((BB, NOUTP), lambda i: (i, 0)),
            scratch_shapes=[
                pltpu.VMEM((T * BB, 4 * HP), f32),   # hoisted x-projection
                pltpu.VMEM((BB, 4 * HP), f32),       # per-step gates
                pltpu.VMEM((BB, HP), f32),           # h
                pltpu.VMEM((BB, HP), f32),           # c
                pltpu.VMEM((BB, NOUTP), f32),        # fused-head accumulator
            ],
        ),
        compiler_params=pltpu.CompilerParams(
            dimension_semantics=("parallel",)),
        cost_estimate=pl.CostEstimate(
            flops=flops, transcendentals=transcendentals,
            bytes_accessed=bytes_accessed),
    )(x_p, wih_p, whh_p, b_p, wd_p, bd_p)

    return out_p[:, :NOUT]


def reference_forward(x, w_ih, w_hh, b_ih, b_hh, w_dense, b_dense):
    """Pure-JAX f32 reference matching PyTorch nn.LSTM (+ head) semantics."""
    h = jnp.zeros((B, H), jnp.float32)
    c = jnp.zeros((B, H), jnp.float32)
    outs = []
    for t in range(T):
        gates = x[:, t, :] @ w_ih.T + b_ih + h @ w_hh.T + b_hh
        i_g, f_g, g_g, o_g = jnp.split(gates, 4, axis=1)
        i_g = jax.nn.sigmoid(i_g)
        f_g = jax.nn.sigmoid(f_g)
        g_g = jnp.tanh(g_g)
        o_g = jax.nn.sigmoid(o_g)
        c = f_g * c + i_g * g_g
        h = o_g * jnp.tanh(c)
        outs.append(h)
    flat = jnp.stack(outs, axis=1).reshape(B, T * H)
    return jax.nn.sigmoid(jnp.tanh(flat) @ w_dense.T + b_dense)


if __name__ == "__main__":
    key = jax.random.PRNGKey(0)
    kx, k1, k2, k3, k4, k5, k6 = jax.random.split(key, 7)

    # Deterministic synthetic parameters (PyTorch-style uniform init ranges).
    s_lstm = 1.0 / jnp.sqrt(jnp.float32(H))
    s_lin = 1.0 / jnp.sqrt(jnp.float32(T * H))
    w_ih = jax.random.uniform(k1, (4 * H, I), jnp.float32, -s_lstm, s_lstm)
    w_hh = jax.random.uniform(k2, (4 * H, H), jnp.float32, -s_lstm, s_lstm)
    b_ih = jax.random.uniform(k3, (4 * H,), jnp.float32, -s_lstm, s_lstm)
    b_hh = jax.random.uniform(k4, (4 * H,), jnp.float32, -s_lstm, s_lstm)
    w_dense = jax.random.uniform(k5, (NOUT, T * H), jnp.float32, -s_lin, s_lin)
    b_dense = jax.random.uniform(k6, (NOUT,), jnp.float32, -s_lin, s_lin)

    x = jax.random.normal(kx, (B, T, I), jnp.float32)

    out = lstm_forward(x, w_ih, w_hh, b_ih, b_hh, w_dense, b_dense)
    out = jax.block_until_ready(out)

    ref = reference_forward(x, w_ih, w_hh, b_ih, b_hh, w_dense, b_dense)
    assert out.shape == (B, NOUT), out.shape
    # Tolerance relaxed vs the f32 reference because matmul operands are bf16
    # (f32 accumulation); outputs are post-sigmoid values in (0, 1).
    assert jnp.allclose(out, ref, atol=2e-2, rtol=2e-2), \
        float(jnp.max(jnp.abs(out - ref)))

    # TODO(synk): original module casts the zero hidden state to .double();
    # the recurrence here runs in f32 activations / bf16 matmul operands
    # (the initial states are zeros, so the math matches up to precision).
    print("KERNEL_OK")
</pallas_src>

<mosaic_0001>
module attributes {stable_mosaic.version = 11 : i64} {
  func.func @_lstm_dense_kernel(%arg0: i32, %arg1: memref<640x32xbf16, #tpu.memory_space<vmem>>, %arg2: memref<32x512xbf16, #tpu.memory_space<vmem>>, %arg3: memref<128x512xbf16, #tpu.memory_space<vmem>>, %arg4: memref<1x512xf32, #tpu.memory_space<vmem>>, %arg5: memref<1280x128xbf16, #tpu.memory_space<vmem>>, %arg6: memref<1x128xf32, #tpu.memory_space<vmem>>, %arg7: memref<64x128xf32, #tpu.memory_space<vmem>>, %arg8: memref<640x512xf32, #tpu.memory_space<vmem>>, %arg9: memref<64x512xf32, #tpu.memory_space<vmem>>, %arg10: memref<64x128xf32, #tpu.memory_space<vmem>>, %arg11: memref<64x128xf32, #tpu.memory_space<vmem>>, %arg12: memref<64x128xf32, #tpu.memory_space<vmem>>) attributes {dimension_semantics = [#tpu.dimension_semantics<parallel>], iteration_bounds = array<i64: 2>, scalar_prefetch = 0 : i64, scratch_operands = 5 : i64, tpu.core_type = #tpu.core_type<tc>, window_params = [{transform_indices = @transform_0, window_bounds = array<i64: 640, 32>}, {pipeline_mode = #tpu.pipeline_mode<synchronous>, transform_indices = @transform_1, window_bounds = array<i64: 32, 512>}, {pipeline_mode = #tpu.pipeline_mode<synchronous>, transform_indices = @transform_2, window_bounds = array<i64: 128, 512>}, {pipeline_mode = #tpu.pipeline_mode<synchronous>, transform_indices = @transform_3, window_bounds = array<i64: 1, 512>}, {pipeline_mode = #tpu.pipeline_mode<synchronous>, transform_indices = @transform_4, window_bounds = array<i64: 1280, 128>}, {pipeline_mode = #tpu.pipeline_mode<synchronous>, transform_indices = @transform_5, window_bounds = array<i64: 1, 128>}, {transform_indices = @transform_6, window_bounds = array<i64: 64, 128>}]} {
    %c0 = arith.constant 0 : index
    %c0_0 = arith.constant 0 : index
    %0 = vector.load %arg1[%c0, %c0_0] : memref<640x32xbf16, #tpu.memory_space<vmem>>, vector<640x32xbf16>
    %c0_1 = arith.constant 0 : index
    %c0_2 = arith.constant 0 : index
    %1 = vector.load %arg2[%c0_1, %c0_2] : memref<32x512xbf16, #tpu.memory_space<vmem>>, vector<32x512xbf16>
    %cst = arith.constant dense<0.000000e+00> : vector<640x512xf32>
    %2 = tpu.matmul %0, %1, %cst {dimension_numbers = #tpu.dot_dimension_numbers<[1], [0], [0], [1], [0, 0, 1, 1], [], []>} : vector<640x32xbf16>, vector<32x512xbf16>, vector<640x512xf32> -> vector<640x512xf32>
    %c0_3 = arith.constant 0 : index
    %c0_4 = arith.constant 0 : index
    %3 = vector.load %arg4[%c0_3, %c0_4] : memref<1x512xf32, #tpu.memory_space<vmem>>, vector<1x512xf32>
    %4 = vector.broadcast %3 : vector<1x512xf32> to vector<640x512xf32>
    %5 = arith.addf %2, %4 : vector<640x512xf32>
    %c0_5 = arith.constant 0 : index
    %c0_6 = arith.constant 0 : index
    %6 = vector.load %arg8[%c0_5, %c0_6] : memref<640x512xf32, #tpu.memory_space<vmem>>, vector<640x512xf32>
    tpu.vector_store %arg8[%c0_5, %c0_6], %5 {strides = array<i32>} : memref<640x512xf32, #tpu.memory_space<vmem>>, vector<640x512xf32>,
    %cst_7 = arith.constant 0.000000e+00 : f32
    %7 = vector.broadcast %cst_7 : f32 to vector<64x128xf32>
    %c0_8 = arith.constant 0 : index
    %c0_9 = arith.constant 0 : index
    %8 = vector.load %arg10[%c0_8, %c0_9] : memref<64x128xf32, #tpu.memory_space<vmem>>, vector<64x128xf32>
    tpu.vector_store %arg10[%c0_8, %c0_9], %7 {strides = array<i32>} : memref<64x128xf32, #tpu.memory_space<vmem>>, vector<64x128xf32>,
    %cst_10 = arith.constant 0.000000e+00 : f32
    %9 = vector.broadcast %cst_10 : f32 to vector<64x128xf32>
    %c0_11 = arith.constant 0 : index
    %c0_12 = arith.constant 0 : index
    %10 = vector.load %arg11[%c0_11, %c0_12] : memref<64x128xf32, #tpu.memory_space<vmem>>, vector<64x128xf32>
    tpu.vector_store %arg11[%c0_11, %c0_12], %9 {strides = array<i32>} : memref<64x128xf32, #tpu.memory_space<vmem>>, vector<64x128xf32>,
    %cst_13 = arith.constant 0.000000e+00 : f32
    %11 = vector.broadcast %cst_13 : f32 to vector<64x128xf32>
    %c0_14 = arith.constant 0 : index
    %c0_15 = arith.constant 0 : index
    %12 = vector.load %arg12[%c0_14, %c0_15] : memref<64x128xf32, #tpu.memory_space<vmem>>, vector<64x128xf32>
    tpu.vector_store %arg12[%c0_14, %c0_15], %11 {strides = array<i32>} : memref<64x128xf32, #tpu.memory_space<vmem>>, vector<64x128xf32>,
    %c0_16 = arith.constant 0 : index
    %c0_17 = arith.constant 0 : index
    %13 = vector.load %arg8[%c0_16, %c0_17] : memref<640x512xf32, #tpu.memory_space<vmem>>, vector<64x512xf32>
    %c0_18 = arith.constant 0 : index
    %c0_19 = arith.constant 0 : index
    %14 = vector.load %arg9[%c0_18, %c0_19] : memref<64x512xf32, #tpu.memory_space<vmem>>, vector<64x512xf32>
    tpu.vector_store %arg9[%c0_18, %c0_19], %13 {strides = array<i32>} : memref<64x512xf32, #tpu.memory_space<vmem>>, vector<64x512xf32>,
    %c0_20 = arith.constant 0 : index
    %c0_21 = arith.constant 0 : index
    %15 = vector.load %arg9[%c0_20, %c0_21] : memref<64x512xf32, #tpu.memory_space<vmem>>, vector<64x128xf32>
    %cst_22 = arith.constant 5.000000e-01 : f32
    %16 = vector.broadcast %cst_22 : f32 to vector<64x128xf32>
    %17 = arith.mulf %16, %15 : vector<64x128xf32>
    %18 = math.tanh %17 : vector<64x128xf32>
    %cst_23 = arith.constant 5.000000e-01 : f32
    %19 = vector.broadcast %cst_23 : f32 to vector<64x128xf32>
    %20 = arith.mulf %19, %18 : vector<64x128xf32>
    %cst_24 = arith.constant 5.000000e-01 : f32
    %21 = vector.broadcast %cst_24 : f32 to vector<64x128xf32>
    %22 = arith.addf %20, %21 : vector<64x128xf32>
    %c0_25 = arith.constant 0 : index
    %c128 = arith.constant 128 : index
    %23 = vector.load %arg9[%c0_25, %c128] : memref<64x512xf32, #tpu.memory_space<vmem>>, vector<64x128xf32>
    %cst_26 = arith.constant 5.000000e-01 : f32
    %24 = vector.broadcast %cst_26 : f32 to vector<64x128xf32>
    %25 = arith.mulf %24, %23 : vector<64x128xf32>
    %26 = math.tanh %25 : vector<64x128xf32>
    %cst_27 = arith.constant 5.000000e-01 : f32
    %27 = vector.broadcast %cst_27 : f32 to vector<64x128xf32>
    %28 = arith.mulf %27, %26 : vector<64x128xf32>
    %cst_28 = arith.constant 5.000000e-01 : f32
    %29 = vector.broadcast %cst_28 : f32 to vector<64x128xf32>
    %30 = arith.addf %28, %29 : vector<64x128xf32>
    %c0_29 = arith.constant 0 : index
    %c256 = arith.constant 256 : index
    %31 = vector.load %arg9[%c0_29, %c256] : memref<64x512xf32, #tpu.memory_space<vmem>>, vector<64x128xf32>
    %32 = math.tanh %31 : vector<64x128xf32>
    %c0_30 = arith.constant 0 : index
    %c384 = arith.constant 384 : index
    %33 = vector.load %arg9[%c0_30, %c384] : memref<64x512xf32, #tpu.memory_space<vmem>>, vector<64x128xf32>
    %cst_31 = arith.constant 5.000000e-01 : f32
    %34 = vector.broadcast %cst_31 : f32 to vector<64x128xf32>
    %35 = arith.mulf %34, %33 : vector<64x128xf32>
    %36 = math.tanh %35 : vector<64x128xf32>
    %cst_32 = arith.constant 5.000000e-01 : f32
    %37 = vector.broadcast %cst_32 : f32 to vector<64x128xf32>
    %38 = arith.mulf %37, %36 : vector<64x128xf32>
    %cst_33 = arith.constant 5.000000e-01 : f32
    %39 = vector.broadcast %cst_33 : f32 to vector<64x128xf32>
    %40 = arith.addf %38, %39 : vector<64x128xf32>
    %c0_34 = arith.constant 0 : index
    %c0_35 = arith.constant 0 : index
    %41 = vector.load %arg11[%c0_34, %c0_35] : memref<64x128xf32, #tpu.memory_space<vmem>>, vector<64x128xf32>
    %42 = arith.mulf %30, %41 : vector<64x128xf32>
    %43 = arith.mulf %22, %32 : vector<64x128xf32>
    %44 = arith.addf %42, %43 : vector<64x128xf32>
    %45 = math.tanh %44 : vector<64x128xf32>
    %46 = arith.mulf %40, %45 : vector<64x128xf32>
    %c0_36 = arith.constant 0 : index
    %c0_37 = arith.constant 0 : index
    %47 = vector.load %arg11[%c0_36, %c0_37] : memref<64x128xf32, #tpu.memory_space<vmem>>, vector<64x128xf32>
    tpu.vector_store %arg11[%c0_36, %c0_37], %44 {strides = array<i32>} : memref<64x128xf32, #tpu.memory_space<vmem>>, vector<64x128xf32>,
    %c0_38 = arith.constant 0 : index
    %c0_39 = arith.constant 0 : index
    %48 = vector.load %arg10[%c0_38, %c0_39] : memref<64x128xf32, #tpu.memory_space<vmem>>, vector<64x128xf32>
    tpu.vector_store %arg10[%c0_38, %c0_39], %46 {strides = array<i32>} : memref<64x128xf32, #tpu.memory_space<vmem>>, vector<64x128xf32>,
    %c0_40 = arith.constant 0 : index
    %c0_41 = arith.constant 0 : index
    %49 = vector.load %arg12[%c0_40, %c0_41] : memref<64x128xf32, #tpu.memory_space<vmem>>, vector<64x128xf32>
    %50 = math.tanh %46 : vector<64x128xf32>
    %51 = arith.truncf %50 : vector<64x128xf32> to vector<64x128xbf16>
    %c0_42 = arith.constant 0 : index
    %c0_43 = arith.constant 0 : index
    %52 = vector.load %arg5[%c0_42, %c0_43] : memref<1280x128xbf16, #tpu.memory_space<vmem>>, vector<128x128xbf16>
    %cst_44 = arith.constant dense<0.000000e+00> : vector<64x128xf32>
    %53 = tpu.matmul %51, %52, %cst_44 {dimension_numbers = #tpu.dot_dimension_numbers<[1], [0], [0], [1], [0, 0, 1, 1], [], []>} : vector<64x128xbf16>, vector<128x128xbf16>, vector<64x128xf32> -> vector<64x128xf32>
    %54 = arith.addf %49, %53 : vector<64x128xf32>
    %c0_45 = arith.constant 0 : index
    %c0_46 = arith.constant 0 : index
    %55 = vector.load %arg12[%c0_45, %c0_46] : memref<64x128xf32, #tpu.memory_space<vmem>>, vector<64x128xf32>
    tpu.vector_store %arg12[%c0_45, %c0_46], %54 {strides = array<i32>} : memref<64x128xf32, #tpu.memory_space<vmem>>, vector<64x128xf32>,
    %c64 = arith.constant 64 : index
    %c0_47 = arith.constant 0 : index
    %56 = vector.load %arg8[%c64, %c0_47] : memref<640x512xf32, #tpu.memory_space<vmem>>, vector<64x512xf32>
    %c0_48 = arith.constant 0 : index
    %c0_49 = arith.constant 0 : index
    %57 = vector.load %arg10[%c0_48, %c0_49] : memref<64x128xf32, #tpu.memory_space<vmem>>, vector<64x128xf32>
    %58 = arith.truncf %57 : vector<64x128xf32> to vector<64x128xbf16>
    %c0_50 = arith.constant 0 : index
    %c0_51 = arith.constant 0 : index
    %59 = vector.load %arg3[%c0_50, %c0_51] : memref<128x512xbf16, #tpu.memory_space<vmem>>, vector<128x512xbf16>
    %cst_52 = arith.constant dense<0.000000e+00> : vector<64x512xf32>
    %60 = tpu.matmul %58, %59, %cst_52 {dimension_numbers = #tpu.dot_dimension_numbers<[1], [0], [0], [1], [0, 0, 1, 1], [], []>} : vector<64x128xbf16>, vector<128x512xbf16>, vector<64x512xf32> -> vector<64x512xf32>
    %61 = arith.addf %56, %60 : vector<64x512xf32>
    %c0_53 = arith.constant 0 : index
    %c0_54 = arith.constant 0 : index
    %62 = vector.load %arg9[%c0_53, %c0_54] : memref<64x512xf32, #tpu.memory_space<vmem>>, vector<64x512xf32>
    tpu.vector_store %arg9[%c0_53, %c0_54], %61 {strides = array<i32>} : memref<64x512xf32, #tpu.memory_space<vmem>>, vector<64x512xf32>,
    %c0_55 = arith.constant 0 : index
    %c0_56 = arith.constant 0 : index
    %63 = vector.load %arg9[%c0_55, %c0_56] : memref<64x512xf32, #tpu.memory_space<vmem>>, vector<64x128xf32>
    %cst_57 = arith.constant 5.000000e-01 : f32
    %64 = vector.broadcast %cst_57 : f32 to vector<64x128xf32>
    %65 = arith.mulf %64, %63 : vector<64x128xf32>
    %66 = math.tanh %65 : vector<64x128xf32>
    %cst_58 = arith.constant 5.000000e-01 : f32
    %67 = vector.broadcast %cst_58 : f32 to vector<64x128xf32>
    %68 = arith.mulf %67, %66 : vector<64x128xf32>
    %cst_59 = arith.constant 5.000000e-01 : f32
    %69 = vector.broadcast %cst_59 : f32 to vector<64x128xf32>
    %70 = arith.addf %68, %69 : vector<64x128xf32>
    %c0_60 = arith.constant 0 : index
    %c128_61 = arith.constant 128 : index
    %71 = vector.load %arg9[%c0_60, %c128_61] : memref<64x512xf32, #tpu.memory_space<vmem>>, vector<64x128xf32>
    %cst_62 = arith.constant 5.000000e-01 : f32
    %72 = vector.broadcast %cst_62 : f32 to vector<64x128xf32>
    %73 = arith.mulf %72, %71 : vector<64x128xf32>
    %74 = math.tanh %73 : vector<64x128xf32>
    %cst_63 = arith.constant 5.000000e-01 : f32
    %75 = vector.broadcast %cst_63 : f32 to vector<64x128xf32>
    %76 = arith.mulf %75, %74 : vector<64x128xf32>
    %cst_64 = arith.constant 5.000000e-01 : f32
    %77 = vector.broadcast %cst_64 : f32 to vector<64x128xf32>
    %78 = arith.addf %76, %77 : vector<64x128xf32>
    %c0_65 = arith.constant 0 : index
    %c256_66 = arith.constant 256 : index
    %79 = vector.load %arg9[%c0_65, %c256_66] : memref<64x512xf32, #tpu.memory_space<vmem>>, vector<64x128xf32>
    %80 = math.tanh %79 : vector<64x128xf32>
    %c0_67 = arith.constant 0 : index
    %c384_68 = arith.constant 384 : index
    %81 = vector.load %arg9[%c0_67, %c384_68] : memref<64x512xf32, #tpu.memory_space<vmem>>, vector<64x128xf32>
    %cst_69 = arith.constant 5.000000e-01 : f32
    %82 = vector.broadcast %cst_69 : f32 to vector<64x128xf32>
    %83 = arith.mulf %82, %81 : vector<64x128xf32>
    %84 = math.tanh %83 : vector<64x128xf32>
    %cst_70 = arith.constant 5.000000e-01 : f32
    %85 = vector.broadcast %cst_70 : f32 to vector<64x128xf32>
    %86 = arith.mulf %85, %84 : vector<64x128xf32>
    %cst_71 = arith.constant 5.000000e-01 : f32
    %87 = vector.broadcast %cst_71 : f32 to vector<64x128xf32>
    %88 = arith.addf %86, %87 : vector<64x128xf32>
    %c0_72 = arith.constant 0 : index
    %c0_73 = arith.constant 0 : index
    %89 = vector.load %arg11[%c0_72, %c0_73] : memref<64x128xf32, #tpu.memory_space<vmem>>, vector<64x128xf32>
    %90 = arith.mulf %78, %89 : vector<64x128xf32>
    %91 = arith.mulf %70, %80 : vector<64x128xf32>
    %92 = arith.addf %90, %91 : vector<64x128xf32>
    %93 = math.tanh %92 : vector<64x128xf32>
    %94 = arith.mulf %88, %93 : vector<64x128xf32>
    %c0_74 = arith.constant 0 : index
    %c0_75 = arith.constant 0 : index
    %95 = vector.load %arg11[%c0_74, %c0_75] : memref<64x128xf32, #tpu.memory_space<vmem>>, vector<64x128xf32>
    tpu.vector_store %arg11[%c0_74, %c0_75], %92 {strides = array<i32>} : memref<64x128xf32, #tpu.memory_space<vmem>>, vector<64x128xf32>,
    %c0_76 = arith.constant 0 : index
    %c0_77 = arith.constant 0 : index
    %96 = vector.load %arg10[%c0_76, %c0_77] : memref<64x128xf32, #tpu.memory_space<vmem>>, vector<64x128xf32>
    tpu.vector_store %arg10[%c0_76, %c0_77], %94 {strides = array<i32>} : memref<64x128xf32, #tpu.memory_space<vmem>>, vector<64x128xf32>,
    %c0_78 = arith.constant 0 : index
    %c0_79 = arith.constant 0 : index
    %97 = vector.load %arg12[%c0_78, %c0_79] : memref<64x128xf32, #tpu.memory_space<vmem>>, vector<64x128xf32>
    %98 = math.tanh %94 : vector<64x128xf32>
    %99 = arith.truncf %98 : vector<64x128xf32> to vector<64x128xbf16>
    %c128_80 = arith.constant 128 : index
    %c0_81 = arith.constant 0 : index
    %100 = vector.load %arg5[%c128_80, %c0_81] : memref<1280x128xbf16, #tpu.memory_space<vmem>>, vector<128x128xbf16>
    %cst_82 = arith.constant dense<0.000000e+00> : vector<64x128xf32>
    %101 = tpu.matmul %99, %100, %cst_82 {dimension_numbers = #tpu.dot_dimension_numbers<[1], [0], [0], [1], [0, 0, 1, 1], [], []>} : vector<64x128xbf16>, vector<128x128xbf16>, vector<64x128xf32> -> vector<64x128xf32>
    %102 = arith.addf %97, %101 : vector<64x128xf32>
    %c0_83 = arith.constant 0 : index
    %c0_84 = arith.constant 0 : index
    %103 = vector.load %arg12[%c0_83, %c0_84] : memref<64x128xf32, #tpu.memory_space<vmem>>, vector<64x128xf32>
    tpu.vector_store %arg12[%c0_83, %c0_84], %102 {strides = array<i32>} : memref<64x128xf32, #tpu.memory_space<vmem>>, vector<64x128xf32>,
    %c128_85 = arith.constant 128 : index
    %c0_86 = arith.constant 0 : index
    %104 = vector.load %arg8[%c128_85, %c0_86] : memref<640x512xf32, #tpu.memory_space<vmem>>, vector<64x512xf32>
    %c0_87 = arith.constant 0 : index
    %c0_88 = arith.constant 0 : index
    %105 = vector.load %arg10[%c0_87, %c0_88] : memref<64x128xf32, #tpu.memory_space<vmem>>, vector<64x128xf32>
    %106 = arith.truncf %105 : vector<64x128xf32> to vector<64x128xbf16>
    %c0_89 = arith.constant 0 : index
    %c0_90 = arith.constant 0 : index
    %107 = vector.load %arg3[%c0_89, %c0_90] : memref<128x512xbf16, #tpu.memory_space<vmem>>, vector<128x512xbf16>
    %cst_91 = arith.constant dense<0.000000e+00> : vector<64x512xf32>
    %108 = tpu.matmul %106, %107, %cst_91 {dimension_numbers = #tpu.dot_dimension_numbers<[1], [0], [0], [1], [0, 0, 1, 1], [], []>} : vector<64x128xbf16>, vector<128x512xbf16>, vector<64x512xf32> -> vector<64x512xf32>
    %109 = arith.addf %104, %108 : vector<64x512xf32>
    %c0_92 = arith.constant 0 : index
    %c0_93 = arith.constant 0 : index
    %110 = vector.load %arg9[%c0_92, %c0_93] : memref<64x512xf32, #tpu.memory_space<vmem>>, vector<64x512xf32>
    tpu.vector_store %arg9[%c0_92, %c0_93], %109 {strides = array<i32>} : memref<64x512xf32, #tpu.memory_space<vmem>>, vector<64x512xf32>,
    %c0_94 = arith.constant 0 : index
    %c0_95 = arith.constant 0 : index
    %111 = vector.load %arg9[%c0_94, %c0_95] : memref<64x512xf32, #tpu.memory_space<vmem>>, vector<64x128xf32>
    %cst_96 = arith.constant 5.000000e-01 : f32
    %112 = vector.broadcast %cst_96 : f32 to vector<64x128xf32>
    %113 = arith.mulf %112, %111 : vector<64x128xf32>
    %114 = math.tanh %113 : vector<64x128xf32>
    %cst_97 = arith.constant 5.000000e-01 : f32
    %115 = vector.broadcast %cst_97 : f32 to vector<64x128xf32>
    %116 = arith.mulf %115, %114 : vector<64x128xf32>
    %cst_98 = arith.constant 5.000000e-01 : f32
    %117 = vector.broadcast %cst_98 : f32 to vector<64x128xf32>
    %118 = arith.addf %116, %117 : vector<64x128xf32>
    %c0_99 = arith.constant 0 : index
    %c128_100 = arith.constant 128 : index
    %119 = vector.load %arg9[%c0_99, %c128_100] : memref<64x512xf32, #tpu.memory_space<vmem>>, vector<64x128xf32>
    %cst_101 = arith.constant 5.000000e-01 : f32
    %120 = vector.broadcast %cst_101 : f32 to vector<64x128xf32>
    %121 = arith.mulf %120, %119 : vector<64x128xf32>
    %122 = math.tanh %121 : vector<64x128xf32>
    %cst_102 = arith.constant 5.000000e-01 : f32
    %123 = vector.broadcast %cst_102 : f32 to vector<64x128xf32>
    %124 = arith.mulf %123, %122 : vector<64x128xf32>
    %cst_103 = arith.constant 5.000000e-01 : f32
    %125 = vector.broadcast %cst_103 : f32 to vector<64x128xf32>
    %126 = arith.addf %124, %125 : vector<64x128xf32>
    %c0_104 = arith.constant 0 : index
    %c256_105 = arith.constant 256 : index
    %127 = vector.load %arg9[%c0_104, %c256_105] : memref<64x512xf32, #tpu.memory_space<vmem>>, vector<64x128xf32>
    %128 = math.tanh %127 : vector<64x128xf32>
    %c0_106 = arith.constant 0 : index
    %c384_107 = arith.constant 384 : index
    %129 = vector.load %arg9[%c0_106, %c384_107] : memref<64x512xf32, #tpu.memory_space<vmem>>, vector<64x128xf32>
    %cst_108 = arith.constant 5.000000e-01 : f32
    %130 = vector.broadcast %cst_108 : f32 to vector<64x128xf32>
    %131 = arith.mulf %130, %129 : vector<64x128xf32>
    %132 = math.tanh %131 : vector<64x128xf32>
    %cst_109 = arith.constant 5.000000e-01 : f32
    %133 = vector.broadcast %cst_109 : f32 to vector<64x128xf32>
    %134 = arith.mulf %133, %132 : vector<64x128xf32>
    %cst_110 = arith.constant 5.000000e-01 : f32
    %135 = vector.broadcast %cst_110 : f32 to vector<64x128xf32>
    %136 = arith.addf %134, %135 : vector<64x128xf32>
    %c0_111 = arith.constant 0 : index
    %c0_112 = arith.constant 0 : index
    %137 = vector.load %arg11[%c0_111, %c0_112] : memref<64x128xf32, #tpu.memory_space<vmem>>, vector<64x128xf32>
    %138 = arith.mulf %126, %137 : vector<64x128xf32>
    %139 = arith.mulf %118, %128 : vector<64x128xf32>
    %140 = arith.addf %138, %139 : vector<64x128xf32>
    %141 = math.tanh %140 : vector<64x128xf32>
    %142 = arith.mulf %136, %141 : vector<64x128xf32>
    %c0_113 = arith.constant 0 : index
    %c0_114 = arith.constant 0 : index
    %143 = vector.load %arg11[%c0_113, %c0_114] : memref<64x128xf32, #tpu.memory_space<vmem>>, vector<64x128xf32>
    tpu.vector_store %arg11[%c0_113, %c0_114], %140 {strides = array<i32>} : memref<64x128xf32, #tpu.memory_space<vmem>>, vector<64x128xf32>,
    %c0_115 = arith.constant 0 : index
    %c0_116 = arith.constant 0 : index
    %144 = vector.load %arg10[%c0_115, %c0_116] : memref<64x128xf32, #tpu.memory_space<vmem>>, vector<64x128xf32>
    tpu.vector_store %arg10[%c0_115, %c0_116], %142 {strides = array<i32>} : memref<64x128xf32, #tpu.memory_space<vmem>>, vector<64x128xf32>,
    %c0_117 = arith.constant 0 : index
    %c0_118 = arith.constant 0 : index
    %145 = vector.load %arg12[%c0_117, %c0_118] : memref<64x128xf32, #tpu.memory_space<vmem>>, vector<64x128xf32>
    %146 = math.tanh %142 : vector<64x128xf32>
    %147 = arith.truncf %146 : vector<64x128xf32> to vector<64x128xbf16>
    %c256_119 = arith.constant 256 : index
    %c0_120 = arith.constant 0 : index
    %148 = vector.load %arg5[%c256_119, %c0_120] : memref<1280x128xbf16, #tpu.memory_space<vmem>>, vector<128x128xbf16>
    %cst_121 = arith.constant dense<0.000000e+00> : vector<64x128xf32>
    %149 = tpu.matmul %147, %148, %cst_121 {dimension_numbers = #tpu.dot_dimension_numbers<[1], [0], [0], [1], [0, 0, 1, 1], [], []>} : vector<64x128xbf16>, vector<128x128xbf16>, vector<64x128xf32> -> vector<64x128xf32>
    %150 = arith.addf %145, %149 : vector<64x128xf32>
    %c0_122 = arith.constant 0 : index
    %c0_123 = arith.constant 0 : index
    %151 = vector.load %arg12[%c0_122, %c0_123] : memref<64x128xf32, #tpu.memory_space<vmem>>, vector<64x128xf32>
    tpu.vector_store %arg12[%c0_122, %c0_123], %150 {strides = array<i32>} : memref<64x128xf32, #tpu.memory_space<vmem>>, vector<64x128xf32>,
    %c192 = arith.constant 192 : index
    %c0_124 = arith.constant 0 : index
    %152 = vector.load %arg8[%c192, %c0_124] : memref<640x512xf32, #tpu.memory_space<vmem>>, vector<64x512xf32>
    %c0_125 = arith.constant 0 : index
    %c0_126 = arith.constant 0 : index
    %153 = vector.load %arg10[%c0_125, %c0_126] : memref<64x128xf32, #tpu.memory_space<vmem>>, vector<64x128xf32>
    %154 = arith.truncf %153 : vector<64x128xf32> to vector<64x128xbf16>
    %c0_127 = arith.constant 0 : index
    %c0_128 = arith.constant 0 : index
    %155 = vector.load %arg3[%c0_127, %c0_128] : memref<128x512xbf16, #tpu.memory_space<vmem>>, vector<128x512xbf16>
    %cst_129 = arith.constant dense<0.000000e+00> : vector<64x512xf32>
    %156 = tpu.matmul %154, %155, %cst_129 {dimension_numbers = #tpu.dot_dimension_numbers<[1], [0], [0], [1], [0, 0, 1, 1], [], []>} : vector<64x128xbf16>, vector<128x512xbf16>, vector<64x512xf32> -> vector<64x512xf32>
    %157 = arith.addf %152, %156 : vector<64x512xf32>
    %c0_130 = arith.constant 0 : index
    %c0_131 = arith.constant 0 : index
    %158 = vector.load %arg9[%c0_130, %c0_131] : memref<64x512xf32, #tpu.memory_space<vmem>>, vector<64x512xf32>
    tpu.vector_store %arg9[%c0_130, %c0_131], %157 {strides = array<i32>} : memref<64x512xf32, #tpu.memory_space<vmem>>, vector<64x512xf32>,
    %c0_132 = arith.constant 0 : index
    %c0_133 = arith.constant 0 : index
    %159 = vector.load %arg9[%c0_132, %c0_133] : memref<64x512xf32, #tpu.memory_space<vmem>>, vector<64x128xf32>
    %cst_134 = arith.constant 5.000000e-01 : f32
    %160 = vector.broadcast %cst_134 : f32 to vector<64x128xf32>
    %161 = arith.mulf %160, %159 : vector<64x128xf32>
    %162 = math.tanh %161 : vector<64x128xf32>
    %cst_135 = arith.constant 5.000000e-01 : f32
    %163 = vector.broadcast %cst_135 : f32 to vector<64x128xf32>
    %164 = arith.mulf %163, %162 : vector<64x128xf32>
    %cst_136 = arith.constant 5.000000e-01 : f32
    %165 = vector.broadcast %cst_136 : f32 to vector<64x128xf32>
    %166 = arith.addf %164, %165 : vector<64x128xf32>
    %c0_137 = arith.constant 0 : index
    %c128_138 = arith.constant 128 : index
    %167 = vector.load %arg9[%c0_137, %c128_138] : memref<64x512xf32, #tpu.memory_space<vmem>>, vector<64x128xf32>
    %cst_139 = arith.constant 5.000000e-01 : f32
    %168 = vector.broadcast %cst_139 : f32 to vector<64x128xf32>
    %169 = arith.mulf %168, %167 : vector<64x128xf32>
    %170 = math.tanh %169 : vector<64x128xf32>
    %cst_140 = arith.constant 5.000000e-01 : f32
    %171 = vector.broadcast %cst_140 : f32 to vector<64x128xf32>
    %172 = arith.mulf %171, %170 : vector<64x128xf32>
    %cst_141 = arith.constant 5.000000e-01 : f32
    %173 = vector.broadcast %cst_141 : f32 to vector<64x128xf32>
    %174 = arith.addf %172, %173 : vector<64x128xf32>
    %c0_142 = arith.constant 0 : index
    %c256_143 = arith.constant 256 : index
    %175 = vector.load %arg9[%c0_142, %c256_143] : memref<64x512xf32, #tpu.memory_space<vmem>>, vector<64x128xf32>
    %176 = math.tanh %175 : vector<64x128xf32>
    %c0_144 = arith.constant 0 : index
    %c384_145 = arith.constant 384 : index
    %177 = vector.load %arg9[%c0_144, %c384_145] : memref<64x512xf32, #tpu.memory_space<vmem>>, vector<64x128xf32>
    %cst_146 = arith.constant 5.000000e-01 : f32
    %178 = vector.broadcast %cst_146 : f32 to vector<64x128xf32>
    %179 = arith.mulf %178, %177 : vector<64x128xf32>
    %180 = math.tanh %179 : vector<64x128xf32>
    %cst_147 = arith.constant 5.000000e-01 : f32
    %181 = vector.broadcast %cst_147 : f32 to vector<64x128xf32>
    %182 = arith.mulf %181, %180 : vector<64x128xf32>
    %cst_148 = arith.constant 5.000000e-01 : f32
    %183 = vector.broadcast %cst_148 : f32 to vector<64x128xf32>
    %184 = arith.addf %182, %183 : vector<64x128xf32>
    %c0_149 = arith.constant 0 : index
    %c0_150 = arith.constant 0 : index
    %185 = vector.load %arg11[%c0_149, %c0_150] : memref<64x128xf32, #tpu.memory_space<vmem>>, vector<64x128xf32>
    %186 = arith.mulf %174, %185 : vector<64x128xf32>
    %187 = arith.mulf %166, %176 : vector<64x128xf32>
    %188 = arith.addf %186, %187 : vector<64x128xf32>
    %189 = math.tanh %188 : vector<64x128xf32>
    %190 = arith.mulf %184, %189 : vector<64x128xf32>
    %c0_151 = arith.constant 0 : index
    %c0_152 = arith.constant 0 : index
    %191 = vector.load %arg11[%c0_151, %c0_152] : memref<64x128xf32, #tpu.memory_space<vmem>>, vector<64x128xf32>
    tpu.vector_store %arg11[%c0_151, %c0_152], %188 {strides = array<i32>} : memref<64x128xf32, #tpu.memory_space<vmem>>, vector<64x128xf32>,
    %c0_153 = arith.constant 0 : index
    %c0_154 = arith.constant 0 : index
    %192 = vector.load %arg10[%c0_153, %c0_154] : memref<64x128xf32, #tpu.memory_space<vmem>>, vector<64x128xf32>
    tpu.vector_store %arg10[%c0_153, %c0_154], %190 {strides = array<i32>} : memref<64x128xf32, #tpu.memory_space<vmem>>, vector<64x128xf32>,
    %c0_155 = arith.constant 0 : index
    %c0_156 = arith.constant 0 : index
    %193 = vector.load %arg12[%c0_155, %c0_156] : memref<64x128xf32, #tpu.memory_space<vmem>>, vector<64x128xf32>
    %194 = math.tanh %190 : vector<64x128xf32>
    %195 = arith.truncf %194 : vector<64x128xf32> to vector<64x128xbf16>
    %c384_157 = arith.constant 384 : index
    %c0_158 = arith.constant 0 : index
    %196 = vector.load %arg5[%c384_157, %c0_158] : memref<1280x128xbf16, #tpu.memory_space<vmem>>, vector<128x128xbf16>
    %cst_159 = arith.constant dense<0.000000e+00> : vector<64x128xf32>
    %197 = tpu.matmul %195, %196, %cst_159 {dimension_numbers = #tpu.dot_dimension_numbers<[1], [0], [0], [1], [0, 0, 1, 1], [], []>} : vector<64x128xbf16>, vector<128x128xbf16>, vector<64x128xf32> -> vector<64x128xf32>
    %198 = arith.addf %193, %197 : vector<64x128xf32>
    %c0_160 = arith.constant 0 : index
    %c0_161 = arith.constant 0 : index
    %199 = vector.load %arg12[%c0_160, %c0_161] : memref<64x128xf32, #tpu.memory_space<vmem>>, vector<64x128xf32>
    tpu.vector_store %arg12[%c0_160, %c0_161], %198 {strides = array<i32>} : memref<64x128xf32, #tpu.memory_space<vmem>>, vector<64x128xf32>,
    %c256_162 = arith.constant 256 : index
    %c0_163 = arith.constant 0 : index
    %200 = vector.load %arg8[%c256_162, %c0_163] : memref<640x512xf32, #tpu.memory_space<vmem>>, vector<64x512xf32>
    %c0_164 = arith.constant 0 : index
    %c0_165 = arith.constant 0 : index
    %201 = vector.load %arg10[%c0_164, %c0_165] : memref<64x128xf32, #tpu.memory_space<vmem>>, vector<64x128xf32>
    %202 = arith.truncf %201 : vector<64x128xf32> to vector<64x128xbf16>
    %c0_166 = arith.constant 0 : index
    %c0_167 = arith.constant 0 : index
    %203 = vector.load %arg3[%c0_166, %c0_167] : memref<128x512xbf16, #tpu.memory_space<vmem>>, vector<128x512xbf16>
    %cst_168 = arith.constant dense<0.000000e+00> : vector<64x512xf32>
    %204 = tpu.matmul %202, %203, %cst_168 {dimension_numbers = #tpu.dot_dimension_numbers<[1], [0], [0], [1], [0, 0, 1, 1], [], []>} : vector<64x128xbf16>, vector<128x512xbf16>, vector<64x512xf32> -> vector<64x512xf32>
    %205 = arith.addf %200, %204 : vector<64x512xf32>
    %c0_169 = arith.constant 0 : index
    %c0_170 = arith.constant 0 : index
    %206 = vector.load %arg9[%c0_169, %c0_170] : memref<64x512xf32, #tpu.memory_space<vmem>>, vector<64x512xf32>
    tpu.vector_store %arg9[%c0_169, %c0_170], %205 {strides = array<i32>} : memref<64x512xf32, #tpu.memory_space<vmem>>, vector<64x512xf32>,
    %c0_171 = arith.constant 0 : index
    %c0_172 = arith.constant 0 : index
    %207 = vector.load %arg9[%c0_171, %c0_172] : memref<64x512xf32, #tpu.memory_space<vmem>>, vector<64x128xf32>
    %cst_173 = arith.constant 5.000000e-01 : f32
    %208 = vector.broadcast %cst_173 : f32 to vector<64x128xf32>
    %209 = arith.mulf %208, %207 : vector<64x128xf32>
    %210 = math.tanh %209 : vector<64x128xf32>
    %cst_174 = arith.constant 5.000000e-01 : f32
    %211 = vector.broadcast %cst_174 : f32 to vector<64x128xf32>
    %212 = arith.mulf %211, %210 : vector<64x128xf32>
    %cst_175 = arith.constant 5.000000e-01 : f32
    %213 = vector.broadcast %cst_175 : f32 to vector<64x128xf32>
    %214 = arith.addf %212, %213 : vector<64x128xf32>
    %c0_176 = arith.constant 0 : index
    %c128_177 = arith.constant 128 : index
    %215 = vector.load %arg9[%c0_176, %c128_177] : memref<64x512xf32, #tpu.memory_space<vmem>>, vector<64x128xf32>
    %cst_178 = arith.constant 5.000000e-01 : f32
    %216 = vector.broadcast %cst_178 : f32 to vector<64x128xf32>
    %217 = arith.mulf %216, %215 : vector<64x128xf32>
    %218 = math.tanh %217 : vector<64x128xf32>
    %cst_179 = arith.constant 5.000000e-01 : f32
    %219 = vector.broadcast %cst_179 : f32 to vector<64x128xf32>
    %220 = arith.mulf %219, %218 : vector<64x128xf32>
    %cst_180 = arith.constant 5.000000e-01 : f32
    %221 = vector.broadcast %cst_180 : f32 to vector<64x128xf32>
    %222 = arith.addf %220, %221 : vector<64x128xf32>
    %c0_181 = arith.constant 0 : index
    %c256_182 = arith.constant 256 : index
    %223 = vector.load %arg9[%c0_181, %c256_182] : memref<64x512xf32, #tpu.memory_space<vmem>>, vector<64x128xf32>
    %224 = math.tanh %223 : vector<64x128xf32>
    %c0_183 = arith.constant 0 : index
    %c384_184 = arith.constant 384 : index
    %225 = vector.load %arg9[%c0_183, %c384_184] : memref<64x512xf32, #tpu.memory_space<vmem>>, vector<64x128xf32>
    %cst_185 = arith.constant 5.000000e-01 : f32
    %226 = vector.broadcast %cst_185 : f32 to vector<64x128xf32>
    %227 = arith.mulf %226, %225 : vector<64x128xf32>
    %228 = math.tanh %227 : vector<64x128xf32>
    %cst_186 = arith.constant 5.000000e-01 : f32
    %229 = vector.broadcast %cst_186 : f32 to vector<64x128xf32>
    %230 = arith.mulf %229, %228 : vector<64x128xf32>
    %cst_187 = arith.constant 5.000000e-01 : f32
    %231 = vector.broadcast %cst_187 : f32 to vector<64x128xf32>
    %232 = arith.addf %230, %231 : vector<64x128xf32>
    %c0_188 = arith.constant 0 : index
    %c0_189 = arith.constant 0 : index
    %233 = vector.load %arg11[%c0_188, %c0_189] : memref<64x128xf32, #tpu.memory_space<vmem>>, vector<64x128xf32>
    %234 = arith.mulf %222, %233 : vector<64x128xf32>
    %235 = arith.mulf %214, %224 : vector<64x128xf32>
    %236 = arith.addf %234, %235 : vector<64x128xf32>
    %237 = math.tanh %236 : vector<64x128xf32>
    %238 = arith.mulf %232, %237 : vector<64x128xf32>
    %c0_190 = arith.constant 0 : index
    %c0_191 = arith.constant 0 : index
    %239 = vector.load %arg11[%c0_190, %c0_191] : memref<64x128xf32, #tpu.memory_space<vmem>>, vector<64x128xf32>
    tpu.vector_store %arg11[%c0_190, %c0_191], %236 {strides = array<i32>} : memref<64x128xf32, #tpu.memory_space<vmem>>, vector<64x128xf32>,
    %c0_192 = arith.constant 0 : index
    %c0_193 = arith.constant 0 : index
    %240 = vector.load %arg10[%c0_192, %c0_193] : memref<64x128xf32, #tpu.memory_space<vmem>>, vector<64x128xf32>
    tpu.vector_store %arg10[%c0_192, %c0_193], %238 {strides = array<i32>} : memref<64x128xf32, #tpu.memory_space<vmem>>, vector<64x128xf32>,
    %c0_194 = arith.constant 0 : index
    %c0_195 = arith.constant 0 : index
    %241 = vector.load %arg12[%c0_194, %c0_195] : memref<64x128xf32, #tpu.memory_space<vmem>>, vector<64x128xf32>
    %242 = math.tanh %238 : vector<64x128xf32>
    %243 = arith.truncf %242 : vector<64x128xf32> to vector<64x128xbf16>
    %c512 = arith.constant 512 : index
    %c0_196 = arith.constant 0 : index
    %244 = vector.load %arg5[%c512, %c0_196] : memref<1280x128xbf16, #tpu.memory_space<vmem>>, vector<128x128xbf16>
    %cst_197 = arith.constant dense<0.000000e+00> : vector<64x128xf32>
    %245 = tpu.matmul %243, %244, %cst_197 {dimension_numbers = #tpu.dot_dimension_numbers<[1], [0], [0], [1], [0, 0, 1, 1], [], []>} : vector<64x128xbf16>, vector<128x128xbf16>, vector<64x128xf32> -> vector<64x128xf32>
    %246 = arith.addf %241, %245 : vector<64x128xf32>
    %c0_198 = arith.constant 0 : index
    %c0_199 = arith.constant 0 : index
    %247 = vector.load %arg12[%c0_198, %c0_199] : memref<64x128xf32, #tpu.memory_space<vmem>>, vector<64x128xf32>
    tpu.vector_store %arg12[%c0_198, %c0_199], %246 {strides = array<i32>} : memref<64x128xf32, #tpu.memory_space<vmem>>, vector<64x128xf32>,
    %c320 = arith.constant 320 : index
    %c0_200 = arith.constant 0 : index
    %248 = vector.load %arg8[%c320, %c0_200] : memref<640x512xf32, #tpu.memory_space<vmem>>, vector<64x512xf32>
    %c0_201 = arith.constant 0 : index
    %c0_202 = arith.constant 0 : index
    %249 = vector.load %arg10[%c0_201, %c0_202] : memref<64x128xf32, #tpu.memory_space<vmem>>, vector<64x128xf32>
    %250 = arith.truncf %249 : vector<64x128xf32> to vector<64x128xbf16>
    %c0_203 = arith.constant 0 : index
    %c0_204 = arith.constant 0 : index
    %251 = vector.load %arg3[%c0_203, %c0_204] : memref<128x512xbf16, #tpu.memory_space<vmem>>, vector<128x512xbf16>
    %cst_205 = arith.constant dense<0.000000e+00> : vector<64x512xf32>
    %252 = tpu.matmul %250, %251, %cst_205 {dimension_numbers = #tpu.dot_dimension_numbers<[1], [0], [0], [1], [0, 0, 1, 1], [], []>} : vector<64x128xbf16>, vector<128x512xbf16>, vector<64x512xf32> -> vector<64x512xf32>
    %253 = arith.addf %248, %252 : vector<64x512xf32>
    %c0_206 = arith.constant 0 : index
    %c0_207 = arith.constant 0 : index
    %254 = vector.load %arg9[%c0_206, %c0_207] : memref<64x512xf32, #tpu.memory_space<vmem>>, vector<64x512xf32>
    tpu.vector_store %arg9[%c0_206, %c0_207], %253 {strides = array<i32>} : memref<64x512xf32, #tpu.memory_space<vmem>>, vector<64x512xf32>,
    %c0_208 = arith.constant 0 : index
    %c0_209 = arith.constant 0 : index
    %255 = vector.load %arg9[%c0_208, %c0_209] : memref<64x512xf32, #tpu.memory_space<vmem>>, vector<64x128xf32>
    %cst_210 = arith.constant 5.000000e-01 : f32
    %256 = vector.broadcast %cst_210 : f32 to vector<64x128xf32>
    %257 = arith.mulf %256, %255 : vector<64x128xf32>
    %258 = math.tanh %257 : vector<64x128xf32>
    %cst_211 = arith.constant 5.000000e-01 : f32
    %259 = vector.broadcast %cst_211 : f32 to vector<64x128xf32>
    %260 = arith.mulf %259, %258 : vector<64x128xf32>
    %cst_212 = arith.constant 5.000000e-01 : f32
    %261 = vector.broadcast %cst_212 : f32 to vector<64x128xf32>
    %262 = arith.addf %260, %261 : vector<64x128xf32>
    %c0_213 = arith.constant 0 : index
    %c128_214 = arith.constant 128 : index
    %263 = vector.load %arg9[%c0_213, %c128_214] : memref<64x512xf32, #tpu.memory_space<vmem>>, vector<64x128xf32>
    %cst_215 = arith.constant 5.000000e-01 : f32
    %264 = vector.broadcast %cst_215 : f32 to vector<64x128xf32>
    %265 = arith.mulf %264, %263 : vector<64x128xf32>
    %266 = math.tanh %265 : vector<64x128xf32>
    %cst_216 = arith.constant 5.000000e-01 : f32
    %267 = vector.broadcast %cst_216 : f32 to vector<64x128xf32>
    %268 = arith.mulf %267, %266 : vector<64x128xf32>
    %cst_217 = arith.constant 5.000000e-01 : f32
    %269 = vector.broadcast %cst_217 : f32 to vector<64x128xf32>
    %270 = arith.addf %268, %269 : vector<64x128xf32>
    %c0_218 = arith.constant 0 : index
    %c256_219 = arith.constant 256 : index
    %271 = vector.load %arg9[%c0_218, %c256_219] : memref<64x512xf32, #tpu.memory_space<vmem>>, vector<64x128xf32>
    %272 = math.tanh %271 : vector<64x128xf32>
    %c0_220 = arith.constant 0 : index
    %c384_221 = arith.constant 384 : index
    %273 = vector.load %arg9[%c0_220, %c384_221] : memref<64x512xf32, #tpu.memory_space<vmem>>, vector<64x128xf32>
    %cst_222 = arith.constant 5.000000e-01 : f32
    %274 = vector.broadcast %cst_222 : f32 to vector<64x128xf32>
    %275 = arith.mulf %274, %273 : vector<64x128xf32>
    %276 = math.tanh %275 : vector<64x128xf32>
    %cst_223 = arith.constant 5.000000e-01 : f32
    %277 = vector.broadcast %cst_223 : f32 to vector<64x128xf32>
    %278 = arith.mulf %277, %276 : vector<64x128xf32>
    %cst_224 = arith.constant 5.000000e-01 : f32
    %279 = vector.broadcast %cst_224 : f32 to vector<64x128xf32>
    %280 = arith.addf %278, %279 : vector<64x128xf32>
    %c0_225 = arith.constant 0 : index
    %c0_226 = arith.constant 0 : index
    %281 = vector.load %arg11[%c0_225, %c0_226] : memref<64x128xf32, #tpu.memory_space<vmem>>, vector<64x128xf32>
    %282 = arith.mulf %270, %281 : vector<64x128xf32>
    %283 = arith.mulf %262, %272 : vector<64x128xf32>
    %284 = arith.addf %282, %283 : vector<64x128xf32>
    %285 = math.tanh %284 : vector<64x128xf32>
    %286 = arith.mulf %280, %285 : vector<64x128xf32>
    %c0_227 = arith.constant 0 : index
    %c0_228 = arith.constant 0 : index
    %287 = vector.load %arg11[%c0_227, %c0_228] : memref<64x128xf32, #tpu.memory_space<vmem>>, vector<64x128xf32>
    tpu.vector_store %arg11[%c0_227, %c0_228], %284 {strides = array<i32>} : memref<64x128xf32, #tpu.memory_space<vmem>>, vector<64x128xf32>,
    %c0_229 = arith.constant 0 : index
    %c0_230 = arith.constant 0 : index
    %288 = vector.load %arg10[%c0_229, %c0_230] : memref<64x128xf32, #tpu.memory_space<vmem>>, vector<64x128xf32>
    tpu.vector_store %arg10[%c0_229, %c0_230], %286 {strides = array<i32>} : memref<64x128xf32, #tpu.memory_space<vmem>>, vector<64x128xf32>,
    %c0_231 = arith.constant 0 : index
    %c0_232 = arith.constant 0 : index
    %289 = vector.load %arg12[%c0_231, %c0_232] : memref<64x128xf32, #tpu.memory_space<vmem>>, vector<64x128xf32>
    %290 = math.tanh %286 : vector<64x128xf32>
    %291 = arith.truncf %290 : vector<64x128xf32> to vector<64x128xbf16>
    %c640 = arith.constant 640 : index
    %c0_233 = arith.constant 0 : index
    %292 = vector.load %arg5[%c640, %c0_233] : memref<1280x128xbf16, #tpu.memory_space<vmem>>, vector<128x128xbf16>
    %cst_234 = arith.constant dense<0.000000e+00> : vector<64x128xf32>
    %293 = tpu.matmul %291, %292, %cst_234 {dimension_numbers = #tpu.dot_dimension_numbers<[1], [0], [0], [1], [0, 0, 1, 1], [], []>} : vector<64x128xbf16>, vector<128x128xbf16>, vector<64x128xf32> -> vector<64x128xf32>
    %294 = arith.addf %289, %293 : vector<64x128xf32>
    %c0_235 = arith.constant 0 : index
    %c0_236 = arith.constant 0 : index
    %295 = vector.load %arg12[%c0_235, %c0_236] : memref<64x128xf32, #tpu.memory_space<vmem>>, vector<64x128xf32>
    tpu.vector_store %arg12[%c0_235, %c0_236], %294 {strides = array<i32>} : memref<64x128xf32, #tpu.memory_space<vmem>>, vector<64x128xf32>,
    %c384_237 = arith.constant 384 : index
    %c0_238 = arith.constant 0 : index
    %296 = vector.load %arg8[%c384_237, %c0_238] : memref<640x512xf32, #tpu.memory_space<vmem>>, vector<64x512xf32>
    %c0_239 = arith.constant 0 : index
    %c0_240 = arith.constant 0 : index
    %297 = vector.load %arg10[%c0_239, %c0_240] : memref<64x128xf32, #tpu.memory_space<vmem>>, vector<64x128xf32>
    %298 = arith.truncf %297 : vector<64x128xf32> to vector<64x128xbf16>
    %c0_241 = arith.constant 0 : index
    %c0_242 = arith.constant 0 : index
    %299 = vector.load %arg3[%c0_241, %c0_242] : memref<128x512xbf16, #tpu.memory_space<vmem>>, vector<128x512xbf16>
    %cst_243 = arith.constant dense<0.000000e+00> : vector<64x512xf32>
    %300 = tpu.matmul %298, %299, %cst_243 {dimension_numbers = #tpu.dot_dimension_numbers<[1], [0], [0], [1], [0, 0, 1, 1], [], []>} : vector<64x128xbf16>, vector<128x512xbf16>, vector<64x512xf32> -> vector<64x512xf32>
    %301 = arith.addf %296, %300 : vector<64x512xf32>
    %c0_244 = arith.constant 0 : index
    %c0_245 = arith.constant 0 : index
    %302 = vector.load %arg9[%c0_244, %c0_245] : memref<64x512xf32, #tpu.memory_space<vmem>>, vector<64x512xf32>
    tpu.vector_store %arg9[%c0_244, %c0_245], %301 {strides = array<i32>} : memref<64x512xf32, #tpu.memory_space<vmem>>, vector<64x512xf32>,
    %c0_246 = arith.constant 0 : index
    %c0_247 = arith.constant 0 : index
    %303 = vector.load %arg9[%c0_246, %c0_247] : memref<64x512xf32, #tpu.memory_space<vmem>>, vector<64x128xf32>
    %cst_248 = arith.constant 5.000000e-01 : f32
    %304 = vector.broadcast %cst_248 : f32 to vector<64x128xf32>
    %305 = arith.mulf %304, %303 : vector<64x128xf32>
    %306 = math.tanh %305 : vector<64x128xf32>
    %cst_249 = arith.constant 5.000000e-01 : f32
    %307 = vector.broadcast %cst_249 : f32 to vector<64x128xf32>
    %308 = arith.mulf %307, %306 : vector<64x128xf32>
    %cst_250 = arith.constant 5.000000e-01 : f32
    %309 = vector.broadcast %cst_250 : f32 to vector<64x128xf32>
    %310 = arith.addf %308, %309 : vector<64x128xf32>
    %c0_251 = arith.constant 0 : index
    %c128_252 = arith.constant 128 : index
    %311 = vector.load %arg9[%c0_251, %c128_252] : memref<64x512xf32, #tpu.memory_space<vmem>>, vector<64x128xf32>
    %cst_253 = arith.constant 5.000000e-01 : f32
    %312 = vector.broadcast %cst_253 : f32 to vector<64x128xf32>
    %313 = arith.mulf %312, %311 : vector<64x128xf32>
    %314 = math.tanh %313 : vector<64x128xf32>
    %cst_254 = arith.constant 5.000000e-01 : f32
    %315 = vector.broadcast %cst_254 : f32 to vector<64x128xf32>
    %316 = arith.mulf %315, %314 : vector<64x128xf32>
    %cst_255 = arith.constant 5.000000e-01 : f32
    %317 = vector.broadcast %cst_255 : f32 to vector<64x128xf32>
    %318 = arith.addf %316, %317 : vector<64x128xf32>
    %c0_256 = arith.constant 0 : index
    %c256_257 = arith.constant 256 : index
    %319 = vector.load %arg9[%c0_256, %c256_257] : memref<64x512xf32, #tpu.memory_space<vmem>>, vector<64x128xf32>
    %320 = math.tanh %319 : vector<64x128xf32>
    %c0_258 = arith.constant 0 : index
    %c384_259 = arith.constant 384 : index
    %321 = vector.load %arg9[%c0_258, %c384_259] : memref<64x512xf32, #tpu.memory_space<vmem>>, vector<64x128xf32>
    %cst_260 = arith.constant 5.000000e-01 : f32
    %322 = vector.broadcast %cst_260 : f32 to vector<64x128xf32>
    %323 = arith.mulf %322, %321 : vector<64x128xf32>
    %324 = math.tanh %323 : vector<64x128xf32>
    %cst_261 = arith.constant 5.000000e-01 : f32
    %325 = vector.broadcast %cst_261 : f32 to vector<64x128xf32>
    %326 = arith.mulf %325, %324 : vector<64x128xf32>
    %cst_262 = arith.constant 5.000000e-01 : f32
    %327 = vector.broadcast %cst_262 : f32 to vector<64x128xf32>
    %328 = arith.addf %326, %327 : vector<64x128xf32>
    %c0_263 = arith.constant 0 : index
    %c0_264 = arith.constant 0 : index
    %329 = vector.load %arg11[%c0_263, %c0_264] : memref<64x128xf32, #tpu.memory_space<vmem>>, vector<64x128xf32>
    %330 = arith.mulf %318, %329 : vector<64x128xf32>
    %331 = arith.mulf %310, %320 : vector<64x128xf32>
    %332 = arith.addf %330, %331 : vector<64x128xf32>
    %333 = math.tanh %332 : vector<64x128xf32>
    %334 = arith.mulf %328, %333 : vector<64x128xf32>
    %c0_265 = arith.constant 0 : index
    %c0_266 = arith.constant 0 : index
    %335 = vector.load %arg11[%c0_265, %c0_266] : memref<64x128xf32, #tpu.memory_space<vmem>>, vector<64x128xf32>
    tpu.vector_store %arg11[%c0_265, %c0_266], %332 {strides = array<i32>} : memref<64x128xf32, #tpu.memory_space<vmem>>, vector<64x128xf32>,
    %c0_267 = arith.constant 0 : index
    %c0_268 = arith.constant 0 : index
    %336 = vector.load %arg10[%c0_267, %c0_268] : memref<64x128xf32, #tpu.memory_space<vmem>>, vector<64x128xf32>
    tpu.vector_store %arg10[%c0_267, %c0_268], %334 {strides = array<i32>} : memref<64x128xf32, #tpu.memory_space<vmem>>, vector<64x128xf32>,
    %c0_269 = arith.constant 0 : index
    %c0_270 = arith.constant 0 : index
    %337 = vector.load %arg12[%c0_269, %c0_270] : memref<64x128xf32, #tpu.memory_space<vmem>>, vector<64x128xf32>
    %338 = math.tanh %334 : vector<64x128xf32>
    %339 = arith.truncf %338 : vector<64x128xf32> to vector<64x128xbf16>
    %c768 = arith.constant 768 : index
    %c0_271 = arith.constant 0 : index
    %340 = vector.load %arg5[%c768, %c0_271] : memref<1280x128xbf16, #tpu.memory_space<vmem>>, vector<128x128xbf16>
    %cst_272 = arith.constant dense<0.000000e+00> : vector<64x128xf32>
    %341 = tpu.matmul %339, %340, %cst_272 {dimension_numbers = #tpu.dot_dimension_numbers<[1], [0], [0], [1], [0, 0, 1, 1], [], []>} : vector<64x128xbf16>, vector<128x128xbf16>, vector<64x128xf32> -> vector<64x128xf32>
    %342 = arith.addf %337, %341 : vector<64x128xf32>
    %c0_273 = arith.constant 0 : index
    %c0_274 = arith.constant 0 : index
    %343 = vector.load %arg12[%c0_273, %c0_274] : memref<64x128xf32, #tpu.memory_space<vmem>>, vector<64x128xf32>
    tpu.vector_store %arg12[%c0_273, %c0_274], %342 {strides = array<i32>} : memref<64x128xf32, #tpu.memory_space<vmem>>, vector<64x128xf32>,
    %c448 = arith.constant 448 : index
    %c0_275 = arith.constant 0 : index
    %344 = vector.load %arg8[%c448, %c0_275] : memref<640x512xf32, #tpu.memory_space<vmem>>, vector<64x512xf32>
    %c0_276 = arith.constant 0 : index
    %c0_277 = arith.constant 0 : index
    %345 = vector.load %arg10[%c0_276, %c0_277] : memref<64x128xf32, #tpu.memory_space<vmem>>, vector<64x128xf32>
    %346 = arith.truncf %345 : vector<64x128xf32> to vector<64x128xbf16>
    %c0_278 = arith.constant 0 : index
    %c0_279 = arith.constant 0 : index
    %347 = vector.load %arg3[%c0_278, %c0_279] : memref<128x512xbf16, #tpu.memory_space<vmem>>, vector<128x512xbf16>
    %cst_280 = arith.constant dense<0.000000e+00> : vector<64x512xf32>
    %348 = tpu.matmul %346, %347, %cst_280 {dimension_numbers = #tpu.dot_dimension_numbers<[1], [0], [0], [1], [0, 0, 1, 1], [], []>} : vector<64x128xbf16>, vector<128x512xbf16>, vector<64x512xf32> -> vector<64x512xf32>
    %349 = arith.addf %344, %348 : vector<64x512xf32>
    %c0_281 = arith.constant 0 : index
    %c0_282 = arith.constant 0 : index
    %350 = vector.load %arg9[%c0_281, %c0_282] : memref<64x512xf32, #tpu.memory_space<vmem>>, vector<64x512xf32>
    tpu.vector_store %arg9[%c0_281, %c0_282], %349 {strides = array<i32>} : memref<64x512xf32, #tpu.memory_space<vmem>>, vector<64x512xf32>,
    %c0_283 = arith.constant 0 : index
    %c0_284 = arith.constant 0 : index
    %351 = vector.load %arg9[%c0_283, %c0_284] : memref<64x512xf32, #tpu.memory_space<vmem>>, vector<64x128xf32>
    %cst_285 = arith.constant 5.000000e-01 : f32
    %352 = vector.broadcast %cst_285 : f32 to vector<64x128xf32>
    %353 = arith.mulf %352, %351 : vector<64x128xf32>
    %354 = math.tanh %353 : vector<64x128xf32>
    %cst_286 = arith.constant 5.000000e-01 : f32
    %355 = vector.broadcast %cst_286 : f32 to vector<64x128xf32>
    %356 = arith.mulf %355, %354 : vector<64x128xf32>
    %cst_287 = arith.constant 5.000000e-01 : f32
    %357 = vector.broadcast %cst_287 : f32 to vector<64x128xf32>
    %358 = arith.addf %356, %357 : vector<64x128xf32>
    %c0_288 = arith.constant 0 : index
    %c128_289 = arith.constant 128 : index
    %359 = vector.load %arg9[%c0_288, %c128_289] : memref<64x512xf32, #tpu.memory_space<vmem>>, vector<64x128xf32>
    %cst_290 = arith.constant 5.000000e-01 : f32
    %360 = vector.broadcast %cst_290 : f32 to vector<64x128xf32>
    %361 = arith.mulf %360, %359 : vector<64x128xf32>
    %362 = math.tanh %361 : vector<64x128xf32>
    %cst_291 = arith.constant 5.000000e-01 : f32
    %363 = vector.broadcast %cst_291 : f32 to vector<64x128xf32>
    %364 = arith.mulf %363, %362 : vector<64x128xf32>
    %cst_292 = arith.constant 5.000000e-01 : f32
    %365 = vector.broadcast %cst_292 : f32 to vector<64x128xf32>
    %366 = arith.addf %364, %365 : vector<64x128xf32>
    %c0_293 = arith.constant 0 : index
    %c256_294 = arith.constant 256 : index
    %367 = vector.load %arg9[%c0_293, %c256_294] : memref<64x512xf32, #tpu.memory_space<vmem>>, vector<64x128xf32>
    %368 = math.tanh %367 : vector<64x128xf32>
    %c0_295 = arith.constant 0 : index
    %c384_296 = arith.constant 384 : index
    %369 = vector.load %arg9[%c0_295, %c384_296] : memref<64x512xf32, #tpu.memory_space<vmem>>, vector<64x128xf32>
    %cst_297 = arith.constant 5.000000e-01 : f32
    %370 = vector.broadcast %cst_297 : f32 to vector<64x128xf32>
    %371 = arith.mulf %370, %369 : vector<64x128xf32>
    %372 = math.tanh %371 : vector<64x128xf32>
    %cst_298 = arith.constant 5.000000e-01 : f32
    %373 = vector.broadcast %cst_298 : f32 to vector<64x128xf32>
    %374 = arith.mulf %373, %372 : vector<64x128xf32>
    %cst_299 = arith.constant 5.000000e-01 : f32
    %375 = vector.broadcast %cst_299 : f32 to vector<64x128xf32>
    %376 = arith.addf %374, %375 : vector<64x128xf32>
    %c0_300 = arith.constant 0 : index
    %c0_301 = arith.constant 0 : index
    %377 = vector.load %arg11[%c0_300, %c0_301] : memref<64x128xf32, #tpu.memory_space<vmem>>, vector<64x128xf32>
    %378 = arith.mulf %366, %377 : vector<64x128xf32>
    %379 = arith.mulf %358, %368 : vector<64x128xf32>
    %380 = arith.addf %378, %379 : vector<64x128xf32>
    %381 = math.tanh %380 : vector<64x128xf32>
    %382 = arith.mulf %376, %381 : vector<64x128xf32>
    %c0_302 = arith.constant 0 : index
    %c0_303 = arith.constant 0 : index
    %383 = vector.load %arg11[%c0_302, %c0_303] : memref<64x128xf32, #tpu.memory_space<vmem>>, vector<64x128xf32>
    tpu.vector_store %arg11[%c0_302, %c0_303], %380 {strides = array<i32>} : memref<64x128xf32, #tpu.memory_space<vmem>>, vector<64x128xf32>,
    %c0_304 = arith.constant 0 : index
    %c0_305 = arith.constant 0 : index
    %384 = vector.load %arg10[%c0_304, %c0_305] : memref<64x128xf32, #tpu.memory_space<vmem>>, vector<64x128xf32>
    tpu.vector_store %arg10[%c0_304, %c0_305], %382 {strides = array<i32>} : memref<64x128xf32, #tpu.memory_space<vmem>>, vector<64x128xf32>,
    %c0_306 = arith.constant 0 : index
    %c0_307 = arith.constant 0 : index
    %385 = vector.load %arg12[%c0_306, %c0_307] : memref<64x128xf32, #tpu.memory_space<vmem>>, vector<64x128xf32>
    %386 = math.tanh %382 : vector<64x128xf32>
    %387 = arith.truncf %386 : vector<64x128xf32> to vector<64x128xbf16>
    %c896 = arith.constant 896 : index
    %c0_308 = arith.constant 0 : index
    %388 = vector.load %arg5[%c896, %c0_308] : memref<1280x128xbf16, #tpu.memory_space<vmem>>, vector<128x128xbf16>
    %cst_309 = arith.constant dense<0.000000e+00> : vector<64x128xf32>
    %389 = tpu.matmul %387, %388, %cst_309 {dimension_numbers = #tpu.dot_dimension_numbers<[1], [0], [0], [1], [0, 0, 1, 1], [], []>} : vector<64x128xbf16>, vector<128x128xbf16>, vector<64x128xf32> -> vector<64x128xf32>
    %390 = arith.addf %385, %389 : vector<64x128xf32>
    %c0_310 = arith.constant 0 : index
    %c0_311 = arith.constant 0 : index
    %391 = vector.load %arg12[%c0_310, %c0_311] : memref<64x128xf32, #tpu.memory_space<vmem>>, vector<64x128xf32>
    tpu.vector_store %arg12[%c0_310, %c0_311], %390 {strides = array<i32>} : memref<64x128xf32, #tpu.memory_space<vmem>>, vector<64x128xf32>,
    %c512_312 = arith.constant 512 : index
    %c0_313 = arith.constant 0 : index
    %392 = vector.load %arg8[%c512_312, %c0_313] : memref<640x512xf32, #tpu.memory_space<vmem>>, vector<64x512xf32>
    %c0_314 = arith.constant 0 : index
    %c0_315 = arith.constant 0 : index
    %393 = vector.load %arg10[%c0_314, %c0_315] : memref<64x128xf32, #tpu.memory_space<vmem>>, vector<64x128xf32>
    %394 = arith.truncf %393 : vector<64x128xf32> to vector<64x128xbf16>
    %c0_316 = arith.constant 0 : index
    %c0_317 = arith.constant 0 : index
    %395 = vector.load %arg3[%c0_316, %c0_317] : memref<128x512xbf16, #tpu.memory_space<vmem>>, vector<128x512xbf16>
    %cst_318 = arith.constant dense<0.000000e+00> : vector<64x512xf32>
    %396 = tpu.matmul %394, %395, %cst_318 {dimension_numbers = #tpu.dot_dimension_numbers<[1], [0], [0], [1], [0, 0, 1, 1], [], []>} : vector<64x128xbf16>, vector<128x512xbf16>, vector<64x512xf32> -> vector<64x512xf32>
    %397 = arith.addf %392, %396 : vector<64x512xf32>
    %c0_319 = arith.constant 0 : index
    %c0_320 = arith.constant 0 : index
    %398 = vector.load %arg9[%c0_319, %c0_320] : memref<64x512xf32, #tpu.memory_space<vmem>>, vector<64x512xf32>
    tpu.vector_store %arg9[%c0_319, %c0_320], %397 {strides = array<i32>} : memref<64x512xf32, #tpu.memory_space<vmem>>, vector<64x512xf32>,
    %c0_321 = arith.constant 0 : index
    %c0_322 = arith.constant 0 : index
    %399 = vector.load %arg9[%c0_321, %c0_322] : memref<64x512xf32, #tpu.memory_space<vmem>>, vector<64x128xf32>
    %cst_323 = arith.constant 5.000000e-01 : f32
    %400 = vector.broadcast %cst_323 : f32 to vector<64x128xf32>
    %401 = arith.mulf %400, %399 : vector<64x128xf32>
    %402 = math.tanh %401 : vector<64x128xf32>
    %cst_324 = arith.constant 5.000000e-01 : f32
    %403 = vector.broadcast %cst_324 : f32 to vector<64x128xf32>
    %404 = arith.mulf %403, %402 : vector<64x128xf32>
    %cst_325 = arith.constant 5.000000e-01 : f32
    %405 = vector.broadcast %cst_325 : f32 to vector<64x128xf32>
    %406 = arith.addf %404, %405 : vector<64x128xf32>
    %c0_326 = arith.constant 0 : index
    %c128_327 = arith.constant 128 : index
    %407 = vector.load %arg9[%c0_326, %c128_327] : memref<64x512xf32, #tpu.memory_space<vmem>>, vector<64x128xf32>
    %cst_328 = arith.constant 5.000000e-01 : f32
    %408 = vector.broadcast %cst_328 : f32 to vector<64x128xf32>
    %409 = arith.mulf %408, %407 : vector<64x128xf32>
    %410 = math.tanh %409 : vector<64x128xf32>
    %cst_329 = arith.constant 5.000000e-01 : f32
    %411 = vector.broadcast %cst_329 : f32 to vector<64x128xf32>
    %412 = arith.mulf %411, %410 : vector<64x128xf32>
    %cst_330 = arith.constant 5.000000e-01 : f32
    %413 = vector.broadcast %cst_330 : f32 to vector<64x128xf32>
    %414 = arith.addf %412, %413 : vector<64x128xf32>
    %c0_331 = arith.constant 0 : index
    %c256_332 = arith.constant 256 : index
    %415 = vector.load %arg9[%c0_331, %c256_332] : memref<64x512xf32, #tpu.memory_space<vmem>>, vector<64x128xf32>
    %416 = math.tanh %415 : vector<64x128xf32>
    %c0_333 = arith.constant 0 : index
    %c384_334 = arith.constant 384 : index
    %417 = vector.load %arg9[%c0_333, %c384_334] : memref<64x512xf32, #tpu.memory_space<vmem>>, vector<64x128xf32>
    %cst_335 = arith.constant 5.000000e-01 : f32
    %418 = vector.broadcast %cst_335 : f32 to vector<64x128xf32>
    %419 = arith.mulf %418, %417 : vector<64x128xf32>
    %420 = math.tanh %419 : vector<64x128xf32>
    %cst_336 = arith.constant 5.000000e-01 : f32
    %421 = vector.broadcast %cst_336 : f32 to vector<64x128xf32>
    %422 = arith.mulf %421, %420 : vector<64x128xf32>
    %cst_337 = arith.constant 5.000000e-01 : f32
    %423 = vector.broadcast %cst_337 : f32 to vector<64x128xf32>
    %424 = arith.addf %422, %423 : vector<64x128xf32>
    %c0_338 = arith.constant 0 : index
    %c0_339 = arith.constant 0 : index
    %425 = vector.load %arg11[%c0_338, %c0_339] : memref<64x128xf32, #tpu.memory_space<vmem>>, vector<64x128xf32>
    %426 = arith.mulf %414, %425 : vector<64x128xf32>
    %427 = arith.mulf %406, %416 : vector<64x128xf32>
    %428 = arith.addf %426, %427 : vector<64x128xf32>
    %429 = math.tanh %428 : vector<64x128xf32>
    %430 = arith.mulf %424, %429 : vector<64x128xf32>
    %c0_340 = arith.constant 0 : index
    %c0_341 = arith.constant 0 : index
    %431 = vector.load %arg11[%c0_340, %c0_341] : memref<64x128xf32, #tpu.memory_space<vmem>>, vector<64x128xf32>
    tpu.vector_store %arg11[%c0_340, %c0_341], %428 {strides = array<i32>} : memref<64x128xf32, #tpu.memory_space<vmem>>, vector<64x128xf32>,
    %c0_342 = arith.constant 0 : index
    %c0_343 = arith.constant 0 : index
    %432 = vector.load %arg10[%c0_342, %c0_343] : memref<64x128xf32, #tpu.memory_space<vmem>>, vector<64x128xf32>
    tpu.vector_store %arg10[%c0_342, %c0_343], %430 {strides = array<i32>} : memref<64x128xf32, #tpu.memory_space<vmem>>, vector<64x128xf32>,
    %c0_344 = arith.constant 0 : index
    %c0_345 = arith.constant 0 : index
    %433 = vector.load %arg12[%c0_344, %c0_345] : memref<64x128xf32, #tpu.memory_space<vmem>>, vector<64x128xf32>
    %434 = math.tanh %430 : vector<64x128xf32>
    %435 = arith.truncf %434 : vector<64x128xf32> to vector<64x128xbf16>
    %c1024 = arith.constant 1024 : index
    %c0_346 = arith.constant 0 : index
    %436 = vector.load %arg5[%c1024, %c0_346] : memref<1280x128xbf16, #tpu.memory_space<vmem>>, vector<128x128xbf16>
    %cst_347 = arith.constant dense<0.000000e+00> : vector<64x128xf32>
    %437 = tpu.matmul %435, %436, %cst_347 {dimension_numbers = #tpu.dot_dimension_numbers<[1], [0], [0], [1], [0, 0, 1, 1], [], []>} : vector<64x128xbf16>, vector<128x128xbf16>, vector<64x128xf32> -> vector<64x128xf32>
    %438 = arith.addf %433, %437 : vector<64x128xf32>
    %c0_348 = arith.constant 0 : index
    %c0_349 = arith.constant 0 : index
    %439 = vector.load %arg12[%c0_348, %c0_349] : memref<64x128xf32, #tpu.memory_space<vmem>>, vector<64x128xf32>
    tpu.vector_store %arg12[%c0_348, %c0_349], %438 {strides = array<i32>} : memref<64x128xf32, #tpu.memory_space<vmem>>, vector<64x128xf32>,
    %c576 = arith.constant 576 : index
    %c0_350 = arith.constant 0 : index
    %440 = vector.load %arg8[%c576, %c0_350] : memref<640x512xf32, #tpu.memory_space<vmem>>, vector<64x512xf32>
    %c0_351 = arith.constant 0 : index
    %c0_352 = arith.constant 0 : index
    %441 = vector.load %arg10[%c0_351, %c0_352] : memref<64x128xf32, #tpu.memory_space<vmem>>, vector<64x128xf32>
    %442 = arith.truncf %441 : vector<64x128xf32> to vector<64x128xbf16>
    %c0_353 = arith.constant 0 : index
    %c0_354 = arith.constant 0 : index
    %443 = vector.load %arg3[%c0_353, %c0_354] : memref<128x512xbf16, #tpu.memory_space<vmem>>, vector<128x512xbf16>
    %cst_355 = arith.constant dense<0.000000e+00> : vector<64x512xf32>
    %444 = tpu.matmul %442, %443, %cst_355 {dimension_numbers = #tpu.dot_dimension_numbers<[1], [0], [0], [1], [0, 0, 1, 1], [], []>} : vector<64x128xbf16>, vector<128x512xbf16>, vector<64x512xf32> -> vector<64x512xf32>
    %445 = arith.addf %440, %444 : vector<64x512xf32>
    %c0_356 = arith.constant 0 : index
    %c0_357 = arith.constant 0 : index
    %446 = vector.load %arg9[%c0_356, %c0_357] : memref<64x512xf32, #tpu.memory_space<vmem>>, vector<64x512xf32>
    tpu.vector_store %arg9[%c0_356, %c0_357], %445 {strides = array<i32>} : memref<64x512xf32, #tpu.memory_space<vmem>>, vector<64x512xf32>,
    %c0_358 = arith.constant 0 : index
    %c0_359 = arith.constant 0 : index
    %447 = vector.load %arg9[%c0_358, %c0_359] : memref<64x512xf32, #tpu.memory_space<vmem>>, vector<64x128xf32>
    %cst_360 = arith.constant 5.000000e-01 : f32
    %448 = vector.broadcast %cst_360 : f32 to vector<64x128xf32>
    %449 = arith.mulf %448, %447 : vector<64x128xf32>
    %450 = math.tanh %449 : vector<64x128xf32>
    %cst_361 = arith.constant 5.000000e-01 : f32
    %451 = vector.broadcast %cst_361 : f32 to vector<64x128xf32>
    %452 = arith.mulf %451, %450 : vector<64x128xf32>
    %cst_362 = arith.constant 5.000000e-01 : f32
    %453 = vector.broadcast %cst_362 : f32 to vector<64x128xf32>
    %454 = arith.addf %452, %453 : vector<64x128xf32>
    %c0_363 = arith.constant 0 : index
    %c128_364 = arith.constant 128 : index
    %455 = vector.load %arg9[%c0_363, %c128_364] : memref<64x512xf32, #tpu.memory_space<vmem>>, vector<64x128xf32>
    %cst_365 = arith.constant 5.000000e-01 : f32
    %456 = vector.broadcast %cst_365 : f32 to vector<64x128xf32>
    %457 = arith.mulf %456, %455 : vector<64x128xf32>
    %458 = math.tanh %457 : vector<64x128xf32>
    %cst_366 = arith.constant 5.000000e-01 : f32
    %459 = vector.broadcast %cst_366 : f32 to vector<64x128xf32>
    %460 = arith.mulf %459, %458 : vector<64x128xf32>
    %cst_367 = arith.constant 5.000000e-01 : f32
    %461 = vector.broadcast %cst_367 : f32 to vector<64x128xf32>
    %462 = arith.addf %460, %461 : vector<64x128xf32>
    %c0_368 = arith.constant 0 : index
    %c256_369 = arith.constant 256 : index
    %463 = vector.load %arg9[%c0_368, %c256_369] : memref<64x512xf32, #tpu.memory_space<vmem>>, vector<64x128xf32>
    %464 = math.tanh %463 : vector<64x128xf32>
    %c0_370 = arith.constant 0 : index
    %c384_371 = arith.constant 384 : index
    %465 = vector.load %arg9[%c0_370, %c384_371] : memref<64x512xf32, #tpu.memory_space<vmem>>, vector<64x128xf32>
    %cst_372 = arith.constant 5.000000e-01 : f32
    %466 = vector.broadcast %cst_372 : f32 to vector<64x128xf32>
    %467 = arith.mulf %466, %465 : vector<64x128xf32>
    %468 = math.tanh %467 : vector<64x128xf32>
    %cst_373 = arith.constant 5.000000e-01 : f32
    %469 = vector.broadcast %cst_373 : f32 to vector<64x128xf32>
    %470 = arith.mulf %469, %468 : vector<64x128xf32>
    %cst_374 = arith.constant 5.000000e-01 : f32
    %471 = vector.broadcast %cst_374 : f32 to vector<64x128xf32>
    %472 = arith.addf %470, %471 : vector<64x128xf32>
    %c0_375 = arith.constant 0 : index
    %c0_376 = arith.constant 0 : index
    %473 = vector.load %arg11[%c0_375, %c0_376] : memref<64x128xf32, #tpu.memory_space<vmem>>, vector<64x128xf32>
    %474 = arith.mulf %462, %473 : vector<64x128xf32>
    %475 = arith.mulf %454, %464 : vector<64x128xf32>
    %476 = arith.addf %474, %475 : vector<64x128xf32>
    %477 = math.tanh %476 : vector<64x128xf32>
    %478 = arith.mulf %472, %477 : vector<64x128xf32>
    %c0_377 = arith.constant 0 : index
    %c0_378 = arith.constant 0 : index
    %479 = vector.load %arg11[%c0_377, %c0_378] : memref<64x128xf32, #tpu.memory_space<vmem>>, vector<64x128xf32>
    tpu.vector_store %arg11[%c0_377, %c0_378], %476 {strides = array<i32>} : memref<64x128xf32, #tpu.memory_space<vmem>>, vector<64x128xf32>,
    %c0_379 = arith.constant 0 : index
    %c0_380 = arith.constant 0 : index
    %480 = vector.load %arg10[%c0_379, %c0_380] : memref<64x128xf32, #tpu.memory_space<vmem>>, vector<64x128xf32>
    tpu.vector_store %arg10[%c0_379, %c0_380], %478 {strides = array<i32>} : memref<64x128xf32, #tpu.memory_space<vmem>>, vector<64x128xf32>,
    %c0_381 = arith.constant 0 : index
    %c0_382 = arith.constant 0 : index
    %481 = vector.load %arg12[%c0_381, %c0_382] : memref<64x128xf32, #tpu.memory_space<vmem>>, vector<64x128xf32>
    %482 = math.tanh %478 : vector<64x128xf32>
    %483 = arith.truncf %482 : vector<64x128xf32> to vector<64x128xbf16>
    %c1152 = arith.constant 1152 : index
    %c0_383 = arith.constant 0 : index
    %484 = vector.load %arg5[%c1152, %c0_383] : memref<1280x128xbf16, #tpu.memory_space<vmem>>, vector<128x128xbf16>
    %cst_384 = arith.constant dense<0.000000e+00> : vector<64x128xf32>
    %485 = tpu.matmul %483, %484, %cst_384 {dimension_numbers = #tpu.dot_dimension_numbers<[1], [0], [0], [1], [0, 0, 1, 1], [], []>} : vector<64x128xbf16>, vector<128x128xbf16>, vector<64x128xf32> -> vector<64x128xf32>
    %486 = arith.addf %481, %485 : vector<64x128xf32>
    %c0_385 = arith.constant 0 : index
    %c0_386 = arith.constant 0 : index
    %487 = vector.load %arg12[%c0_385, %c0_386] : memref<64x128xf32, #tpu.memory_space<vmem>>, vector<64x128xf32>
    tpu.vector_store %arg12[%c0_385, %c0_386], %486 {strides = array<i32>} : memref<64x128xf32, #tpu.memory_space<vmem>>, vector<64x128xf32>,
    %c0_387 = arith.constant 0 : index
    %c0_388 = arith.constant 0 : index
    %488 = vector.load %arg12[%c0_387, %c0_388] : memref<64x128xf32, #tpu.memory_space<vmem>>, vector<64x128xf32>
    %c0_389 = arith.constant 0 : index
    %c0_390 = arith.constant 0 : index
    %489 = vector.load %arg6[%c0_389, %c0_390] : memref<1x128xf32, #tpu.memory_space<vmem>>, vector<1x128xf32>
    %490 = vector.broadcast %489 : vector<1x128xf32> to vector<64x128xf32>
    %491 = arith.addf %488, %490 : vector<64x128xf32>
    %cst_391 = arith.constant 5.000000e-01 : f32
    %492 = vector.broadcast %cst_391 : f32 to vector<64x128xf32>
    %493 = arith.mulf %492, %491 : vector<64x128xf32>
    %494 = math.tanh %493 : vector<64x128xf32>
    %cst_392 = arith.constant 5.000000e-01 : f32
    %495 = vector.broadcast %cst_392 : f32 to vector<64x128xf32>
    %496 = arith.mulf %495, %494 : vector<64x128xf32>
    %cst_393 = arith.constant 5.000000e-01 : f32
    %497 = vector.broadcast %cst_393 : f32 to vector<64x128xf32>
    %498 = arith.addf %496, %497 : vector<64x128xf32>
    %c0_394 = arith.constant 0 : index
    %c0_395 = arith.constant 0 : index
    %499 = vector.load %arg7[%c0_394, %c0_395] : memref<64x128xf32, #tpu.memory_space<vmem>>, vector<64x128xf32>
    tpu.vector_store %arg7[%c0_394, %c0_395], %498 {strides = array<i32>} : memref<64x128xf32, #tpu.memory_space<vmem>>, vector<64x128xf32>,
    return
  }
  func.func @transform_0(%arg0: i32) -> (i32, i32) {
    %c0_i32 = arith.constant 0 : i32
    %c0_i32_0 = arith.constant 0 : i32
    return %arg0, %c0_i32 : i32, i32
  }
  func.func @transform_1(%arg0: i32) -> (i32, i32) {
    %c0_i32 = arith.constant 0 : i32
    %c0_i32_0 = arith.constant 0 : i32
    %c0_i32_1 = arith.constant 0 : i32
    return %c0_i32, %c0_i32_0 : i32, i32
  }
  func.func @transform_2(%arg0: i32) -> (i32, i32) {
    %c0_i32 = arith.constant 0 : i32
    %c0_i32_0 = arith.constant 0 : i32
    %c0_i32_1 = arith.constant 0 : i32
    return %c0_i32, %c0_i32_0 : i32, i32
  }
  func.func @transform_3(%arg0: i32) -> (i32, i32) {
    %c0_i32 = arith.constant 0 : i32
    %c0_i32_0 = arith.constant 0 : i32
    %c0_i32_1 = arith.constant 0 : i32
    return %c0_i32, %c0_i32_0 : i32, i32
  }
  func.func @transform_4(%arg0: i32) -> (i32, i32) {
    %c0_i32 = arith.constant 0 : i32
    %c0_i32_0 = arith.constant 0 : i32
    %c0_i32_1 = arith.constant 0 : i32
    return %c0_i32, %c0_i32_0 : i32, i32
  }
  func.func @transform_5(%arg0: i32) -> (i32, i32) {
    %c0_i32 = arith.constant 0 : i32
    %c0_i32_0 = arith.constant 0 : i32
    %c0_i32_1 = arith.constant 0 : i32
    return %c0_i32, %c0_i32_0 : i32, i32
  }
  func.func @transform_6(%arg0: i32) -> (i32, i32) {
    %c0_i32 = arith.constant 0 : i32
    %c0_i32_0 = arith.constant 0 : i32
    return %arg0, %c0_i32 : i32, i32
  }
}

</mosaic_0001>

<bundles_post_ra>
// kernel: lstm_forward.1
= control target key start
LH: loop header
LB: loop body
LE: loop exit
PB: predicated region body
PF: predicated region fallthrough
CT: control target
= control target key end

     0   :  { %s12723_s21 = smov 0   ;;  %s15694_s0 = inlined_call_operand.vmem [shape: bf16[1280,32], index: 0, kind: input, shape index: {}]   ;;  %s15695_s1 = inlined_call_operand.vmem [shape: bf16[32,512], index: 1, kind: input, shape index: {}]   ;;  %s15696_s2 = inlined_call_operand.vmem [shape: bf16[128,512], index: 2, kind: input, shape index: {}]   ;;  %s15697_s3 = inlined_call_operand.vmem [shape: f32[1,512], index: 3, kind: input, shape index: {}]   ;;  %s15698_s4 = inlined_call_operand.vmem [shape: bf16[1280,128], index: 4, kind: input, shape index: {}]   ;;  %s15699_s5 = inlined_call_operand.vmem [shape: f32[1,128], index: 5, kind: input, shape index: {}]   ;;  %s15700_s6 = inlined_call_operand.vmem [shape: f32[128,128], index: 6, kind: output, shape index: {}]  }
   0x1 LB: > { %s9784_s22 = sadd.s32 4294967295, %s12685_s21   ;;  %p9788_p0 = scmp.ge.s32.totalorder %s12685_s21, 1  ;;  %s12685_s21 = sphi %s12723_s21, %s16_s21  }
   0x2   : > { %p213_p1 = scmp.lt.s32.totalorder %s12685_s21, 3 }
   0x4   : > { %p214_p2 = pnand %p9788_p0, %p213_p1 }
   0x6   : > { %217 = sbr.rel (%p214_p2) target bundleno = 3447 (0xd77), region = 44 }
   0xd   : > { %v11312_v0 = vld [vmem:[%s15695_s1 + $0x4] ss:$16 sps:$4 sm:$0xff]   ;;  %s243_s25 = smul.u32 80, %s9784_s22  ;;  %v11314_v1 = vld [vmem:[%s15695_s1] ss:$16 sps:$4 sm:$0xff]   ;;  %v15701_v2 = vmov 0  }
   0xe   : > { %969 = vmatprep.mubr.bf16.mxu1 %v15701_v2  ;;  %759 = vmatprep.mubr.bf16.mxu0 %v15701_v2  ;;  %v11315_v3 = vld [vmem:[%s15695_s1 + $0x24] ss:$16 sps:$4 sm:$0xff]   ;;  %v11317_v4 = vld [vmem:[%s15695_s1 + $0x20] ss:$16 sps:$4 sm:$0xff]   ;;  %v11321_v5 = vld [vmem:[%s15695_s1 + $0xc] ss:$16 sps:$4 sm:$0xff]  }
   0xf   : > { %10651 = vmatprep.subr.bf16.mxu1 %v11312_v0  ;;  %p244_p3 = scmp.lt.s32.totalorder %s243_s25, 159  ;;  %727 = vmatprep.subr.bf16.mxu0 %v11312_v0  ;;  %v11319_v6 = vld [vmem:[%s15695_s1 + $0x8] ss:$16 sps:$4 sm:$0xff]   ;;  %v11333_v7 = vld [vmem:[%s15695_s1 + $0x2c] ss:$16 sps:$4 sm:$0xff]   ;;  %vm606_vm0 = vcmask 261120  }
  0x10   : > { %10653 = vmatpush1.bf16.msra.mxu1 %v11314_v1  ;;  %728 = vmatpush1.bf16.msra.mxu0 %v11314_v1  ;;  %v11331_v9 = vld [vmem:[%s15695_s1 + $0x28] ss:$16 sps:$4 sm:$0xff]   ;;  %v11346_v15 = vld [vmem:[%s15696_s2 + $0xc] ss:$16 sps:$4 sm:$0xff]   ;;  %v11367_v43 = vld [vmem:[%s15698_s4] sm:$0xff]  }
  0x11   : > { %10652 = vmatprep.subr.bf16.mxu1 %v11315_v3  ;;  %s15979_s25 = smov (!%p244_p3, %s243_s25), 159  ;;  %729 = vmatprep.subr.bf16.mxu0 %v11315_v3  ;;  %v11344_v46 = vld [vmem:[%s15696_s2 + $0x8] ss:$16 sps:$4 sm:$0xff]   ;;  %v11354_v47 = vld [vmem:[%s15696_s2 + $0x2c] ss:$16 sps:$4 sm:$0xff]   ;;  %v11377_v58 = vld [vmem:[%s15698_s4 + $0x10] sm:$0xff]  }
  0x12   : > { %s9789_s12 = sshll.u32 %s15979_s25, 2  ;;  %v11352_v49 = vld [vmem:[%s15696_s2 + $0x28] ss:$16 sps:$4 sm:$0xff]   ;;  %v11362_v50 = vld [vmem:[%s15696_s2 + $0x4c] ss:$16 sps:$4 sm:$0xff]   ;;  %s9790_s25 = sshll.u32 %s9784_s22, 3 }
  0x13   : > { %s12759_s17 = scalar_lea.vmem %s15694_s0, %s9789_s12  ;;  %v11360_v51 = vld [vmem:[%s15696_s2 + $0x48] ss:$16 sps:$4 sm:$0xff]   ;;  %v11371_v52 = vld [vmem:[%s15696_s2 + $0x6c] ss:$16 sps:$4 sm:$0xff]   ;;  %p250_p4 = scmp.lt.s32.totalorder %s9790_s25, 15 }
  0x14   : > { %10654 = vmatpush1.bf16.msra.mxu1 %v11317_v4  ;;  %730 = vmatpush1.bf16.msra.mxu0 %v11317_v4  ;;  %v11318_v8 = vld [vmem:[%s12759_s17 + $0xa8] sm:$0xff]   ;;  %v11322_v10 = vld [vmem:[%s12759_s17 + $0xb0] sm:$0xff]   ;;  %v11323_v11 = vld [vmem:[%s12759_s17 + $0xb8] sm:$0xff]  }
  0x15   : > { %1160 = vmatprep.subr.bf16.mxu1 %v11321_v5  ;;  %v12774_v12 = vld [vmem:[%s12759_s17] sm:$0xff]   ;;  %v12781_v14 = vld [vmem:[%s12759_s17 + $0x8] sm:$0xff]   ;;  %v12793_v17 = vld [vmem:[%s12759_s17 + $0x10] sm:$0xff]   ;;  %10411 = vmatprep.subr.bf16.mxu0 %v11367_v43  ;;  %s15981_s25 = smov (!%p250_p4, %s9790_s25), 15 }
  0x16   : > { %v11324_v13 = vld [vmem:[%s12759_s17 + $0xc0] sm:$0xff]   ;;  %v11325_v16 = vld [vmem:[%s12759_s17 + $0xc8] sm:$0xff]   ;;  %v11326_v18 = vld [vmem:[%s12759_s17 + $0xd0] sm:$0xff]   ;;  %s9791_s26 = sshll.u32 %s15981_s25, 3 }
  0x17   : > { %9861 = vmatmul.mubr.msk.bf16.vlgmr.msra.gmra.mrb[0].mxu1 %vm606_vm0, %v11318_v8  ;;  %9840 = vmatmul.mubr.msk.bf16.vlgmr.msra.gmra.mrb[0].mxu0 %vm606_vm0, %v12774_v12  ;;  %v12802_v19 = vld [vmem:[%s12759_s17 + $0x18] sm:$0xff]   ;;  %v12813_v21 = vld [vmem:[%s12759_s17 + $0x20] sm:$0xff]   ;;  %v12822_v23 = vld [vmem:[%s12759_s17 + $0x28] sm:$0xff]   ;;  %s15681_s28 = scalar_lea.vmem %s15700_s6, %s9791_s26 }
  0x18   : > { %1161 = vmatpush1.bf16.msra.mxu1 %v11319_v6  ;;  %979 = vmatprep.mubr.bf16.mxu1 %v15701_v2  ;;  %v11327_v20 = vld [vmem:[%s12759_s17 + $0xd8] sm:$0xff]   ;;  %v11328_v22 = vld [vmem:[%s12759_s17 + $0xe0] sm:$0xff]   ;;  %v11329_v24 = vld [vmem:[%s12759_s17 + $0xe8] sm:$0xff]  }
  0x19   : > { %1162 = vmatprep.subr.bf16.mxu1 %v11333_v7  ;;  %769 = vmatprep.mubr.bf16.mxu0 %v15701_v2  ;;  %v12831_v25 = vld [vmem:[%s12759_s17 + $0x30] sm:$0xff]   ;;  %v12840_v27 = vld [vmem:[%s12759_s17 + $0x38] sm:$0xff]   ;;  %v11335_v29 = vld [vmem:[%s12759_s17 + $0x100] sm:$0xff]  }
  0x1a   : > { %v11330_v26 = vld [vmem:[%s12759_s17 + $0xf0] sm:$0xff]   ;;  %v11334_v28 = vld [vmem:[%s12759_s17 + $0xf8] sm:$0xff]   ;;  %v12850_v30 = vld [vmem:[%s12759_s17 + $0x40] sm:$0xff]   ;;  %10412 = vmatpush3.bf16.msra.mxu0 %v11367_v43 }
  0x1b   : > { %v11336_v31 = vld [vmem:[%s12759_s17 + $0x108] sm:$0xff]   ;;  %v11337_v33 = vld [vmem:[%s12759_s17 + $0x110] sm:$0xff]   ;;  %v11338_v35 = vld [vmem:[%s12759_s17 + $0x118] sm:$0xff]  }
  0x1c   : > { %1163 = vmatpush1.bf16.msra.mxu1 %v11331_v9  ;;  %v12859_v32 = vld [vmem:[%s12759_s17 + $0x48] sm:$0xff]   ;;  %v12868_v34 = vld [vmem:[%s12759_s17 + $0x50] sm:$0xff]   ;;  %v12877_v36 = vld [vmem:[%s12759_s17 + $0x58] sm:$0xff]  }
  0x1d   : > { %2675 = vmatprep.subr.bf16.mxu1 %v11346_v15  ;;  %v11339_v37 = vld [vmem:[%s12759_s17 + $0x120] sm:$0xff]   ;;  %v11340_v39 = vld [vmem:[%s12759_s17 + $0x128] sm:$0xff]   ;;  %v11341_v41 = vld [vmem:[%s12759_s17 + $0x130] sm:$0xff]  }
  0x1e   : > { %v12886_v38 = vld [vmem:[%s12759_s17 + $0x60] sm:$0xff]   ;;  %v12895_v40 = vld [vmem:[%s12759_s17 + $0x68] sm:$0xff]   ;;  %v12904_v42 = vld [vmem:[%s12759_s17 + $0x70] sm:$0xff]  }
  0x1f   : > { %9862 = vmatmul.mubr.msk.bf16.gmra.mrb[4].mxu1 %vm606_vm0, %v11322_v10  ;;  %9841 = vmatmul.mubr.msk.bf16.gmra.mrb[4].mxu0 %vm606_vm0, %v12781_v14  ;;  %v11342_v44 = vld [vmem:[%s12759_s17 + $0x138] sm:$0xff]   ;;  %v12930_v48 = vld [vmem:[%s12759_s17 + $0x80] sm:$0xff]   ;;  %v12951_v53 = vld [vmem:[%s12759_s17 + $0x88] sm:$0xff]  }
  0x20   : > { %989 = vmatprep.mubr.bf16.mxu1 %v15701_v2  ;;  %779 = vmatprep.mubr.bf16.mxu0 %v15701_v2  ;;  %v12916_v45 = vld [vmem:[%s12759_s17 + $0x78] sm:$0xff]   ;;  %v11373_v54 = vld [vmem:[%s15698_s4 + $0x8] sm:$0xff]   ;;  %v12966_v56 = vld [vmem:[%s12759_s17 + $0x90] sm:$0xff]  }
  0x21   : > { %v11369_v55 = vld [vmem:[%s15696_s2 + $0x68] ss:$16 sps:$4 sm:$0xff]   ;;  %10413 = vmatprep.subr.bf16.mxu0 %v11373_v54  ;;  %v12987_v59 = vld [vmem:[%s12759_s17 + $0xa0] sm:$0xff]   ;;  %v11381_v61 = vld [vmem:[%s15696_s2 + $0x8c] ss:$16 sps:$4 sm:$0xff]  }
  0x22   : > { %10414 = vmatpush3.bf16.msra.mxu0 %v11373_v54  ;;  %v12975_v57 = vld [vmem:[%s12759_s17 + $0x98] sm:$0xff]   ;;  %v11383_v8 = vld [vmem:[%s15698_s4 + $0x20] sm:$0xff]  }
  0x23   : > { %10415 = vmatprep.subr.bf16.mxu0 %v11377_v58  ;;  %v11379_v60 = vld [vmem:[%s15696_s2 + $0x88] ss:$16 sps:$4 sm:$0xff]   ;;  %v11386_v10 = vld [vmem:[%s15696_s2 + $0xac] ss:$16 sps:$4 sm:$0xff]  }
  0x24   : > { %v11382_v62 = vld [vmem:[%s15698_s4 + $0x18] sm:$0xff]  }
  0x25   : > { %v11384_v9 = vld [vmem:[%s15696_s2 + $0xa8] ss:$16 sps:$4 sm:$0xff]  }
  0x26   : > { %10416 = vmatpush3.bf16.msra.mxu0 %v11377_v58 }
  0x27   : > { %9863 = vmatmul.mubr.msk.bf16.gmra.mrb[8].mxu1 %vm606_vm0, %v11323_v11  ;;  %9842 = vmatmul.mubr.msk.bf16.gmra.mrb[8].mxu0 %vm606_vm0, %v12793_v17 }
  0x28   : > { %999 = vmatprep.mubr.bf16.mxu1 %v15701_v2  ;;  %789 = vmatprep.mubr.bf16.mxu0 %v15701_v2 }
  0x29   : > { %10417 = vmatprep.subr.bf16.mxu0 %v11382_v62 }
  0x2a   : > { %10418 = vmatpush3.bf16.msra.mxu0 %v11382_v62  ;;  %v11388_v62 = vld [vmem:[%s15698_s4 + $0x30] sm:$0xff]  }
  0x2b   : > { %10419 = vmatprep.subr.bf16.mxu0 %v11383_v8 }
  0x2e   : > { %10420 = vmatpush3.bf16.msra.mxu0 %v11383_v8 }
  0x2f   : > { %9864 = vmatmul.mubr.msk.bf16.gmra.mrb[12].mxu1 %vm606_vm0, %v11324_v13  ;;  %9843 = vmatmul.mubr.msk.bf16.gmra.mrb[12].mxu0 %vm606_vm0, %v12802_v19 }
  0x30   : > { %1009 = vmatprep.mubr.bf16.mxu1 %v15701_v2  ;;  %799 = vmatprep.mubr.bf16.mxu0 %v15701_v2 }
  0x37   : > { %9865 = vmatmul.mubr.msk.bf16.gmra.mrb[16].mxu1 %vm606_vm0, %v11325_v16  ;;  %9844 = vmatmul.mubr.msk.bf16.gmra.mrb[16].mxu0 %vm606_vm0, %v12813_v21 }
  0x38   : > { %1019 = vmatprep.mubr.bf16.mxu1 %v15701_v2  ;;  %809 = vmatprep.mubr.bf16.mxu0 %v15701_v2 }
  0x3f   : > { %9866 = vmatmul.mubr.msk.bf16.gmra.mrb[20].mxu1 %vm606_vm0, %v11326_v18  ;;  %9845 = vmatmul.mubr.msk.bf16.gmra.mrb[20].mxu0 %vm606_vm0, %v12822_v23 }
  0x40   : > { %1029 = vmatprep.mubr.bf16.mxu1 %v15701_v2  ;;  %819 = vmatprep.mubr.bf16.mxu0 %v15701_v2 }
  0x47   : > { %9867 = vmatmul.mubr.msk.bf16.gmra.mrb[24].mxu1 %vm606_vm0, %v11327_v20  ;;  %9846 = vmatmul.mubr.msk.bf16.gmra.mrb[24].mxu0 %vm606_vm0, %v12831_v25 }
  0x48   : > { %1039 = vmatprep.mubr.bf16.mxu1 %v15701_v2  ;;  %829 = vmatprep.mubr.bf16.mxu0 %v15701_v2 }
  0x4f   : > { %9868 = vmatmul.mubr.msk.bf16.gmra.mrb[28].mxu1 %vm606_vm0, %v11328_v22  ;;  %9847 = vmatmul.mubr.msk.bf16.gmra.mrb[28].mxu0 %vm606_vm0, %v12840_v27 }
  0x50   : > { %1049 = vmatprep.mubr.bf16.mxu1 %v15701_v2  ;;  %839 = vmatprep.mubr.bf16.mxu0 %v15701_v2 }
  0x57   : > { %9869 = vmatmul.mubr.msk.bf16.gmra.mrb[32].mxu1 %vm606_vm0, %v11329_v24  ;;  %9848 = vmatmul.mubr.msk.bf16.gmra.mrb[32].mxu0 %vm606_vm0, %v12850_v30 }
  0x58   : > { %1059 = vmatprep.mubr.bf16.mxu1 %v15701_v2  ;;  %849 = vmatprep.mubr.bf16.mxu0 %v15701_v2 }
  0x5f   : > { %9870 = vmatmul.mubr.msk.bf16.gmra.mrb[36].mxu1 %vm606_vm0, %v11330_v26  ;;  %9849 = vmatmul.mubr.msk.bf16.gmra.mrb[36].mxu0 %vm606_vm0, %v12859_v32 }
  0x60   : > { %1069 = vmatprep.mubr.bf16.mxu1 %v15701_v2  ;;  %859 = vmatprep.mubr.bf16.mxu0 %v15701_v2 }
  0x67   : > { %9871 = vmatmul.mubr.msk.bf16.gmra.mrb[40].mxu1 %vm606_vm0, %v11334_v28  ;;  %9850 = vmatmul.mubr.msk.bf16.gmra.mrb[40].mxu0 %vm606_vm0, %v12868_v34 }
  0x68   : > { %1079 = vmatprep.mubr.bf16.mxu1 %v15701_v2  ;;  %869 = vmatprep.mubr.bf16.mxu0 %v15701_v2 }
  0x6f   : > { %9872 = vmatmul.mubr.msk.bf16.gmra.mrb[44].mxu1 %vm606_vm0, %v11335_v29  ;;  %9851 = vmatmul.mubr.msk.bf16.gmra.mrb[44].mxu0 %vm606_vm0, %v12877_v36 }
  0x70   : > { %1089 = vmatprep.mubr.bf16.mxu1 %v15701_v2  ;;  %879 = vmatprep.mubr.bf16.mxu0 %v15701_v2 }
  0x77   : > { %9873 = vmatmul.mubr.msk.bf16.gmra.mrb[48].mxu1 %vm606_vm0, %v11336_v31  ;;  %9852 = vmatmul.mubr.msk.bf16.gmra.mrb[48].mxu0 %vm606_vm0, %v12886_v38 }
  0x78   : > { %1099 = vmatprep.mubr.bf16.mxu1 %v15701_v2  ;;  %889 = vmatprep.mubr.bf16.mxu0 %v15701_v2 }
  0x7f   : > { %9874 = vmatmul.mubr.msk.bf16.gmra.mrb[52].mxu1 %vm606_vm0, %v11337_v33  ;;  %9853 = vmatmul.mubr.msk.bf16.gmra.mrb[52].mxu0 %vm606_vm0, %v12895_v40 }
  0x80   : > { %1109 = vmatprep.mubr.bf16.mxu1 %v15701_v2  ;;  %899 = vmatprep.mubr.bf16.mxu0 %v15701_v2 }
  0x87   : > { %9875 = vmatmul.mubr.msk.bf16.gmra.mrb[56].mxu1 %vm606_vm0, %v11338_v35  ;;  %9854 = vmatmul.mubr.msk.bf16.gmra.mrb[56].mxu0 %vm606_vm0, %v12904_v42 }
  0x88   : > { %1119 = vmatprep.mubr.bf16.mxu1 %v15701_v2  ;;  %909 = vmatprep.mubr.bf16.mxu0 %v15701_v2 }
  0x8f   : > { %9876 = vmatmul.mubr.msk.bf16.gmra.mrb[60].mxu1 %vm606_vm0, %v11339_v37  ;;  %9855 = vmatmul.mubr.msk.bf16.gmra.mrb[60].mxu0 %vm606_vm0, %v12916_v45 }
  0x90   : > { %1129 = vmatprep.mubr.bf16.mxu1 %v15701_v2  ;;  %919 = vmatprep.mubr.bf16.mxu0 %v15701_v2 }
  0x97   : > { %9877 = vmatmul.mubr.msk.bf16.gmra.mrb[64].mxu1 %vm606_vm0, %v11340_v39  ;;  %9856 = vmatmul.mubr.msk.bf16.gmra.mrb[64].mxu0 %vm606_vm0, %v12930_v48 }
  0x98   : > { %1139 = vmatprep.mubr.bf16.mxu1 %v15701_v2  ;;  %929 = vmatprep.mubr.bf16.mxu0 %v15701_v2 }
  0x9f   : > { %9878 = vmatmul.mubr.msk.bf16.gmra.mrb[68].mxu1 %vm606_vm0, %v11341_v41  ;;  %9857 = vmatmul.mubr.msk.bf16.gmra.mrb[68].mxu0 %vm606_vm0, %v12951_v53 }
  0xa0   : > { %1149 = vmatprep.mubr.bf16.mxu1 %v15701_v2  ;;  %939 = vmatprep.mubr.bf16.mxu0 %v15701_v2 }
  0xa7   : > { %9879 = vmatmul.mubr.msk.bf16.gmra.mrb[72].mxu1 %vm606_vm0, %v11342_v44  ;;  %9858 = vmatmul.mubr.msk.bf16.gmra.mrb[72].mxu0 %vm606_vm0, %v12966_v56 }
  0xa8   : > { %1192 = vmatprep.mubr.bf16.mxu1 %v15701_v2  ;;  %949 = vmatprep.mubr.bf16.mxu0 %v15701_v2 }
  0xaf   : > { %9880 = vmatmul.mubr.msk.bf16.vlgmr.msra.gmra.mrb[76].mxu1 %vm606_vm0, %v12774_v12  ;;  %9859 = vmatmul.mubr.msk.bf16.gmra.mrb[76].mxu0 %vm606_vm0, %v12975_v57 }
  0xb0   : > { %2676 = vmatpush1.bf16.msra.mxu1 %v11344_v46  ;;  %1202 = vmatprep.mubr.bf16.mxu1 %v15701_v2 }
  0xb1   : > { %2677 = vmatprep.subr.bf16.mxu1 %v11354_v47  ;;  %959 = vmatprep.mubr.bf16.mxu0 %v15701_v2 }
  0xb4   : > { %2678 = vmatpush1.bf16.msra.mxu1 %v11352_v49 }
  0xb5   : > { %2679 = vmatprep.subr.bf16.mxu1 %v11362_v50 }
  0xb7   : > { %9881 = vmatmul.mubr.msk.bf16.gmra.mrb[80].mxu1 %vm606_vm0, %v12781_v14  ;;  %9860 = vmatmul.mubr.msk.bf16.gmra.mrb[80].mxu0 %vm606_vm0, %v12987_v59 }
  0xb8   : > { %1212 = vmatprep.mubr.bf16.mxu1 %v15701_v2  ;;  %2680 = vmatpush1.bf16.msra.mxu1 %v11360_v51 }
  0xb9   : > { %2681 = vmatprep.subr.bf16.mxu1 %v11371_v52  ;;  %v11387_v52 = vld [vmem:[%s15698_s4 + $0x28] sm:$0xff]  }
  0xba   : > { %10421 = vmatprep.subr.bf16.mxu0 %v11387_v52 }
  0xbb   : > { %10422 = vmatpush3.bf16.msra.mxu0 %v11387_v52 }
  0xbc   : > { %2682 = vmatpush1.bf16.msra.mxu1 %v11369_v55  ;;  %10423 = vmatprep.subr.bf16.mxu0 %v11388_v62 }
  0xbd   : > { %2683 = vmatprep.subr.bf16.mxu1 %v11381_v61 }
  0xbf   : > { %9882 = vmatmul.mubr.msk.bf16.gmra.mrb[84].mxu1 %vm606_vm0, %v12793_v17  ;;  %10424 = vmatpush3.bf16.msra.mxu0 %v11388_v62 }
  0xc0   : > { %1222 = vmatprep.mubr.bf16.mxu1 %v15701_v2  ;;  %2684 = vmatpush1.bf16.msra.mxu1 %v11379_v60 }
  0xc1   : > { %2685 = vmatprep.subr.bf16.mxu1 %v11386_v10 }
  0xc4   : > { %2686 = vmatpush1.bf16.msra.mxu1 %v11384_v9 }
  0xc7   : > { %9883 = vmatmul.mubr.msk.bf16.gmra.mrb[88].mxu1 %vm606_vm0, %v12802_v19 }
  0xc8   : > { %1232 = vmatprep.mubr.bf16.mxu1 %v15701_v2 }
  0xcf   : > { %9884 = vmatmul.mubr.msk.bf16.gmra.mrb[92].mxu1 %vm606_vm0, %v12813_v21 }
  0xd0   : > { %1242 = vmatprep.mubr.bf16.mxu1 %v15701_v2 }
  0xd7   : > { %9885 = vmatmul.mubr.msk.bf16.gmra.mrb[96].mxu1 %vm606_vm0, %v12822_v23 }
  0xd8   : > { %1252 = vmatprep.mubr.bf16.mxu1 %v15701_v2 }
  0xdf   : > { %9886 = vmatmul.mubr.msk.bf16.gmra.mrb[100].mxu1 %vm606_vm0, %v12831_v25 }
  0xe0   : > { %1262 = vmatprep.mubr.bf16.mxu1 %v15701_v2 }
  0xe7   : > { %9887 = vmatmul.mubr.msk.bf16.gmra.mrb[104].mxu1 %vm606_vm0, %v12840_v27 }
  0xe8   : > { %1272 = vmatprep.mubr.bf16.mxu1 %v15701_v2 }
  0xea   : > { %v13012_v63 = vpop.f32.mrb[0].mxu1  ;;  %v13051_v15 = vpop.f32.mrb[0].mxu0 }
  0xeb   : > { %15745 = vst [vmem:[#allocation7_spill] sm:$0xff] %v13012_v63  ;;  %v13014_v0 = vpop.f32.mrb[1].mxu1  ;;  %v13053_v16 = vpop.f32.mrb[1].mxu0 }
  0xec   : > { %15746 = vst [vmem:[#allocation8_spill] sm:$0xff] %v13014_v0  ;;  %v13016_v1 = vpop.f32.mrb[2].mxu1  ;;  %v13057_v17 = vpop.f32.mrb[2].mxu0 }
  0xed   : > { %15747 = vst [vmem:[#allocation9_spill] sm:$0xff] %v13016_v1  ;;  %v13018_v3 = vpop.f32.mrb[3].mxu1  ;;  %v13060_v18 = vpop.f32.mrb[3].mxu0 }
  0xee   : > { %15748 = vst [vmem:[#allocation10_spill] sm:$0xff] %v13018_v3 }
  0xef   : > { %9888 = vmatmul.mubr.msk.bf16.gmra.mrb[108].mxu1 %vm606_vm0, %v12850_v30 }
  0xf0   : > { %1282 = vmatprep.mubr.bf16.mxu1 %v15701_v2 }
  0xf2   : > { %v13023_v4 = vpop.f32.mrb[4].mxu1  ;;  %v13070_v23 = vpop.f32.mrb[4].mxu0 }
  0xf3   : > { %15749 = vst [vmem:[#allocation11_spill] sm:$0xff] %v13023_v4  ;;  %v13025_v5 = vpop.f32.mrb[5].mxu1  ;;  %v13072_v24 = vpop.f32.mrb[5].mxu0 }
  0xf4   : > { %15750 = vst [vmem:[#allocation12_spill] sm:$0xff] %v13025_v5  ;;  %v13027_v6 = vpop.f32.mrb[6].mxu1  ;;  %v13076_v25 = vpop.f32.mrb[6].mxu0 }
  0xf5   : > { %15751 = vst [vmem:[#allocation13_spill] sm:$0xff] %v13027_v6  ;;  %v13029_v7 = vpop.f32.mrb[7].mxu1  ;;  %v13079_v26 = vpop.f32.mrb[7].mxu0 }
  0xf6   : > { %15752 = vst [vmem:[#allocation14_spill] sm:$0xff] %v13029_v7 }
  0xf7   : > { %9889 = vmatmul.mubr.msk.bf16.gmra.mrb[112].mxu1 %vm606_vm0, %v12859_v32 }
  0xf8   : > { %1292 = vmatprep.mubr.bf16.mxu1 %v15701_v2 }
  0xfa   : > { %v13043_v11 = vpop.f32.mrb[8].mxu1  ;;  %v13089_v31 = vpop.f32.mrb[8].mxu0 }
  0xfb   : > { %15753 = vst [vmem:[#allocation15_spill] sm:$0xff] %v13043_v11  ;;  %v13045_v12 = vpop.f32.mrb[9].mxu1  ;;  %v13091_v32 = vpop.f32.mrb[9].mxu0 }
  0xfc   : > { %15754 = vst [vmem:[#allocation16_spill] sm:$0xff] %v13045_v12  ;;  %v13047_v13 = vpop.f32.mrb[10].mxu1  ;;  %v13095_v33 = vpop.f32.mrb[10].mxu0 }
  0xfd   : > { %15755 = vst [vmem:[#allocation17_spill] sm:$0xff] %v13047_v13  ;;  %v13049_v14 = vpop.f32.mrb[11].mxu1 }
  0xfe   : > { %15756 = vst [vmem:[#allocation18_spill] sm:$0xff] %v13049_v14 }
  0xff   : > { %9890 = vmatmul.mubr.msk.bf16.gmra.mrb[116].mxu1 %vm606_vm0, %v12868_v34  ;;  %v13098_v34 = vpop.f32.mrb[11].mxu0 }
 0x100   : > { %1302 = vmatprep.mubr.bf16.mxu1 %v15701_v2 }
 0x102   : > { %v13062_v19 = vpop.f32.mrb[12].mxu1  ;;  %v13108_v41 = vpop.f32.mrb[12].mxu0 }
 0x103   : > { %15757 = vst [vmem:[#allocation19_spill] sm:$0xff] %v13062_v19  ;;  %v13064_v20 = vpop.f32.mrb[13].mxu1  ;;  %v13110_v43 = vpop.f32.mrb[13].mxu0 }
 0x104   : > { %15758 = vst [vmem:[#allocation20_spill] sm:$0xff] %v13064_v20  ;;  %v13066_v21 = vpop.f32.mrb[14].mxu1 }
 0x105   : > { %15759 = vst [vmem:[#allocation21_spill] sm:$0xff] %v13066_v21  ;;  %v13068_v22 = vpop.f32.mrb[15].mxu1 }
 0x106   : > { %15760 = vst [vmem:[#allocation22_spill] sm:$0xff] %v13068_v22 }
 0x107   : > { %9891 = vmatmul.mubr.msk.bf16.gmra.mrb[120].mxu1 %vm606_vm0, %v12877_v36 }
 0x108   : > { %1312 = vmatprep.mubr.bf16.mxu1 %v15701_v2 }
 0x10a   : > { %v13081_v27 = vpop.f32.mrb[16].mxu1 }
 0x10b   : > { %15761 = vst [vmem:[#allocation23_spill] sm:$0xff] %v13081_v27  ;;  %v13083_v28 = vpop.f32.mrb[17].mxu1  ;;  %v11441_v27 = vld [vmem:[%s15698_s4 + $0x58] sm:$0xff]  }
 0x10c   : > { %15762 = vst [vmem:[#allocation24_spill] sm:$0xff] %v13083_v28  ;;  %v13085_v29 = vpop.f32.mrb[18].mxu1  ;;  %v11439_v28 = vld [vmem:[%s15698_s4 + $0x48] sm:$0xff]  }
 0x10d   : > { %15763 = vst [vmem:[#allocation25_spill] sm:$0xff] %v13085_v29  ;;  %v13087_v30 = vpop.f32.mrb[19].mxu1  ;;  %v13608_v29 = vld [vmem:[%s15696_s2 + $0xa8] ss:$16 sps:$4 sm:$0xff]  }
 0x10e   : > { %15764 = vst [vmem:[#allocation26_spill] sm:$0xff] %v13087_v30  ;;  %v13603_v30 = vld [vmem:[%s15696_s2 + $0xac] ss:$16 sps:$4 sm:$0xff]  }
 0x10f   : > { %9892 = vmatmul.mubr.msk.bf16.gmra.mrb[124].mxu1 %vm606_vm0, %v12886_v38  ;;  %v13114_v38 = vpop.f32.mrb[14].mxu0 }
 0x110   : > { %1322 = vmatprep.mubr.bf16.mxu1 %v15701_v2  ;;  %v13117_v44 = vpop.f32.mrb[15].mxu0 }
 0x112   : > { %v13100_v35 = vpop.f32.mrb[20].mxu1 }
 0x113   : > { %15765 = vst [vmem:[#allocation27_spill] sm:$0xff] %v13100_v35  ;;  %v13102_v36 = vpop.f32.mrb[21].mxu1 }
 0x114   : > { %15766 = vst [vmem:[#allocation28_spill] sm:$0xff] %v13102_v36  ;;  %v13104_v37 = vpop.f32.mrb[22].mxu1 }
 0x115   : > { %15767 = vst [vmem:[#allocation29_spill] sm:$0xff] %v13104_v37  ;;  %v13106_v39 = vpop.f32.mrb[23].mxu1 }
 0x116   : > { %15768 = vst [vmem:[#allocation30_spill] sm:$0xff] %v13106_v39 }
 0x117   : > { %9893 = vmatmul.mubr.msk.bf16.gmra.mrb[128].mxu1 %vm606_vm0, %v12895_v40 }
 0x118   : > { %1332 = vmatprep.mubr.bf16.mxu1 %v15701_v2 }
 0x11a   : > { %v13119_v46 = vpop.f32.mrb[24].mxu1 }
 0x11b   : > { %15769 = vst [vmem:[#allocation31_spill] sm:$0xff] %v13119_v46  ;;  %v13121_v47 = vpop.f32.mrb[25].mxu1 }
 0x11c   : > { %15770 = vst [vmem:[#allocation32_spill] sm:$0xff] %v13121_v47  ;;  %v13123_v49 = vpop.f32.mrb[26].mxu1 }
 0x11d   : > { %15771 = vst [vmem:[#allocation33_spill] sm:$0xff] %v13123_v49  ;;  %v13125_v50 = vpop.f32.mrb[27].mxu1 }
 0x11e   : > { %15772 = vst [vmem:[#allocation34_spill] sm:$0xff] %v13125_v50  ;;  %v12664_v50 = vld [vmem:[%s12759_s17 + $0xc8] sm:$0xff]  }
 0x11f   : > { %9894 = vmatmul.mubr.msk.bf16.gmra.mrb[132].mxu1 %vm606_vm0, %v12904_v42 }
 0x120   : > { %1342 = vmatprep.mubr.bf16.mxu1 %v15701_v2 }
 0x122   : > { %v13130_v40 = vpop.f32.mrb[28].mxu1 }
 0x123   : > { %15773 = vst [vmem:[#allocation35_spill] sm:$0xff] %v13130_v40  ;;  %v13132_v51 = vpop.f32.mrb[29].mxu1 }
 0x124   : > { %15774 = vst [vmem:[#allocation36_spill] sm:$0xff] %v13132_v51  ;;  %v13137_v54 = vpop.f32.mrb[30].mxu1 }
 0x125   : > { %15775 = vst [vmem:[#allocation37_spill] sm:$0xff] %v13137_v54  ;;  %v13139_v55 = vpop.f32.mrb[31].mxu1 }
 0x126   : > { %15776 = vst [vmem:[#allocation38_spill] sm:$0xff] %v13139_v55 }
 0x127   : > { %9895 = vmatmul.mubr.msk.bf16.gmra.mrb[136].mxu1 %vm606_vm0, %v12916_v45  ;;  %v11392_v45 = vld [vmem:[%s15698_s4 + $0x38] sm:$0xff]  }
 0x128   : > { %1352 = vmatprep.mubr.bf16.mxu1 %v15701_v2  ;;  %10425 = vmatprep.subr.bf16.mxu0 %v11392_v45 }
 0x129   : > { %10426 = vmatpush3.bf16.msra.mxu0 %v11392_v45  ;;  %v13185_v45 = vld [vmem:[%s15696_s2 + $0xc8] ss:$16 sps:$4 sm:$0xff]  }
 0x12a   : > { %v13144_v42 = vpop.f32.mrb[32].mxu1 }
 0x12b   : > { %15777 = vst [vmem:[#allocation39_spill] sm:$0xff] %v13144_v42  ;;  %v13146_v58 = vpop.f32.mrb[33].mxu1  ;;  %v12662_v42 = vld [vmem:[%s12759_s17 + $0xb8] sm:$0xff]  }
 0x12c   : > { %15778 = vst [vmem:[#allocation40_spill] sm:$0xff] %v13146_v58  ;;  %v13148_v60 = vpop.f32.mrb[34].mxu1  ;;  %v12660_v58 = vld [vmem:[%s12759_s17 + $0xa8] sm:$0xff]  }
 0x12d   : > { %15779 = vst [vmem:[#allocation41_spill] sm:$0xff] %v13148_v60  ;;  %v13150_v61 = vpop.f32.mrb[35].mxu1 }
 0x12e   : > { %15780 = vst [vmem:[#allocation42_spill] sm:$0xff] %v13150_v61 }
 0x12f   : > { %9896 = vmatmul.mubr.msk.bf16.gmra.mrb[140].mxu1 %vm606_vm0, %v12930_v48  ;;  %v13172_v48 = vld [vmem:[%s15696_s2 + $0x4] ss:$16 sps:$4 sm:$0xff]  }
 0x130   : > { %1362 = vmatprep.mubr.bf16.mxu1 %v15701_v2  ;;  %2602 = vmatprep.subr.bf16.mxu0 %v13172_v48 }
 0x132   : > { %v13161_v8 = vpop.f32.mrb[36].mxu1 }
 0x133   : > { %15781 = vst [vmem:[#allocation43_spill] sm:$0xff] %v13161_v8  ;;  %v13163_v9 = vpop.f32.mrb[37].mxu1 }
 0x134   : > { %15782 = vst [vmem:[#allocation44_spill] sm:$0xff] %v13163_v9  ;;  %v13165_v10 = vpop.f32.mrb[38].mxu1 }
 0x135   : > { %15783 = vst [vmem:[#allocation45_spill] sm:$0xff] %v13165_v10  ;;  %v13167_v52 = vpop.f32.mrb[39].mxu1 }
 0x136   : > { %15784 = vst [vmem:[#allocation46_spill] sm:$0xff] %v13167_v52  ;;  %v13190_v52 = vld [vmem:[%s15696_s2 + $0xcc] ss:$16 sps:$4 sm:$0xff]  }
 0x137   : > { %9897 = vmatmul.mubr.msk.bf16.gmra.mrb[144].mxu1 %vm606_vm0, %v12951_v53  ;;  %2687 = vmatprep.subr.bf16.mxu1 %v13190_v52 }
 0x138   : > { %1372 = vmatprep.mubr.bf16.mxu1 %v15701_v2  ;;  %2688 = vmatpush1.bf16.msra.mxu1 %v13185_v45 }
 0x13a   : > { %v13178_v62 = vpop.f32.mrb[40].mxu1 }
 0x13b   : > { %15785 = vst [vmem:[#allocation47_spill] sm:$0xff] %v13178_v62  ;;  %v13180_v9 = vpop.f32.mrb[41].mxu1 }
 0x13c   : > { %15786 = vst [vmem:[#allocation48_spill] sm:$0xff] %v13180_v9  ;;  %v13192_v10 = vpop.f32.mrb[42].mxu1 }
 0x13d   : > { %15787 = vst [vmem:[#allocation49_spill] sm:$0xff] %v13192_v10  ;;  %v13194_v53 = vpop.f32.mrb[43].mxu1 }
 0x13e   : > { %15788 = vst [vmem:[#allocation50_spill] sm:$0xff] %v13194_v53  ;;  %v13214_v53 = vld [vmem:[%s15696_s2 + $0xe8] ss:$16 sps:$4 sm:$0xff]  }
 0x13f   : > { %9898 = vmatmul.mubr.msk.bf16.gmra.mrb[148].mxu1 %vm606_vm0, %v12966_v56  ;;  %v13219_v56 = vld [vmem:[%s15696_s2 + $0xec] ss:$16 sps:$4 sm:$0xff]  }
 0x140   : > { %1382 = vmatprep.mubr.bf16.mxu1 %v15701_v2  ;;  %2689 = vmatprep.subr.bf16.mxu1 %v13219_v56 }
 0x141   : > { %2690 = vmatpush1.bf16.msra.mxu1 %v13214_v53 }
 0x142   : > { %v13201_v9 = vpop.f32.mrb[44].mxu1 }
 0x143   : > { %15789 = vst [vmem:[#allocation51_spill] sm:$0xff] %v13201_v9  ;;  %v13203_v62 = vpop.f32.mrb[45].mxu1 }
 0x144   : > { %15790 = vst [vmem:[#allocation52_spill] sm:$0xff] %v13203_v62  ;;  %v13205_v8 = vpop.f32.mrb[46].mxu1 }
 0x145   : > { %15791 = vst [vmem:[#allocation53_spill] sm:$0xff] %v13205_v8  ;;  %v13207_v61 = vpop.f32.mrb[47].mxu1 }
 0x146   : > { %15792 = vst [vmem:[#allocation54_spill] sm:$0xff] %v13207_v61 }
 0x147   : > { %9899 = vmatmul.mubr.msk.bf16.gmra.mrb[152].mxu1 %vm606_vm0, %v12975_v57 }
 0x148   : > { %1392 = vmatprep.mubr.bf16.mxu1 %v15701_v2 }
 0x14a   : > { %v13223_v8 = vpop.f32.mrb[48].mxu1 }
 0x14b   : > { %15793 = vst [vmem:[#allocation55_spill] sm:$0xff] %v13223_v8  ;;  %v13226_v57 = vpop.f32.mrb[49].mxu1 }
 0x14c   : > { %15794 = vst [vmem:[#allocation56_spill] sm:$0xff] %v13226_v57  ;;  %v13228_v61 = vpop.f32.mrb[50].mxu1 }
 0x14d   : > { %15795 = vst [vmem:[#allocation57_spill] sm:$0xff] %v13228_v61  ;;  %v13230_v62 = vpop.f32.mrb[51].mxu1 }
 0x14e   : > { %15796 = vst [vmem:[#allocation58_spill] sm:$0xff] %v13230_v62 }
 0x14f   : > { %9900 = vmatmul.mubr.msk.bf16.gmra.mrb[156].mxu1 %vm606_vm0, %v12987_v59 }
 0x150   : > { %1402 = vmatprep.mubr.bf16.mxu1 %v15701_v2 }
 0x152   : > { %v13235_v9 = vpop.f32.mrb[52].mxu1 }
 0x153   : > { %15797 = vst [vmem:[#allocation59_spill] sm:$0xff] %v13235_v9  ;;  %v13237_v10 = vpop.f32.mrb[53].mxu1  ;;  %v12661_v9 = vld [vmem:[%s12759_s17 + $0xb0] sm:$0xff]  }
 0x154   : > { %15798 = vst [vmem:[#allocation60_spill] sm:$0xff] %v13237_v10  ;;  %v13239_v60 = vpop.f32.mrb[54].mxu1 }
 0x155   : > { %15799 = vst [vmem:[#allocation61_spill] sm:$0xff] %v13239_v60  ;;  %v13241_v8 = vpop.f32.mrb[55].mxu1 }
 0x156   : > { %15800 = vst [vmem:[#allocation62_spill] sm:$0xff] %v13241_v8  ;;  %v346_v8 = vlaneseq }
 0x157   : > { %9901 = vmatmul.mubr.msk.bf16.gmra.mrb[160].mxu1 %vm606_vm0, %v12660_v58 }
 0x158   : > { %1412 = vmatprep.mubr.bf16.mxu1 %v15701_v2 }
 0x15a   : > { %v13246_v62 = vpop.f32.mrb[56].mxu1 }
 0x15b   : > { %15801 = vst [vmem:[#allocation63_spill] sm:$0xff] %v13246_v62  ;;  %v13248_v61 = vpop.f32.mrb[57].mxu1 }
 0x15c   : > { %15802 = vst [vmem:[#allocation64_spill] sm:$0xff] %v13248_v61  ;;  %v13250_v59 = vpop.f32.mrb[58].mxu1  ;;  %v347_v61 = vshrl.u32 %v346_v8, 7 }
 0x15d   : > { %15803 = vst [vmem:[#allocation65_spill] sm:$0xff] %v13250_v59  ;;  %v13252_v57 = vpop.f32.mrb[59].mxu1 }
 0x15e   : > { %15804 = vst [vmem:[#allocation66_spill] sm:$0xff] %v13252_v57  ;;  %v348_v57 = vsub.s32 0, %v347_v61  ;;  %v352_v59 = vsub.s32 1, %v347_v61 }
 0x15f   : > { %9902 = vmatmul.mubr.msk.bf16.gmra.mrb[164].mxu1 %vm606_vm0, %v12661_v9 }
 0x160   : > { %1422 = vmatprep.mubr.bf16.mxu1 %v15701_v2 }
 0x162   : > { %v13257_v60 = vpop.f32.mrb[60].mxu1 }
 0x163   : > { %15805 = vst [vmem:[#allocation67_spill] sm:$0xff] %v13257_v60  ;;  %v13259_v10 = vpop.f32.mrb[61].mxu1  ;;  %v344_v60 = vld [vmem:[%s15697_s3] sm:$0xf] }
 0x164   : > { %15806 = vst [vmem:[#allocation68_spill] sm:$0xff] %v13259_v10  ;;  %v13261_v58 = vpop.f32.mrb[62].mxu1  ;;  %v13279_v8 = vrot.slane %v344_v60, %v348_v57 }
 0x165   : > { %15807 = vst [vmem:[#allocation69_spill] sm:$0xff] %v13261_v58  ;;  %v13263_v62 = vpop.f32.mrb[63].mxu1 }
 0x166   : > { %15808 = vst [vmem:[#allocation70_spill] sm:$0xff] %v13263_v62  ;;  %15813 = vst [vmem:[#allocation75_spill] sm:$0xff] %v13279_v8  ;;  %v762_v62 = vadd.f32 %v13051_v15, %v13279_v8 }
 0x167   : > { %9903 = vmatmul.mubr.msk.bf16.gmra.mrb[168].mxu1 %vm606_vm0, %v12662_v42  ;;  %v13281_v42 = vrot.slane %v344_v60, %v352_v59  ;;  %v766_v59 = vadd.f32 %v13057_v17, %v13279_v8  ;;  %v772_v17 = vadd.f32 %v13070_v23, %v13279_v8  ;;  %v782_v23 = vadd.f32 %v13089_v31, %v13279_v8 }
 0x168   : > { %1432 = vmatprep.mubr.bf16.mxu1 %v15701_v2  ;;  %v12663_v2 = vld [vmem:[%s12759_s17 + $0xc0] sm:$0xff]   ;;  %v786_v31 = vadd.f32 %v13095_v33, %v13279_v8 }
 0x169   : > { %15814 = vst [vmem:[#allocation76_spill] sm:$0xff] %v13281_v42  ;;  %v768_v57 = vadd.f32 %v13060_v18, %v13281_v42  ;;  %v774_v18 = vadd.f32 %v13072_v24, %v13281_v42  ;;  %v360_v24 = vsub.s32 3, %v347_v61 }
 0x16a   : > { %v13268_v9 = vpop.f32.mrb[64].mxu1 }
 0x16b   : > { %15809 = vst [vmem:[#allocation71_spill] sm:$0xff] %v13268_v9  ;;  %v13273_v10 = vpop.f32.mrb[65].mxu1  ;;  %v15815_v9 = vmov 0   ;;  %v2050_v15 = vmul.f32 0.5, %v768_v57 }
 0x16c   : > { %15810 = vst [vmem:[#allocation72_spill] sm:$0xff] %v13273_v10  ;;  %v13275_v55 = vpop.f32.mrb[66].mxu1  ;;  %v764_v10 = vadd.f32 %v13053_v16, %v13281_v42  ;;  %v2010_v16 = vmul.f32 0.5, %v766_v59  ;;  %v778_v59 = vadd.f32 %v13079_v26, %v13281_v42 }
 0x16d   : > { %15811 = vst [vmem:[#allocation73_spill] sm:$0xff] %v13275_v55  ;;  %v13277_v58 = vpop.f32.mrb[67].mxu1 }
 0x16e   : > { %15812 = vst [vmem:[#allocation74_spill] sm:$0xff] %v13277_v58  ;;  %v2049_v40 = vmul.f32 0.5, %v764_v10  ;;  %v776_v10 = vadd.f32 %v13076_v25, %v13279_v8  ;;  %v784_v25 = vadd.f32 %v13091_v32, %v13281_v42  ;;  %v2052_v26 = vmul.f32 0.5, %v778_v59 }
 0x16f   : > { %9904 = vmatmul.mubr.msk.bf16.gmra.mrb[172].mxu1 %vm606_vm0, %v12663_v2  ;;  %v2009_v2 = vmul.f32 0.5, %v762_v62 }
 0x170   : > { %1442 = vmatprep.mubr.bf16.mxu1 %v15815_v9 }
 0x171   : > { %11684 = vtanh.f32 %v2009_v2 }
 0x172   : > { %v13290_v54 = vpop.f32.mrb[68].mxu1  ;;  %11686 = vtanh.f32 %v2049_v40  ;;  %v2051_v40 = vmul.f32 0.5, %v774_v18  ;;  %v788_v18 = vadd.f32 %v13098_v34, %v13281_v42 }
 0x173   : > { %15816 = vst [vmem:[#allocation77_spill] sm:$0xff] %v13290_v54  ;;  %v13294_v58 = vpop.f32.mrb[69].mxu1  ;;  %11688 = vtanh.f32 %v2050_v15  ;;  %v2011_v15 = vmul.f32 0.5, %v772_v17 }
 0x174   : > { %15817 = vst [vmem:[#allocation78_spill] sm:$0xff] %v13294_v58  ;;  %v13298_v55 = vpop.f32.mrb[70].mxu1  ;;  %11690 = vtanh.f32 %v2010_v16  ;;  %v12666_v58 = vld [vmem:[%s12759_s17 + $0xd8] sm:$0xff]  }
 0x175   : > { %15818 = vst [vmem:[#allocation79_spill] sm:$0xff] %v13298_v55  ;;  %v13300_v51 = vpop.f32.mrb[71].mxu1  ;;  %v13329_v55 = vrot.slane %v344_v60, %v360_v24  ;;  %11692 = vtanh.f32 %v2051_v40  ;;  %v794_v24 = vadd.f32 %v13110_v43, %v13281_v42 }
 0x176   : > { %15819 = vst [vmem:[#allocation80_spill] sm:$0xff] %v13300_v51  ;;  %11694 = vtanh.f32 %v2011_v15 }
 0x177   : > { %9905 = vmatmul.mubr.msk.bf16.gmra.mrb[176].mxu1 %vm606_vm0, %v12664_v50  ;;  %v356_v50 = vsub.s32 2, %v347_v61  ;;  %v2013_v61 = vmul.f32 0.5, %v782_v23  ;;  %v2014_v23 = vmul.f32 0.5, %v786_v31 }
 0x178   : > { %1452 = vmatprep.mubr.bf16.mxu1 %v15815_v9 }
 0x179   : > { %v13327_v16 = vrot.slane %v344_v60, %v356_v50 }
 0x17a   : > { %v13309_v62 = vpop.f32.mrb[72].mxu1 }
 0x17b   : > { %15820 = vst [vmem:[#allocation81_spill] sm:$0xff] %v13309_v62  ;;  %v13313_v57 = vpop.f32.mrb[73].mxu1  ;;  %v2012_v62 = vmul.f32 0.5, %v776_v10  ;;  %v11685_v32 = vpop.eup %11684  ;;  %v2053_v10 = vmul.f32 0.5, %v784_v25  ;;  %v2054_v25 = vmul.f32 0.5, %v788_v18  ;;  %v796_v18 = vadd.f32 %v13114_v38, %v13279_v8 }
 0x17c   : > { %15821 = vst [vmem:[#allocation82_spill] sm:$0xff] %v13313_v57  ;;  %v13317_v2 = vpop.f32.mrb[74].mxu1  ;;  %v12665_v57 = vld [vmem:[%s12759_s17 + $0xd0] sm:$0xff]   ;;  %v11687_v60 = vpop.eup %11686 }
 0x17d   : > { %15822 = vst [vmem:[#allocation83_spill] sm:$0xff] %v13317_v2  ;;  %v13321_v51 = vpop.f32.mrb[75].mxu1  ;;  %11696 = vtanh.f32 %v2012_v62  ;;  %v11689_v33 = vpop.eup %11688  ;;  %v2025_v2 = vmul.f32 0.5, %v11685_v32 }
 0x17e   : > { %15823 = vst [vmem:[#allocation84_spill] sm:$0xff] %v13321_v51  ;;  %11698 = vtanh.f32 %v2052_v26  ;;  %v11691_v62 = vpop.eup %11690  ;;  %v2065_v51 = vmul.f32 0.5, %v11687_v60  ;;  %v2066_v43 = vmul.f32 0.5, %v11689_v33 }
 0x17f   : > { %9906 = vmatmul.mubr.msk.bf16.gmra.mrb[180].mxu1 %vm606_vm0, %v12665_v57  ;;  %v792_v57 = vadd.f32 %v13108_v41, %v13279_v8  ;;  %11700 = vtanh.f32 %v2013_v61  ;;  %v2026_v61 = vmul.f32 0.5, %v11691_v62 }
 0x180   : > { %1462 = vmatprep.mubr.bf16.mxu1 %v15815_v9  ;;  %v2073_v32 = vadd.f32 0.5, %v2065_v51 }
 0x181   : > { %v2015_v26 = vmul.f32 0.5, %v792_v57  ;;  %v11693_v57 = vpop.eup %11692  ;;  %v2034_v62 = vadd.f32 0.5, %v2026_v61 }
 0x182   : > { %v1194_v17 = vpop.f32.mrb[76].mxu1  ;;  %v11695_v33 = vpop.eup %11694  ;;  %v2067_v51 = vmul.f32 0.5, %v11693_v57 }
 0x183   : > { %v1195_v50 = vadd.f32 %v1194_v17, %v13327_v16  ;;  %v1196_v59 = vpop.f32.mrb[77].mxu1  ;;  %v2027_v54 = vmul.f32 0.5, %v11695_v33 }
 0x184   : > { %v1197_v40 = vadd.f32 %v1196_v59, %v13329_v55  ;;  %v1198_v34 = vpop.f32.mrb[78].mxu1  ;;  %v2055_v59 = vmul.f32 0.5, %v794_v24  ;;  %v2074_v24 = vadd.f32 0.5, %v2066_v43  ;;  %v2145_v43 = vmul.f32 0.0, %v2073_v32 }
 0x185   : > { %11702 = vtanh.f32 %v1195_v50  ;;  %v1199_v15 = vadd.f32 %v1198_v34, %v13327_v16  ;;  %v1200_v41 = vpop.f32.mrb[79].mxu1  ;;  %v2075_v32 = vadd.f32 0.5, %v2067_v51 }
 0x186   : > { %v1201_v17 = vadd.f32 %v1200_v41, %v13329_v55  ;;  %11704 = vtanh.f32 %v2053_v10  ;;  %v2105_v31 = vmul.f32 0.5, %v1197_v40  ;;  %v798_v10 = vadd.f32 %v13117_v44, %v13281_v42 }
 0x187   : > { %11706 = vtanh.f32 %v1199_v15  ;;  %9907 = vmatmul.mubr.msk.bf16.gmra.mrb[184].mxu1 %vm606_vm0, %v12666_v58  ;;  %v2033_v58 = vadd.f32 0.5, %v2025_v2  ;;  %v2016_v41 = vmul.f32 0.5, %v796_v18  ;;  %v12667_v18 = vld [vmem:[%s12759_s17 + $0xe0] sm:$0xff]  }
 0x188   : > { %11708 = vtanh.f32 %v2014_v23  ;;  %1472 = vmatprep.mubr.bf16.mxu1 %v15815_v9  ;;  %v2106_v60 = vmul.f32 0.5, %v1201_v17  ;;  %v11697_v23 = vpop.eup %11696  ;;  %v2056_v2 = vmul.f32 0.5, %v798_v10 }
 0x189   : > { %11710 = vtanh.f32 %v2054_v25  ;;  %v11699_v44 = vpop.eup %11698 }
 0x18a   : > { %v1204_v50 = vpop.f32.mrb[80].mxu1  ;;  %11712 = vtanh.f32 %v2015_v26  ;;  %v11701_v26 = vpop.eup %11700  ;;  %v2068_v49 = vmul.f32 0.5, %v11699_v44 }
 0x18b   : > { %v1205_v40 = vadd.f32 %v1204_v50, %v13327_v16  ;;  %v1206_v34 = vpop.f32.mrb[81].mxu1  ;;  %11714 = vtanh.f32 %v2055_v59 }
 0x18c   : > { %11716 = vtanh.f32 %v2105_v31  ;;  %v1207_v38 = vadd.f32 %v1206_v34, %v13329_v55  ;;  %v1208_v15 = vpop.f32.mrb[82].mxu1  ;;  %v2146_v31 = vmul.f32 0.0, %v2074_v24  ;;  %v2028_v34 = vmul.f32 0.5, %v11697_v23 }
 0x18d   : > { %11718 = vtanh.f32 %v1205_v40  ;;  %v1209_v25 = vadd.f32 %v1208_v15, %v13327_v16  ;;  %v1210_v17 = vpop.f32.mrb[83].mxu1  ;;  %v2076_v51 = vadd.f32 0.5, %v2068_v49 }
 0x18e   : > { %11720 = vtanh.f32 %v2106_v60  ;;  %v2107_v50 = vmul.f32 0.5, %v1207_v38  ;;  %v1211_v59 = vadd.f32 %v1210_v17, %v13329_v55  ;;  %v2036_v17 = vadd.f32 0.5, %v2028_v34 }
 0x18f   : > { %v11703_v61 = vpop.eup %11702  ;;  %11722 = vtanh.f32 %v1209_v25  ;;  %9908 = vmatmul.mubr.msk.bf16.gmra.mrb[188].mxu1 %vm606_vm0, %v12667_v18  ;;  %v2035_v25 = vadd.f32 0.5, %v2027_v54 }
 0x190   : > { %v11705_v57 = vpop.eup %11704  ;;  %v2153_v40 = vmul.f32 %v11703_v61, %v2033_v58  ;;  %v2108_v15 = vmul.f32 0.5, %v1211_v59  ;;  %11724 = vtanh.f32 %v2016_v41  ;;  %1482 = vmatprep.mubr.bf16.mxu1 %v15815_v9 }
 0x191   : > { %v11707_v10 = vpop.eup %11706  ;;  %11726 = vtanh.f32 %v2056_v2  ;;  %v2069_v61 = vmul.f32 0.5, %v11705_v57 }
 0x192   : > { %v11709_v60 = vpop.eup %11708  ;;  %v13358_v38 = vadd.f32 %v2153_v40, %v2145_v43  ;;  %v2154_v24 = vmul.f32 %v11707_v10, %v2034_v62  ;;  %11728 = vtanh.f32 %v2107_v50  ;;  %v1214_v33 = vpop.f32.mrb[84].mxu1  ;;  %v2147_v50 = vmul.f32 0.0, %v2075_v32 }
 0x193   : > { %v11711_v23 = vpop.eup %11710  ;;  %11730 = vtanh.f32 %v2108_v15  ;;  %v1215_v58 = vadd.f32 %v1214_v33, %v13327_v16  ;;  %v1216_v44 = vpop.f32.mrb[85].mxu1  ;;  %v2029_v40 = vmul.f32 0.5, %v11701_v26  ;;  %v2148_v32 = vmul.f32 0.0, %v2076_v51 }
 0x194   : > { %v13361_v59 = vpop.eup %11712  ;;  %11732 = vtanh.f32 %v13358_v38  ;;  %v13364_v41 = vadd.f32 %v2154_v24, %v2146_v31  ;;  %v1217_v2 = vadd.f32 %v1216_v44, %v13329_v55  ;;  %v1218_v62 = vpop.f32.mrb[86].mxu1  ;;  %v2070_v49 = vmul.f32 0.5, %v11711_v23  ;;  %v12668_v24 = vld [vmem:[%s12759_s17 + $0xe8] sm:$0xff]  }
 0x195   : > { %v11715_v43 = vpop.eup %11714  ;;  %11734 = vtanh.f32 %v1215_v58  ;;  %v1219_v54 = vadd.f32 %v1218_v62, %v13327_v16  ;;  %v1220_v34 = vpop.f32.mrb[87].mxu1  ;;  %v2030_v58 = vmul.f32 0.5, %v11709_v60  ;;  %v2077_v46 = vadd.f32 0.5, %v2069_v61 }
 0x196   : > { %v11717_v18 = vpop.eup %11716  ;;  %11736 = vtanh.f32 %v13364_v41  ;;  %v2109_v15 = vmul.f32 0.5, %v1217_v2  ;;  %v1221_v31 = vadd.f32 %v1220_v34, %v13329_v55  ;;  %v2037_v34 = vadd.f32 0.5, %v2029_v40 }
 0x197   : > { %v11719_v10 = vpop.eup %11718  ;;  %11738 = vtanh.f32 %v1219_v54  ;;  %9909 = vmatmul.mubr.msk.bf16.gmra.mrb[192].mxu1 %vm606_vm0, %v12668_v24  ;;  %v2121_v47 = vmul.f32 0.5, %v11717_v18  ;;  %v2078_v24 = vadd.f32 0.5, %v2070_v49  ;;  %v2038_v61 = vadd.f32 0.5, %v2030_v58 }
 0x198   : > { %v11721_v33 = vpop.eup %11720  ;;  %v2155_v57 = vmul.f32 %v11719_v10, %v2035_v25  ;;  %v2110_v44 = vmul.f32 0.5, %v1221_v31  ;;  %1492 = vmatprep.mubr.bf16.mxu1 %v15815_v9  ;;  %11740 = vtanh.f32 %v2109_v15  ;;  %v2149_v15 = vmul.f32 0.0, %v2077_v46 }
 0x199   : > { %v11723_v62 = vpop.eup %11722  ;;  %v2122_v37 = vmul.f32 0.5, %v11721_v33 }
 0x19a   : > { %v11725_v26 = vpop.eup %11724  ;;  %v13373_v2 = vadd.f32 %v2155_v57, %v2147_v50  ;;  %v2156_v39 = vmul.f32 %v11723_v62, %v2036_v17  ;;  %v1224_v23 = vpop.f32.mrb[88].mxu1  ;;  %11742 = vtanh.f32 %v2110_v44  ;;  %v2129_v17 = vadd.f32 0.5, %v2121_v47 }
 0x19b   : > { %v11727_v54 = vpop.eup %11726  ;;  %v1225_v25 = vadd.f32 %v1224_v23, %v13327_v16  ;;  %v1226_v60 = vpop.f32.mrb[89].mxu1  ;;  %v2071_v57 = vmul.f32 0.5, %v11715_v43  ;;  %v2130_v62 = vadd.f32 0.5, %v2122_v37  ;;  %v2150_v23 = vmul.f32 0.0, %v2078_v24 }
 0x19c   : > { %v11729_v51 = vpop.eup %11728  ;;  %11744 = vtanh.f32 %v13373_v2  ;;  %v13377_v31 = vadd.f32 %v2156_v39, %v2148_v32  ;;  %v1227_v50 = vadd.f32 %v1226_v60, %v13329_v55  ;;  %v1228_v18 = vpop.f32.mrb[90].mxu1  ;;  %v12669_v60 = vld [vmem:[%s12759_s17 + $0xf0] sm:$0xff]   ;;  %v2072_v36 = vmul.f32 0.5, %v11727_v54 }
 0x19d   : > { %v11731_v40 = vpop.eup %11730  ;;  %11746 = vtanh.f32 %v1225_v25  ;;  %v1229_v10 = vadd.f32 %v1228_v18, %v13327_v16  ;;  %v1230_v49 = vpop.f32.mrb[91].mxu1  ;;  %v2031_v25 = vmul.f32 0.5, %v13361_v59  ;;  %v2032_v18 = vmul.f32 0.5, %v11725_v26 }
 0x19e   : > { %v11733_v33 = vpop.eup %11732  ;;  %11748 = vtanh.f32 %v13377_v31  ;;  %v2111_v44 = vmul.f32 0.5, %v1227_v50  ;;  %v1231_v39 = vadd.f32 %v1230_v49, %v13329_v55  ;;  %v2123_v35 = vmul.f32 0.5, %v11729_v51 }
 0x19f   : > { %v11735_v32 = vpop.eup %11734  ;;  %v2177_v58 = vmul.f32 %v11733_v33, %v2129_v17  ;;  %11750 = vtanh.f32 %v1229_v10  ;;  %9910 = vmatmul.mubr.msk.bf16.gmra.mrb[196].mxu1 %vm606_vm0, %v12669_v60  ;;  %v2079_v24 = vadd.f32 0.5, %v2071_v57  ;;  %v2039_v26 = vadd.f32 0.5, %v2031_v25 }
 0x1a0   : > { %v11737_v46 = vpop.eup %11736  ;;  %v2157_v47 = vmul.f32 %v11735_v32, %v2037_v34  ;;  %1502 = vmatprep.mubr.bf16.mxu1 %v15815_v9  ;;  %11752 = vtanh.f32 %v2111_v44  ;;  %v2112_v49 = vmul.f32 0.5, %v1231_v39  ;;  %v2124_v34 = vmul.f32 0.5, %v11731_v40  ;;  %v12670_v40 = vld [vmem:[%s12759_s17 + $0xf8] sm:$0xff]  }
 0x1a1   : > { %v11739_v43 = vpop.eup %11738  ;;  %v2178_v50 = vmul.f32 %v11737_v46, %v2130_v62  ;;  %11754 = vtanh.f32 %v2177_v58  ;;  %v2080_v33 = vadd.f32 0.5, %v2072_v36  ;;  %v2131_v44 = vadd.f32 0.5, %v2123_v35 }
 0x1a2   : > { %v13387_v37 = vadd.f32 %v2157_v47, %v2149_v15  ;;  %v2158_v17 = vmul.f32 %v11739_v43, %v2038_v61  ;;  %v11741_v59 = vpop.eup %11740  ;;  %v2151_v15 = vmul.f32 0.0, %v2079_v24  ;;  %v2040_v61 = vadd.f32 0.5, %v2032_v18 }
 0x1a3   : > { %11756 = vtanh.f32 %v2178_v50  ;;  %v13389_v10 = vpack.c.bf16 %v2178_v50, %v2177_v58  ;;  %v2132_v58 = vadd.f32 0.5, %v2124_v34  ;;  %v2152_v60 = vmul.f32 0.0, %v2080_v33 }
 0x1a4   : > { %11758 = vtanh.f32 %v13387_v37  ;;  %v13392_v54 = vadd.f32 %v2158_v17, %v2150_v23  ;;  %v11743_v51 = vpop.eup %11742  ;;  %v2125_v35 = vmul.f32 0.5, %v11741_v59 }
 0x1a5   : > { %11760 = vtanh.f32 %v2112_v49  ;;  %v2126_v43 = vmul.f32 0.5, %v11743_v51 }
 0x1a6   : > { %v11745_v39 = vpop.eup %11744  ;;  %11762 = vtanh.f32 %v13392_v54  ;;  %v2133_v34 = vadd.f32 0.5, %v2125_v35  ;;  %v13419_v35 = vld [vmem:[%s15696_s2 + $0x24] ss:$16 sps:$4 sm:$0xff]  }
 0x1a7   : > { %v11747_v57 = vpop.eup %11746  ;;  %v2179_v32 = vmul.f32 %v11745_v39, %v2131_v44  ;;  %9911 = vmatmul.mubr.msk.bf16.gmra.mrb[200].mxu1 %vm606_vm0, %v12670_v40  ;;  %v2134_v39 = vadd.f32 0.5, %v2126_v43  ;;  %v12672_v43 = vld [vmem:[%s12759_s17 + $0x108] sm:$0xff]  }
 0x1a8   : > { %v11749_v62 = vpop.eup %11748  ;;  %v2159_v46 = vmul.f32 %v11747_v57, %v2039_v26  ;;  %1512 = vmatprep.mubr.bf16.mxu1 %v15815_v9 }
 0x1a9   : > { %v11751_v36 = vpop.eup %11750  ;;  %v2180_v23 = vmul.f32 %v11749_v62, %v2132_v58  ;;  %11764 = vtanh.f32 %v2179_v32 }
 0x1aa   : > { %v13398_v47 = vadd.f32 %v2159_v46, %v2151_v15  ;;  %v2160_v25 = vmul.f32 %v11751_v36, %v2040_v61  ;;  %v11753_v18 = vpop.eup %11752  ;;  %v12671_v15 = vld [vmem:[%s12759_s17 + $0x100] sm:$0xff]  }
 0x1ab   : > { %11766 = vtanh.f32 %v2180_v23  ;;  %v13400_v50 = vpack.c.bf16 %v2180_v23, %v2179_v32  ;;  %v11755_v49 = vpop.eup %11754  ;;  %v2127_v57 = vmul.f32 0.5, %v11753_v18  ;;  %v13414_v46 = vld [vmem:[%s15696_s2] ss:$16 sps:$4 sm:$0xff]  }
 0x1ac   : > { %11768 = vtanh.f32 %v13398_v47  ;;  %v13403_v24 = vadd.f32 %v2160_v25, %v2152_v60 }
 0x1ad   : > { %v11757_v17 = vpop.eup %11756  ;;  %v2135_v60 = vadd.f32 0.5, %v2127_v57  ;;  %v13457_v57 = vld [vmem:[%s15696_s2 + $0x60] ss:$16 sps:$4 sm:$0xff]  }
 0x1ae   : > { %v11759_v26 = vpop.eup %11758  ;;  %11770 = vtanh.f32 %v13403_v24  ;;  %v2217_v59 = vpack.c.bf16 %v11757_v17, %v11755_v49 }
 0x1af   : > { %v11761_v33 = vpop.eup %11760  ;;  %v2181_v44 = vmul.f32 %v11759_v26, %v2133_v34  ;;  %9912 = vmatmul.mubr.msk.bf16.gmra.mrb[204].mxu1 %vm606_vm0, %v12671_v15  ;;  %v13428_v34 = vld [vmem:[%s15696_s2 + $0x20] ss:$16 sps:$4 sm:$0xff]   ;;  %v13434_v26 = vld [vmem:[%s15696_s2 + $0x44] ss:$16 sps:$4 sm:$0xff]  }
 0x1b0   : > { %v11763_v51 = vpop.eup %11762  ;;  %10427 = vmatprep.mubr.bf16.mxu0 %v2217_v59  ;;  %1522 = vmatprep.mubr.bf16.mxu1 %v15815_v9  ;;  %v2128_v32 = vmul.f32 0.5, %v11761_v33 }
 0x1b1   : > { %v2182_v61 = vmul.f32 %v11763_v51, %v2134_v39  ;;  %11772 = vtanh.f32 %v2181_v44  ;;  %v13442_v39 = vld [vmem:[%s15696_s2 + $0x40] ss:$16 sps:$4 sm:$0xff]   ;;  %v13448_v51 = vld [vmem:[%s15696_s2 + $0x64] ss:$16 sps:$4 sm:$0xff]  }
 0x1b2   : > { %v2136_v18 = vadd.f32 0.5, %v2128_v32  ;;  %v13463_v32 = vld [vmem:[%s15696_s2 + $0x84] ss:$16 sps:$4 sm:$0xff]  }
 0x1b3   : > { %11774 = vtanh.f32 %v2182_v61  ;;  %v13409_v58 = vpack.c.bf16 %v2182_v61, %v2181_v44  ;;  %v11765_v40 = vpop.eup %11764  ;;  %v12673_v61 = vld [vmem:[%s12759_s17 + $0x110] sm:$0xff]  }
 0x1b5   : > { %v11767_v62 = vpop.eup %11766 }
 0x1b6   : > { %v11769_v36 = vpop.eup %11768  ;;  %v2218_v23 = vpack.c.bf16 %v11767_v62, %v11765_v40 }
 0x1b7   : > { %v2183_v25 = vmul.f32 %v11769_v36, %v2135_v60  ;;  %9913 = vmatmul.mubr.msk.bf16.gmra.mrb[208].mxu1 %vm606_vm0, %v12672_v43  ;;  %v13469_v60 = vld [vmem:[%s15696_s2 + $0x80] ss:$16 sps:$4 sm:$0xff]   ;;  %v13491_v43 = vld [vmem:[%s15696_s2 + $0xc4] ss:$16 sps:$4 sm:$0xff]  }
 0x1b8   : > { %v11771_v49 = vpop.eup %11770  ;;  %10428 = vmatmul.mubr.bf16.vlgmr.msra.gmra.mrb[84].mxu0 %v2218_v23  ;;  %1532 = vmatprep.mubr.bf16.mxu1 %v15815_v9  ;;  %v13475_v23 = vld [vmem:[%s15696_s2 + $0xa4] ss:$16 sps:$4 sm:$0xff]   ;;  %15824 = vst [vmem:[#allocation85_spill] sm:$0xff] %v13491_v43 }
 0x1b9   : > { %v2184_v17 = vmul.f32 %v11771_v49, %v2136_v18  ;;  %2603 = vmatpush1.bf16.msra.mxu0 %v13414_v46  ;;  %11776 = vtanh.f32 %v2183_v25  ;;  %v13484_v18 = vld [vmem:[%s15696_s2 + $0xa0] ss:$16 sps:$4 sm:$0xff]  }
 0x1ba   : > { %2604 = vmatprep.subr.bf16.mxu0 %v13419_v35  ;;  %v13497_v49 = vld [vmem:[%s15696_s2 + $0xc0] ss:$16 sps:$4 sm:$0xff]  }
 0x1bb   : > { %11778 = vtanh.f32 %v2184_v17  ;;  %v13436_v59 = vpack.c.bf16 %v2184_v17, %v2183_v25  ;;  %v11773_v33 = vpop.eup %11772  ;;  %v12674_v25 = vld [vmem:[%s12759_s17 + $0x118] sm:$0xff]   ;;  %15825 = vst [vmem:[#allocation86_spill] sm:$0xff] %v13497_v49  ;;  %v13503_v17 = vld [vmem:[%s15696_s2 + $0xe4] ss:$16 sps:$4 sm:$0xff]  }
 0x1bc   : > { %15826 = vst [vmem:[#allocation87_spill] sm:$0xff] %v13503_v17 }
 0x1bd   : > { %v11775_v44 = vpop.eup %11774  ;;  %2605 = vmatpush1.bf16.msra.mxu0 %v13428_v34 }
 0x1be   : > { %2606 = vmatprep.subr.bf16.mxu0 %v13434_v26  ;;  %v2219_v15 = vpack.c.bf16 %v11775_v44, %v11773_v33  ;;  %v12675_v33 = vld [vmem:[%s12759_s17 + $0x120] sm:$0xff]  }
 0x1bf   : > { %9914 = vmatmul.mubr.msk.bf16.gmra.mrb[212].mxu1 %vm606_vm0, %v12673_v61  ;;  %v13512_v44 = vld [vmem:[%s15696_s2 + $0xe0] ss:$16 sps:$4 sm:$0xff]  }
 0x1c0   : > { %10431 = vmatprep.mubr.bf16.mxu0 %v2219_v15  ;;  %1542 = vmatprep.mubr.bf16.mxu1 %v15815_v9  ;;  %15827 = vst [vmem:[#allocation88_spill] sm:$0xff] %v13512_v44  ;;  %v12676_v15 = vld [vmem:[%s12759_s17 + $0x128] sm:$0xff]   ;;  %v12677_v61 = vld [vmem:[%s12759_s17 + $0x130] sm:$0xff]  }
 0x1c1   : > { %2607 = vmatpush1.bf16.msra.mxu0 %v13442_v39 }
 0x1c2   : > { %2608 = vmatprep.subr.bf16.mxu0 %v13448_v51 }
 0x1c3   : > { %v11777_v40 = vpop.eup %11776 }
 0x1c5   : > { %v11779_v62 = vpop.eup %11778  ;;  %2609 = vmatpush1.bf16.msra.mxu0 %v13457_v57 }
 0x1c6   : > { %2610 = vmatprep.subr.bf16.mxu0 %v13463_v32  ;;  %v2220_v36 = vpack.c.bf16 %v11779_v62, %v11777_v40  ;;  %v12678_v40 = vld [vmem:[%s12759_s17 + $0x138] sm:$0xff]  }
 0x1c7   : > { %9915 = vmatmul.mubr.msk.bf16.gmra.mrb[216].mxu1 %vm606_vm0, %v12674_v25  ;;  %v13546_v62 = vld [vmem:[%s15696_s2 + $0x8] ss:$16 sps:$4 sm:$0xff]   ;;  %v13576_v25 = vld [vmem:[%s15696_s2 + $0x6c] ss:$16 sps:$4 sm:$0xff]  }
 0x1c8   : > { %10432 = vmatmul.mubr.bf16.gmra.mrb[88].mxu0 %v2220_v36  ;;  %1552 = vmatprep.mubr.bf16.mxu1 %v15815_v9  ;;  %v13569_v36 = vld [vmem:[%s15696_s2 + $0x48] ss:$16 sps:$4 sm:$0xff]  }
 0x1c9   : > { %2611 = vmatpush1.bf16.msra.mxu0 %v13469_v60  ;;  %2634 = vmatprep.mubr.bf16.mxu0 %v15815_v9 }
 0x1ca   : > { %2612 = vmatprep.subr.bf16.mxu0 %v13475_v23 }
 0x1cd   : > { %2613 = vmatpush1.bf16.msra.mxu0 %v13484_v18 }
 0x1ce   : > { %2614 = vmatprep.subr.bf16.mxu0 %v13491_v43 }
 0x1cf   : > { %9916 = vmatmul.mubr.msk.bf16.gmra.mrb[220].mxu1 %vm606_vm0, %v12675_v33  ;;  %v13581_v33 = vld [vmem:[%s15696_s2 + $0x68] ss:$16 sps:$4 sm:$0xff]  }
 0x1d0   : > { %1562 = vmatprep.mubr.bf16.mxu1 %v15815_v9 }
 0x1d1   : > { %2615 = vmatpush1.bf16.msra.mxu0 %v13497_v49 }
 0x1d2   : > { %2616 = vmatprep.subr.bf16.mxu0 %v13503_v17 }
 0x1d5   : > { %2617 = vmatpush1.bf16.msra.mxu0 %v13512_v44 }
 0x1d7   : > { %9917 = vmatmul.mubr.msk.bf16.gmra.mrb[224].mxu1 %vm606_vm0, %v12676_v15  ;;  %v13588_v15 = vld [vmem:[%s15696_s2 + $0x8c] ss:$16 sps:$4 sm:$0xff]  }
 0x1d8   : > { %2635 = vmatmul.mubr.bf16.vlgmr.msra.gmra.mrb[16].mxu0 %v13389_v10  ;;  %1572 = vmatprep.mubr.bf16.mxu1 %v15815_v9 }
 0x1d9   : > { %2644 = vmatprep.mubr.bf16.mxu0 %v15815_v9 }
 0x1df   : > { %9918 = vmatmul.mubr.msk.bf16.gmra.mrb[228].mxu1 %vm606_vm0, %v12677_v61  ;;  %v13593_v61 = vld [vmem:[%s15696_s2 + $0x88] ss:$16 sps:$4 sm:$0xff]  }
 0x1e0   : > { %2645 = vmatmul.mubr.bf16.gmra.mrb[20].mxu0 %v13400_v50  ;;  %1582 = vmatprep.mubr.bf16.mxu1 %v15815_v9 }
 0x1e1   : > { %2654 = vmatprep.mubr.bf16.mxu0 %v15815_v9 }
 0x1e7   : > { %9919 = vmatmul.mubr.msk.bf16.gmra.mrb[232].mxu1 %vm606_vm0, %v12678_v40  ;;  %v11435_v40 = vld [vmem:[%s15698_s4 + $0x40] sm:$0xff]  }
 0x1e8   : > { %2655 = vmatmul.mubr.bf16.gmra.mrb[24].mxu0 %v13409_v58  ;;  %2707 = vmatprep.mubr.bf16.mxu1 %v15815_v9 }
 0x1e9   : > { %2664 = vmatprep.mubr.bf16.mxu0 %v15815_v9  ;;  %10435 = vmatprep.subr.bf16.mxu0 %v11435_v40 }
 0x1ea   : > { %10436 = vmatpush3.bf16.msra.mxu0 %v11435_v40  ;;  %v11440_v40 = vld [vmem:[%s15698_s4 + $0x50] sm:$0xff]  }
 0x1eb   : > { %10437 = vmatprep.subr.bf16.mxu0 %v11439_v28 }
 0x1ee   : > { %10438 = vmatpush3.bf16.msra.mxu0 %v11439_v28  ;;  %v11442_v28 = vld [vmem:[%s15698_s4 + $0x60] sm:$0xff]  }
 0x1ef   : > { %2708 = vmatmul.mubr.bf16.vlgmr.msra.gmra.mrb[92].mxu1 %v13389_v10  ;;  %v11422_v10 = vld [vmem:[%s15696_s2 + $0xc] ss:$16 sps:$4 sm:$0xff]   ;;  %10439 = vmatprep.subr.bf16.mxu0 %v11440_v40 }
 0x1f0   : > { %2665 = vmatmul.mubr.bf16.gmra.mrb[28].mxu0 %v13436_v59  ;;  %2717 = vmatprep.mubr.bf16.mxu1 %v15815_v9 }
 0x1f1   : > { %3486 = vmatprep.subr.bf16.mxu1 %v11422_v10 }
 0x1f2   : > { %3487 = vmatpush1.bf16.msra.mxu1 %v13546_v62  ;;  %10440 = vmatpush3.bf16.msra.mxu0 %v11440_v40 }
 0x1f3   : > { %10441 = vmatprep.subr.bf16.mxu0 %v11441_v27 }
 0x1f6   : > { %10442 = vmatpush3.bf16.msra.mxu0 %v11441_v27  ;;  %v11445_v27 = vld [vmem:[%s15698_s4 + $0x78] sm:$0xff]  }
 0x1f7   : > { %2718 = vmatmul.mubr.bf16.gmra.mrb[96].mxu1 %v13400_v50  ;;  %v13552_v50 = vld [vmem:[%s15696_s2 + $0x2c] ss:$16 sps:$4 sm:$0xff]   ;;  %10443 = vmatprep.subr.bf16.mxu0 %v11442_v28 }
 0x1f8   : > { %2727 = vmatprep.mubr.bf16.mxu1 %v15815_v9  ;;  %3488 = vmatprep.subr.bf16.mxu1 %v13552_v50 }
 0x1fa   : > { %10444 = vmatpush3.bf16.msra.mxu0 %v11442_v28 }
 0x1ff   : > { %2728 = vmatmul.mubr.bf16.gmra.mrb[100].mxu1 %v13409_v58  ;;  %v13557_v58 = vld [vmem:[%s15696_s2 + $0x28] ss:$16 sps:$4 sm:$0xff]  }
 0x200   : > { %2737 = vmatprep.mubr.bf16.mxu1 %v15815_v9  ;;  %3489 = vmatpush1.bf16.msra.mxu1 %v13557_v58 }
 0x207   : > { %2738 = vmatmul.mubr.bf16.gmra.mrb[104].mxu1 %v13436_v59  ;;  %v13564_v59 = vld [vmem:[%s15696_s2 + $0x4c] ss:$16 sps:$4 sm:$0xff]  }
 0x208   : > { %3518 = vmatprep.mubr.bf16.mxu1 %v15815_v9  ;;  %3490 = vmatprep.subr.bf16.mxu1 %v13564_v59 }
 0x209   : > { %3491 = vmatpush1.bf16.msra.mxu1 %v13569_v36 }
 0x20a   : > { %3492 = vmatprep.subr.bf16.mxu1 %v13576_v25 }
 0x20d   : > { %3493 = vmatpush1.bf16.msra.mxu1 %v13581_v33 }
 0x20e   : > { %3494 = vmatprep.subr.bf16.mxu1 %v13588_v15 }
 0x211   : > { %3495 = vmatpush1.bf16.msra.mxu1 %v13593_v61 }
 0x212   : > { %3496 = vmatprep.subr.bf16.mxu1 %v13603_v30 }
 0x215   : > { %3497 = vmatpush1.bf16.msra.mxu1 %v13608_v29 }
 0x216   : > { %3498 = vmatprep.subr.bf16.mxu1 %v13190_v52  ;;  %v11443_v52 = vld [vmem:[%s15698_s4 + $0x68] sm:$0xff]  }
 0x217   : > { %10445 = vmatprep.subr.bf16.mxu0 %v11443_v52 }
 0x218   : > { %10446 = vmatpush3.bf16.msra.mxu0 %v11443_v52 }
 0x219   : > { %3499 = vmatpush1.bf16.msra.mxu1 %v13185_v45  ;;  %v11444_v45 = vld [vmem:[%s15698_s4 + $0x70] sm:$0xff]  }
 0x21a   : > { %3500 = vmatprep.subr.bf16.mxu1 %v13219_v56  ;;  %10447 = vmatprep.subr.bf16.mxu0 %v11444_v45 }
 0x21c   : > { %10448 = vmatpush3.bf16.msra.mxu0 %v11444_v45 }
 0x21d   : > { %3501 = vmatpush1.bf16.msra.mxu1 %v13214_v53  ;;  %10449 = vmatprep.subr.bf16.mxu0 %v11445_v27 }
 0x21e   : > { %4297 = vmatprep.subr.bf16.mxu1 %v11422_v10 }
 0x220   : > { %10450 = vmatpush3.bf16.msra.mxu0 %v11445_v27 }
 0x221   : > { %3413 = vmatprep.subr.bf16.mxu0 %v13172_v48 }
 0x2ab   : > { %v2636_v53 = vpop.f32.mrb[16].mxu0 }
 0x2ac   : > { %v2638_v56 = vpop.f32.mrb[17].mxu0  ;;  %v10655_v21 = vadd.f32 %v2636_v53, %v13279_v8 }
 0x2ad   : > { %v2640_v10 = vpop.f32.mrb[18].mxu0  ;;  %v10656_v28 = vadd.f32 %v2638_v56, %v13281_v42 }
 0x2ae   : > { %v2642_v40 = vpop.f32.mrb[19].mxu0  ;;  %v10657_v14 = vadd.f32 %v2640_v10, %v13279_v8  ;;  %v2820_v13 = vmul.f32 0.5, %v10655_v21 }
 0x2af   : > { %v2860_v45 = vmul.f32 0.5, %v10656_v28  ;;  %v10658_v27 = vadd.f32 %v2642_v40, %v13281_v42 }
 0x2b0   : > { %v2821_v7 = vmul.f32 0.5, %v10657_v14 }
 0x2b1   : > { %11780 = vtanh.f32 %v2860_v45  ;;  %v2861_v53 = vmul.f32 0.5, %v10658_v27 }
 0x2b2   : > { %11782 = vtanh.f32 %v2820_v13 }
 0x2b3   : > { %v2646_v52 = vpop.f32.mrb[20].mxu0  ;;  %11784 = vtanh.f32 %v2821_v7 }
 0x2b4   : > { %v2648_v22 = vpop.f32.mrb[21].mxu0  ;;  %v10659_v48 = vadd.f32 %v2646_v52, %v13279_v8  ;;  %11786 = vtanh.f32 %v2861_v53 }
 0x2b5   : > { %v2650_v20 = vpop.f32.mrb[22].mxu0  ;;  %v10660_v12 = vadd.f32 %v2648_v22, %v13281_v42 }
 0x2b6   : > { %v2652_v19 = vpop.f32.mrb[23].mxu0  ;;  %v2822_v28 = vmul.f32 0.5, %v10659_v48  ;;  %v10661_v4 = vadd.f32 %v2650_v20, %v13279_v8 }
 0x2b7   : > { %v10662_v56 = vadd.f32 %v2652_v19, %v13281_v42  ;;  %v2862_v21 = vmul.f32 0.5, %v10660_v12 }
 0x2b8   : > { %11788 = vtanh.f32 %v2822_v28  ;;  %v2823_v19 = vmul.f32 0.5, %v10661_v4 }
 0x2b9   : > { %v2863_v45 = vmul.f32 0.5, %v10662_v56  ;;  %11790 = vtanh.f32 %v2862_v21 }
 0x2bb   : > { %v2656_v11 = vpop.f32.mrb[24].mxu0  ;;  %v11781_v3 = vpop.eup %11780  ;;  %11792 = vtanh.f32 %v2863_v45 }
 0x2bc   : > { %v2658_v6 = vpop.f32.mrb[25].mxu0  ;;  %v10663_v40 = vadd.f32 %v2656_v11, %v13279_v8  ;;  %v2876_v1 = vmul.f32 0.5, %v11781_v3 }
 0x2bd   : > { %v2660_v5 = vpop.f32.mrb[26].mxu0  ;;  %v10664_v52 = vadd.f32 %v2658_v6, %v13281_v42 }
 0x2be   : > { %v2662_v10 = vpop.f32.mrb[27].mxu0  ;;  %v10665_v14 = vadd.f32 %v2660_v5, %v13279_v8  ;;  %v2824_v27 = vmul.f32 0.5, %v10663_v40  ;;  %v2884_v63 = vadd.f32 0.5, %v2876_v1 }
 0x2bf   : > { %v10666_v13 = vadd.f32 %v2662_v10, %v13281_v42  ;;  %v2864_v7 = vmul.f32 0.5, %v10664_v52 }
 0x2c0   : > { %v2825_v53 = vmul.f32 0.5, %v10665_v14 }
 0x2c1   : > { %v2865_v10 = vmul.f32 0.5, %v10666_v13 }
 0x2c2   : > { %v2709_v22 = vpop.f32.mrb[92].mxu1 }
 0x2c3   : > { %v2666_v48 = vpop.f32.mrb[28].mxu0  ;;  %v10875_v20 = vadd.f32 %v2709_v22, %v13327_v16  ;;  %v2711_v12 = vpop.f32.mrb[93].mxu1 }
 0x2c4   : > { %v10667_v11 = vadd.f32 %v2666_v48, %v13279_v8  ;;  %v2668_v6 = vpop.f32.mrb[29].mxu0  ;;  %v2713_v56 = vpop.f32.mrb[94].mxu1  ;;  %v10876_v21 = vadd.f32 %v2711_v12, %v13329_v55 }
 0x2c5   : > { %11794 = vtanh.f32 %v10875_v20  ;;  %v10668_v4 = vadd.f32 %v2668_v6, %v13281_v42  ;;  %v2670_v5 = vpop.f32.mrb[30].mxu0  ;;  %v2715_v28 = vpop.f32.mrb[95].mxu1  ;;  %v10877_v48 = vadd.f32 %v2713_v56, %v13327_v16 }
 0x2c6   : > { %11796 = vtanh.f32 %v2823_v19  ;;  %v2672_v40 = vpop.f32.mrb[31].mxu0  ;;  %v11783_v22 = vpop.eup %11782  ;;  %v2826_v45 = vmul.f32 0.5, %v10667_v11  ;;  %v10669_v52 = vadd.f32 %v2670_v5, %v13279_v8  ;;  %v2916_v0 = vmul.f32 0.5, %v10876_v21 }
 0x2c7   : > { %11798 = vtanh.f32 %v2824_v27  ;;  %v2866_v14 = vmul.f32 0.5, %v10668_v4  ;;  %v11785_v20 = vpop.eup %11784  ;;  %v2836_v6 = vmul.f32 0.5, %v11783_v22  ;;  %v10670_v19 = vadd.f32 %v2672_v40, %v13281_v42 }
 0x2c8   : > { %11800 = vtanh.f32 %v2864_v7  ;;  %v11787_v12 = vpop.eup %11786  ;;  %v10878_v3 = vadd.f32 %v2715_v28, %v13329_v55  ;;  %v2827_v5 = vmul.f32 0.5, %v10669_v52  ;;  %v2837_v1 = vmul.f32 0.5, %v11785_v20 }
 0x2c9   : > { %11802 = vtanh.f32 %v2825_v53  ;;  %v11789_v11 = vpop.eup %11788  ;;  %v2844_v22 = vadd.f32 0.5, %v2836_v6  ;;  %v2877_v42 = vmul.f32 0.5, %v11787_v12 }
 0x2ca   : > { %11804 = vtanh.f32 %v2865_v10  ;;  %v2719_v13 = vpop.f32.mrb[96].mxu1  ;;  %v11791_v4 = vpop.eup %11790  ;;  %v2917_v8 = vmul.f32 0.5, %v10878_v3 }
 0x2cb   : > { %11806 = vtanh.f32 %v2826_v45  ;;  %v10879_v27 = vadd.f32 %v2719_v13, %v13327_v16  ;;  %v2721_v7 = vpop.f32.mrb[97].mxu1  ;;  %v11793_v40 = vpop.eup %11792  ;;  %v2867_v45 = vmul.f32 0.5, %v10670_v19  ;;  %v2956_v13 = vmul.f32 %v2884_v63, %v13358_v38 }
 0x2cc   : > { %11808 = vtanh.f32 %v10877_v48  ;;  %v10880_v56 = vadd.f32 %v2721_v7, %v13329_v55  ;;  %v2723_v53 = vpop.f32.mrb[98].mxu1  ;;  %v2879_v6 = vmul.f32 0.5, %v11793_v40  ;;  %v2845_v63 = vadd.f32 0.5, %v2837_v1 }
 0x2cd   : > { %11810 = vtanh.f32 %v2866_v14  ;;  %v10881_v10 = vadd.f32 %v2723_v53, %v13327_v16  ;;  %v2725_v21 = vpop.f32.mrb[99].mxu1  ;;  %v2878_v53 = vmul.f32 0.5, %v11791_v4  ;;  %v2885_v38 = vadd.f32 0.5, %v2877_v42 }
 0x2ce   : > { %11812 = vtanh.f32 %v2916_v0  ;;  %v2918_v7 = vmul.f32 0.5, %v10880_v56  ;;  %v10882_v14 = vadd.f32 %v2725_v21, %v13329_v55 }
 0x2cf   : > { %v11795_v28 = vpop.eup %11794  ;;  %11814 = vtanh.f32 %v10879_v27  ;;  %v2886_v40 = vadd.f32 0.5, %v2878_v53 }
 0x2d0   : > { %v11797_v52 = vpop.eup %11796  ;;  %v2964_v48 = vmul.f32 %v11795_v28, %v2844_v22  ;;  %11816 = vtanh.f32 %v2827_v5  ;;  %v2838_v5 = vmul.f32 0.5, %v11789_v11  ;;  %v2919_v56 = vmul.f32 0.5, %v10882_v14 }
 0x2d1   : > { %v11799_v44 = vpop.eup %11798  ;;  %11818 = vtanh.f32 %v10881_v10  ;;  %v2839_v22 = vmul.f32 0.5, %v11797_v52 }
 0x2d2   : > { %v11801_v17 = vpop.eup %11800  ;;  %v13663_v20 = vadd.f32 %v2964_v48, %v2956_v13  ;;  %11820 = vtanh.f32 %v2867_v45  ;;  %v2729_v0 = vpop.f32.mrb[100].mxu1  ;;  %v2957_v48 = vmul.f32 %v2885_v38, %v13364_v41  ;;  %v2846_v53 = vadd.f32 0.5, %v2838_v5 }
 0x2d3   : > { %v11803_v19 = vpop.eup %11802  ;;  %11822 = vtanh.f32 %v2917_v8  ;;  %v10883_v12 = vadd.f32 %v2729_v0, %v13327_v16  ;;  %v2731_v3 = vpop.f32.mrb[101].mxu1  ;;  %v2887_v8 = vadd.f32 0.5, %v2879_v6  ;;  %v2840_v49 = vmul.f32 0.5, %v11799_v44 }
 0x2d4   : > { %15828 = vst [vmem:[#allocation89_spill] sm:$0xff] %v13663_v20  ;;  %v11805_v27 = vpop.eup %11804  ;;  %11824 = vtanh.f32 %v2918_v7  ;;  %v10884_v4 = vadd.f32 %v2731_v3, %v13329_v55  ;;  %v2733_v10 = vpop.f32.mrb[102].mxu1  ;;  %v2880_v7 = vmul.f32 0.5, %v11801_v17  ;;  %v2958_v3 = vmul.f32 %v2886_v40, %v13373_v2 }
 0x2d5   : > { %v13667_v21 = vpop.eup %11806  ;;  %11826 = vtanh.f32 %v10883_v12  ;;  %v10885_v45 = vadd.f32 %v2733_v10, %v13327_v16  ;;  %v2735_v1 = vpop.f32.mrb[103].mxu1  ;;  %v2881_v52 = vmul.f32 0.5, %v11805_v27  ;;  %v2847_v10 = vadd.f32 0.5, %v2839_v22 }
 0x2d6   : > { %v11809_v42 = vpop.eup %11808  ;;  %11828 = vtanh.f32 %v13663_v20  ;;  %v2920_v28 = vmul.f32 0.5, %v10884_v4  ;;  %v10886_v11 = vadd.f32 %v2735_v1, %v13329_v55  ;;  %v2959_v1 = vmul.f32 %v2887_v8, %v13377_v31 }
 0x2d7   : > { %v11811_v13 = vpop.eup %11810  ;;  %v2965_v14 = vmul.f32 %v11809_v42, %v2845_v63  ;;  %11830 = vtanh.f32 %v10885_v45  ;;  %v2888_v63 = vadd.f32 0.5, %v2880_v7  ;;  %v2841_v38 = vmul.f32 0.5, %v11803_v19 }
 0x2d8   : > { %v11813_v0 = vpop.eup %11812  ;;  %11832 = vtanh.f32 %v2919_v56  ;;  %v2921_v20 = vmul.f32 0.5, %v10886_v11  ;;  %v2889_v56 = vadd.f32 0.5, %v2881_v52  ;;  %v2848_v11 = vadd.f32 0.5, %v2840_v49 }
 0x2d9   : > { %v11815_v12 = vpop.eup %11814  ;;  %v13674_v6 = vadd.f32 %v2965_v14, %v2957_v48  ;;  %11834 = vtanh.f32 %v2920_v28  ;;  %v2932_v44 = vmul.f32 0.5, %v11813_v0  ;;  %v2849_v14 = vadd.f32 0.5, %v2841_v38 }
 0x2da   : > { %v11817_v4 = vpop.eup %11816  ;;  %v2966_v43 = vmul.f32 %v11815_v12, %v2846_v53  ;;  %v2739_v41 = vpop.f32.mrb[104].mxu1  ;;  %v2960_v52 = vmul.f32 %v2888_v63, %v13387_v37  ;;  %v2961_v49 = vmul.f32 %v2889_v56, %v13392_v54 }
 0x2db   : > { %v11819_v17 = vpop.eup %11818  ;;  %11836 = vtanh.f32 %v13674_v6  ;;  %v10887_v27 = vadd.f32 %v2739_v41, %v13327_v16  ;;  %v2741_v5 = vpop.f32.mrb[105].mxu1  ;;  %v2940_v41 = vadd.f32 0.5, %v2932_v44  ;;  %v2843_v63 = vmul.f32 0.5, %v11817_v4 }
 0x2dc   : > { %v11821_v2 = vpop.eup %11820  ;;  %v13679_v40 = vadd.f32 %v2966_v43, %v2958_v3  ;;  %v2967_v22 = vmul.f32 %v11819_v17, %v2847_v10  ;;  %11838 = vtanh.f32 %v2921_v20  ;;  %v2743_v45 = vpop.f32.mrb[106].mxu1  ;;  %v10888_v42 = vadd.f32 %v2741_v5, %v13329_v55 }
 0x2dd   : > { %v11823_v31 = vpop.eup %11822  ;;  %11840 = vtanh.f32 %v10887_v27  ;;  %v10889_v8 = vadd.f32 %v2743_v45, %v13327_v16  ;;  %v2745_v19 = vpop.f32.mrb[107].mxu1  ;;  %v2882_v20 = vmul.f32 0.5, %v11811_v13  ;;  %v2842_v27 = vmul.f32 0.5, %v13667_v21 }
 0x2de   : > { %v11825_v28 = vpop.eup %11824  ;;  %11842 = vtanh.f32 %v13679_v40  ;;  %v13684_v48 = vadd.f32 %v2967_v22, %v2959_v1  ;;  %v10890_v43 = vadd.f32 %v2745_v19, %v13329_v55  ;;  %v2922_v53 = vmul.f32 0.5, %v10888_v42 }
 0x2df   : > { %v11827_v7 = vpop.eup %11826  ;;  %11844 = vtanh.f32 %v10889_v8  ;;  %v2933_v12 = vmul.f32 0.5, %v11823_v31  ;;  %v2883_v5 = vmul.f32 0.5, %v11821_v2  ;;  %v2890_v22 = vadd.f32 0.5, %v2882_v20 }
 0x2e0   : > { %v11829_v0 = vpop.eup %11828  ;;  %11846 = vtanh.f32 %v13684_v48  ;;  %v2968_v3 = vmul.f32 %v11827_v7, %v2848_v11  ;;  %v2923_v1 = vmul.f32 0.5, %v10890_v43  ;;  %v2934_v42 = vmul.f32 0.5, %v11825_v28 }
 0x2e1   : > { %v11831_v10 = vpop.eup %11830  ;;  %v2988_v45 = vmul.f32 %v11829_v0, %v2940_v41  ;;  %11848 = vtanh.f32 %v2922_v53  ;;  %v2941_v31 = vadd.f32 0.5, %v2933_v12  ;;  %v2850_v21 = vadd.f32 0.5, %v2842_v27 }
 0x2e2   : > { %v11833_v17 = vpop.eup %11832  ;;  %v13691_v38 = vadd.f32 %v2968_v3, %v2960_v52  ;;  %v2969_v13 = vmul.f32 %v11831_v10, %v2849_v14  ;;  %v2891_v2 = vadd.f32 0.5, %v2883_v5  ;;  %v2962_v28 = vmul.f32 %v2890_v22, %v13398_v47 }
 0x2e3   : > { %v11835_v37 = vpop.eup %11834  ;;  %v2935_v56 = vmul.f32 0.5, %v11833_v17  ;;  %v2942_v43 = vadd.f32 0.5, %v2934_v42  ;;  %v2851_v7 = vadd.f32 0.5, %v2843_v63 }
 0x2e4   : > { %11850 = vtanh.f32 %v13691_v38  ;;  %v13694_v8 = vadd.f32 %v2969_v13, %v2961_v49  ;;  %v2936_v52 = vmul.f32 0.5, %v11835_v37  ;;  %v2963_v10 = vmul.f32 %v2891_v2, %v13403_v24 }
 0x2e5   : > { %v11837_v54 = vpop.eup %11836  ;;  %11852 = vtanh.f32 %v2923_v1  ;;  %v2943_v0 = vadd.f32 0.5, %v2935_v56 }
 0x2e6   : > { %v11839_v44 = vpop.eup %11838  ;;  %v2989_v19 = vmul.f32 %v11837_v54, %v2941_v31  ;;  %11854 = vtanh.f32 %v13694_v8  ;;  %v2944_v24 = vadd.f32 0.5, %v2936_v52  ;;  %v13798_v52 = vld [vmem:[%s15696_s2 + $0x4] ss:$16 sps:$4 sm:$0xff]  }
 0x2e7   : > { %v11841_v11 = vpop.eup %11840  ;;  %11856 = vtanh.f32 %v2988_v45  ;;  %v2937_v47 = vmul.f32 0.5, %v11839_v44 }
 0x2e8   : > { %v11843_v4 = vpop.eup %11842  ;;  %11858 = vtanh.f32 %v2989_v19  ;;  %v13698_v14 = vpack.c.bf16 %v2989_v19, %v2988_v45  ;;  %v2970_v20 = vmul.f32 %v11841_v11, %v2850_v21 }
 0x2e9   : > { %v11845_v53 = vpop.eup %11844  ;;  %v2990_v12 = vmul.f32 %v11843_v4, %v2942_v43  ;;  %v2945_v45 = vadd.f32 0.5, %v2937_v47 }
 0x2ea   : > { %v11847_v3 = vpop.eup %11846  ;;  %v13701_v49 = vadd.f32 %v2970_v20, %v2962_v28  ;;  %v2971_v41 = vmul.f32 %v11845_v53, %v2851_v7  ;;  %3519 = vmatmul.mubr.bf16.vlgmr.msra.gmra.mrb[108].mxu1 %v13698_v14  ;;  %v11457_v20 = vld [vmem:[%s15698_s4 + $0xa8] sm:$0xff]   ;;  %v11458_v53 = vld [vmem:[%s15698_s4 + $0xb0] sm:$0xff]  }
 0x2eb   : > { %3528 = vmatprep.mubr.bf16.mxu1 %v15815_v9  ;;  %v2991_v1 = vmul.f32 %v11847_v3, %v2943_v0  ;;  %11860 = vtanh.f32 %v2990_v12  ;;  %4298 = vmatpush1.bf16.msra.mxu1 %v13546_v62  ;;  %v11849_v27 = vpop.eup %11848  ;;  %v11459_v0 = vld [vmem:[%s15698_s4 + $0xb8] sm:$0xff]  }
 0x2ec   : > { %11862 = vtanh.f32 %v13701_v49  ;;  %v13707_v17 = vadd.f32 %v2971_v41, %v2963_v10  ;;  %4299 = vmatprep.subr.bf16.mxu1 %v13552_v50  ;;  %v2938_v63 = vmul.f32 0.5, %v11849_v27 }
 0x2ed   : > { %11864 = vtanh.f32 %v2991_v1  ;;  %v13710_v5 = vpack.c.bf16 %v2991_v1, %v2990_v12 }
 0x2ee   : > { %v11851_v13 = vpop.eup %11850  ;;  %11866 = vtanh.f32 %v13707_v17  ;;  %v2946_v21 = vadd.f32 0.5, %v2938_v63 }
 0x2ef   : > { %v11853_v22 = vpop.eup %11852  ;;  %v2992_v42 = vmul.f32 %v11851_v13, %v2944_v24  ;;  %4300 = vmatpush1.bf16.msra.mxu1 %v13557_v58 }
 0x2f0   : > { %v11855_v62 = vpop.eup %11854  ;;  %4301 = vmatprep.subr.bf16.mxu1 %v13564_v59  ;;  %v2939_v54 = vmul.f32 0.5, %v11853_v22 }
 0x2f1   : > { %v11857_v37 = vpop.eup %11856  ;;  %v2993_v31 = vmul.f32 %v11855_v62, %v2945_v45  ;;  %11868 = vtanh.f32 %v2992_v42 }
 0x2f2   : > { %v11859_v50 = vpop.eup %11858  ;;  %3529 = vmatmul.mubr.bf16.gmra.mrb[112].mxu1 %v13710_v5  ;;  %v2947_v19 = vadd.f32 0.5, %v2939_v54 }
 0x2f3   : > { %v3028_v56 = vpack.c.bf16 %v11859_v50, %v11857_v37  ;;  %3538 = vmatprep.mubr.bf16.mxu1 %v15815_v9  ;;  %11870 = vtanh.f32 %v2993_v31  ;;  %v3219_v44 = vpack.c.bf16 %v2993_v31, %v2992_v42  ;;  %4302 = vmatpush1.bf16.msra.mxu1 %v13569_v36 }
 0x2f4   : > { %4303 = vmatprep.subr.bf16.mxu1 %v13576_v25 }
 0x2f5   : > { %v11861_v58 = vpop.eup %11860  ;;  %10451 = vmatprep.mubr.bf16.mxu0 %v3028_v56 }
 0x2f6   : > { %v11863_v59 = vpop.eup %11862 }
 0x2f7   : > { %v11865_v2 = vpop.eup %11864  ;;  %v2994_v11 = vmul.f32 %v11863_v59, %v2946_v21  ;;  %4304 = vmatpush1.bf16.msra.mxu1 %v13581_v33 }
 0x2f8   : > { %v11867_v28 = vpop.eup %11866  ;;  %v3029_v43 = vpack.c.bf16 %v11865_v2, %v11861_v58  ;;  %4305 = vmatprep.subr.bf16.mxu1 %v13588_v15 }
 0x2f9   : > { %v2995_v4 = vmul.f32 %v11867_v28, %v2947_v19  ;;  %11872 = vtanh.f32 %v2994_v11 }
 0x2fa   : > { %3539 = vmatmul.mubr.bf16.gmra.mrb[116].mxu1 %v3219_v44  ;;  %10452 = vmatmul.mubr.bf16.vlgmr.msra.gmra.mrb[84].mxu0 %v3029_v43 }
 0x2fb   : > { %3414 = vmatpush1.bf16.msra.mxu0 %v13414_v46  ;;  %3548 = vmatprep.mubr.bf16.mxu1 %v15815_v9  ;;  %11874 = vtanh.f32 %v2995_v4  ;;  %v3220_v36 = vpack.c.bf16 %v2995_v4, %v2994_v11  ;;  %v11869_v25 = vpop.eup %11868  ;;  %v15833_v11 = vld [vmem:[#allocation75_spill] sm:$0xff] }
 0x2fc   : > { %3415 = vmatprep.subr.bf16.mxu0 %v13419_v35  ;;  %4306 = vmatpush1.bf16.msra.mxu1 %v13593_v61  ;;  %v11455_v61 = vld [vmem:[%s15698_s4 + $0x98] sm:$0xff]  }
 0x2fd   : > { %v11871_v33 = vpop.eup %11870  ;;  %4307 = vmatprep.subr.bf16.mxu1 %v13603_v30  ;;  %v15830_v30 = vld [vmem:[#allocation86_spill] sm:$0xff] }
 0x2fe   : > { %v3030_v7 = vpack.c.bf16 %v11871_v33, %v11869_v25 }
 0x2ff   : > { %3416 = vmatpush1.bf16.msra.mxu0 %v13428_v34  ;;  %v15831_v34 = vld [vmem:[#allocation87_spill] sm:$0xff] }
 0x300   : > { %3417 = vmatprep.subr.bf16.mxu0 %v13434_v26  ;;  %10455 = vmatprep.mubr.bf16.mxu0 %v3030_v7  ;;  %v15832_v26 = vld [vmem:[#allocation88_spill] sm:$0xff] }
 0x301   : > { %4308 = vmatpush1.bf16.msra.mxu1 %v13608_v29  ;;  %v15829_v29 = vld [vmem:[#allocation85_spill] sm:$0xff] }
 0x302   : > { %3549 = vmatmul.mubr.bf16.gmra.mrb[120].mxu1 %v3220_v36 }
 0x303   : > { %3418 = vmatpush1.bf16.msra.mxu0 %v13442_v39  ;;  %4329 = vmatprep.mubr.bf16.mxu1 %v15815_v9  ;;  %v11873_v46 = vpop.eup %11872  ;;  %v11446_v39 = vld [vmem:[%s15698_s4 + $0x80] sm:$0xff]  }
 0x304   : > { %3419 = vmatprep.subr.bf16.mxu0 %v13448_v51  ;;  %v11447_v51 = vld [vmem:[%s15698_s4 + $0x88] sm:$0xff]  }
 0x305   : > { %v11875_v35 = vpop.eup %11874 }
 0x306   : > { %v3031_v15 = vpack.c.bf16 %v11875_v35, %v11873_v46 }
 0x307   : > { %3420 = vmatpush1.bf16.msra.mxu0 %v13457_v57  ;;  %v13756_v57 = vld [vmem:[%s15696_s2 + $0xcc] ss:$16 sps:$4 sm:$0xff]  }
 0x308   : > { %3421 = vmatprep.subr.bf16.mxu0 %v13463_v32  ;;  %10456 = vmatmul.mubr.bf16.gmra.mrb[88].mxu0 %v3031_v15  ;;  %v13761_v32 = vld [vmem:[%s15696_s2 + $0xc8] ss:$16 sps:$4 sm:$0xff]  }
 0x309   : > { %3445 = vmatprep.mubr.bf16.mxu0 %v15815_v9  ;;  %4309 = vmatprep.subr.bf16.mxu1 %v13756_v57 }
 0x30a   : > { %4310 = vmatpush1.bf16.msra.mxu1 %v13761_v32 }
 0x30b   : > { %3422 = vmatpush1.bf16.msra.mxu0 %v13469_v60  ;;  %v11451_v60 = vld [vmem:[%s15698_s4 + $0x90] sm:$0xff]  }
 0x30c   : > { %3423 = vmatprep.subr.bf16.mxu0 %v13475_v23  ;;  %v13771_v23 = vld [vmem:[%s15696_s2 + $0xec] ss:$16 sps:$4 sm:$0xff]  }
 0x30d   : > { %4311 = vmatprep.subr.bf16.mxu1 %v13771_v23 }
 0x30f   : > { %3424 = vmatpush1.bf16.msra.mxu0 %v13484_v18  ;;  %v13776_v18 = vld [vmem:[%s15696_s2 + $0xe8] ss:$16 sps:$4 sm:$0xff]  }
 0x310   : > { %3425 = vmatprep.subr.bf16.mxu0 %v15829_v29  ;;  %4312 = vmatpush1.bf16.msra.mxu1 %v13776_v18 }
 0x313   : > { %3426 = vmatpush1.bf16.msra.mxu0 %v15830_v30 }
 0x314   : > { %3427 = vmatprep.subr.bf16.mxu0 %v15831_v34 }
 0x317   : > { %3428 = vmatpush1.bf16.msra.mxu0 %v15832_v26 }
 0x318   : > { %10459 = vmatprep.subr.bf16.mxu0 %v11446_v39 }
 0x31a   : > { %3446 = vmatmul.mubr.bf16.vlgmr.msra.gmra.mrb[32].mxu0 %v13698_v14  ;;  %v11456_v14 = vld [vmem:[%s15698_s4 + $0xa0] sm:$0xff]  }
 0x31b   : > { %3455 = vmatprep.mubr.bf16.mxu0 %v15815_v9  ;;  %10460 = vmatpush3.bf16.msra.mxu0 %v11446_v39 }
 0x31c   : > { %10461 = vmatprep.subr.bf16.mxu0 %v11447_v51 }
 0x31f   : > { %10462 = vmatpush3.bf16.msra.mxu0 %v11447_v51 }
 0x320   : > { %10463 = vmatprep.subr.bf16.mxu0 %v11451_v60 }
 0x322   : > { %3456 = vmatmul.mubr.bf16.gmra.mrb[36].mxu0 %v13710_v5 }
 0x323   : > { %3465 = vmatprep.mubr.bf16.mxu0 %v15815_v9  ;;  %10464 = vmatpush3.bf16.msra.mxu0 %v11451_v60 }
 0x324   : > { %10465 = vmatprep.subr.bf16.mxu0 %v11455_v61 }
 0x327   : > { %10466 = vmatpush3.bf16.msra.mxu0 %v11455_v61 }
 0x328   : > { %10467 = vmatprep.subr.bf16.mxu0 %v11456_v14 }
 0x32a   : > { %3466 = vmatmul.mubr.bf16.gmra.mrb[40].mxu0 %v3219_v44 }
 0x32b   : > { %3475 = vmatprep.mubr.bf16.mxu0 %v15815_v9  ;;  %10468 = vmatpush3.bf16.msra.mxu0 %v11456_v14 }
 0x32c   : > { %10469 = vmatprep.subr.bf16.mxu0 %v11457_v20 }
 0x32f   : > { %10470 = vmatpush3.bf16.msra.mxu0 %v11457_v20 }
 0x330   : > { %10471 = vmatprep.subr.bf16.mxu0 %v11458_v53 }
 0x332   : > { %3476 = vmatmul.mubr.bf16.gmra.mrb[44].mxu0 %v3220_v36  ;;  %v15834_v36 = vld [vmem:[#allocation76_spill] sm:$0xff] }
 0x333   : > { %10472 = vmatpush3.bf16.msra.mxu0 %v11458_v53 }
 0x334   : > { %10473 = vmatprep.subr.bf16.mxu0 %v11459_v0 }
 0x337   : > { %10474 = vmatpush3.bf16.msra.mxu0 %v11459_v0 }
 0x338   : > { %4224 = vmatprep.subr.bf16.mxu0 %v13798_v52 }
 0x3bd   : > { %v3520_v12 = vpop.f32.mrb[108].mxu1 }
 0x3be   : > { %v3522_v3 = vpop.f32.mrb[109].mxu1  ;;  %v10891_v54 = vadd.f32 %v3520_v12, %v13327_v16 }
 0x3bf   : > { %v3524_v10 = vpop.f32.mrb[110].mxu1  ;;  %v10892_v31 = vadd.f32 %v3522_v3, %v13329_v55 }
 0x3c0   : > { %v3526_v41 = vpop.f32.mrb[111].mxu1  ;;  %v10893_v56 = vadd.f32 %v3524_v10, %v13327_v16  ;;  %11876 = vtanh.f32 %v10891_v54 }
 0x3c1   : > { %v10894_v50 = vadd.f32 %v3526_v41, %v13329_v55  ;;  %v3727_v44 = vmul.f32 0.5, %v10892_v31 }
 0x3c2   : > { %11878 = vtanh.f32 %v10893_v56 }
 0x3c3   : > { %v3728_v58 = vmul.f32 0.5, %v10894_v50  ;;  %11880 = vtanh.f32 %v3727_v44 }
 0x3c5   : > { %v3530_v47 = vpop.f32.mrb[112].mxu1  ;;  %11882 = vtanh.f32 %v3728_v58 }
 0x3c6   : > { %v3532_v1 = vpop.f32.mrb[113].mxu1  ;;  %v10895_v21 = vadd.f32 %v3530_v47, %v13327_v16 }
 0x3c7   : > { %v3534_v27 = vpop.f32.mrb[114].mxu1  ;;  %v10896_v19 = vadd.f32 %v3532_v1, %v13329_v55 }
 0x3c8   : > { %v3536_v24 = vpop.f32.mrb[115].mxu1  ;;  %v10897_v59 = vadd.f32 %v3534_v27, %v13327_v16  ;;  %11884 = vtanh.f32 %v10895_v21 }
 0x3c9   : > { %v10898_v4 = vadd.f32 %v3536_v24, %v13329_v55  ;;  %v3729_v30 = vmul.f32 0.5, %v10896_v19 }
 0x3ca   : > { %11886 = vtanh.f32 %v10897_v59  ;;  %v11877_v14 = vpop.eup %11876 }
 0x3cb   : > { %v3730_v26 = vmul.f32 0.5, %v10898_v4 }
 0x3cc   : > { %v11879_v12 = vpop.eup %11878 }
 0x3cd   : > { %v3540_v5 = vpop.f32.mrb[116].mxu1  ;;  %v11881_v47 = vpop.eup %11880 }
 0x3ce   : > { %v3542_v13 = vpop.f32.mrb[117].mxu1  ;;  %v10899_v51 = vadd.f32 %v3540_v5, %v13327_v16 }
 0x3cf   : > { %v3544_v22 = vpop.f32.mrb[118].mxu1  ;;  %v10900_v20 = vadd.f32 %v3542_v13, %v13329_v55  ;;  %v13828_v5 = vpop.eup %11882 }
 0x3d0   : > { %v3546_v45 = vpop.f32.mrb[119].mxu1  ;;  %v10901_v60 = vadd.f32 %v3544_v22, %v13327_v16 }
 0x3d1   : > { %v10902_v3 = vadd.f32 %v3546_v45, %v13329_v55  ;;  %v3731_v50 = vmul.f32 0.5, %v10900_v20 }
 0x3d2   : > { %v13831_v31 = vpop.eup %11884 }
 0x3d3   : > { %v3732_v56 = vmul.f32 0.5, %v10902_v3  ;;  %v15835_v3 = vld [vmem:[#allocation89_spill] sm:$0xff] }
 0x3d4   : > { %v13833_v54 = vpop.eup %11886 }
 0x3d5   : > { %v13801_v42 = vpop.f32.mrb[120].mxu1 }
 0x3d6   : > { %v13803_v62 = vpop.f32.mrb[121].mxu1 }
 0x3d7   : > { %v13805_v37 = vpop.f32.mrb[122].mxu1 }
 0x3d8   : > { %v13807_v63 = vpop.f32.mrb[123].mxu1 }
 0x3ed   : > { %v3447_v2 = vpop.f32.mrb[32].mxu0 }
 0x3ee   : > { %v10671_v28 = vadd.f32 %v3447_v2, %v15833_v11  ;;  %v3449_v43 = vpop.f32.mrb[33].mxu0 }
 0x3ef   : > { %v10672_v25 = vadd.f32 %v3449_v43, %v15834_v36  ;;  %v3451_v33 = vpop.f32.mrb[34].mxu0 }
 0x3f0   : > { %v3631_v7 = vmul.f32 0.5, %v10671_v28  ;;  %v10673_v46 = vadd.f32 %v3451_v33, %v15833_v11  ;;  %v3453_v35 = vpop.f32.mrb[35].mxu0 }
 0x3f1   : > { %v3671_v15 = vmul.f32 0.5, %v10672_v25  ;;  %v10674_v29 = vadd.f32 %v3453_v35, %v15834_v36 }
 0x3f2   : > { %11888 = vtanh.f32 %v3631_v7  ;;  %v3632_v34 = vmul.f32 0.5, %v10673_v46 }
 0x3f3   : > { %11890 = vtanh.f32 %v3671_v15  ;;  %v3672_v39 = vmul.f32 0.5, %v10674_v29 }
 0x3f4   : > { %11892 = vtanh.f32 %v3632_v34 }
 0x3f5   : > { %11894 = vtanh.f32 %v3672_v39  ;;  %v3457_v61 = vpop.f32.mrb[36].mxu0 }
 0x3f6   : > { %11896 = vtanh.f32 %v3729_v30  ;;  %v10675_v53 = vadd.f32 %v3457_v61, %v15833_v11  ;;  %v3459_v0 = vpop.f32.mrb[37].mxu0 }
 0x3f7   : > { %11898 = vtanh.f32 %v3730_v26  ;;  %v10676_v10 = vadd.f32 %v3459_v0, %v15834_v36  ;;  %v3461_v41 = vpop.f32.mrb[38].mxu0 }
 0x3f8   : > { %11900 = vtanh.f32 %v10899_v51  ;;  %v3633_v1 = vmul.f32 0.5, %v10675_v53  ;;  %v10677_v27 = vadd.f32 %v3461_v41, %v15833_v11  ;;  %v3463_v24 = vpop.f32.mrb[39].mxu0 }
 0x3f9   : > { %11902 = vtanh.f32 %v10901_v60  ;;  %v3673_v13 = vmul.f32 0.5, %v10676_v10  ;;  %v10678_v22 = vadd.f32 %v3463_v24, %v15834_v36 }
 0x3fa   : > { %11904 = vtanh.f32 %v3633_v1  ;;  %v3634_v45 = vmul.f32 0.5, %v10677_v27 }
 0x3fb   : > { %11906 = vtanh.f32 %v3673_v13  ;;  %v3674_v44 = vmul.f32 0.5, %v10678_v22 }
 0x3fc   : > { %v11889_v58 = vpop.eup %11888  ;;  %11908 = vtanh.f32 %v3634_v45 }
 0x3fd   : > { %v11891_v21 = vpop.eup %11890  ;;  %v3647_v59 = vmul.f32 0.5, %v11889_v58  ;;  %11910 = vtanh.f32 %v3674_v44  ;;  %v3467_v2 = vpop.f32.mrb[40].mxu0 }
 0x3fe   : > { %v11893_v19 = vpop.eup %11892  ;;  %11912 = vtanh.f32 %v3731_v50  ;;  %v3687_v28 = vmul.f32 0.5, %v11891_v21  ;;  %v10679_v43 = vadd.f32 %v3467_v2, %v15833_v11  ;;  %v3469_v4 = vpop.f32.mrb[41].mxu0 }
 0x3ff   : > { %v11895_v25 = vpop.eup %11894  ;;  %11914 = vtanh.f32 %v3732_v56  ;;  %v3655_v33 = vadd.f32 0.5, %v3647_v59  ;;  %v3648_v7 = vmul.f32 0.5, %v11893_v19  ;;  %v10680_v46 = vadd.f32 %v3469_v4, %v15834_v36  ;;  %v3471_v35 = vpop.f32.mrb[42].mxu0 }
 0x400   : > { %v13837_v15 = vpop.eup %11896  ;;  %v3695_v29 = vadd.f32 0.5, %v3687_v28  ;;  %v3688_v30 = vmul.f32 0.5, %v11895_v25  ;;  %v3635_v34 = vmul.f32 0.5, %v10679_v43  ;;  %v10681_v26 = vadd.f32 %v3471_v35, %v15833_v11  ;;  %v3473_v39 = vpop.f32.mrb[43].mxu0 }
 0x401   : > { %v13840_v51 = vpop.eup %11898  ;;  %v3775_v60 = vmul.f32 %v11877_v14, %v3655_v33  ;;  %v3656_v61 = vadd.f32 0.5, %v3648_v7  ;;  %v3675_v20 = vmul.f32 0.5, %v10680_v46  ;;  %v10682_v53 = vadd.f32 %v3473_v39, %v15834_v36 }
 0x402   : > { %v13843_v0 = vpop.eup %11900  ;;  %v3767_v10 = vmul.f32 %v3695_v29, %v15835_v3  ;;  %v3696_v41 = vadd.f32 0.5, %v3688_v30  ;;  %11916 = vtanh.f32 %v3635_v34  ;;  %v3636_v1 = vmul.f32 0.5, %v10681_v26 }
 0x403   : > { %v13846_v27 = vpop.eup %11902  ;;  %v3776_v24 = vmul.f32 %v11879_v12, %v3656_v61  ;;  %11918 = vtanh.f32 %v3675_v20  ;;  %v3676_v13 = vmul.f32 0.5, %v10682_v53  ;;  %v3743_v56 = vmul.f32 0.5, %v11881_v47 }
 0x404   : > { %v11905_v22 = vpop.eup %11904  ;;  %v13848_v50 = vadd.f32 %v3775_v60, %v3767_v10  ;;  %v3768_v14 = vmul.f32 %v3696_v41, %v13674_v6  ;;  %11920 = vtanh.f32 %v3636_v1  ;;  %v10903_v43 = vadd.f32 %v13801_v42, %v13327_v16 }
 0x405   : > { %v11907_v45 = vpop.eup %11906  ;;  %v3649_v44 = vmul.f32 0.5, %v11905_v22  ;;  %11922 = vtanh.f32 %v3676_v13  ;;  %v3477_v58 = vpop.f32.mrb[44].mxu0  ;;  %v3744_v53 = vmul.f32 0.5, %v13828_v5 }
 0x406   : > { %v11909_v21 = vpop.eup %11908  ;;  %11924 = vtanh.f32 %v13848_v50  ;;  %v13852_v59 = vadd.f32 %v3776_v24, %v3768_v14  ;;  %v3689_v2 = vmul.f32 0.5, %v11907_v45  ;;  %v10683_v12 = vadd.f32 %v3477_v58, %v15833_v11  ;;  %v3479_v19 = vpop.f32.mrb[45].mxu0 }
 0x407   : > { %v11911_v28 = vpop.eup %11910  ;;  %v3657_v6 = vadd.f32 0.5, %v3649_v44  ;;  %v3650_v4 = vmul.f32 0.5, %v11909_v21  ;;  %v10684_v47 = vadd.f32 %v3479_v19, %v15834_v36  ;;  %v3481_v25 = vpop.f32.mrb[46].mxu0  ;;  %v3751_v45 = vadd.f32 0.5, %v3743_v56 }
 0x408   : > { %v13858_v33 = vpop.eup %11912  ;;  %11926 = vtanh.f32 %v13852_v59  ;;  %v3697_v7 = vadd.f32 0.5, %v3689_v2  ;;  %v3690_v46 = vmul.f32 0.5, %v11911_v28  ;;  %v3637_v35 = vmul.f32 0.5, %v10683_v12  ;;  %v3483_v29 = vpop.f32.mrb[47].mxu0 }
 0x409   : > { %v13861_v30 = vpop.eup %11914  ;;  %v3777_v34 = vmul.f32 %v13831_v31, %v3657_v6  ;;  %v3658_v26 = vadd.f32 0.5, %v3650_v4  ;;  %v3677_v39 = vmul.f32 0.5, %v10684_v47  ;;  %v10685_v42 = vadd.f32 %v3481_v25, %v15833_v11 }
 0x40a   : > { %v3769_v60 = vmul.f32 %v3697_v7, %v13679_v40  ;;  %v3698_v61 = vadd.f32 0.5, %v3690_v46  ;;  %11928 = vtanh.f32 %v3637_v35  ;;  %v10686_v20 = vadd.f32 %v3483_v29, %v15834_v36 }
 0x40b   : > { %v3778_v3 = vmul.f32 %v13833_v54, %v3658_v26  ;;  %11930 = vtanh.f32 %v3677_v39  ;;  %v3638_v10 = vmul.f32 0.5, %v10685_v42  ;;  %v10905_v40 = vadd.f32 %v13805_v37, %v13327_v16 }
 0x40c   : > { %v11917_v41 = vpop.eup %11916  ;;  %11932 = vtanh.f32 %v10903_v43  ;;  %v13869_v1 = vadd.f32 %v3777_v34, %v3769_v60  ;;  %v3770_v31 = vmul.f32 %v3698_v61, %v13684_v48  ;;  %v3678_v24 = vmul.f32 0.5, %v10686_v20 }
 0x40d   : > { %v11919_v13 = vpop.eup %11918  ;;  %v3651_v22 = vmul.f32 0.5, %v11917_v41  ;;  %11934 = vtanh.f32 %v3638_v10  ;;  %v10904_v58 = vadd.f32 %v13803_v62, %v13329_v55  ;;  %v3752_v12 = vadd.f32 0.5, %v3744_v53 }
 0x40e   : > { %v11921_v14 = vpop.eup %11920  ;;  %11936 = vtanh.f32 %v13869_v1  ;;  %v13875_v5 = vadd.f32 %v3778_v3, %v3770_v31  ;;  %v3691_v54 = vmul.f32 0.5, %v11919_v13  ;;  %v10906_v4 = vadd.f32 %v13807_v63, %v13329_v55 }
 0x40f   : > { %v11923_v44 = vpop.eup %11922  ;;  %v3659_v21 = vadd.f32 0.5, %v3651_v22  ;;  %v3652_v48 = vmul.f32 0.5, %v11921_v14  ;;  %11938 = vtanh.f32 %v3678_v24  ;;  %v3745_v25 = vmul.f32 0.5, %v13837_v15 }
 0x410   : > { %v11925_v2 = vpop.eup %11924  ;;  %11940 = vtanh.f32 %v13875_v5  ;;  %v3699_v37 = vadd.f32 0.5, %v3691_v54  ;;  %v3692_v19 = vmul.f32 0.5, %v11923_v44  ;;  %v3733_v7 = vmul.f32 0.5, %v10904_v58 }
 0x411   : > { %11942 = vtanh.f32 %v10905_v40  ;;  %v3779_v56 = vmul.f32 %v13843_v0, %v3659_v21  ;;  %v3660_v28 = vadd.f32 0.5, %v3652_v48  ;;  %v3799_v43 = vmul.f32 %v11925_v2, %v3751_v45 }
 0x412   : > { %v11927_v6 = vpop.eup %11926  ;;  %v3771_v62 = vmul.f32 %v3699_v37, %v13691_v38  ;;  %v3700_v47 = vadd.f32 0.5, %v3692_v19  ;;  %v3746_v39 = vmul.f32 0.5, %v13840_v51  ;;  %v3734_v60 = vmul.f32 0.5, %v10906_v4 }
 0x413   : > { %v3780_v46 = vmul.f32 %v13846_v27, %v3660_v28  ;;  %v3800_v35 = vmul.f32 %v11927_v6, %v3752_v12  ;;  %11944 = vtanh.f32 %v3799_v43  ;;  %v3753_v20 = vadd.f32 0.5, %v3745_v25 }
 0x414   : > { %v11929_v29 = vpop.eup %11928  ;;  %v13886_v34 = vadd.f32 %v3779_v56, %v3771_v62  ;;  %v3772_v0 = vmul.f32 %v3700_v47, %v13694_v8  ;;  %v3754_v41 = vadd.f32 0.5, %v3746_v39  ;;  %v3747_v54 = vmul.f32 0.5, %v13858_v33 }
 0x415   : > { %v11931_v26 = vpop.eup %11930  ;;  %v3653_v42 = vmul.f32 0.5, %v11929_v29  ;;  %v13890_v63 = vpack.c.bf16 %v3800_v35, %v3799_v43  ;;  %11946 = vtanh.f32 %v3800_v35  ;;  %v3748_v2 = vmul.f32 0.5, %v13861_v30 }
 0x416   : > { %v11933_v38 = vpop.eup %11932  ;;  %11948 = vtanh.f32 %v13886_v34  ;;  %v13893_v15 = vadd.f32 %v3780_v46, %v3772_v0  ;;  %v3693_v27 = vmul.f32 0.5, %v11931_v26  ;;  %v3755_v56 = vadd.f32 0.5, %v3747_v54  ;;  %v13915_v0 = vld [vmem:[%s15696_s2] ss:$16 sps:$4 sm:$0xff]  }
 0x417   : > { %v11935_v61 = vpop.eup %11934  ;;  %11950 = vtanh.f32 %v3733_v7  ;;  %v3661_v53 = vadd.f32 0.5, %v3653_v42  ;;  %4330 = vmatmul.mubr.bf16.vlgmr.msra.gmra.mrb[124].mxu1 %v13890_v63  ;;  %v3756_v30 = vadd.f32 0.5, %v3748_v2  ;;  %v13989_v2 = vld [vmem:[%s15696_s2 + $0xc0] ss:$16 sps:$4 sm:$0xff]  }
 0x418   : > { %v11937_v8 = vpop.eup %11936  ;;  %11952 = vtanh.f32 %v13893_v15  ;;  %v3701_v51 = vadd.f32 0.5, %v3693_v27  ;;  %v3654_v3 = vmul.f32 0.5, %v11935_v61  ;;  %4339 = vmatprep.mubr.bf16.mxu1 %v15815_v9  ;;  %v13927_v61 = vld [vmem:[%s15696_s2 + $0x20] ss:$16 sps:$4 sm:$0xff]   ;;  %15841 = vst [vmem:[#allocation76_spill] sm:$0xff] %v13989_v2 }
 0x419   : > { %v11939_v10 = vpop.eup %11938  ;;  %v3781_v31 = vmul.f32 %v11933_v38, %v3661_v53  ;;  %v3801_v24 = vmul.f32 %v11937_v8, %v3753_v20  ;;  %11954 = vtanh.f32 %v3734_v60  ;;  %v13920_v38 = vld [vmem:[%s15696_s2 + $0x24] ss:$16 sps:$4 sm:$0xff]  }
 0x41a   : > { %v11941_v13 = vpop.eup %11940  ;;  %v3773_v40 = vmul.f32 %v3701_v51, %v13701_v49  ;;  %v3662_v22 = vadd.f32 0.5, %v3654_v3  ;;  %v3694_v14 = vmul.f32 0.5, %v11939_v10  ;;  %v13933_v53 = vld [vmem:[%s15696_s2 + $0x44] ss:$16 sps:$4 sm:$0xff]  }
 0x41b   : > { %v11943_v45 = vpop.eup %11942  ;;  %v3802_v44 = vmul.f32 %v11941_v13, %v3754_v41  ;;  %11956 = vtanh.f32 %v3801_v24  ;;  %v13939_v41 = vld [vmem:[%s15696_s2 + $0x40] ss:$16 sps:$4 sm:$0xff]  }
 0x41c   : > { %v13900_v58 = vadd.f32 %v3781_v31, %v3773_v40  ;;  %v3782_v21 = vmul.f32 %v11943_v45, %v3662_v22  ;;  %v3702_v48 = vadd.f32 0.5, %v3694_v14  ;;  %v13952_v13 = vld [vmem:[%s15696_s2 + $0x60] ss:$16 sps:$4 sm:$0xff]   ;;  %v13958_v40 = vld [vmem:[%s15696_s2 + $0x84] ss:$16 sps:$4 sm:$0xff]  }
 0x41d   : > { %11958 = vtanh.f32 %v3802_v44  ;;  %v13903_v12 = vpack.c.bf16 %v3802_v44, %v3801_v24  ;;  %v11945_v37 = vpop.eup %11944  ;;  %v13945_v24 = vld [vmem:[%s15696_s2 + $0x64] ss:$16 sps:$4 sm:$0xff]   ;;  %15836 = vst [vmem:[#allocation85_spill] sm:$0xff] %v13958_v40  ;;  %v13964_v22 = vld [vmem:[%s15696_s2 + $0x80] ss:$16 sps:$4 sm:$0xff]  }
 0x41e   : > { %11960 = vtanh.f32 %v13900_v58  ;;  %v3774_v49 = vmul.f32 %v3702_v48, %v13707_v17  ;;  %15837 = vst [vmem:[#allocation86_spill] sm:$0xff] %v13964_v22  ;;  %v13970_v45 = vld [vmem:[%s15696_s2 + $0xa4] ss:$16 sps:$4 sm:$0xff]  }
 0x41f   : > { %v11947_v19 = vpop.eup %11946  ;;  %4340 = vmatmul.mubr.bf16.gmra.mrb[128].mxu1 %v13903_v12  ;;  %15838 = vst [vmem:[#allocation87_spill] sm:$0xff] %v13970_v45  ;;  %v13982_v48 = vld [vmem:[%s15696_s2 + $0xc4] ss:$16 sps:$4 sm:$0xff]  }
 0x420   : > { %v11949_v33 = vpop.eup %11948  ;;  %v13908_v28 = vadd.f32 %v3782_v21, %v3774_v49  ;;  %v3839_v43 = vpack.c.bf16 %v11947_v19, %v11945_v37  ;;  %4349 = vmatprep.mubr.bf16.mxu1 %v15815_v9  ;;  %v13976_v21 = vld [vmem:[%s15696_s2 + $0xa0] ss:$16 sps:$4 sm:$0xff]   ;;  %15840 = vst [vmem:[#allocation75_spill] sm:$0xff] %v13982_v48  ;;  %v13995_v37 = vld [vmem:[%s15696_s2 + $0xe4] ss:$16 sps:$4 sm:$0xff]  }
 0x421   : > { %v11951_v6 = vpop.eup %11950  ;;  %v3803_v4 = vmul.f32 %v11949_v33, %v3755_v56  ;;  %15839 = vst [vmem:[#allocation88_spill] sm:$0xff] %v13976_v21  ;;  %15842 = vst [vmem:[#allocation89_spill] sm:$0xff] %v13995_v37  ;;  %v14001_v49 = vld [vmem:[%s15696_s2 + $0xe0] ss:$16 sps:$4 sm:$0xff]   ;;  %v11486_v19 = vld [vmem:[%s15696_s2 + $0xc] ss:$16 sps:$4 sm:$0xff]  }
 0x422   : > { %v11953_v62 = vpop.eup %11952  ;;  %11962 = vtanh.f32 %v13908_v28  ;;  %10475 = vmatprep.mubr.bf16.mxu0 %v3839_v43  ;;  %v3749_v17 = vmul.f32 0.5, %v11951_v6  ;;  %15843 = vst [vmem:[#allocation90_spill] sm:$0xff] %v14001_v49  ;;  %v14016_v56 = vld [vmem:[%s15696_s2 + $0x8] ss:$16 sps:$4 sm:$0xff]   ;;  %5108 = vmatprep.subr.bf16.mxu1 %v11486_v19  ;;  %v14034_v33 = vld [vmem:[%s15696_s2 + $0x4c] ss:$16 sps:$4 sm:$0xff]  }
 0x423   : > { %v3804_v47 = vmul.f32 %v11953_v62, %v3756_v30  ;;  %v11955_v25 = vpop.eup %11954  ;;  %11964 = vtanh.f32 %v3803_v4  ;;  %5109 = vmatpush1.bf16.msra.mxu1 %v14016_v56  ;;  %v14039_v43 = vld [vmem:[%s15696_s2 + $0x48] ss:$16 sps:$4 sm:$0xff]   ;;  %v14046_v6 = vld [vmem:[%s15696_s2 + $0x6c] ss:$16 sps:$4 sm:$0xff]  }
 0x424   : > { %v3750_v29 = vmul.f32 0.5, %v11955_v25  ;;  %v3757_v39 = vadd.f32 0.5, %v3749_v17  ;;  %v14051_v30 = vld [vmem:[%s15696_s2 + $0x68] ss:$16 sps:$4 sm:$0xff]   ;;  %v14073_v25 = vld [vmem:[%s15696_s2 + $0xac] ss:$16 sps:$4 sm:$0xff]  }
 0x425   : > { %11966 = vtanh.f32 %v3804_v47  ;;  %v4030_v7 = vpack.c.bf16 %v3804_v47, %v3803_v4  ;;  %v11957_v46 = vpop.eup %11956  ;;  %v14058_v4 = vld [vmem:[%s15696_s2 + $0x8c] ss:$16 sps:$4 sm:$0xff]   ;;  %v14063_v62 = vld [vmem:[%s15696_s2 + $0x88] ss:$16 sps:$4 sm:$0xff]   ;;  %v11499_v47 = vld [vmem:[%s15698_s4 + $0xc0] sm:$0xff]  }
 0x426   : > { %v3758_v27 = vadd.f32 0.5, %v3750_v29  ;;  %v14078_v17 = vld [vmem:[%s15696_s2 + $0xa8] ss:$16 sps:$4 sm:$0xff]  }
 0x427   : > { %v11959_v35 = vpop.eup %11958  ;;  %4350 = vmatmul.mubr.bf16.gmra.mrb[132].mxu1 %v4030_v7 }
 0x428   : > { %v11961_v26 = vpop.eup %11960  ;;  %v3840_v42 = vpack.c.bf16 %v11959_v35, %v11957_v46  ;;  %4359 = vmatprep.mubr.bf16.mxu1 %v15815_v9  ;;  %v11504_v46 = vld [vmem:[%s15698_s4 + $0xd0] sm:$0xff]   ;;  %v11505_v35 = vld [vmem:[%s15698_s4 + $0xd8] sm:$0xff]  }
 0x429   : > { %v3805_v60 = vmul.f32 %v11961_v26, %v3757_v39 }
 0x42a   : > { %10476 = vmatmul.mubr.bf16.vlgmr.msra.gmra.mrb[84].mxu0 %v3840_v42 }
 0x42b   : > { %4225 = vmatpush1.bf16.msra.mxu0 %v13915_v0  ;;  %11968 = vtanh.f32 %v3805_v60 }
 0x42c   : > { %v11963_v20 = vpop.eup %11962  ;;  %4226 = vmatprep.subr.bf16.mxu0 %v13920_v38 }
 0x42d   : > { %v3806_v8 = vmul.f32 %v11963_v20, %v3758_v27  ;;  %v11965_v51 = vpop.eup %11964 }
 0x42f   : > { %v11967_v3 = vpop.eup %11966  ;;  %4227 = vmatpush1.bf16.msra.mxu0 %v13927_v61  ;;  %11970 = vtanh.f32 %v3806_v8  ;;  %v4031_v10 = vpack.c.bf16 %v3806_v8, %v3805_v60 }
 0x430   : > { %4228 = vmatprep.subr.bf16.mxu0 %v13933_v53  ;;  %v3841_v31 = vpack.c.bf16 %v11967_v3, %v11965_v51 }
 0x431   : > { %4360 = vmatmul.mubr.bf16.gmra.mrb[136].mxu1 %v4031_v10 }
 0x432   : > { %10479 = vmatprep.mubr.bf16.mxu0 %v3841_v31  ;;  %5140 = vmatprep.mubr.bf16.mxu1 %v15815_v9 }
 0x433   : > { %4229 = vmatpush1.bf16.msra.mxu0 %v13939_v41 }
 0x434   : > { %4230 = vmatprep.subr.bf16.mxu0 %v13945_v24 }
 0x435   : > { %v11969_v14 = vpop.eup %11968 }
 0x437   : > { %4231 = vmatpush1.bf16.msra.mxu0 %v13952_v13 }
 0x438   : > { %4232 = vmatprep.subr.bf16.mxu0 %v13958_v40 }
 0x439   : > { %v11971_v54 = vpop.eup %11970 }
 0x43a   : > { %v3842_v44 = vpack.c.bf16 %v11971_v54, %v11969_v14 }
 0x43b   : > { %4233 = vmatpush1.bf16.msra.mxu0 %v13964_v22 }
 0x43c   : > { %10480 = vmatmul.mubr.bf16.gmra.mrb[88].mxu0 %v3842_v44  ;;  %4234 = vmatprep.subr.bf16.mxu0 %v13970_v45 }
 0x43d   : > { %4256 = vmatprep.mubr.bf16.mxu0 %v15815_v9 }
 0x43f   : > { %4235 = vmatpush1.bf16.msra.mxu0 %v13976_v21 }
 0x440   : > { %4236 = vmatprep.subr.bf16.mxu0 %v13982_v48 }
 0x443   : > { %4237 = vmatpush1.bf16.msra.mxu0 %v13989_v2 }
 0x444   : > { %4238 = vmatprep.subr.bf16.mxu0 %v13995_v37 }
 0x447   : > { %4239 = vmatpush1.bf16.msra.mxu0 %v14001_v49 }
 0x448   : > { %10483 = vmatprep.subr.bf16.mxu0 %v11499_v47 }
 0x44a   : > { %4257 = vmatmul.mubr.bf16.vlgmr.msra.gmra.mrb[48].mxu0 %v13890_v63  ;;  %v14022_v63 = vld [vmem:[%s15696_s2 + $0x2c] ss:$16 sps:$4 sm:$0xff]  }
 0x44b   : > { %4266 = vmatprep.mubr.bf16.mxu0 %v15815_v9  ;;  %5110 = vmatprep.subr.bf16.mxu1 %v14022_v63 }
 0x44c   : > { %10484 = vmatpush3.bf16.msra.mxu0 %v11499_v47 }
 0x452   : > { %4267 = vmatmul.mubr.bf16.gmra.mrb[52].mxu0 %v13903_v12  ;;  %v14027_v12 = vld [vmem:[%s15696_s2 + $0x28] ss:$16 sps:$4 sm:$0xff]  }
 0x453   : > { %4276 = vmatprep.mubr.bf16.mxu0 %v15815_v9  ;;  %5111 = vmatpush1.bf16.msra.mxu1 %v14027_v12 }
 0x454   : > { %5112 = vmatprep.subr.bf16.mxu1 %v14034_v33 }
 0x457   : > { %5113 = vmatpush1.bf16.msra.mxu1 %v14039_v43 }
 0x458   : > { %5114 = vmatprep.subr.bf16.mxu1 %v14046_v6 }
 0x45a   : > { %4277 = vmatmul.mubr.bf16.gmra.mrb[56].mxu0 %v4030_v7  ;;  %v11503_v7 = vld [vmem:[%s15698_s4 + $0xc8] sm:$0xff]  }
 0x45b   : > { %4286 = vmatprep.mubr.bf16.mxu0 %v15815_v9  ;;  %5115 = vmatpush1.bf16.msra.mxu1 %v14051_v30 }
 0x45c   : > { %5116 = vmatprep.subr.bf16.mxu1 %v14058_v4  ;;  %10485 = vmatprep.subr.bf16.mxu0 %v11503_v7 }
 0x45d   : > { %10486 = vmatpush3.bf16.msra.mxu0 %v11503_v7 }
 0x45e   : > { %10487 = vmatprep.subr.bf16.mxu0 %v11504_v46 }
 0x45f   : > { %5117 = vmatpush1.bf16.msra.mxu1 %v14063_v62 }
 0x460   : > { %5118 = vmatprep.subr.bf16.mxu1 %v14073_v25 }
 0x461   : > { %10488 = vmatpush3.bf16.msra.mxu0 %v11504_v46 }
 0x462   : > { %4287 = vmatmul.mubr.bf16.gmra.mrb[60].mxu0 %v4031_v10  ;;  %10489 = vmatprep.subr.bf16.mxu0 %v11505_v35 }
 0x463   : > { %5119 = vmatpush1.bf16.msra.mxu1 %v14078_v17 }
 0x464   : > { %5120 = vmatprep.subr.bf16.mxu1 %v13756_v57  ;;  %v11506_v57 = vld [vmem:[%s15698_s4 + $0xe0] sm:$0xff]  }
 0x465   : > { %10490 = vmatpush3.bf16.msra.mxu0 %v11505_v35 }
 0x466   : > { %10491 = vmatprep.subr.bf16.mxu0 %v11506_v57 }
 0x467   : > { %5121 = vmatpush1.bf16.msra.mxu1 %v13761_v32  ;;  %v11507_v32 = vld [vmem:[%s15698_s4 + $0xe8] sm:$0xff]  }
 0x468   : > { %5122 = vmatprep.subr.bf16.mxu1 %v13771_v23  ;;  %v11508_v23 = vld [vmem:[%s15698_s4 + $0xf0] sm:$0xff]  }
 0x469   : > { %10492 = vmatpush3.bf16.msra.mxu0 %v11506_v57 }
 0x46a   : > { %10493 = vmatprep.subr.bf16.mxu0 %v11507_v32 }
 0x46b   : > { %5123 = vmatpush1.bf16.msra.mxu1 %v13776_v18  ;;  %v11509_v18 = vld [vmem:[%s15698_s4 + $0xf8] sm:$0xff]  }
 0x46c   : > { %5919 = vmatprep.subr.bf16.mxu1 %v11486_v19 }
 0x46d   : > { %10494 = vmatpush3.bf16.msra.mxu0 %v11507_v32 }
 0x46e   : > { %10495 = vmatprep.subr.bf16.mxu0 %v11508_v23 }
 0x471   : > { %10496 = vmatpush3.bf16.msra.mxu0 %v11508_v23 }
 0x472   : > { %10497 = vmatprep.subr.bf16.mxu0 %v11509_v18 }
 0x475   : > { %10498 = vmatpush3.bf16.msra.mxu0 %v11509_v18 }
 0x476   : > { %5035 = vmatprep.subr.bf16.mxu0 %v13798_v52 }
 0x4ea   : > { %v4331_v29 = vpop.f32.mrb[124].mxu1 }
 0x4eb   : > { %v4333_v26 = vpop.f32.mrb[125].mxu1  ;;  %v10907_v7 = vadd.f32 %v4331_v29, %v13327_v16 }
 0x4ec   : > { %v4335_v39 = vpop.f32.mrb[126].mxu1  ;;  %v10908_v52 = vadd.f32 %v4333_v26, %v13329_v55 }
 0x4ed   : > { %v4337_v42 = vpop.f32.mrb[127].mxu1  ;;  %v10909_v46 = vadd.f32 %v4335_v39, %v13327_v16  ;;  %11972 = vtanh.f32 %v10907_v7 }
 0x4ee   : > { %v10910_v47 = vadd.f32 %v4337_v42, %v13329_v55  ;;  %v4538_v35 = vmul.f32 0.5, %v10908_v52 }
 0x4ef   : > { %11974 = vtanh.f32 %v10909_v46 }
 0x4f0   : > { %v4539_v57 = vmul.f32 0.5, %v10910_v47  ;;  %11976 = vtanh.f32 %v4538_v35 }
 0x4f2   : > { %v4341_v60 = vpop.f32.mrb[128].mxu1  ;;  %11978 = vtanh.f32 %v4539_v57 }
 0x4f3   : > { %v4343_v27 = vpop.f32.mrb[129].mxu1  ;;  %v10911_v32 = vadd.f32 %v4341_v60, %v13327_v16 }
 0x4f4   : > { %v4345_v20 = vpop.f32.mrb[130].mxu1  ;;  %v10912_v49 = vadd.f32 %v4343_v27, %v13329_v55 }
 0x4f5   : > { %v4347_v8 = vpop.f32.mrb[131].mxu1  ;;  %v10913_v23 = vadd.f32 %v4345_v20, %v13327_v16  ;;  %11980 = vtanh.f32 %v10911_v32 }
 0x4f6   : > { %v10914_v29 = vadd.f32 %v4347_v8, %v13329_v55  ;;  %v4540_v46 = vmul.f32 0.5, %v10912_v49 }
 0x4f7   : > { %11982 = vtanh.f32 %v10913_v23 }
 0x4f8   : > { %v4541_v35 = vmul.f32 0.5, %v10914_v29 }
 0x4fa   : > { %v4351_v51 = vpop.f32.mrb[132].mxu1 }
 0x4fb   : > { %v4353_v3 = vpop.f32.mrb[133].mxu1  ;;  %v10915_v8 = vadd.f32 %v4351_v51, %v13327_v16 }
 0x4fc   : > { %v4355_v10 = vpop.f32.mrb[134].mxu1  ;;  %v10916_v23 = vadd.f32 %v4353_v3, %v13329_v55 }
 0x4fd   : > { %v4357_v31 = vpop.f32.mrb[135].mxu1 }
 0x4fe   : > { %v10918_v29 = vadd.f32 %v4357_v31, %v13329_v55 }
 0x504   : > { %v14108_v14 = vpop.f32.mrb[136].mxu1 }
 0x505   : > { %v14110_v54 = vpop.f32.mrb[137].mxu1 }
 0x506   : > { %v14112_v44 = vpop.f32.mrb[138].mxu1 }
 0x507   : > { %v14114_v19 = vpop.f32.mrb[139].mxu1 }
 0x51d   : > { %v4258_v18 = vpop.f32.mrb[48].mxu0 }
 0x51e   : > { %v10687_v26 = vadd.f32 %v4258_v18, %v15833_v11  ;;  %v4260_v37 = vpop.f32.mrb[49].mxu0  ;;  %v11973_v18 = vpop.eup %11972 }
 0x51f   : > { %v10688_v39 = vadd.f32 %v4260_v37, %v15834_v36  ;;  %v4262_v42 = vpop.f32.mrb[50].mxu0  ;;  %v10917_v37 = vadd.f32 %v4355_v10, %v13327_v16  ;;  %v11975_v49 = vpop.eup %11974 }
 0x520   : > { %v4442_v52 = vmul.f32 0.5, %v10687_v26  ;;  %v10689_v60 = vadd.f32 %v4262_v42, %v15833_v11  ;;  %v4264_v47 = vpop.f32.mrb[51].mxu0  ;;  %v11977_v51 = vpop.eup %11976 }
 0x521   : > { %v4482_v20 = vmul.f32 0.5, %v10688_v39  ;;  %v10690_v7 = vadd.f32 %v4264_v47, %v15834_v36 }
 0x522   : > { %11984 = vtanh.f32 %v4442_v52  ;;  %v4443_v27 = vmul.f32 0.5, %v10689_v60 }
 0x523   : > { %11986 = vtanh.f32 %v4482_v20  ;;  %v4483_v57 = vmul.f32 0.5, %v10690_v7  ;;  %v14135_v20 = vpop.eup %11978 }
 0x524   : > { %11988 = vtanh.f32 %v4443_v27  ;;  %v4542_v27 = vmul.f32 0.5, %v10916_v23 }
 0x525   : > { %11990 = vtanh.f32 %v4483_v57  ;;  %v4268_v32 = vpop.f32.mrb[52].mxu0  ;;  %v4543_v57 = vmul.f32 0.5, %v10918_v29 }
 0x526   : > { %11992 = vtanh.f32 %v4540_v46  ;;  %v10691_v26 = vadd.f32 %v4268_v32, %v15833_v11  ;;  %v4270_v39 = vpop.f32.mrb[53].mxu0  ;;  %v14138_v46 = vpop.eup %11980 }
 0x527   : > { %11994 = vtanh.f32 %v4541_v35  ;;  %v10692_v42 = vadd.f32 %v4270_v39, %v15834_v36  ;;  %v4272_v52 = vpop.f32.mrb[54].mxu0  ;;  %v14140_v35 = vpop.eup %11982 }
 0x528   : > { %11996 = vtanh.f32 %v10915_v8  ;;  %v4444_v60 = vmul.f32 0.5, %v10691_v26  ;;  %v10693_v10 = vadd.f32 %v4272_v52, %v15833_v11  ;;  %v4274_v47 = vpop.f32.mrb[55].mxu0 }
 0x529   : > { %11998 = vtanh.f32 %v10917_v37  ;;  %v4484_v3 = vmul.f32 0.5, %v10692_v42  ;;  %v10694_v7 = vadd.f32 %v4274_v47, %v15834_v36 }
 0x52a   : > { %12000 = vtanh.f32 %v4444_v60  ;;  %v4445_v31 = vmul.f32 0.5, %v10693_v10 }
 0x52b   : > { %12002 = vtanh.f32 %v4484_v3  ;;  %v4485_v8 = vmul.f32 0.5, %v10694_v7 }
 0x52c   : > { %v11985_v32 = vpop.eup %11984  ;;  %12004 = vtanh.f32 %v4445_v31 }
 0x52d   : > { %v11987_v26 = vpop.eup %11986  ;;  %v4458_v39 = vmul.f32 0.5, %v11985_v32  ;;  %12006 = vtanh.f32 %v4485_v8  ;;  %v4278_v52 = vpop.f32.mrb[56].mxu0 }
 0x52e   : > { %v11989_v37 = vpop.eup %11988  ;;  %12008 = vtanh.f32 %v4542_v27  ;;  %v4498_v42 = vmul.f32 0.5, %v11987_v26  ;;  %v10695_v47 = vadd.f32 %v4278_v52, %v15833_v11  ;;  %v4280_v2 = vpop.f32.mrb[57].mxu0 }
 0x52f   : > { %v11991_v23 = vpop.eup %11990  ;;  %12010 = vtanh.f32 %v4543_v57  ;;  %v4466_v60 = vadd.f32 0.5, %v4458_v39  ;;  %v4459_v10 = vmul.f32 0.5, %v11989_v37  ;;  %v10696_v29 = vadd.f32 %v4280_v2, %v15834_v36  ;;  %v4282_v3 = vpop.f32.mrb[58].mxu0 }
 0x530   : > { %v14144_v7 = vpop.eup %11992  ;;  %v4506_v31 = vadd.f32 0.5, %v4498_v42  ;;  %v4499_v48 = vmul.f32 0.5, %v11991_v23  ;;  %v4446_v32 = vmul.f32 0.5, %v10695_v47  ;;  %v10697_v8 = vadd.f32 %v4282_v3, %v15833_v11  ;;  %v4284_v21 = vpop.f32.mrb[59].mxu0 }
 0x531   : > { %v14147_v27 = vpop.eup %11994  ;;  %v4586_v26 = vmul.f32 %v11973_v18, %v4466_v60  ;;  %v4467_v52 = vadd.f32 0.5, %v4459_v10  ;;  %v4486_v45 = vmul.f32 0.5, %v10696_v29  ;;  %v10698_v57 = vadd.f32 %v4284_v21, %v15834_v36 }
 0x532   : > { %v14150_v39 = vpop.eup %11996  ;;  %v4578_v2 = vmul.f32 %v4506_v31, %v13848_v50  ;;  %v4507_v37 = vadd.f32 0.5, %v4499_v48  ;;  %12012 = vtanh.f32 %v4446_v32  ;;  %v4447_v22 = vmul.f32 0.5, %v10697_v8 }
 0x533   : > { %v14153_v42 = vpop.eup %11998  ;;  %v4587_v47 = vmul.f32 %v11975_v49, %v4467_v52  ;;  %12014 = vtanh.f32 %v4486_v45  ;;  %v4487_v23 = vmul.f32 0.5, %v10698_v57  ;;  %v4554_v21 = vmul.f32 0.5, %v11977_v51 }
 0x534   : > { %v12001_v3 = vpop.eup %12000  ;;  %v14155_v40 = vadd.f32 %v4586_v26, %v4578_v2  ;;  %v4579_v18 = vmul.f32 %v4507_v37, %v13852_v59  ;;  %12016 = vtanh.f32 %v4447_v22  ;;  %v10919_v8 = vadd.f32 %v14108_v14, %v13327_v16 }
 0x535   : > { %v12003_v60 = vpop.eup %12002  ;;  %v4460_v10 = vmul.f32 0.5, %v12001_v3  ;;  %12018 = vtanh.f32 %v4487_v23  ;;  %v4288_v29 = vpop.f32.mrb[60].mxu0 }
 0x536   : > { %v12005_v50 = vpop.eup %12004  ;;  %12020 = vtanh.f32 %v14155_v40  ;;  %v14159_v48 = vadd.f32 %v4587_v47, %v4579_v18  ;;  %v4500_v31 = vmul.f32 0.5, %v12003_v60  ;;  %v10699_v45 = vadd.f32 %v4288_v29, %v15833_v11  ;;  %v4290_v49 = vpop.f32.mrb[61].mxu0 }
 0x537   : > { %v12007_v32 = vpop.eup %12006  ;;  %v4468_v59 = vadd.f32 0.5, %v4460_v10  ;;  %v4461_v22 = vmul.f32 0.5, %v12005_v50  ;;  %v10700_v51 = vadd.f32 %v4290_v49, %v15834_v36  ;;  %v4292_v26 = vpop.f32.mrb[62].mxu0  ;;  %v4555_v49 = vmul.f32 0.5, %v14135_v20 }
 0x538   : > { %15844 = vst [vmem:[#allocation91_spill] sm:$0xff] %v14159_v48  ;;  %v14165_v52 = vpop.eup %12008  ;;  %12022 = vtanh.f32 %v14159_v48  ;;  %v4508_v57 = vadd.f32 0.5, %v4500_v31  ;;  %v4501_v2 = vmul.f32 0.5, %v12007_v32  ;;  %v4448_v37 = vmul.f32 0.5, %v10699_v45  ;;  %v4294_v47 = vpop.f32.mrb[63].mxu0 }
 0x539   : > { %v14168_v23 = vpop.eup %12010  ;;  %v4588_v3 = vmul.f32 %v14138_v46, %v4468_v59  ;;  %v4469_v18 = vadd.f32 0.5, %v4461_v22  ;;  %v4488_v60 = vmul.f32 0.5, %v10700_v51  ;;  %v10701_v14 = vadd.f32 %v4292_v26, %v15833_v11 }
 0x53a   : > { %v4580_v10 = vmul.f32 %v4508_v57, %v13869_v1  ;;  %v4509_v29 = vadd.f32 0.5, %v4501_v2  ;;  %12024 = vtanh.f32 %v4448_v37  ;;  %v10702_v50 = vadd.f32 %v4294_v47, %v15834_v36 }
 0x53b   : > { %v4589_v31 = vmul.f32 %v14140_v35, %v4469_v18  ;;  %12026 = vtanh.f32 %v4488_v60  ;;  %v4449_v45 = vmul.f32 0.5, %v10701_v14  ;;  %v10921_v1 = vadd.f32 %v14112_v44, %v13327_v16 }
 0x53c   : > { %v12013_v32 = vpop.eup %12012  ;;  %12028 = vtanh.f32 %v10919_v8  ;;  %v14176_v48 = vadd.f32 %v4588_v3, %v4580_v10  ;;  %v4581_v46 = vmul.f32 %v4509_v29, %v13875_v5  ;;  %v4489_v59 = vmul.f32 0.5, %v10702_v50 }
 0x53d   : > { %v12015_v22 = vpop.eup %12014  ;;  %v4462_v51 = vmul.f32 0.5, %v12013_v32  ;;  %12030 = vtanh.f32 %v4449_v45  ;;  %v4562_v57 = vadd.f32 0.5, %v4554_v21  ;;  %v10920_v8 = vadd.f32 %v14110_v54, %v13329_v55 }
 0x53e   : > { %v12017_v26 = vpop.eup %12016  ;;  %12032 = vtanh.f32 %v14176_v48  ;;  %v14182_v20 = vadd.f32 %v4589_v31, %v4581_v46  ;;  %v4502_v35 = vmul.f32 0.5, %v12015_v22  ;;  %v4563_v3 = vadd.f32 0.5, %v4555_v49 }
 0x53f   : > { %v12019_v2 = vpop.eup %12018  ;;  %v4470_v37 = vadd.f32 0.5, %v4462_v51  ;;  %v4463_v5 = vmul.f32 0.5, %v12017_v26  ;;  %12034 = vtanh.f32 %v4489_v59  ;;  %v10922_v29 = vadd.f32 %v14114_v19, %v13329_v55 }
 0x540   : > { %v12021_v47 = vpop.eup %12020  ;;  %12036 = vtanh.f32 %v14182_v20  ;;  %v4510_v44 = vadd.f32 0.5, %v4502_v35  ;;  %v4503_v18 = vmul.f32 0.5, %v12019_v2  ;;  %v4556_v31 = vmul.f32 0.5, %v14144_v7 }
 0x541   : > { %12038 = vtanh.f32 %v10921_v1  ;;  %v4590_v21 = vmul.f32 %v14150_v39, %v4470_v37  ;;  %v4471_v60 = vadd.f32 0.5, %v4463_v5  ;;  %v4610_v14 = vmul.f32 %v12021_v47, %v4562_v57 }
 0x542   : > { %v12023_v10 = vpop.eup %12022  ;;  %v4582_v54 = vmul.f32 %v4510_v44, %v13886_v34  ;;  %v4511_v50 = vadd.f32 0.5, %v4503_v18  ;;  %v4544_v45 = vmul.f32 0.5, %v10920_v8  ;;  %v4557_v1 = vmul.f32 0.5, %v14147_v27 }
 0x543   : > { %v4591_v49 = vmul.f32 %v14153_v42, %v4471_v60  ;;  %v4611_v32 = vmul.f32 %v12023_v10, %v4563_v3  ;;  %12040 = vtanh.f32 %v4610_v14  ;;  %v4545_v26 = vmul.f32 0.5, %v10922_v29 }
 0x544   : > { %v12025_v46 = vpop.eup %12024  ;;  %v14193_v59 = vadd.f32 %v4590_v21, %v4582_v54  ;;  %v4583_v39 = vmul.f32 %v4511_v50, %v13893_v15  ;;  %v4564_v35 = vadd.f32 0.5, %v4556_v31  ;;  %v4565_v5 = vadd.f32 0.5, %v4557_v1 }
 0x545   : > { %v12027_v22 = vpop.eup %12026  ;;  %v4464_v51 = vmul.f32 0.5, %v12025_v46  ;;  %v14197_v19 = vpack.c.bf16 %v4611_v32, %v4610_v14  ;;  %12042 = vtanh.f32 %v4611_v32  ;;  %v4558_v10 = vmul.f32 0.5, %v14165_v52 }
 0x546   : > { %v12029_v34 = vpop.eup %12028  ;;  %12044 = vtanh.f32 %v14193_v59  ;;  %v14200_v7 = vadd.f32 %v4591_v49, %v4583_v39  ;;  %v4504_v42 = vmul.f32 0.5, %v12027_v22  ;;  %v4559_v31 = vmul.f32 0.5, %v14168_v23 }
 0x547   : > { %v12031_v57 = vpop.eup %12030  ;;  %12046 = vtanh.f32 %v4544_v45  ;;  %v4472_v2 = vadd.f32 0.5, %v4464_v51  ;;  %5141 = vmatmul.mubr.bf16.vlgmr.msra.gmra.mrb[140].mxu1 %v14197_v19  ;;  %v4566_v49 = vadd.f32 0.5, %v4558_v10  ;;  %v11519_v10 = vld [vmem:[%s15698_s4 + $0x118] sm:$0xff]  }
 0x548   : > { %v12033_v15 = vpop.eup %12032  ;;  %12048 = vtanh.f32 %v14200_v7  ;;  %v4512_v27 = vadd.f32 0.5, %v4504_v42  ;;  %v4465_v8 = vmul.f32 0.5, %v12031_v57  ;;  %5150 = vmatprep.mubr.bf16.mxu1 %v15815_v9  ;;  %5920 = vmatpush1.bf16.msra.mxu1 %v14016_v56  ;;  %v4567_v39 = vadd.f32 0.5, %v4559_v31  ;;  %v11523_v31 = vld [vmem:[%s15698_s4 + $0x138] sm:$0xff]  }
 0x549   : > { %v12035_v37 = vpop.eup %12034  ;;  %v4592_v47 = vmul.f32 %v12029_v34, %v4472_v2  ;;  %v4612_v3 = vmul.f32 %v12033_v15, %v4564_v35  ;;  %5921 = vmatprep.subr.bf16.mxu1 %v14022_v63  ;;  %12050 = vtanh.f32 %v4545_v26 }
 0x54a   : > { %v12037_v44 = vpop.eup %12036  ;;  %v4584_v18 = vmul.f32 %v4512_v27, %v13900_v58  ;;  %v4473_v21 = vadd.f32 0.5, %v4465_v8  ;;  %v4505_v60 = vmul.f32 0.5, %v12035_v37  ;;  %v15846_v37 = vld [vmem:[#allocation86_spill] sm:$0xff] }
 0x54b   : > { %v12039_v14 = vpop.eup %12038  ;;  %v4613_v29 = vmul.f32 %v12037_v44, %v4565_v5  ;;  %12052 = vtanh.f32 %v4612_v3  ;;  %v15848_v5 = vld [vmem:[#allocation88_spill] sm:$0xff] }
 0x54c   : > { %v14209_v54 = vadd.f32 %v4592_v47, %v4584_v18  ;;  %v4593_v50 = vmul.f32 %v12039_v14, %v4473_v21  ;;  %v4513_v56 = vadd.f32 0.5, %v4505_v60  ;;  %5922 = vmatpush1.bf16.msra.mxu1 %v14027_v12  ;;  %v15849_v47 = vld [vmem:[#allocation75_spill] sm:$0xff]  ;;  %v14262_v44 = vld [vmem:[%s15696_s2 + $0xcc] ss:$16 sps:$4 sm:$0xff]   ;;  %v14267_v18 = vld [vmem:[%s15696_s2 + $0xc8] ss:$16 sps:$4 sm:$0xff]  }
 0x54d   : > { %12054 = vtanh.f32 %v4613_v29  ;;  %v14213_v63 = vpack.c.bf16 %v4613_v29, %v4612_v3  ;;  %5923 = vmatprep.subr.bf16.mxu1 %v14034_v33  ;;  %v12041_v58 = vpop.eup %12040  ;;  %v11510_v3 = vld [vmem:[%s15698_s4 + $0x100] sm:$0xff]   ;;  %v11515_v21 = vld [vmem:[%s15698_s4 + $0x110] sm:$0xff]   ;;  %v14277_v60 = vld [vmem:[%s15696_s2 + $0xec] ss:$16 sps:$4 sm:$0xff]  }
 0x54e   : > { %12056 = vtanh.f32 %v14209_v54  ;;  %v4585_v52 = vmul.f32 %v4513_v56, %v13908_v28  ;;  %v14282_v14 = vld [vmem:[%s15696_s2 + $0xe8] ss:$16 sps:$4 sm:$0xff]   ;;  %v11520_v29 = vld [vmem:[%s15698_s4 + $0x120] sm:$0xff]   ;;  %v11522_v56 = vld [vmem:[%s15698_s4 + $0x130] sm:$0xff]  }
 0x54f   : > { %v12043_v45 = vpop.eup %12042  ;;  %5151 = vmatmul.mubr.bf16.gmra.mrb[144].mxu1 %v14213_v63 }
 0x550   : > { %v12045_v32 = vpop.eup %12044  ;;  %v14219_v46 = vadd.f32 %v4593_v50, %v4585_v52  ;;  %v4650_v12 = vpack.c.bf16 %v12043_v45, %v12041_v58  ;;  %5160 = vmatprep.mubr.bf16.mxu1 %v15815_v9  ;;  %5924 = vmatpush1.bf16.msra.mxu1 %v14039_v43  ;;  %v11521_v50 = vld [vmem:[%s15698_s4 + $0x128] sm:$0xff]  }
 0x551   : > { %v12047_v23 = vpop.eup %12046  ;;  %v4614_v33 = vmul.f32 %v12045_v32, %v4566_v49  ;;  %5925 = vmatprep.subr.bf16.mxu1 %v14046_v6 }
 0x552   : > { %v12049_v22 = vpop.eup %12048  ;;  %12058 = vtanh.f32 %v14219_v46  ;;  %10499 = vmatprep.mubr.bf16.mxu0 %v4650_v12  ;;  %v4560_v51 = vmul.f32 0.5, %v12047_v23 }
 0x553   : > { %v4615_v28 = vmul.f32 %v12049_v22, %v4567_v39  ;;  %v12051_v1 = vpop.eup %12050  ;;  %12060 = vtanh.f32 %v4614_v33 }
 0x554   : > { %5926 = vmatpush1.bf16.msra.mxu1 %v14051_v30  ;;  %v4561_v42 = vmul.f32 0.5, %v12051_v1  ;;  %v4568_v6 = vadd.f32 0.5, %v4560_v51 }
 0x555   : > { %12062 = vtanh.f32 %v4615_v28  ;;  %v4841_v34 = vpack.c.bf16 %v4615_v28, %v4614_v33  ;;  %5927 = vmatprep.subr.bf16.mxu1 %v14058_v4  ;;  %v12053_v43 = vpop.eup %12052 }
 0x556   : > { %v4569_v30 = vadd.f32 0.5, %v4561_v42 }
 0x557   : > { %v12055_v26 = vpop.eup %12054  ;;  %5161 = vmatmul.mubr.bf16.gmra.mrb[148].mxu1 %v4841_v34 }
 0x558   : > { %v12057_v57 = vpop.eup %12056  ;;  %v4651_v35 = vpack.c.bf16 %v12055_v26, %v12053_v43  ;;  %5170 = vmatprep.mubr.bf16.mxu1 %v15815_v9  ;;  %5928 = vmatpush1.bf16.msra.mxu1 %v14063_v62 }
 0x559   : > { %5929 = vmatprep.subr.bf16.mxu1 %v14073_v25  ;;  %v4616_v2 = vmul.f32 %v12057_v57, %v4568_v6 }
 0x55a   : > { %10500 = vmatmul.mubr.bf16.vlgmr.msra.gmra.mrb[84].mxu0 %v4651_v35 }
 0x55b   : > { %5036 = vmatpush1.bf16.msra.mxu0 %v13915_v0  ;;  %12064 = vtanh.f32 %v4616_v2 }
 0x55c   : > { %v12059_v15 = vpop.eup %12058  ;;  %5037 = vmatprep.subr.bf16.mxu0 %v13920_v38  ;;  %5930 = vmatpush1.bf16.msra.mxu1 %v14078_v17  ;;  %v15845_v38 = vld [vmem:[#allocation85_spill] sm:$0xff] }
 0x55d   : > { %v4617_v4 = vmul.f32 %v12059_v15, %v4569_v30  ;;  %v12061_v27 = vpop.eup %12060  ;;  %5931 = vmatprep.subr.bf16.mxu1 %v14262_v44 }
 0x55f   : > { %v12063_v8 = vpop.eup %12062  ;;  %5038 = vmatpush1.bf16.msra.mxu0 %v13927_v61  ;;  %12066 = vtanh.f32 %v4617_v4  ;;  %v4842_v62 = vpack.c.bf16 %v4617_v4, %v4616_v2 }
 0x560   : > { %5039 = vmatprep.subr.bf16.mxu0 %v13933_v53  ;;  %v4652_v25 = vpack.c.bf16 %v12063_v8, %v12061_v27  ;;  %v15847_v53 = vld [vmem:[#allocation87_spill] sm:$0xff]  ;;  %5932 = vmatpush1.bf16.msra.mxu1 %v14267_v18 }
 0x561   : > { %5171 = vmatmul.mubr.bf16.gmra.mrb[152].mxu1 %v4842_v62  ;;  %5933 = vmatprep.subr.bf16.mxu1 %v14277_v60 }
 0x562   : > { %10503 = vmatprep.mubr.bf16.mxu0 %v4652_v25  ;;  %5951 = vmatprep.mubr.bf16.mxu1 %v15815_v9 }
 0x563   : > { %5040 = vmatpush1.bf16.msra.mxu0 %v13939_v41  ;;  %v15850_v41 = vld [vmem:[#allocation76_spill] sm:$0xff] }
 0x564   : > { %5041 = vmatprep.subr.bf16.mxu0 %v13945_v24  ;;  %v15851_v24 = vld [vmem:[#allocation89_spill] sm:$0xff]  ;;  %5934 = vmatpush1.bf16.msra.mxu1 %v14282_v14 }
 0x565   : > { %v12065_v0 = vpop.eup %12064 }
 0x567   : > { %5042 = vmatpush1.bf16.msra.mxu0 %v13952_v13  ;;  %v15852_v13 = vld [vmem:[#allocation90_spill] sm:$0xff] }
 0x568   : > { %5043 = vmatprep.subr.bf16.mxu0 %v15845_v38 }
 0x569   : > { %v12067_v17 = vpop.eup %12066 }
 0x56a   : > { %v4653_v61 = vpack.c.bf16 %v12067_v17, %v12065_v0 }
 0x56b   : > { %5044 = vmatpush1.bf16.msra.mxu0 %v15846_v37 }
 0x56c   : > { %10504 = vmatmul.mubr.bf16.gmra.mrb[88].mxu0 %v4653_v61  ;;  %5045 = vmatprep.subr.bf16.mxu0 %v15847_v53 }
 0x56d   : > { %5067 = vmatprep.mubr.bf16.mxu0 %v15815_v9 }
 0x56f   : > { %5046 = vmatpush1.bf16.msra.mxu0 %v15848_v5 }
 0x570   : > { %5047 = vmatprep.subr.bf16.mxu0 %v15849_v47 }
 0x573   : > { %5048 = vmatpush1.bf16.msra.mxu0 %v15850_v41 }
 0x574   : > { %5049 = vmatprep.subr.bf16.mxu0 %v15851_v24 }
 0x577   : > { %5050 = vmatpush1.bf16.msra.mxu0 %v15852_v13 }
 0x578   : > { %10507 = vmatprep.subr.bf16.mxu0 %v11510_v3 }
 0x57a   : > { %5068 = vmatmul.mubr.bf16.vlgmr.msra.gmra.mrb[64].mxu0 %v14197_v19  ;;  %v11511_v19 = vld [vmem:[%s15698_s4 + $0x108] sm:$0xff]  }
 0x57b   : > { %5077 = vmatprep.mubr.bf16.mxu0 %v15815_v9  ;;  %10508 = vmatpush3.bf16.msra.mxu0 %v11510_v3 }
 0x57c   : > { %10509 = vmatprep.subr.bf16.mxu0 %v11511_v19 }
 0x57f   : > { %10510 = vmatpush3.bf16.msra.mxu0 %v11511_v19 }
 0x580   : > { %10511 = vmatprep.subr.bf16.mxu0 %v11515_v21 }
 0x582   : > { %5078 = vmatmul.mubr.bf16.gmra.mrb[68].mxu0 %v14213_v63  ;;  %v14304_v63 = vld [vmem:[%s15696_s2 + $0x4] ss:$16 sps:$4 sm:$0xff]  }
 0x583   : > { %5087 = vmatprep.mubr.bf16.mxu0 %v15815_v9  ;;  %10512 = vmatpush3.bf16.msra.mxu0 %v11515_v21 }
 0x584   : > { %10513 = vmatprep.subr.bf16.mxu0 %v11519_v10 }
 0x587   : > { %10514 = vmatpush3.bf16.msra.mxu0 %v11519_v10 }
 0x588   : > { %10515 = vmatprep.subr.bf16.mxu0 %v11520_v29 }
 0x58a   : > { %5088 = vmatmul.mubr.bf16.gmra.mrb[72].mxu0 %v4841_v34 }
 0x58b   : > { %5097 = vmatprep.mubr.bf16.mxu0 %v15815_v9  ;;  %10516 = vmatpush3.bf16.msra.mxu0 %v11520_v29 }
 0x58c   : > { %10517 = vmatprep.subr.bf16.mxu0 %v11521_v50 }
 0x58f   : > { %10518 = vmatpush3.bf16.msra.mxu0 %v11521_v50 }
 0x590   : > { %10519 = vmatprep.subr.bf16.mxu0 %v11522_v56 }
 0x592   : > { %5098 = vmatmul.mubr.bf16.gmra.mrb[76].mxu0 %v4842_v62 }
 0x593   : > { %10520 = vmatpush3.bf16.msra.mxu0 %v11522_v56 }
 0x594   : > { %10521 = vmatprep.subr.bf16.mxu0 %v11523_v31 }
 0x597   : > { %10522 = vmatpush3.bf16.msra.mxu0 %v11523_v31 }
 0x598   : > { %5846 = vmatprep.subr.bf16.mxu0 %v14304_v63 }
 0x61a   : > { %v5142_v58 = vpop.f32.mrb[140].mxu1 }
 0x61b   : > { %v5144_v52 = vpop.f32.mrb[141].mxu1  ;;  %v10923_v6 = vadd.f32 %v5142_v58, %v13327_v16 }
 0x61c   : > { %v5146_v45 = vpop.f32.mrb[142].mxu1  ;;  %v10924_v42 = vadd.f32 %v5144_v52, %v13329_v55 }
 0x61d   : > { %v5148_v49 = vpop.f32.mrb[143].mxu1  ;;  %v10925_v35 = vadd.f32 %v5146_v45, %v13327_v16  ;;  %12068 = vtanh.f32 %v10923_v6 }
 0x61e   : > { %v10926_v57 = vadd.f32 %v5148_v49, %v13329_v55  ;;  %v5349_v2 = vmul.f32 0.5, %v10924_v42 }
 0x61f   : > { %12070 = vtanh.f32 %v10925_v35 }
 0x620   : > { %v5350_v30 = vmul.f32 0.5, %v10926_v57  ;;  %12072 = vtanh.f32 %v5349_v2 }
 0x622   : > { %v5152_v32 = vpop.f32.mrb[144].mxu1  ;;  %12074 = vtanh.f32 %v5350_v30 }
 0x623   : > { %v5154_v12 = vpop.f32.mrb[145].mxu1  ;;  %v10927_v15 = vadd.f32 %v5152_v32, %v13327_v16 }
 0x624   : > { %v5156_v23 = vpop.f32.mrb[146].mxu1  ;;  %v10928_v8 = vadd.f32 %v5154_v12, %v13329_v55 }
 0x625   : > { %v5158_v39 = vpop.f32.mrb[147].mxu1  ;;  %v10929_v4 = vadd.f32 %v5156_v23, %v13327_v16  ;;  %12076 = vtanh.f32 %v10927_v15 }
 0x626   : > { %v10930_v0 = vadd.f32 %v5158_v39, %v13329_v55  ;;  %v5351_v41 = vmul.f32 0.5, %v10928_v8 }
 0x627   : > { %12078 = vtanh.f32 %v10929_v4  ;;  %v12069_v29 = vpop.eup %12068 }
 0x628   : > { %v5352_v13 = vmul.f32 0.5, %v10930_v0 }
 0x629   : > { %v12071_v58 = vpop.eup %12070 }
 0x62a   : > { %v5162_v33 = vpop.f32.mrb[148].mxu1  ;;  %v12073_v32 = vpop.eup %12072 }
 0x62b   : > { %v5164_v22 = vpop.f32.mrb[149].mxu1  ;;  %v10931_v19 = vadd.f32 %v5162_v33, %v13327_v16 }
 0x62c   : > { %v5166_v28 = vpop.f32.mrb[150].mxu1  ;;  %v10932_v50 = vadd.f32 %v5164_v22, %v13329_v55  ;;  %v14334_v33 = vpop.eup %12074 }
 0x62d   : > { %v5168_v1 = vpop.f32.mrb[151].mxu1  ;;  %v10933_v21 = vadd.f32 %v5166_v28, %v13327_v16 }
 0x62e   : > { %v10934_v52 = vadd.f32 %v5168_v1, %v13329_v55  ;;  %v5353_v57 = vmul.f32 0.5, %v10932_v50 }
 0x62f   : > { %v14337_v42 = vpop.eup %12076 }
 0x630   : > { %v5354_v35 = vmul.f32 0.5, %v10934_v52 }
 0x631   : > { %v14339_v6 = vpop.eup %12078 }
 0x634   : > { %v14307_v51 = vpop.f32.mrb[152].mxu1 }
 0x635   : > { %v14309_v34 = vpop.f32.mrb[153].mxu1 }
 0x636   : > { %v14311_v43 = vpop.f32.mrb[154].mxu1 }
 0x637   : > { %v14313_v26 = vpop.f32.mrb[155].mxu1 }
 0x64d   : > { %v5069_v27 = vpop.f32.mrb[64].mxu0 }
 0x64e   : > { %v10703_v62 = vadd.f32 %v5069_v27, %v15833_v11  ;;  %v5071_v25 = vpop.f32.mrb[65].mxu0 }
 0x64f   : > { %v10704_v38 = vadd.f32 %v5071_v25, %v15834_v36  ;;  %v5073_v17 = vpop.f32.mrb[66].mxu0 }
 0x650   : > { %v5253_v61 = vmul.f32 0.5, %v10703_v62  ;;  %v10705_v37 = vadd.f32 %v5073_v17, %v15833_v11  ;;  %v5075_v53 = vpop.f32.mrb[67].mxu0 }
 0x651   : > { %v5293_v5 = vmul.f32 0.5, %v10704_v38  ;;  %v10706_v47 = vadd.f32 %v5075_v53, %v15834_v36 }
 0x652   : > { %12080 = vtanh.f32 %v5253_v61  ;;  %v5254_v24 = vmul.f32 0.5, %v10705_v37 }
 0x653   : > { %12082 = vtanh.f32 %v5293_v5  ;;  %v5294_v3 = vmul.f32 0.5, %v10706_v47 }
 0x654   : > { %12084 = vtanh.f32 %v5254_v24 }
 0x655   : > { %12086 = vtanh.f32 %v5294_v3  ;;  %v5079_v10 = vpop.f32.mrb[68].mxu0 }
 0x656   : > { %12088 = vtanh.f32 %v5351_v41  ;;  %v10707_v56 = vadd.f32 %v5079_v10, %v15833_v11  ;;  %v5081_v31 = vpop.f32.mrb[69].mxu0 }
 0x657   : > { %12090 = vtanh.f32 %v5352_v13  ;;  %v10708_v45 = vadd.f32 %v5081_v31, %v15834_v36  ;;  %v5083_v49 = vpop.f32.mrb[70].mxu0 }
 0x658   : > { %12092 = vtanh.f32 %v10931_v19  ;;  %v5255_v12 = vmul.f32 0.5, %v10707_v56  ;;  %v10709_v23 = vadd.f32 %v5083_v49, %v15833_v11  ;;  %v5085_v39 = vpop.f32.mrb[71].mxu0 }
 0x659   : > { %12094 = vtanh.f32 %v10933_v21  ;;  %v5295_v22 = vmul.f32 0.5, %v10708_v45  ;;  %v10710_v28 = vadd.f32 %v5085_v39, %v15834_v36 }
 0x65a   : > { %12096 = vtanh.f32 %v5255_v12  ;;  %v5256_v1 = vmul.f32 0.5, %v10709_v23 }
 0x65b   : > { %12098 = vtanh.f32 %v5295_v22  ;;  %v5296_v2 = vmul.f32 0.5, %v10710_v28 }
 0x65c   : > { %v12081_v30 = vpop.eup %12080  ;;  %12100 = vtanh.f32 %v5256_v1 }
 0x65d   : > { %v12083_v15 = vpop.eup %12082  ;;  %v5269_v4 = vmul.f32 0.5, %v12081_v30  ;;  %12102 = vtanh.f32 %v5296_v2  ;;  %v5089_v27 = vpop.f32.mrb[72].mxu0 }
 0x65e   : > { %v12085_v8 = vpop.eup %12084  ;;  %12104 = vtanh.f32 %v5353_v57  ;;  %v5309_v62 = vmul.f32 0.5, %v12083_v15  ;;  %v10711_v25 = vadd.f32 %v5089_v27, %v15833_v11  ;;  %v5091_v0 = vpop.f32.mrb[73].mxu0 }
 0x65f   : > { %v12087_v38 = vpop.eup %12086  ;;  %12106 = vtanh.f32 %v5354_v35  ;;  %v5277_v17 = vadd.f32 0.5, %v5269_v4  ;;  %v5270_v61 = vmul.f32 0.5, %v12085_v8  ;;  %v10712_v37 = vadd.f32 %v5091_v0, %v15834_v36  ;;  %v5093_v53 = vpop.f32.mrb[74].mxu0 }
 0x660   : > { %v14343_v5 = vpop.eup %12088  ;;  %v5317_v47 = vadd.f32 0.5, %v5309_v62  ;;  %v5310_v41 = vmul.f32 0.5, %v12087_v38  ;;  %v5257_v24 = vmul.f32 0.5, %v10711_v25  ;;  %v10713_v13 = vadd.f32 %v5093_v53, %v15833_v11  ;;  %v5095_v3 = vpop.f32.mrb[75].mxu0 }
 0x661   : > { %v14346_v19 = vpop.eup %12090  ;;  %v5397_v21 = vmul.f32 %v12069_v29, %v5277_v17  ;;  %v5278_v10 = vadd.f32 0.5, %v5270_v61  ;;  %v5297_v50 = vmul.f32 0.5, %v10712_v37  ;;  %v10714_v56 = vadd.f32 %v5095_v3, %v15834_v36  ;;  %v15853_v29 = vld [vmem:[#allocation91_spill] sm:$0xff] }
 0x662   : > { %v14349_v31 = vpop.eup %12092  ;;  %v5389_v52 = vmul.f32 %v5317_v47, %v14155_v40  ;;  %v5318_v45 = vadd.f32 0.5, %v5310_v41  ;;  %12108 = vtanh.f32 %v5257_v24  ;;  %v5258_v49 = vmul.f32 0.5, %v10713_v13 }
 0x663   : > { %v14352_v12 = vpop.eup %12094  ;;  %v5398_v23 = vmul.f32 %v12071_v58, %v5278_v10  ;;  %12110 = vtanh.f32 %v5297_v50  ;;  %v5298_v39 = vmul.f32 0.5, %v10714_v56  ;;  %v5365_v35 = vmul.f32 0.5, %v12073_v32 }
 0x664   : > { %v12097_v22 = vpop.eup %12096  ;;  %v14354_v28 = vadd.f32 %v5397_v21, %v5389_v52  ;;  %v5390_v57 = vmul.f32 %v5318_v45, %v15853_v29  ;;  %12112 = vtanh.f32 %v5258_v49  ;;  %v10935_v62 = vadd.f32 %v14307_v51, %v13327_v16 }
 0x665   : > { %v12099_v1 = vpop.eup %12098  ;;  %v5271_v2 = vmul.f32 0.5, %v12097_v22  ;;  %12114 = vtanh.f32 %v5298_v39  ;;  %v5099_v30 = vpop.f32.mrb[76].mxu0  ;;  %v5366_v56 = vmul.f32 0.5, %v14334_v33 }
 0x666   : > { %v12101_v40 = vpop.eup %12100  ;;  %12116 = vtanh.f32 %v14354_v28  ;;  %v14358_v15 = vadd.f32 %v5398_v23, %v5390_v57  ;;  %v5311_v4 = vmul.f32 0.5, %v12099_v1  ;;  %v10715_v58 = vadd.f32 %v5099_v30, %v15833_v11  ;;  %v5101_v27 = vpop.f32.mrb[77].mxu0 }
 0x667   : > { %v12103_v8 = vpop.eup %12102  ;;  %v5279_v25 = vadd.f32 0.5, %v5271_v2  ;;  %v5272_v0 = vmul.f32 0.5, %v12101_v40  ;;  %v10716_v32 = vadd.f32 %v5101_v27, %v15834_v36  ;;  %v5103_v38 = vpop.f32.mrb[78].mxu0  ;;  %v5373_v1 = vadd.f32 0.5, %v5365_v35 }
 0x668   : > { %v14364_v17 = vpop.eup %12104  ;;  %12118 = vtanh.f32 %v14358_v15  ;;  %v5319_v61 = vadd.f32 0.5, %v5311_v4  ;;  %v5312_v37 = vmul.f32 0.5, %v12103_v8  ;;  %v5259_v53 = vmul.f32 0.5, %v10715_v58  ;;  %v5105_v47 = vpop.f32.mrb[79].mxu0 }
 0x669   : > { %v14367_v41 = vpop.eup %12106  ;;  %v5399_v24 = vmul.f32 %v14337_v42, %v5279_v25  ;;  %v5280_v13 = vadd.f32 0.5, %v5272_v0  ;;  %v5299_v3 = vmul.f32 0.5, %v10716_v32  ;;  %v10717_v51 = vadd.f32 %v5103_v38, %v15833_v11 }
 0x66a   : > { %v5391_v21 = vmul.f32 %v5319_v61, %v14176_v48  ;;  %v5320_v10 = vadd.f32 0.5, %v5312_v37  ;;  %12120 = vtanh.f32 %v5259_v53  ;;  %v10718_v50 = vadd.f32 %v5105_v47, %v15834_v36 }
 0x66b   : > { %v5400_v52 = vmul.f32 %v14339_v6, %v5280_v13  ;;  %12122 = vtanh.f32 %v5299_v3  ;;  %v5260_v45 = vmul.f32 0.5, %v10717_v51  ;;  %v10937_v48 = vadd.f32 %v14311_v43, %v13327_v16 }
 0x66c   : > { %v12109_v49 = vpop.eup %12108  ;;  %12124 = vtanh.f32 %v10935_v62  ;;  %v14375_v23 = vadd.f32 %v5399_v24, %v5391_v21  ;;  %v5392_v42 = vmul.f32 %v5320_v10, %v14182_v20  ;;  %v5300_v39 = vmul.f32 0.5, %v10718_v50 }
 0x66d   : > { %v12111_v22 = vpop.eup %12110  ;;  %v5273_v29 = vmul.f32 0.5, %v12109_v49  ;;  %12126 = vtanh.f32 %v5260_v45  ;;  %v10936_v30 = vadd.f32 %v14309_v34, %v13329_v55  ;;  %v5374_v58 = vadd.f32 0.5, %v5366_v56 }
 0x66e   : > { %v12113_v57 = vpop.eup %12112  ;;  %12128 = vtanh.f32 %v14375_v23  ;;  %v14381_v33 = vadd.f32 %v5400_v52, %v5392_v42  ;;  %v5313_v6 = vmul.f32 0.5, %v12111_v22  ;;  %v10938_v0 = vadd.f32 %v14313_v26, %v13329_v55 }
 0x66f   : > { %v12115_v2 = vpop.eup %12114  ;;  %v5281_v40 = vadd.f32 0.5, %v5273_v29  ;;  %v5274_v20 = vmul.f32 0.5, %v12113_v57  ;;  %12130 = vtanh.f32 %v5300_v39  ;;  %v5367_v38 = vmul.f32 0.5, %v14343_v5 }
 0x670   : > { %v12117_v4 = vpop.eup %12116  ;;  %12132 = vtanh.f32 %v14381_v33  ;;  %v5321_v43 = vadd.f32 0.5, %v5313_v6  ;;  %v5314_v27 = vmul.f32 0.5, %v12115_v2  ;;  %v5355_v61 = vmul.f32 0.5, %v10936_v30 }
 0x671   : > { %12134 = vtanh.f32 %v10937_v48  ;;  %v5401_v35 = vmul.f32 %v14349_v31, %v5281_v40  ;;  %v5282_v8 = vadd.f32 0.5, %v5274_v20  ;;  %v5421_v62 = vmul.f32 %v12117_v4, %v5373_v1 }
 0x672   : > { %v12119_v25 = vpop.eup %12118  ;;  %v5393_v34 = vmul.f32 %v5321_v43, %v14193_v59  ;;  %v5322_v32 = vadd.f32 0.5, %v5314_v27  ;;  %v5368_v3 = vmul.f32 0.5, %v14346_v19  ;;  %v5356_v21 = vmul.f32 0.5, %v10938_v0 }
 0x673   : > { %v5402_v37 = vmul.f32 %v14352_v12, %v5282_v8  ;;  %v5422_v53 = vmul.f32 %v12119_v25, %v5374_v58  ;;  %12136 = vtanh.f32 %v5421_v62  ;;  %v5375_v50 = vadd.f32 0.5, %v5367_v38 }
 0x674   : > { %v12121_v47 = vpop.eup %12120  ;;  %v14392_v24 = vadd.f32 %v5401_v35, %v5393_v34  ;;  %v5394_v31 = vmul.f32 %v5322_v32, %v14200_v7  ;;  %v5376_v49 = vadd.f32 0.5, %v5368_v3  ;;  %v5369_v6 = vmul.f32 0.5, %v14364_v17 }
 0x675   : > { %v12123_v13 = vpop.eup %12122  ;;  %v5275_v51 = vmul.f32 0.5, %v12121_v47  ;;  %v14396_v26 = vpack.c.bf16 %v5422_v53, %v5421_v62  ;;  %12138 = vtanh.f32 %v5422_v53  ;;  %v5370_v4 = vmul.f32 0.5, %v14367_v41 }
 0x676   : > { %v12125_v59 = vpop.eup %12124  ;;  %12140 = vtanh.f32 %v14392_v24  ;;  %v14399_v5 = vadd.f32 %v5402_v37, %v5394_v31  ;;  %v5315_v12 = vmul.f32 0.5, %v12123_v13  ;;  %v5377_v35 = vadd.f32 0.5, %v5369_v6  ;;  %v14421_v31 = vld [vmem:[%s15696_s2] ss:$16 sps:$4 sm:$0xff]  }
 0x677   : > { %v12127_v10 = vpop.eup %12126  ;;  %12142 = vtanh.f32 %v5355_v61  ;;  %v5283_v56 = vadd.f32 0.5, %v5275_v51  ;;  %5952 = vmatmul.mubr.bf16.vlgmr.msra.gmra.mrb[156].mxu1 %v14396_v26  ;;  %v5378_v41 = vadd.f32 0.5, %v5370_v4  ;;  %v14495_v4 = vld [vmem:[%s15696_s2 + $0xc0] ss:$16 sps:$4 sm:$0xff]  }
 0x678   : > { %v12129_v7 = vpop.eup %12128  ;;  %12144 = vtanh.f32 %v14399_v5  ;;  %v5323_v19 = vadd.f32 0.5, %v5315_v12  ;;  %v5276_v52 = vmul.f32 0.5, %v12127_v10  ;;  %5961 = vmatprep.mubr.bf16.mxu1 %v15815_v9  ;;  %v14433_v10 = vld [vmem:[%s15696_s2 + $0x20] ss:$16 sps:$4 sm:$0xff]   ;;  %15863 = vst [vmem:[#allocation92_spill] sm:$0xff] %v14495_v4 }
 0x679   : > { %v12131_v45 = vpop.eup %12130  ;;  %v5403_v42 = vmul.f32 %v12125_v59, %v5283_v56  ;;  %v5423_v39 = vmul.f32 %v12129_v7, %v5375_v50  ;;  %12146 = vtanh.f32 %v5356_v21  ;;  %v14426_v59 = vld [vmem:[%s15696_s2 + $0x24] ss:$16 sps:$4 sm:$0xff]  }
 0x67a   : > { %v12133_v22 = vpop.eup %12132  ;;  %v5395_v48 = vmul.f32 %v5323_v19, %v14209_v54  ;;  %v5284_v29 = vadd.f32 0.5, %v5276_v52  ;;  %v5316_v57 = vmul.f32 0.5, %v12131_v45  ;;  %v14439_v56 = vld [vmem:[%s15696_s2 + $0x44] ss:$16 sps:$4 sm:$0xff]  }
 0x67b   : > { %v12135_v1 = vpop.eup %12134  ;;  %v5424_v2 = vmul.f32 %v12133_v22, %v5376_v49  ;;  %12148 = vtanh.f32 %v5423_v39  ;;  %15854 = vst [vmem:[#allocation85_spill] sm:$0xff] %v14439_v56  ;;  %v14445_v49 = vld [vmem:[%s15696_s2 + $0x40] ss:$16 sps:$4 sm:$0xff]  }
 0x67c   : > { %v14406_v30 = vadd.f32 %v5403_v42, %v5395_v48  ;;  %v5404_v40 = vmul.f32 %v12135_v1, %v5284_v29  ;;  %v5324_v20 = vadd.f32 0.5, %v5316_v57  ;;  %15855 = vst [vmem:[#allocation86_spill] sm:$0xff] %v14445_v49  ;;  %v14458_v22 = vld [vmem:[%s15696_s2 + $0x60] ss:$16 sps:$4 sm:$0xff]   ;;  %v14464_v48 = vld [vmem:[%s15696_s2 + $0x84] ss:$16 sps:$4 sm:$0xff]  }
 0x67d   : > { %12150 = vtanh.f32 %v5424_v2  ;;  %v14409_v58 = vpack.c.bf16 %v5424_v2, %v5423_v39  ;;  %v12137_v43 = vpop.eup %12136  ;;  %v14451_v39 = vld [vmem:[%s15696_s2 + $0x64] ss:$16 sps:$4 sm:$0xff]   ;;  %15857 = vst [vmem:[#allocation88_spill] sm:$0xff] %v14458_v22  ;;  %15858 = vst [vmem:[#allocation75_spill] sm:$0xff] %v14464_v48  ;;  %v14470_v29 = vld [vmem:[%s15696_s2 + $0x80] ss:$16 sps:$4 sm:$0xff]  }
 0x67e   : > { %12152 = vtanh.f32 %v14406_v30  ;;  %v5396_v54 = vmul.f32 %v5324_v20, %v14219_v46  ;;  %15856 = vst [vmem:[#allocation87_spill] sm:$0xff] %v14451_v39  ;;  %15859 = vst [vmem:[#allocation76_spill] sm:$0xff] %v14470_v29  ;;  %v14476_v1 = vld [vmem:[%s15696_s2 + $0xa4] ss:$16 sps:$4 sm:$0xff]  }
 0x67f   : > { %v12139_v27 = vpop.eup %12138  ;;  %5962 = vmatmul.mubr.bf16.gmra.mrb[160].mxu1 %v14409_v58  ;;  %15860 = vst [vmem:[#allocation89_spill] sm:$0xff] %v14476_v1  ;;  %v14488_v20 = vld [vmem:[%s15696_s2 + $0xc4] ss:$16 sps:$4 sm:$0xff]  }
 0x680   : > { %v12141_v17 = vpop.eup %12140  ;;  %v14414_v8 = vadd.f32 %v5404_v40, %v5396_v54  ;;  %v5461_v62 = vpack.c.bf16 %v12139_v27, %v12137_v43  ;;  %5971 = vmatprep.mubr.bf16.mxu1 %v15815_v9  ;;  %v14482_v40 = vld [vmem:[%s15696_s2 + $0xa0] ss:$16 sps:$4 sm:$0xff]   ;;  %15862 = vst [vmem:[#allocation91_spill] sm:$0xff] %v14488_v20  ;;  %v14501_v43 = vld [vmem:[%s15696_s2 + $0xe4] ss:$16 sps:$4 sm:$0xff]  }
 0x681   : > { %v12143_v25 = vpop.eup %12142  ;;  %v5425_v0 = vmul.f32 %v12141_v17, %v5377_v35  ;;  %15861 = vst [vmem:[#allocation90_spill] sm:$0xff] %v14482_v40  ;;  %15864 = vst [vmem:[#allocation93_spill] sm:$0xff] %v14501_v43  ;;  %v14507_v54 = vld [vmem:[%s15696_s2 + $0xe0] ss:$16 sps:$4 sm:$0xff]   ;;  %v11550_v27 = vld [vmem:[%s15696_s2 + $0xc] ss:$16 sps:$4 sm:$0xff]  }
 0x682   : > { %v12145_v34 = vpop.eup %12144  ;;  %12154 = vtanh.f32 %v14414_v8  ;;  %10523 = vmatprep.mubr.bf16.mxu0 %v5461_v62  ;;  %v5371_v46 = vmul.f32 0.5, %v12143_v25  ;;  %15865 = vst [vmem:[#allocation94_spill] sm:$0xff] %v14507_v54  ;;  %v14522_v35 = vld [vmem:[%s15696_s2 + $0x8] ss:$16 sps:$4 sm:$0xff]   ;;  %6730 = vmatprep.subr.bf16.mxu1 %v11550_v27  ;;  %v14540_v17 = vld [vmem:[%s15696_s2 + $0x4c] ss:$16 sps:$4 sm:$0xff]  }
 0x683   : > { %v5426_v32 = vmul.f32 %v12145_v34, %v5378_v41  ;;  %v12147_v38 = vpop.eup %12146  ;;  %12156 = vtanh.f32 %v5425_v0  ;;  %6731 = vmatpush1.bf16.msra.mxu1 %v14522_v35  ;;  %v14545_v62 = vld [vmem:[%s15696_s2 + $0x48] ss:$16 sps:$4 sm:$0xff]   ;;  %v14552_v25 = vld [vmem:[%s15696_s2 + $0x6c] ss:$16 sps:$4 sm:$0xff]  }
 0x684   : > { %v5372_v47 = vmul.f32 0.5, %v12147_v38  ;;  %v5379_v3 = vadd.f32 0.5, %v5371_v46  ;;  %v14557_v41 = vld [vmem:[%s15696_s2 + $0x68] ss:$16 sps:$4 sm:$0xff]   ;;  %v14579_v38 = vld [vmem:[%s15696_s2 + $0xac] ss:$16 sps:$4 sm:$0xff]  }
 0x685   : > { %12158 = vtanh.f32 %v5426_v32  ;;  %v5652_v61 = vpack.c.bf16 %v5426_v32, %v5425_v0  ;;  %v12149_v37 = vpop.eup %12148  ;;  %v14564_v0 = vld [vmem:[%s15696_s2 + $0x8c] ss:$16 sps:$4 sm:$0xff]   ;;  %v14569_v34 = vld [vmem:[%s15696_s2 + $0x88] ss:$16 sps:$4 sm:$0xff]   ;;  %v11563_v32 = vld [vmem:[%s15698_s4 + $0x140] sm:$0xff]  }
 0x686   : > { %v5380_v12 = vadd.f32 0.5, %v5372_v47  ;;  %v14584_v46 = vld [vmem:[%s15696_s2 + $0xa8] ss:$16 sps:$4 sm:$0xff]  }
 0x687   : > { %v12151_v53 = vpop.eup %12150  ;;  %5972 = vmatmul.mubr.bf16.gmra.mrb[164].mxu1 %v5652_v61 }
 0x688   : > { %v12153_v13 = vpop.eup %12152  ;;  %v5462_v51 = vpack.c.bf16 %v12151_v53, %v12149_v37  ;;  %5981 = vmatprep.mubr.bf16.mxu1 %v15815_v9  ;;  %v11568_v37 = vld [vmem:[%s15698_s4 + $0x150] sm:$0xff]   ;;  %v11569_v53 = vld [vmem:[%s15698_s4 + $0x158] sm:$0xff]  }
 0x689   : > { %v5427_v21 = vmul.f32 %v12153_v13, %v5379_v3 }
 0x68a   : > { %10524 = vmatmul.mubr.bf16.vlgmr.msra.gmra.mrb[84].mxu0 %v5462_v51 }
 0x68b   : > { %5847 = vmatpush1.bf16.msra.mxu0 %v14421_v31  ;;  %12160 = vtanh.f32 %v5427_v21 }
 0x68c   : > { %v12155_v50 = vpop.eup %12154  ;;  %5848 = vmatprep.subr.bf16.mxu0 %v14426_v59 }
 0x68d   : > { %v5428_v7 = vmul.f32 %v12155_v50, %v5380_v12  ;;  %v12157_v19 = vpop.eup %12156 }
 0x68f   : > { %v12159_v52 = vpop.eup %12158  ;;  %5849 = vmatpush1.bf16.msra.mxu0 %v14433_v10  ;;  %12162 = vtanh.f32 %v5428_v7  ;;  %v5653_v45 = vpack.c.bf16 %v5428_v7, %v5427_v21 }
 0x690   : > { %5850 = vmatprep.subr.bf16.mxu0 %v14439_v56  ;;  %v5463_v42 = vpack.c.bf16 %v12159_v52, %v12157_v19 }
 0x691   : > { %5982 = vmatmul.mubr.bf16.gmra.mrb[168].mxu1 %v5653_v45 }
 0x692   : > { %10527 = vmatprep.mubr.bf16.mxu0 %v5463_v42  ;;  %6762 = vmatprep.mubr.bf16.mxu1 %v15815_v9 }
 0x693   : > { %5851 = vmatpush1.bf16.msra.mxu0 %v14445_v49 }
 0x694   : > { %5852 = vmatprep.subr.bf16.mxu0 %v14451_v39 }
 0x695   : > { %v12161_v57 = vpop.eup %12160 }
 0x697   : > { %5853 = vmatpush1.bf16.msra.mxu0 %v14458_v22 }
 0x698   : > { %5854 = vmatprep.subr.bf16.mxu0 %v14464_v48 }
 0x699   : > { %v12163_v6 = vpop.eup %12162 }
 0x69a   : > { %v5464_v2 = vpack.c.bf16 %v12163_v6, %v12161_v57 }
 0x69b   : > { %5855 = vmatpush1.bf16.msra.mxu0 %v14470_v29 }
 0x69c   : > { %10528 = vmatmul.mubr.bf16.gmra.mrb[88].mxu0 %v5464_v2  ;;  %5856 = vmatprep.subr.bf16.mxu0 %v14476_v1 }
 0x69d   : > { %5878 = vmatprep.mubr.bf16.mxu0 %v15815_v9 }
 0x69f   : > { %5857 = vmatpush1.bf16.msra.mxu0 %v14482_v40 }
 0x6a0   : > { %5858 = vmatprep.subr.bf16.mxu0 %v14488_v20 }
 0x6a3   : > { %5859 = vmatpush1.bf16.msra.mxu0 %v14495_v4 }
 0x6a4   : > { %5860 = vmatprep.subr.bf16.mxu0 %v14501_v43 }
 0x6a7   : > { %5861 = vmatpush1.bf16.msra.mxu0 %v14507_v54 }
 0x6a8   : > { %10531 = vmatprep.subr.bf16.mxu0 %v11563_v32 }
 0x6aa   : > { %5879 = vmatmul.mubr.bf16.vlgmr.msra.gmra.mrb[80].mxu0 %v14396_v26  ;;  %v14528_v26 = vld [vmem:[%s15696_s2 + $0x2c] ss:$16 sps:$4 sm:$0xff]  }
 0x6ab   : > { %5888 = vmatprep.mubr.bf16.mxu0 %v15815_v9  ;;  %6732 = vmatprep.subr.bf16.mxu1 %v14528_v26 }
 0x6ac   : > { %10532 = vmatpush3.bf16.msra.mxu0 %v11563_v32 }
 0x6b2   : > { %5889 = vmatmul.mubr.bf16.gmra.mrb[92].mxu0 %v14409_v58  ;;  %v14533_v58 = vld [vmem:[%s15696_s2 + $0x28] ss:$16 sps:$4 sm:$0xff]  }
 0x6b3   : > { %5898 = vmatprep.mubr.bf16.mxu0 %v15815_v9  ;;  %6733 = vmatpush1.bf16.msra.mxu1 %v14533_v58 }
 0x6b4   : > { %6734 = vmatprep.subr.bf16.mxu1 %v14540_v17 }
 0x6b7   : > { %6735 = vmatpush1.bf16.msra.mxu1 %v14545_v62 }
 0x6b8   : > { %6736 = vmatprep.subr.bf16.mxu1 %v14552_v25 }
 0x6ba   : > { %5899 = vmatmul.mubr.bf16.gmra.mrb[96].mxu0 %v5652_v61  ;;  %v11567_v61 = vld [vmem:[%s15698_s4 + $0x148] sm:$0xff]  }
 0x6bb   : > { %5908 = vmatprep.mubr.bf16.mxu0 %v15815_v9  ;;  %6737 = vmatpush1.bf16.msra.mxu1 %v14557_v41 }
 0x6bc   : > { %6738 = vmatprep.subr.bf16.mxu1 %v14564_v0  ;;  %10533 = vmatprep.subr.bf16.mxu0 %v11567_v61 }
 0x6bd   : > { %10534 = vmatpush3.bf16.msra.mxu0 %v11567_v61 }
 0x6be   : > { %10535 = vmatprep.subr.bf16.mxu0 %v11568_v37 }
 0x6bf   : > { %6739 = vmatpush1.bf16.msra.mxu1 %v14569_v34 }
 0x6c0   : > { %6740 = vmatprep.subr.bf16.mxu1 %v14579_v38 }
 0x6c1   : > { %10536 = vmatpush3.bf16.msra.mxu0 %v11568_v37 }
 0x6c2   : > { %5909 = vmatmul.mubr.bf16.gmra.mrb[100].mxu0 %v5653_v45  ;;  %10537 = vmatprep.subr.bf16.mxu0 %v11569_v53 }
 0x6c3   : > { %6741 = vmatpush1.bf16.msra.mxu1 %v14584_v46 }
 0x6c4   : > { %6742 = vmatprep.subr.bf16.mxu1 %v14262_v44  ;;  %v11570_v44 = vld [vmem:[%s15698_s4 + $0x160] sm:$0xff]  }
 0x6c5   : > { %10538 = vmatpush3.bf16.msra.mxu0 %v11569_v53 }
 0x6c6   : > { %10539 = vmatprep.subr.bf16.mxu0 %v11570_v44 }
 0x6c7   : > { %6743 = vmatpush1.bf16.msra.mxu1 %v14267_v18  ;;  %v11571_v18 = vld [vmem:[%s15698_s4 + $0x168] sm:$0xff]  }
 0x6c8   : > { %6744 = vmatprep.subr.bf16.mxu1 %v14277_v60  ;;  %v11572_v60 = vld [vmem:[%s15698_s4 + $0x170] sm:$0xff]  }
 0x6c9   : > { %10540 = vmatpush3.bf16.msra.mxu0 %v11570_v44 }
 0x6ca   : > { %10541 = vmatprep.subr.bf16.mxu0 %v11571_v18 }
 0x6cb   : > { %6745 = vmatpush1.bf16.msra.mxu1 %v14282_v14  ;;  %v11573_v14 = vld [vmem:[%s15698_s4 + $0x178] sm:$0xff]  }
 0x6cc   : > { %7541 = vmatprep.subr.bf16.mxu1 %v11550_v27 }
 0x6cd   : > { %10542 = vmatpush3.bf16.msra.mxu0 %v11571_v18 }
 0x6ce   : > { %10543 = vmatprep.subr.bf16.mxu0 %v11572_v60 }
 0x6d1   : > { %10544 = vmatpush3.bf16.msra.mxu0 %v11572_v60 }
 0x6d2   : > { %10545 = vmatprep.subr.bf16.mxu0 %v11573_v14 }
 0x6d5   : > { %10546 = vmatpush3.bf16.msra.mxu0 %v11573_v14 }
 0x6d6   : > { %6657 = vmatprep.subr.bf16.mxu0 %v14304_v63 }
 0x74a   : > { %v5953_v47 = vpop.f32.mrb[156].mxu1 }
 0x74b   : > { %v5955_v13 = vpop.f32.mrb[157].mxu1  ;;  %v10939_v61 = vadd.f32 %v5953_v47, %v13327_v16 }
 0x74c   : > { %v5957_v3 = vpop.f32.mrb[158].mxu1  ;;  %v10940_v63 = vadd.f32 %v5955_v13, %v13329_v55 }
 0x74d   : > { %v5959_v51 = vpop.f32.mrb[159].mxu1  ;;  %v10941_v37 = vadd.f32 %v5957_v3, %v13327_v16  ;;  %12164 = vtanh.f32 %v10939_v61 }
 0x74e   : > { %v10942_v32 = vadd.f32 %v5959_v51, %v13329_v55  ;;  %v6160_v53 = vmul.f32 0.5, %v10940_v63 }
 0x74f   : > { %12166 = vtanh.f32 %v10941_v37 }
 0x750   : > { %v6161_v44 = vmul.f32 0.5, %v10942_v32  ;;  %12168 = vtanh.f32 %v6160_v53 }
 0x752   : > { %v5963_v21 = vpop.f32.mrb[160].mxu1  ;;  %12170 = vtanh.f32 %v6161_v44 }
 0x753   : > { %v5965_v12 = vpop.f32.mrb[161].mxu1  ;;  %v10943_v18 = vadd.f32 %v5963_v21, %v13327_v16 }
 0x754   : > { %v5967_v50 = vpop.f32.mrb[162].mxu1  ;;  %v10944_v54 = vadd.f32 %v5965_v12, %v13329_v55 }
 0x755   : > { %v5969_v7 = vpop.f32.mrb[163].mxu1  ;;  %v10945_v60 = vadd.f32 %v5967_v50, %v13327_v16  ;;  %12172 = vtanh.f32 %v10943_v18  ;;  %v15867_v18 = vld [vmem:[#allocation8_spill] sm:$0xff] }
 0x756   : > { %v10946_v47 = vadd.f32 %v5969_v7, %v13329_v55  ;;  %v6162_v37 = vmul.f32 0.5, %v10944_v54  ;;  %v15866_v7 = vld [vmem:[#allocation7_spill] sm:$0xff]  ;;  %v15868_v54 = vld [vmem:[#allocation9_spill] sm:$0xff] }
 0x757   : > { %12174 = vtanh.f32 %v10945_v60 }
 0x758   : > { %v6163_v53 = vmul.f32 0.5, %v10946_v47 }
 0x75a   : > { %v5973_v19 = vpop.f32.mrb[164].mxu1 }
 0x75b   : > { %v5975_v52 = vpop.f32.mrb[165].mxu1 }
 0x75c   : > { %v5977_v45 = vpop.f32.mrb[166].mxu1  ;;  %v10948_v47 = vadd.f32 %v5975_v52, %v13329_v55 }
 0x75d   : > { %v5979_v42 = vpop.f32.mrb[167].mxu1  ;;  %v10949_v60 = vadd.f32 %v5977_v45, %v13327_v16 }
 0x75e   : > { %v6164_v20 = vmul.f32 0.5, %v10948_v47  ;;  %v15873_v47 = vld [vmem:[#allocation14_spill] sm:$0xff] }
 0x764   : > { %v14614_v57 = vpop.f32.mrb[168].mxu1 }
 0x765   : > { %v14616_v6 = vpop.f32.mrb[169].mxu1 }
 0x766   : > { %v14618_v2 = vpop.f32.mrb[170].mxu1 }
 0x767   : > { %v14620_v27 = vpop.f32.mrb[171].mxu1 }
 0x77d   : > { %v5880_v14 = vpop.f32.mrb[80].mxu0 }
 0x77e   : > { %v10719_v13 = vadd.f32 %v5880_v14, %v15833_v11  ;;  %v5882_v43 = vpop.f32.mrb[81].mxu0  ;;  %v972_v14 = vadd.f32 %v15866_v7, %v15833_v11 }
 0x77f   : > { %v10720_v3 = vadd.f32 %v5882_v43, %v15834_v36  ;;  %v5884_v51 = vpop.f32.mrb[82].mxu0  ;;  %v10947_v43 = vadd.f32 %v5973_v19, %v13327_v16  ;;  %v15869_v19 = vld [vmem:[#allocation10_spill] sm:$0xff] }
 0x780   : > { %v6064_v63 = vmul.f32 0.5, %v10719_v13  ;;  %v10721_v21 = vadd.f32 %v5884_v51, %v15833_v11  ;;  %v5886_v32 = vpop.f32.mrb[83].mxu0  ;;  %v974_v13 = vadd.f32 %v15867_v18, %v15834_v36  ;;  %v12165_v51 = vpop.eup %12164 }
 0x781   : > { %v6104_v50 = vmul.f32 0.5, %v10720_v3  ;;  %v10722_v61 = vadd.f32 %v5886_v32, %v15834_v36 }
 0x782   : > { %12176 = vtanh.f32 %v6064_v63  ;;  %v6065_v12 = vmul.f32 0.5, %v10721_v21  ;;  %v976_v63 = vadd.f32 %v15868_v54, %v15833_v11 }
 0x783   : > { %12178 = vtanh.f32 %v6104_v50  ;;  %v6105_v44 = vmul.f32 0.5, %v10722_v61  ;;  %v14643_v50 = vpop.eup %12166  ;;  %v978_v61 = vadd.f32 %v15869_v19, %v15834_v36 }
 0x784   : > { %12180 = vtanh.f32 %v6065_v12  ;;  %v10950_v12 = vadd.f32 %v5979_v42, %v13329_v55  ;;  %v14648_v7 = vpop.eup %12168 }
 0x785   : > { %12182 = vtanh.f32 %v6105_v44  ;;  %v5890_v3 = vpop.f32.mrb[92].mxu0  ;;  %v14650_v4 = vpop.eup %12170 }
 0x786   : > { %12184 = vtanh.f32 %v6162_v37  ;;  %v6000_v21 = vadd.f32 %v5890_v3, %v972_v14  ;;  %v5892_v32 = vpop.f32.mrb[93].mxu0  ;;  %v14652_v3 = vpop.eup %12172  ;;  %v6165_v42 = vmul.f32 0.5, %v10950_v12 }
 0x787   : > { %12186 = vtanh.f32 %v6163_v53  ;;  %v6001_v45 = vadd.f32 %v5892_v32, %v974_v13  ;;  %v5894_v44 = vpop.f32.mrb[94].mxu0  ;;  %v14654_v19 = vpop.eup %12174 }
 0x788   : > { %12188 = vtanh.f32 %v10947_v43  ;;  %v6066_v18 = vmul.f32 0.5, %v6000_v21  ;;  %v6004_v54 = vadd.f32 %v5894_v44, %v976_v63  ;;  %v5896_v37 = vpop.f32.mrb[95].mxu0  ;;  %v15870_v43 = vld [vmem:[#allocation11_spill] sm:$0xff]  ;;  %v15871_v21 = vld [vmem:[#allocation12_spill] sm:$0xff] }
 0x789   : > { %12190 = vtanh.f32 %v10949_v60  ;;  %v6106_v52 = vmul.f32 0.5, %v6001_v45  ;;  %v6005_v14 = vadd.f32 %v5896_v37, %v978_v61  ;;  %v982_v63 = vadd.f32 %v15870_v43, %v15833_v11  ;;  %v15872_v61 = vld [vmem:[#allocation13_spill] sm:$0xff] }
 0x78a   : > { %12192 = vtanh.f32 %v6066_v18  ;;  %v6067_v53 = vmul.f32 0.5, %v6004_v54  ;;  %v984_v44 = vadd.f32 %v15871_v21, %v15834_v36  ;;  %v986_v45 = vadd.f32 %v15872_v61, %v15833_v11 }
 0x78b   : > { %12194 = vtanh.f32 %v6106_v52  ;;  %v6107_v13 = vmul.f32 0.5, %v6005_v14  ;;  %v988_v18 = vadd.f32 %v15873_v47, %v15834_v36  ;;  %v15874_v52 = vld [vmem:[#allocation15_spill] sm:$0xff] }
 0x78c   : > { %v12177_v32 = vpop.eup %12176  ;;  %12196 = vtanh.f32 %v6067_v53  ;;  %v992_v14 = vadd.f32 %v15874_v52, %v15833_v11 }
 0x78d   : > { %v12179_v60 = vpop.eup %12178  ;;  %v6080_v54 = vmul.f32 0.5, %v12177_v32  ;;  %12198 = vtanh.f32 %v6107_v13  ;;  %v5900_v12 = vpop.f32.mrb[96].mxu0 }
 0x78e   : > { %v12181_v37 = vpop.eup %12180  ;;  %12200 = vtanh.f32 %v6164_v20  ;;  %v6120_v43 = vmul.f32 0.5, %v12179_v60  ;;  %v6008_v40 = vadd.f32 %v5900_v12, %v982_v63  ;;  %v5902_v1 = vpop.f32.mrb[97].mxu0 }
 0x78f   : > { %v12183_v21 = vpop.eup %12182  ;;  %12202 = vtanh.f32 %v6165_v42  ;;  %v6088_v53 = vadd.f32 0.5, %v6080_v54  ;;  %v6081_v29 = vmul.f32 0.5, %v12181_v37  ;;  %v6009_v48 = vadd.f32 %v5902_v1, %v984_v44  ;;  %v5904_v61 = vpop.f32.mrb[98].mxu0  ;;  %v15875_v37 = vld [vmem:[#allocation16_spill] sm:$0xff] }
 0x790   : > { %v14666_v22 = vpop.eup %12184  ;;  %v6128_v47 = vadd.f32 0.5, %v6120_v43  ;;  %v6121_v32 = vmul.f32 0.5, %v12183_v21  ;;  %v6068_v13 = vmul.f32 0.5, %v6008_v40  ;;  %v6012_v39 = vadd.f32 %v5904_v61, %v986_v45  ;;  %v5906_v49 = vpop.f32.mrb[99].mxu0 }
 0x791   : > { %v14668_v56 = vpop.eup %12186  ;;  %v6208_v52 = vmul.f32 %v12165_v51, %v6088_v53  ;;  %v6089_v20 = vadd.f32 0.5, %v6081_v29  ;;  %v6108_v60 = vmul.f32 0.5, %v6009_v48  ;;  %v6013_v63 = vadd.f32 %v5906_v49, %v988_v18  ;;  %v15876_v48 = vld [vmem:[#allocation17_spill] sm:$0xff] }
 0x792   : > { %v14670_v12 = vpop.eup %12188  ;;  %v6200_v42 = vmul.f32 %v6128_v47, %v14354_v28  ;;  %v6129_v54 = vadd.f32 0.5, %v6121_v32  ;;  %12204 = vtanh.f32 %v6068_v13  ;;  %v6069_v1 = vmul.f32 0.5, %v6012_v39  ;;  %v15877_v39 = vld [vmem:[#allocation18_spill] sm:$0xff] }
 0x793   : > { %v14673_v44 = vpop.eup %12190  ;;  %v994_v40 = vadd.f32 %v15875_v37, %v15834_v36  ;;  %v6209_v45 = vmul.f32 %v14643_v50, %v6089_v20  ;;  %12206 = vtanh.f32 %v6108_v60  ;;  %v6109_v43 = vmul.f32 0.5, %v6013_v63 }
 0x794   : > { %v12193_v51 = vpop.eup %12192  ;;  %v996_v49 = vadd.f32 %v15876_v48, %v15833_v11  ;;  %v14680_v29 = vadd.f32 %v6208_v52, %v6200_v42  ;;  %v6201_v28 = vmul.f32 %v6129_v54, %v14358_v15  ;;  %12208 = vtanh.f32 %v6069_v1 }
 0x795   : > { %v12195_v18 = vpop.eup %12194  ;;  %v998_v21 = vadd.f32 %v15877_v39, %v15834_v36  ;;  %v6176_v53 = vmul.f32 0.5, %v14648_v7  ;;  %v6082_v61 = vmul.f32 0.5, %v12193_v51  ;;  %12210 = vtanh.f32 %v6109_v43  ;;  %v5910_v50 = vpop.f32.mrb[100].mxu0 }
 0x796   : > { %v12197_v47 = vpop.eup %12196  ;;  %12212 = vtanh.f32 %v14680_v29  ;;  %v14687_v32 = vadd.f32 %v6209_v45, %v6201_v28  ;;  %v6122_v13 = vmul.f32 0.5, %v12195_v18  ;;  %v6016_v52 = vadd.f32 %v5910_v50, %v992_v14  ;;  %v5912_v20 = vpop.f32.mrb[101].mxu0 }
 0x797   : > { %v12199_v60 = vpop.eup %12198  ;;  %v10951_v15 = vadd.f32 %v14614_v57, %v13327_v16  ;;  %v6090_v63 = vadd.f32 0.5, %v6082_v61  ;;  %v6083_v42 = vmul.f32 0.5, %v12197_v47  ;;  %v6017_v54 = vadd.f32 %v5912_v20, %v994_v40  ;;  %v5914_v1 = vpop.f32.mrb[102].mxu0 }
 0x798   : > { %v14691_v7 = vpop.eup %12200  ;;  %12214 = vtanh.f32 %v14687_v32  ;;  %v6130_v37 = vadd.f32 0.5, %v6122_v13  ;;  %v6123_v43 = vmul.f32 0.5, %v12199_v60  ;;  %v6070_v51 = vmul.f32 0.5, %v6016_v52  ;;  %v5916_v45 = vpop.f32.mrb[103].mxu0 }
 0x799   : > { %v14694_v48 = vpop.eup %12202  ;;  %v6210_v14 = vmul.f32 %v14652_v3, %v6090_v63  ;;  %v6091_v28 = vadd.f32 0.5, %v6083_v42  ;;  %v6110_v18 = vmul.f32 0.5, %v6017_v54  ;;  %v6020_v39 = vadd.f32 %v5914_v1, %v996_v49 }
 0x79a   : > { %v6202_v57 = vmul.f32 %v6130_v37, %v14375_v23  ;;  %v6131_v61 = vadd.f32 0.5, %v6123_v43  ;;  %12216 = vtanh.f32 %v6070_v51  ;;  %v6021_v40 = vadd.f32 %v5916_v45, %v998_v21 }
 0x79b   : > { %v6177_v50 = vmul.f32 0.5, %v14650_v4  ;;  %v6211_v47 = vmul.f32 %v14654_v19, %v6091_v28  ;;  %12218 = vtanh.f32 %v6110_v18  ;;  %v6071_v13 = vmul.f32 0.5, %v6020_v39 }
 0x79c   : > { %v12205_v52 = vpop.eup %12204  ;;  %12220 = vtanh.f32 %v10951_v15  ;;  %v14700_v20 = vadd.f32 %v6210_v14, %v6202_v57  ;;  %v6203_v3 = vmul.f32 %v6131_v61, %v14381_v33  ;;  %v6111_v60 = vmul.f32 0.5, %v6021_v40 }
 0x79d   : > { %v12207_v63 = vpop.eup %12206  ;;  %v10953_v23 = vadd.f32 %v14618_v2, %v13327_v16  ;;  %v6084_v49 = vmul.f32 0.5, %v12205_v52  ;;  %12222 = vtanh.f32 %v6071_v13  ;;  %v6184_v42 = vadd.f32 0.5, %v6176_v53 }
 0x79e   : > { %v12209_v21 = vpop.eup %12208  ;;  %12224 = vtanh.f32 %v14700_v20  ;;  %v14706_v4 = vadd.f32 %v6211_v47, %v6203_v3  ;;  %v6124_v19 = vmul.f32 0.5, %v12207_v63  ;;  %v10952_v15 = vadd.f32 %v14616_v6, %v13329_v55 }
 0x79f   : > { %v12211_v54 = vpop.eup %12210  ;;  %v6092_v1 = vadd.f32 0.5, %v6084_v49  ;;  %v6085_v33 = vmul.f32 0.5, %v12209_v21  ;;  %12226 = vtanh.f32 %v6111_v60  ;;  %v6185_v43 = vadd.f32 0.5, %v6177_v50 }
 0x7a0   : > { %v12213_v37 = vpop.eup %12212  ;;  %12228 = vtanh.f32 %v14706_v4  ;;  %v6132_v2 = vadd.f32 0.5, %v6124_v19  ;;  %v6125_v51 = vmul.f32 0.5, %v12211_v54  ;;  %v10954_v18 = vadd.f32 %v14620_v27, %v13329_v55 }
 0x7a1   : > { %12230 = vtanh.f32 %v10953_v23  ;;  %v6212_v53 = vmul.f32 %v14670_v12, %v6092_v1  ;;  %v6093_v45 = vadd.f32 0.5, %v6085_v33  ;;  %v6232_v14 = vmul.f32 %v12213_v37, %v6184_v42 }
 0x7a2   : > { %v12215_v28 = vpop.eup %12214  ;;  %v6204_v6 = vmul.f32 %v6132_v2, %v14392_v24  ;;  %v6133_v39 = vadd.f32 0.5, %v6125_v51  ;;  %v6178_v57 = vmul.f32 0.5, %v14666_v22  ;;  %v6166_v61 = vmul.f32 0.5, %v10952_v15 }
 0x7a3   : > { %v6213_v40 = vmul.f32 %v14673_v44, %v6093_v45  ;;  %v6233_v50 = vmul.f32 %v12215_v28, %v6185_v43  ;;  %12232 = vtanh.f32 %v6232_v14  ;;  %v6179_v3 = vmul.f32 0.5, %v14668_v56 }
 0x7a4   : > { %v12217_v47 = vpop.eup %12216  ;;  %v14717_v13 = vadd.f32 %v6212_v53, %v6204_v6  ;;  %v6205_v12 = vmul.f32 %v6133_v39, %v14399_v5  ;;  %v6167_v63 = vmul.f32 0.5, %v10954_v18  ;;  %v6186_v49 = vadd.f32 0.5, %v6178_v57 }
 0x7a5   : > { %v12219_v52 = vpop.eup %12218  ;;  %v6086_v60 = vmul.f32 0.5, %v12217_v47  ;;  %v14721_v27 = vpack.c.bf16 %v6233_v50, %v6232_v14  ;;  %12234 = vtanh.f32 %v6233_v50  ;;  %v6187_v54 = vadd.f32 0.5, %v6179_v3 }
 0x7a6   : > { %v12221_v24 = vpop.eup %12220  ;;  %12236 = vtanh.f32 %v14717_v13  ;;  %v14724_v22 = vadd.f32 %v6213_v40, %v6205_v12  ;;  %v6126_v44 = vmul.f32 0.5, %v12219_v52  ;;  %v6180_v53 = vmul.f32 0.5, %v14691_v7 }
 0x7a7   : > { %v12223_v23 = vpop.eup %12222  ;;  %12238 = vtanh.f32 %v6166_v61  ;;  %v6094_v21 = vadd.f32 0.5, %v6086_v60  ;;  %6763 = vmatmul.mubr.bf16.vlgmr.msra.gmra.mrb[172].mxu1 %v14721_v27  ;;  %v6181_v18 = vmul.f32 0.5, %v14694_v48 }
 0x7a8   : > { %v12225_v5 = vpop.eup %12224  ;;  %12240 = vtanh.f32 %v14724_v22  ;;  %v6134_v56 = vadd.f32 0.5, %v6126_v44  ;;  %v6087_v42 = vmul.f32 0.5, %v12223_v23  ;;  %6772 = vmatprep.mubr.bf16.mxu1 %v15815_v9  ;;  %7542 = vmatpush1.bf16.msra.mxu1 %v14522_v35  ;;  %v6188_v39 = vadd.f32 0.5, %v6180_v53  ;;  %v14786_v53 = vld [vmem:[%s15696_s2 + $0xcc] ss:$16 sps:$4 sm:$0xff]  }
 0x7a9   : > { %v12227_v19 = vpop.eup %12226  ;;  %v6214_v15 = vmul.f32 %v12221_v24, %v6094_v21  ;;  %v6234_v1 = vmul.f32 %v12225_v5, %v6186_v49  ;;  %7543 = vmatprep.subr.bf16.mxu1 %v14528_v26  ;;  %12242 = vtanh.f32 %v6167_v63  ;;  %v6189_v40 = vadd.f32 0.5, %v6181_v18  ;;  %v15878_v5 = vld [vmem:[#allocation85_spill] sm:$0xff]  ;;  %v14806_v18 = vld [vmem:[%s15696_s2 + $0xe8] ss:$16 sps:$4 sm:$0xff]  }
 0x7aa   : > { %v12229_v33 = vpop.eup %12228  ;;  %v6206_v37 = vmul.f32 %v6134_v56, %v14406_v30  ;;  %v6095_v43 = vadd.f32 0.5, %v6087_v42  ;;  %v6127_v2 = vmul.f32 0.5, %v12227_v19  ;;  %v15882_v42 = vld [vmem:[#allocation75_spill] sm:$0xff] }
 0x7ab   : > { %v12231_v51 = vpop.eup %12230  ;;  %v6235_v45 = vmul.f32 %v12229_v33, %v6187_v54  ;;  %12244 = vtanh.f32 %v6234_v1  ;;  %v15883_v54 = vld [vmem:[#allocation76_spill] sm:$0xff]  ;;  %v15886_v33 = vld [vmem:[#allocation91_spill] sm:$0xff] }
 0x7ac   : > { %v14733_v14 = vadd.f32 %v6214_v15, %v6206_v37  ;;  %v6215_v28 = vmul.f32 %v12231_v51, %v6095_v43  ;;  %v6135_v35 = vadd.f32 0.5, %v6127_v2  ;;  %7544 = vmatpush1.bf16.msra.mxu1 %v14533_v58  ;;  %v15884_v15 = vld [vmem:[#allocation89_spill] sm:$0xff]  ;;  %v15887_v37 = vld [vmem:[#allocation92_spill] sm:$0xff]  ;;  %v15889_v2 = vld [vmem:[#allocation94_spill] sm:$0xff] }
 0x7ad   : > { %12246 = vtanh.f32 %v6235_v45  ;;  %v14737_v26 = vpack.c.bf16 %v6235_v45, %v6234_v1  ;;  %7545 = vmatprep.subr.bf16.mxu1 %v14540_v17  ;;  %v12233_v30 = vpop.eup %12232  ;;  %v15885_v1 = vld [vmem:[#allocation90_spill] sm:$0xff]  ;;  %v15888_v43 = vld [vmem:[#allocation93_spill] sm:$0xff]  ;;  %v11574_v51 = vld [vmem:[%s15698_s4 + $0x180] sm:$0xff]  }
 0x7ae   : > { %12248 = vtanh.f32 %v14733_v14  ;;  %v6207_v7 = vmul.f32 %v6135_v35, %v14414_v8  ;;  %v14791_v45 = vld [vmem:[%s15696_s2 + $0xc8] ss:$16 sps:$4 sm:$0xff]   ;;  %v14801_v35 = vld [vmem:[%s15696_s2 + $0xec] ss:$16 sps:$4 sm:$0xff]  }
 0x7af   : > { %v12235_v6 = vpop.eup %12234  ;;  %6773 = vmatmul.mubr.bf16.gmra.mrb[176].mxu1 %v14737_v26 }
 0x7b0   : > { %v12237_v57 = vpop.eup %12236  ;;  %v14743_v61 = vadd.f32 %v6215_v28, %v6207_v7  ;;  %v6272_v58 = vpack.c.bf16 %v12235_v6, %v12233_v30  ;;  %6782 = vmatprep.mubr.bf16.mxu1 %v15815_v9  ;;  %7546 = vmatpush1.bf16.msra.mxu1 %v14545_v62  ;;  %v11579_v28 = vld [vmem:[%s15698_s4 + $0x190] sm:$0xff]   ;;  %v11584_v30 = vld [vmem:[%s15698_s4 + $0x1a0] sm:$0xff]   ;;  %v11585_v7 = vld [vmem:[%s15698_s4 + $0x1a8] sm:$0xff]  }
 0x7b1   : > { %v12239_v48 = vpop.eup %12238  ;;  %v6236_v17 = vmul.f32 %v12237_v57, %v6188_v39  ;;  %7547 = vmatprep.subr.bf16.mxu1 %v14552_v25  ;;  %v11586_v6 = vld [vmem:[%s15698_s4 + $0x1b0] sm:$0xff]   ;;  %v11587_v39 = vld [vmem:[%s15698_s4 + $0x1b8] sm:$0xff]  }
 0x7b2   : > { %v12241_v50 = vpop.eup %12240  ;;  %12250 = vtanh.f32 %v14743_v61  ;;  %10547 = vmatprep.mubr.bf16.mxu0 %v6272_v58  ;;  %v6182_v12 = vmul.f32 0.5, %v12239_v48  ;;  %v14828_v57 = vld [vmem:[%s15696_s2 + $0x4] ss:$16 sps:$4 sm:$0xff]  }
 0x7b3   : > { %v6237_v8 = vmul.f32 %v12241_v50, %v6189_v40  ;;  %v12243_v47 = vpop.eup %12242  ;;  %12252 = vtanh.f32 %v6236_v17 }
 0x7b4   : > { %7548 = vmatpush1.bf16.msra.mxu1 %v14557_v41  ;;  %v6183_v60 = vmul.f32 0.5, %v12243_v47  ;;  %v6190_v25 = vadd.f32 0.5, %v6182_v12 }
 0x7b5   : > { %12254 = vtanh.f32 %v6237_v8  ;;  %v6463_v52 = vpack.c.bf16 %v6237_v8, %v6236_v17  ;;  %7549 = vmatprep.subr.bf16.mxu1 %v14564_v0  ;;  %v12245_v62 = vpop.eup %12244 }
 0x7b6   : > { %v6191_v41 = vadd.f32 0.5, %v6183_v60 }
 0x7b7   : > { %v12247_v3 = vpop.eup %12246  ;;  %6783 = vmatmul.mubr.bf16.gmra.mrb[180].mxu1 %v6463_v52 }
 0x7b8   : > { %v12249_v24 = vpop.eup %12248  ;;  %v6273_v63 = vpack.c.bf16 %v12247_v3, %v12245_v62  ;;  %6792 = vmatprep.mubr.bf16.mxu1 %v15815_v9  ;;  %7550 = vmatpush1.bf16.msra.mxu1 %v14569_v34 }
 0x7b9   : > { %7551 = vmatprep.subr.bf16.mxu1 %v14579_v38  ;;  %v6238_v44 = vmul.f32 %v12249_v24, %v6190_v25 }
 0x7ba   : > { %10548 = vmatmul.mubr.bf16.vlgmr.msra.gmra.mrb[84].mxu0 %v6273_v63 }
 0x7bb   : > { %6658 = vmatpush1.bf16.msra.mxu0 %v14421_v31  ;;  %12256 = vtanh.f32 %v6238_v44  ;;  %v15879_v31 = vld [vmem:[#allocation86_spill] sm:$0xff] }
 0x7bc   : > { %v12251_v23 = vpop.eup %12250  ;;  %6659 = vmatprep.subr.bf16.mxu0 %v14426_v59  ;;  %7552 = vmatpush1.bf16.msra.mxu1 %v14584_v46  ;;  %v15880_v59 = vld [vmem:[#allocation87_spill] sm:$0xff]  ;;  %v15881_v46 = vld [vmem:[#allocation88_spill] sm:$0xff] }
 0x7bd   : > { %v6239_v0 = vmul.f32 %v12251_v23, %v6191_v41  ;;  %v12253_v49 = vpop.eup %12252  ;;  %7553 = vmatprep.subr.bf16.mxu1 %v14786_v53 }
 0x7bf   : > { %v12255_v21 = vpop.eup %12254  ;;  %6660 = vmatpush1.bf16.msra.mxu0 %v14433_v10  ;;  %12258 = vtanh.f32 %v6239_v0  ;;  %v6464_v34 = vpack.c.bf16 %v6239_v0, %v6238_v44 }
 0x7c0   : > { %6661 = vmatprep.subr.bf16.mxu0 %v15878_v5  ;;  %v6274_v38 = vpack.c.bf16 %v12255_v21, %v12253_v49  ;;  %7554 = vmatpush1.bf16.msra.mxu1 %v14791_v45  ;;  %v15890_v5 = vld [vmem:[#allocation19_spill] sm:$0xff] }
 0x7c1   : > { %6793 = vmatmul.mubr.bf16.gmra.mrb[184].mxu1 %v6464_v34  ;;  %7555 = vmatprep.subr.bf16.mxu1 %v14801_v35 }
 0x7c2   : > { %10551 = vmatprep.mubr.bf16.mxu0 %v6274_v38  ;;  %7573 = vmatprep.mubr.bf16.mxu1 %v15815_v9  ;;  %v1002_v38 = vadd.f32 %v15890_v5, %v15833_v11 }
 0x7c3   : > { %6662 = vmatpush1.bf16.msra.mxu0 %v15879_v31 }
 0x7c4   : > { %6663 = vmatprep.subr.bf16.mxu0 %v15880_v59  ;;  %7556 = vmatpush1.bf16.msra.mxu1 %v14806_v18  ;;  %v15891_v59 = vld [vmem:[#allocation20_spill] sm:$0xff] }
 0x7c5   : > { %v12257_v56 = vpop.eup %12256 }
 0x7c7   : > { %6664 = vmatpush1.bf16.msra.mxu0 %v15881_v46  ;;  %v1004_v46 = vadd.f32 %v15891_v59, %v15834_v36 }
 0x7c8   : > { %6665 = vmatprep.subr.bf16.mxu0 %v15882_v42 }
 0x7c9   : > { %v12259_v19 = vpop.eup %12258 }
 0x7ca   : > { %v6275_v10 = vpack.c.bf16 %v12259_v19, %v12257_v56  ;;  %v15892_v19 = vld [vmem:[#allocation21_spill] sm:$0xff] }
 0x7cb   : > { %6666 = vmatpush1.bf16.msra.mxu0 %v15883_v54 }
 0x7cc   : > { %10552 = vmatmul.mubr.bf16.gmra.mrb[88].mxu0 %v6275_v10  ;;  %6667 = vmatprep.subr.bf16.mxu0 %v15884_v15  ;;  %v1006_v10 = vadd.f32 %v15892_v19, %v15833_v11 }
 0x7cd   : > { %6689 = vmatprep.mubr.bf16.mxu0 %v15815_v9 }
 0x7cf   : > { %6668 = vmatpush1.bf16.msra.mxu0 %v15885_v1 }
 0x7d0   : > { %6669 = vmatprep.subr.bf16.mxu0 %v15886_v33  ;;  %v15893_v33 = vld [vmem:[#allocation22_spill] sm:$0xff] }
 0x7d3   : > { %6670 = vmatpush1.bf16.msra.mxu0 %v15887_v37  ;;  %v1008_v37 = vadd.f32 %v15893_v33, %v15834_v36 }
 0x7d4   : > { %6671 = vmatprep.subr.bf16.mxu0 %v15888_v43 }
 0x7d7   : > { %6672 = vmatpush1.bf16.msra.mxu0 %v15889_v2 }
 0x7d8   : > { %10555 = vmatprep.subr.bf16.mxu0 %v11574_v51 }
 0x7da   : > { %6690 = vmatmul.mubr.bf16.vlgmr.msra.gmra.mrb[104].mxu0 %v14721_v27  ;;  %v11575_v27 = vld [vmem:[%s15698_s4 + $0x188] sm:$0xff]  }
 0x7db   : > { %6699 = vmatprep.mubr.bf16.mxu0 %v15815_v9  ;;  %10556 = vmatpush3.bf16.msra.mxu0 %v11574_v51 }
 0x7dc   : > { %10557 = vmatprep.subr.bf16.mxu0 %v11575_v27 }
 0x7df   : > { %10558 = vmatpush3.bf16.msra.mxu0 %v11575_v27 }
 0x7e0   : > { %10559 = vmatprep.subr.bf16.mxu0 %v11579_v28 }
 0x7e2   : > { %6700 = vmatmul.mubr.bf16.gmra.mrb[108].mxu0 %v14737_v26  ;;  %v11583_v26 = vld [vmem:[%s15698_s4 + $0x198] sm:$0xff]  }
 0x7e3   : > { %6709 = vmatprep.mubr.bf16.mxu0 %v15815_v9  ;;  %10560 = vmatpush3.bf16.msra.mxu0 %v11579_v28 }
 0x7e4   : > { %10561 = vmatprep.subr.bf16.mxu0 %v11583_v26 }
 0x7e7   : > { %10562 = vmatpush3.bf16.msra.mxu0 %v11583_v26 }
 0x7e8   : > { %10563 = vmatprep.subr.bf16.mxu0 %v11584_v30 }
 0x7ea   : > { %6710 = vmatmul.mubr.bf16.gmra.mrb[112].mxu0 %v6463_v52 }
 0x7eb   : > { %6719 = vmatprep.mubr.bf16.mxu0 %v15815_v9  ;;  %10564 = vmatpush3.bf16.msra.mxu0 %v11584_v30 }
 0x7ec   : > { %10565 = vmatprep.subr.bf16.mxu0 %v11585_v7 }
 0x7ef   : > { %10566 = vmatpush3.bf16.msra.mxu0 %v11585_v7 }
 0x7f0   : > { %10567 = vmatprep.subr.bf16.mxu0 %v11586_v6 }
 0x7f2   : > { %6720 = vmatmul.mubr.bf16.gmra.mrb[116].mxu0 %v6464_v34 }
 0x7f3   : > { %10568 = vmatpush3.bf16.msra.mxu0 %v11586_v6 }
 0x7f4   : > { %10569 = vmatprep.subr.bf16.mxu0 %v11587_v39 }
 0x7f7   : > { %10570 = vmatpush3.bf16.msra.mxu0 %v11587_v39 }
 0x7f8   : > { %7468 = vmatprep.subr.bf16.mxu0 %v14828_v57 }
 0x87a   : > { %v6764_v58 = vpop.f32.mrb[172].mxu1 }
 0x87b   : > { %v6766_v48 = vpop.f32.mrb[173].mxu1  ;;  %v10955_v0 = vadd.f32 %v6764_v58, %v13327_v16 }
 0x87c   : > { %v6768_v40 = vpop.f32.mrb[174].mxu1  ;;  %v10956_v41 = vadd.f32 %v6766_v48, %v13329_v55 }
 0x87d   : > { %v6770_v17 = vpop.f32.mrb[175].mxu1  ;;  %v10957_v49 = vadd.f32 %v6768_v40, %v13327_v16  ;;  %12260 = vtanh.f32 %v10955_v0  ;;  %v15894_v40 = vld [vmem:[#allocation23_spill] sm:$0xff]  ;;  %v15896_v0 = vld [vmem:[#allocation25_spill] sm:$0xff] }
 0x87e   : > { %v10958_v23 = vadd.f32 %v6770_v17, %v13329_v55  ;;  %v6971_v21 = vmul.f32 0.5, %v10956_v41  ;;  %v1012_v17 = vadd.f32 %v15894_v40, %v15833_v11 }
 0x87f   : > { %12262 = vtanh.f32 %v10957_v49  ;;  %v1016_v49 = vadd.f32 %v15896_v0, %v15833_v11 }
 0x880   : > { %v6972_v34 = vmul.f32 0.5, %v10958_v23  ;;  %12264 = vtanh.f32 %v6971_v21 }
 0x882   : > { %v6774_v50 = vpop.f32.mrb[176].mxu1  ;;  %12266 = vtanh.f32 %v6972_v34 }
 0x883   : > { %v6776_v8 = vpop.f32.mrb[177].mxu1  ;;  %v10959_v31 = vadd.f32 %v6774_v50, %v13327_v16 }
 0x884   : > { %v6778_v47 = vpop.f32.mrb[178].mxu1  ;;  %v10960_v54 = vadd.f32 %v6776_v8, %v13329_v55  ;;  %v15895_v8 = vld [vmem:[#allocation24_spill] sm:$0xff] }
 0x885   : > { %v6780_v12 = vpop.f32.mrb[179].mxu1  ;;  %v10961_v56 = vadd.f32 %v6778_v47, %v13327_v16  ;;  %12268 = vtanh.f32 %v10959_v31  ;;  %v1014_v47 = vadd.f32 %v15895_v8, %v15834_v36  ;;  %v15902_v8 = vld [vmem:[#allocation31_spill] sm:$0xff] }
 0x886   : > { %v10962_v43 = vadd.f32 %v6780_v12, %v13329_v55  ;;  %v6973_v6 = vmul.f32 0.5, %v10960_v54 }
 0x887   : > { %12270 = vtanh.f32 %v10961_v56  ;;  %v12261_v23 = vpop.eup %12260 }
 0x888   : > { %v6974_v58 = vmul.f32 0.5, %v10962_v43 }
 0x88a   : > { %v6784_v52 = vpop.f32.mrb[180].mxu1 }
 0x88b   : > { %v6786_v62 = vpop.f32.mrb[181].mxu1  ;;  %v10963_v50 = vadd.f32 %v6784_v52, %v13327_v16  ;;  %v15897_v52 = vld [vmem:[#allocation26_spill] sm:$0xff] }
 0x88c   : > { %v6788_v3 = vpop.f32.mrb[182].mxu1  ;;  %v10964_v21 = vadd.f32 %v6786_v62, %v13329_v55  ;;  %v1018_v31 = vadd.f32 %v15897_v52, %v15834_v36 }
 0x88d   : > { %v6790_v60 = vpop.f32.mrb[183].mxu1  ;;  %v10965_v12 = vadd.f32 %v6788_v3, %v13327_v16 }
 0x88e   : > { %v10966_v59 = vadd.f32 %v6790_v60, %v13329_v55  ;;  %v6975_v33 = vmul.f32 0.5, %v10964_v21 }
 0x890   : > { %v6976_v60 = vmul.f32 0.5, %v10966_v59 }
 0x894   : > { %v14831_v24 = vpop.f32.mrb[184].mxu1 }
 0x895   : > { %v14833_v25 = vpop.f32.mrb[185].mxu1 }
 0x896   : > { %v14835_v63 = vpop.f32.mrb[186].mxu1 }
 0x897   : > { %v14837_v44 = vpop.f32.mrb[187].mxu1 }
 0x8ad   : > { %v6691_v42 = vpop.f32.mrb[104].mxu0 }
 0x8ae   : > { %v6803_v15 = vadd.f32 %v6691_v42, %v1002_v38  ;;  %v6693_v1 = vpop.f32.mrb[105].mxu0  ;;  %v14864_v38 = vpop.eup %12262 }
 0x8af   : > { %v6804_v2 = vadd.f32 %v6693_v1, %v1004_v46  ;;  %v6695_v51 = vpop.f32.mrb[106].mxu0  ;;  %v14869_v56 = vpop.eup %12264 }
 0x8b0   : > { %v6875_v27 = vmul.f32 0.5, %v6803_v15  ;;  %v6807_v28 = vadd.f32 %v6695_v51, %v1006_v10  ;;  %v6697_v26 = vpop.f32.mrb[107].mxu0  ;;  %v14871_v54 = vpop.eup %12266 }
 0x8b1   : > { %v6915_v30 = vmul.f32 0.5, %v6804_v2  ;;  %v6808_v7 = vadd.f32 %v6697_v26, %v1008_v37  ;;  %v14873_v1 = vpop.eup %12268  ;;  %v15899_v26 = vld [vmem:[#allocation28_spill] sm:$0xff] }
 0x8b2   : > { %12272 = vtanh.f32 %v6875_v27  ;;  %v6876_v39 = vmul.f32 0.5, %v6807_v28  ;;  %v14875_v43 = vpop.eup %12270  ;;  %v15898_v27 = vld [vmem:[#allocation27_spill] sm:$0xff] }
 0x8b3   : > { %12274 = vtanh.f32 %v6915_v30  ;;  %v6916_v48 = vmul.f32 0.5, %v6808_v7  ;;  %v1022_v28 = vadd.f32 %v15898_v27, %v15833_v11  ;;  %v1024_v30 = vadd.f32 %v15899_v26, %v15834_v36  ;;  %v15903_v26 = vld [vmem:[#allocation32_spill] sm:$0xff] }
 0x8b4   : > { %12276 = vtanh.f32 %v6876_v39 }
 0x8b5   : > { %12278 = vtanh.f32 %v6916_v48  ;;  %v6701_v41 = vpop.f32.mrb[108].mxu0 }
 0x8b6   : > { %12280 = vtanh.f32 %v6973_v6  ;;  %v6811_v34 = vadd.f32 %v6701_v41, %v1012_v17  ;;  %v6703_v5 = vpop.f32.mrb[109].mxu0  ;;  %v15900_v6 = vld [vmem:[#allocation29_spill] sm:$0xff] }
 0x8b7   : > { %12282 = vtanh.f32 %v6974_v58  ;;  %v6812_v3 = vadd.f32 %v6703_v5, %v1014_v47  ;;  %v6705_v46 = vpop.f32.mrb[110].mxu0  ;;  %v1026_v39 = vadd.f32 %v15900_v6, %v15833_v11  ;;  %v15901_v58 = vld [vmem:[#allocation30_spill] sm:$0xff]  ;;  %v1032_v47 = vadd.f32 %v15902_v8, %v15833_v11 }
 0x8b8   : > { %12284 = vtanh.f32 %v10963_v50  ;;  %v6877_v42 = vmul.f32 0.5, %v6811_v34  ;;  %v6815_v19 = vadd.f32 %v6705_v46, %v1016_v49  ;;  %v6707_v10 = vpop.f32.mrb[111].mxu0  ;;  %v1028_v48 = vadd.f32 %v15901_v58, %v15834_v36 }
 0x8b9   : > { %12286 = vtanh.f32 %v10965_v12  ;;  %v6917_v62 = vmul.f32 0.5, %v6812_v3  ;;  %v6816_v15 = vadd.f32 %v6707_v10, %v1018_v31  ;;  %v6987_v8 = vmul.f32 0.5, %v14869_v56 }
 0x8ba   : > { %12288 = vtanh.f32 %v6877_v42  ;;  %v6878_v37 = vmul.f32 0.5, %v6815_v19 }
 0x8bb   : > { %12290 = vtanh.f32 %v6917_v62  ;;  %v6918_v2 = vmul.f32 0.5, %v6816_v15 }
 0x8bc   : > { %v12273_v51 = vpop.eup %12272  ;;  %12292 = vtanh.f32 %v6878_v37 }
 0x8bd   : > { %v12275_v7 = vpop.eup %12274  ;;  %v6891_v40 = vmul.f32 0.5, %v12273_v51  ;;  %12294 = vtanh.f32 %v6918_v2  ;;  %v6711_v17 = vpop.f32.mrb[112].mxu0 }
 0x8be   : > { %v12277_v50 = vpop.eup %12276  ;;  %12296 = vtanh.f32 %v6975_v33  ;;  %v6931_v12 = vmul.f32 0.5, %v12275_v7  ;;  %v6819_v41 = vadd.f32 %v6711_v17, %v1022_v28  ;;  %v6713_v0 = vpop.f32.mrb[113].mxu0  ;;  %v15905_v17 = vld [vmem:[#allocation34_spill] sm:$0xff] }
 0x8bf   : > { %v12279_v49 = vpop.eup %12278  ;;  %12298 = vtanh.f32 %v6976_v60  ;;  %v6899_v21 = vadd.f32 0.5, %v6891_v40  ;;  %v6892_v34 = vmul.f32 0.5, %v12277_v50  ;;  %v6820_v5 = vadd.f32 %v6713_v0, %v1024_v30  ;;  %v6715_v52 = vpop.f32.mrb[114].mxu0 }
 0x8c0   : > { %v14887_v31 = vpop.eup %12280  ;;  %v6939_v59 = vadd.f32 0.5, %v6931_v12  ;;  %v6932_v3 = vmul.f32 0.5, %v12279_v49  ;;  %v6879_v46 = vmul.f32 0.5, %v6819_v41  ;;  %v6823_v42 = vadd.f32 %v6715_v52, %v1026_v39  ;;  %v6717_v19 = vpop.f32.mrb[115].mxu0  ;;  %v15904_v39 = vld [vmem:[#allocation33_spill] sm:$0xff] }
 0x8c1   : > { %v14889_v10 = vpop.eup %12282  ;;  %v7019_v62 = vmul.f32 %v12261_v23, %v6899_v21  ;;  %v6900_v15 = vadd.f32 0.5, %v6892_v34  ;;  %v6919_v33 = vmul.f32 0.5, %v6820_v5  ;;  %v6824_v37 = vadd.f32 %v6717_v19, %v1028_v48 }
 0x8c2   : > { %v14891_v2 = vpop.eup %12284  ;;  %v7011_v60 = vmul.f32 %v6939_v59, %v14680_v29  ;;  %v6940_v51 = vadd.f32 0.5, %v6932_v3  ;;  %12300 = vtanh.f32 %v6879_v46  ;;  %v6880_v27 = vmul.f32 0.5, %v6823_v42 }
 0x8c3   : > { %v14894_v28 = vpop.eup %12286  ;;  %v1034_v30 = vadd.f32 %v15903_v26, %v15834_v36  ;;  %v7020_v7 = vmul.f32 %v14864_v38, %v6900_v15  ;;  %12302 = vtanh.f32 %v6919_v33  ;;  %v6920_v6 = vmul.f32 0.5, %v6824_v37 }
 0x8c4   : > { %v12289_v23 = vpop.eup %12288  ;;  %v1036_v58 = vadd.f32 %v15904_v39, %v15833_v11  ;;  %v14901_v48 = vadd.f32 %v7019_v62, %v7011_v60  ;;  %v7012_v29 = vmul.f32 %v6940_v51, %v14687_v32  ;;  %12304 = vtanh.f32 %v6880_v27 }
 0x8c5   : > { %v12291_v40 = vpop.eup %12290  ;;  %v1038_v50 = vadd.f32 %v15905_v17, %v15834_v36  ;;  %v6893_v12 = vmul.f32 0.5, %v12289_v23  ;;  %12306 = vtanh.f32 %v6920_v6  ;;  %v6721_v38 = vpop.f32.mrb[116].mxu0  ;;  %v10967_v32 = vadd.f32 %v14831_v24, %v13327_v16 }
 0x8c6   : > { %v12293_v41 = vpop.eup %12292  ;;  %12308 = vtanh.f32 %v14901_v48  ;;  %v14908_v0 = vadd.f32 %v7020_v7, %v7012_v29  ;;  %v6933_v49 = vmul.f32 0.5, %v12291_v40  ;;  %v6827_v21 = vadd.f32 %v6721_v38, %v1032_v47  ;;  %v6723_v34 = vpop.f32.mrb[117].mxu0 }
 0x8c7   : > { %v12295_v5 = vpop.eup %12294  ;;  %v6901_v52 = vadd.f32 0.5, %v6893_v12  ;;  %v6894_v59 = vmul.f32 0.5, %v12293_v41  ;;  %v6828_v3 = vadd.f32 %v6723_v34, %v1034_v30  ;;  %v6725_v46 = vpop.f32.mrb[118].mxu0  ;;  %v6988_v30 = vmul.f32 0.5, %v14871_v54 }
 0x8c8   : > { %v14912_v56 = vpop.eup %12296  ;;  %12310 = vtanh.f32 %v14908_v0  ;;  %v6941_v42 = vadd.f32 0.5, %v6933_v49  ;;  %v6934_v19 = vmul.f32 0.5, %v12295_v5  ;;  %v6881_v62 = vmul.f32 0.5, %v6827_v21  ;;  %v6727_v15 = vpop.f32.mrb[119].mxu0 }
 0x8c9   : > { %v14915_v33 = vpop.eup %12298  ;;  %v7021_v47 = vmul.f32 %v14873_v1, %v6901_v52  ;;  %v6902_v37 = vadd.f32 0.5, %v6894_v59  ;;  %v6921_v60 = vmul.f32 0.5, %v6828_v3  ;;  %v6831_v51 = vadd.f32 %v6725_v46, %v1036_v58 }
 0x8ca   : > { %v7013_v24 = vmul.f32 %v6941_v42, %v14700_v20  ;;  %v6942_v27 = vadd.f32 0.5, %v6934_v19  ;;  %12312 = vtanh.f32 %v6881_v62  ;;  %v6832_v26 = vadd.f32 %v6727_v15, %v1038_v50 }
 0x8cb   : > { %v7022_v7 = vmul.f32 %v14875_v43, %v6902_v37  ;;  %12314 = vtanh.f32 %v6921_v60  ;;  %v6882_v6 = vmul.f32 0.5, %v6831_v51  ;;  %v10969_v20 = vadd.f32 %v14835_v63, %v13327_v16 }
 0x8cc   : > { %v12301_v23 = vpop.eup %12300  ;;  %12316 = vtanh.f32 %v10967_v32  ;;  %v14921_v39 = vadd.f32 %v7021_v47, %v7013_v24  ;;  %v7014_v1 = vmul.f32 %v6942_v27, %v14706_v4  ;;  %v6922_v29 = vmul.f32 0.5, %v6832_v26 }
 0x8cd   : > { %v12303_v40 = vpop.eup %12302  ;;  %v6895_v58 = vmul.f32 0.5, %v12301_v23  ;;  %12318 = vtanh.f32 %v6882_v6  ;;  %v6995_v50 = vadd.f32 0.5, %v6987_v8  ;;  %v10968_v38 = vadd.f32 %v14833_v25, %v13329_v55 }
 0x8ce   : > { %v12305_v17 = vpop.eup %12304  ;;  %12320 = vtanh.f32 %v14921_v39  ;;  %v14927_v54 = vadd.f32 %v7022_v7, %v7014_v1  ;;  %v6935_v43 = vmul.f32 0.5, %v12303_v40  ;;  %v6996_v21 = vadd.f32 0.5, %v6988_v30 }
 0x8cf   : > { %v12307_v12 = vpop.eup %12306  ;;  %v6903_v41 = vadd.f32 0.5, %v6895_v58  ;;  %v6896_v4 = vmul.f32 0.5, %v12305_v17  ;;  %12322 = vtanh.f32 %v6922_v29  ;;  %v10970_v59 = vadd.f32 %v14837_v44, %v13329_v55 }
 0x8d0   : > { %v12309_v49 = vpop.eup %12308  ;;  %12324 = vtanh.f32 %v14927_v54  ;;  %v6943_v63 = vadd.f32 0.5, %v6935_v43  ;;  %v6936_v34 = vmul.f32 0.5, %v12307_v12  ;;  %v6989_v46 = vmul.f32 0.5, %v14887_v31 }
 0x8d1   : > { %12326 = vtanh.f32 %v10969_v20  ;;  %v7023_v8 = vmul.f32 %v14891_v2, %v6903_v41  ;;  %v6904_v5 = vadd.f32 0.5, %v6896_v4  ;;  %v7043_v32 = vmul.f32 %v12309_v49, %v6995_v50 }
 0x8d2   : > { %v12311_v52 = vpop.eup %12310  ;;  %v7015_v25 = vmul.f32 %v6943_v63, %v14717_v13  ;;  %v6944_v3 = vadd.f32 0.5, %v6936_v34  ;;  %v6977_v42 = vmul.f32 0.5, %v10968_v38  ;;  %v6990_v60 = vmul.f32 0.5, %v14889_v10 }
 0x8d3   : > { %v7024_v19 = vmul.f32 %v14894_v28, %v6904_v5  ;;  %v7044_v62 = vmul.f32 %v12311_v52, %v6996_v21  ;;  %12328 = vtanh.f32 %v7043_v32  ;;  %v6978_v24 = vmul.f32 0.5, %v10970_v59 }
 0x8d4   : > { %v12313_v15 = vpop.eup %12312  ;;  %v14938_v47 = vadd.f32 %v7023_v8, %v7015_v25  ;;  %v7016_v2 = vmul.f32 %v6944_v3, %v14724_v22  ;;  %v6997_v26 = vadd.f32 0.5, %v6989_v46  ;;  %v6998_v23 = vadd.f32 0.5, %v6990_v60 }
 0x8d5   : > { %v12315_v37 = vpop.eup %12314  ;;  %v6897_v51 = vmul.f32 0.5, %v12313_v15  ;;  %v14942_v44 = vpack.c.bf16 %v7044_v62, %v7043_v32  ;;  %12330 = vtanh.f32 %v7044_v62  ;;  %v6991_v43 = vmul.f32 0.5, %v14912_v56 }
 0x8d6   : > { %v12317_v13 = vpop.eup %12316  ;;  %12332 = vtanh.f32 %v14938_v47  ;;  %v14945_v31 = vadd.f32 %v7024_v19, %v7016_v2  ;;  %v6937_v28 = vmul.f32 0.5, %v12315_v37  ;;  %v6992_v49 = vmul.f32 0.5, %v14915_v33  ;;  %v14967_v2 = vld [vmem:[%s15696_s2] ss:$16 sps:$4 sm:$0xff]  }
 0x8d7   : > { %v12319_v27 = vpop.eup %12318  ;;  %12334 = vtanh.f32 %v6977_v42  ;;  %v6905_v30 = vadd.f32 0.5, %v6897_v51  ;;  %7574 = vmatmul.mubr.bf16.vlgmr.msra.gmra.mrb[188].mxu1 %v14942_v44  ;;  %v6999_v8 = vadd.f32 0.5, %v6991_v43 }
 0x8d8   : > { %v12321_v22 = vpop.eup %12320  ;;  %12336 = vtanh.f32 %v14945_v31  ;;  %v6945_v10 = vadd.f32 0.5, %v6937_v28  ;;  %v6898_v7 = vmul.f32 0.5, %v12319_v27  ;;  %7583 = vmatprep.mubr.bf16.mxu1 %v15815_v9  ;;  %v7000_v33 = vadd.f32 0.5, %v6992_v49  ;;  %v14979_v27 = vld [vmem:[%s15696_s2 + $0x20] ss:$16 sps:$4 sm:$0xff]  }
 0x8d9   : > { %v12323_v6 = vpop.eup %12322  ;;  %v7025_v1 = vmul.f32 %v12317_v13, %v6905_v30  ;;  %v7045_v29 = vmul.f32 %v12321_v22, %v6997_v26  ;;  %12338 = vtanh.f32 %v6978_v24  ;;  %v14972_v13 = vld [vmem:[%s15696_s2 + $0x24] ss:$16 sps:$4 sm:$0xff]   ;;  %v15041_v49 = vld [vmem:[%s15696_s2 + $0xc0] ss:$16 sps:$4 sm:$0xff]  }
 0x8da   : > { %v12325_v40 = vpop.eup %12324  ;;  %v7017_v20 = vmul.f32 %v6945_v10, %v14733_v14  ;;  %v6906_v58 = vadd.f32 0.5, %v6898_v7  ;;  %v6938_v17 = vmul.f32 0.5, %v12323_v6  ;;  %v14985_v30 = vld [vmem:[%s15696_s2 + $0x44] ss:$16 sps:$4 sm:$0xff]   ;;  %15915 = vst [vmem:[#allocation16_spill] sm:$0xff] %v15041_v49 }
 0x8db   : > { %v12327_v50 = vpop.eup %12326  ;;  %v7046_v12 = vmul.f32 %v12325_v40, %v6998_v23  ;;  %12340 = vtanh.f32 %v7045_v29  ;;  %15906 = vst [vmem:[#allocation7_spill] sm:$0xff] %v14985_v30  ;;  %v14991_v23 = vld [vmem:[%s15696_s2 + $0x40] ss:$16 sps:$4 sm:$0xff]  }
 0x8dc   : > { %v14952_v38 = vadd.f32 %v7025_v1, %v7017_v20  ;;  %v7026_v41 = vmul.f32 %v12327_v50, %v6906_v58  ;;  %v6946_v4 = vadd.f32 0.5, %v6938_v17  ;;  %15907 = vst [vmem:[#allocation8_spill] sm:$0xff] %v14991_v23  ;;  %v15004_v40 = vld [vmem:[%s15696_s2 + $0x60] ss:$16 sps:$4 sm:$0xff]   ;;  %v15010_v20 = vld [vmem:[%s15696_s2 + $0x84] ss:$16 sps:$4 sm:$0xff]  }
 0x8dd   : > { %12342 = vtanh.f32 %v7046_v12  ;;  %v14955_v21 = vpack.c.bf16 %v7046_v12, %v7045_v29  ;;  %v12329_v63 = vpop.eup %12328  ;;  %v14997_v29 = vld [vmem:[%s15696_s2 + $0x64] ss:$16 sps:$4 sm:$0xff]   ;;  %15909 = vst [vmem:[#allocation10_spill] sm:$0xff] %v15004_v40  ;;  %15910 = vst [vmem:[#allocation11_spill] sm:$0xff] %v15010_v20  ;;  %v15016_v58 = vld [vmem:[%s15696_s2 + $0x80] ss:$16 sps:$4 sm:$0xff]  }
 0x8de   : > { %12344 = vtanh.f32 %v14952_v38  ;;  %v7018_v14 = vmul.f32 %v6946_v4, %v14743_v61  ;;  %15908 = vst [vmem:[#allocation9_spill] sm:$0xff] %v14997_v29  ;;  %15911 = vst [vmem:[#allocation12_spill] sm:$0xff] %v15016_v58  ;;  %v15022_v50 = vld [vmem:[%s15696_s2 + $0xa4] ss:$16 sps:$4 sm:$0xff]  }
 0x8df   : > { %v12331_v34 = vpop.eup %12330  ;;  %7584 = vmatmul.mubr.bf16.gmra.mrb[192].mxu1 %v14955_v21  ;;  %15912 = vst [vmem:[#allocation13_spill] sm:$0xff] %v15022_v50  ;;  %v15034_v4 = vld [vmem:[%s15696_s2 + $0xc4] ss:$16 sps:$4 sm:$0xff]  }
 0x8e0   : > { %v12333_v56 = vpop.eup %12332  ;;  %v14960_v5 = vadd.f32 %v7026_v41, %v7018_v14  ;;  %v7083_v32 = vpack.c.bf16 %v12331_v34, %v12329_v63  ;;  %7593 = vmatprep.mubr.bf16.mxu1 %v15815_v9  ;;  %v15028_v41 = vld [vmem:[%s15696_s2 + $0xa0] ss:$16 sps:$4 sm:$0xff]   ;;  %15914 = vst [vmem:[#allocation15_spill] sm:$0xff] %v15034_v4  ;;  %v15047_v63 = vld [vmem:[%s15696_s2 + $0xe4] ss:$16 sps:$4 sm:$0xff]  }
 0x8e1   : > { %v12335_v52 = vpop.eup %12334  ;;  %v7047_v59 = vmul.f32 %v12333_v56, %v6999_v8  ;;  %15913 = vst [vmem:[#allocation14_spill] sm:$0xff] %v15028_v41  ;;  %15916 = vst [vmem:[#allocation17_spill] sm:$0xff] %v15047_v63  ;;  %v15053_v14 = vld [vmem:[%s15696_s2 + $0xe0] ss:$16 sps:$4 sm:$0xff]   ;;  %v11614_v34 = vld [vmem:[%s15696_s2 + $0xc] ss:$16 sps:$4 sm:$0xff]  }
 0x8e2   : > { %v12337_v25 = vpop.eup %12336  ;;  %12346 = vtanh.f32 %v14960_v5  ;;  %10571 = vmatprep.mubr.bf16.mxu0 %v7083_v32  ;;  %v6993_v61 = vmul.f32 0.5, %v12335_v52  ;;  %15917 = vst [vmem:[#allocation18_spill] sm:$0xff] %v15053_v14  ;;  %v15068_v8 = vld [vmem:[%s15696_s2 + $0x8] ss:$16 sps:$4 sm:$0xff]   ;;  %8352 = vmatprep.subr.bf16.mxu1 %v11614_v34  ;;  %v15086_v56 = vld [vmem:[%s15696_s2 + $0x4c] ss:$16 sps:$4 sm:$0xff]  }
 0x8e3   : > { %v7048_v3 = vmul.f32 %v12337_v25, %v7000_v33  ;;  %v12339_v46 = vpop.eup %12338  ;;  %12348 = vtanh.f32 %v7047_v59  ;;  %8353 = vmatpush1.bf16.msra.mxu1 %v15068_v8  ;;  %v15091_v32 = vld [vmem:[%s15696_s2 + $0x48] ss:$16 sps:$4 sm:$0xff]   ;;  %v15098_v52 = vld [vmem:[%s15696_s2 + $0x6c] ss:$16 sps:$4 sm:$0xff]  }
 0x8e4   : > { %v6994_v15 = vmul.f32 0.5, %v12339_v46  ;;  %v7001_v60 = vadd.f32 0.5, %v6993_v61  ;;  %v15103_v33 = vld [vmem:[%s15696_s2 + $0x68] ss:$16 sps:$4 sm:$0xff]   ;;  %v15125_v46 = vld [vmem:[%s15696_s2 + $0xac] ss:$16 sps:$4 sm:$0xff]  }
 0x8e5   : > { %12350 = vtanh.f32 %v7048_v3  ;;  %v7274_v42 = vpack.c.bf16 %v7048_v3, %v7047_v59  ;;  %v12341_v19 = vpop.eup %12340  ;;  %v15110_v59 = vld [vmem:[%s15696_s2 + $0x8c] ss:$16 sps:$4 sm:$0xff]   ;;  %v15115_v25 = vld [vmem:[%s15696_s2 + $0x88] ss:$16 sps:$4 sm:$0xff]   ;;  %v11627_v3 = vld [vmem:[%s15698_s4 + $0x1c0] sm:$0xff]  }
 0x8e6   : > { %v7002_v28 = vadd.f32 0.5, %v6994_v15  ;;  %v15130_v61 = vld [vmem:[%s15696_s2 + $0xa8] ss:$16 sps:$4 sm:$0xff]  }
 0x8e7   : > { %v12343_v62 = vpop.eup %12342  ;;  %7594 = vmatmul.mubr.bf16.gmra.mrb[196].mxu1 %v7274_v42 }
 0x8e8   : > { %v12345_v37 = vpop.eup %12344  ;;  %v7084_v51 = vpack.c.bf16 %v12343_v62, %v12341_v19  ;;  %7603 = vmatprep.mubr.bf16.mxu1 %v15815_v9  ;;  %v11632_v19 = vld [vmem:[%s15698_s4 + $0x1d0] sm:$0xff]   ;;  %v11633_v62 = vld [vmem:[%s15698_s4 + $0x1d8] sm:$0xff]  }
 0x8e9   : > { %v7049_v24 = vmul.f32 %v12345_v37, %v7001_v60 }
 0x8ea   : > { %10572 = vmatmul.mubr.bf16.vlgmr.msra.gmra.mrb[84].mxu0 %v7084_v51 }
 0x8eb   : > { %7469 = vmatpush1.bf16.msra.mxu0 %v14967_v2  ;;  %12352 = vtanh.f32 %v7049_v24 }
 0x8ec   : > { %v12347_v26 = vpop.eup %12346  ;;  %7470 = vmatprep.subr.bf16.mxu0 %v14972_v13 }
 0x8ed   : > { %v7050_v22 = vmul.f32 %v12347_v26, %v7002_v28  ;;  %v12349_v10 = vpop.eup %12348 }
 0x8ef   : > { %v12351_v7 = vpop.eup %12350  ;;  %7471 = vmatpush1.bf16.msra.mxu0 %v14979_v27  ;;  %12354 = vtanh.f32 %v7050_v22  ;;  %v7275_v6 = vpack.c.bf16 %v7050_v22, %v7049_v24 }
 0x8f0   : > { %7472 = vmatprep.subr.bf16.mxu0 %v14985_v30  ;;  %v7085_v1 = vpack.c.bf16 %v12351_v7, %v12349_v10 }
 0x8f1   : > { %7604 = vmatmul.mubr.bf16.gmra.mrb[200].mxu1 %v7275_v6 }
 0x8f2   : > { %10575 = vmatprep.mubr.bf16.mxu0 %v7085_v1  ;;  %8384 = vmatprep.mubr.bf16.mxu1 %v15815_v9 }
 0x8f3   : > { %7473 = vmatpush1.bf16.msra.mxu0 %v14991_v23 }
 0x8f4   : > { %7474 = vmatprep.subr.bf16.mxu0 %v14997_v29 }
 0x8f5   : > { %v12353_v17 = vpop.eup %12352 }
 0x8f7   : > { %7475 = vmatpush1.bf16.msra.mxu0 %v15004_v40 }
 0x8f8   : > { %7476 = vmatprep.subr.bf16.mxu0 %v15010_v20 }
 0x8f9   : > { %v12355_v43 = vpop.eup %12354 }
 0x8fa   : > { %v7086_v12 = vpack.c.bf16 %v12355_v43, %v12353_v17 }
 0x8fb   : > { %7477 = vmatpush1.bf16.msra.mxu0 %v15016_v58 }
 0x8fc   : > { %10576 = vmatmul.mubr.bf16.gmra.mrb[88].mxu0 %v7086_v12  ;;  %7478 = vmatprep.subr.bf16.mxu0 %v15022_v50 }
 0x8fd   : > { %7500 = vmatprep.mubr.bf16.mxu0 %v15815_v9 }
 0x8ff   : > { %7479 = vmatpush1.bf16.msra.mxu0 %v15028_v41 }
 0x900   : > { %7480 = vmatprep.subr.bf16.mxu0 %v15034_v4 }
 0x903   : > { %7481 = vmatpush1.bf16.msra.mxu0 %v15041_v49 }
 0x904   : > { %7482 = vmatprep.subr.bf16.mxu0 %v15047_v63 }
 0x907   : > { %7483 = vmatpush1.bf16.msra.mxu0 %v15053_v14  ;;  %v15919_v14 = vld [vmem:[#allocation36_spill] sm:$0xff] }
 0x908   : > { %10579 = vmatprep.subr.bf16.mxu0 %v11627_v3  ;;  %v1044_v63 = vadd.f32 %v15919_v14, %v15834_v36 }
 0x90a   : > { %7501 = vmatmul.mubr.bf16.vlgmr.msra.gmra.mrb[120].mxu0 %v14942_v44  ;;  %v15074_v44 = vld [vmem:[%s15696_s2 + $0x2c] ss:$16 sps:$4 sm:$0xff]  }
 0x90b   : > { %7510 = vmatprep.mubr.bf16.mxu0 %v15815_v9  ;;  %8354 = vmatprep.subr.bf16.mxu1 %v15074_v44 }
 0x90c   : > { %10580 = vmatpush3.bf16.msra.mxu0 %v11627_v3 }
 0x912   : > { %7511 = vmatmul.mubr.bf16.gmra.mrb[124].mxu0 %v14955_v21  ;;  %v15079_v21 = vld [vmem:[%s15696_s2 + $0x28] ss:$16 sps:$4 sm:$0xff]  }
 0x913   : > { %7520 = vmatprep.mubr.bf16.mxu0 %v15815_v9  ;;  %8355 = vmatpush1.bf16.msra.mxu1 %v15079_v21 }
 0x914   : > { %8356 = vmatprep.subr.bf16.mxu1 %v15086_v56 }
 0x917   : > { %8357 = vmatpush1.bf16.msra.mxu1 %v15091_v32 }
 0x918   : > { %8358 = vmatprep.subr.bf16.mxu1 %v15098_v52 }
 0x91a   : > { %7521 = vmatmul.mubr.bf16.gmra.mrb[128].mxu0 %v7274_v42  ;;  %v11631_v42 = vld [vmem:[%s15698_s4 + $0x1c8] sm:$0xff]  }
 0x91b   : > { %7530 = vmatprep.mubr.bf16.mxu0 %v15815_v9  ;;  %8359 = vmatpush1.bf16.msra.mxu1 %v15103_v33 }
 0x91c   : > { %8360 = vmatprep.subr.bf16.mxu1 %v15110_v59  ;;  %10581 = vmatprep.subr.bf16.mxu0 %v11631_v42 }
 0x91d   : > { %10582 = vmatpush3.bf16.msra.mxu0 %v11631_v42 }
 0x91e   : > { %10583 = vmatprep.subr.bf16.mxu0 %v11632_v19 }
 0x91f   : > { %8361 = vmatpush1.bf16.msra.mxu1 %v15115_v25 }
 0x920   : > { %8362 = vmatprep.subr.bf16.mxu1 %v15125_v46 }
 0x921   : > { %10584 = vmatpush3.bf16.msra.mxu0 %v11632_v19 }
 0x922   : > { %7531 = vmatmul.mubr.bf16.gmra.mrb[132].mxu0 %v7275_v6  ;;  %10585 = vmatprep.subr.bf16.mxu0 %v11633_v62 }
 0x923   : > { %8363 = vmatpush1.bf16.msra.mxu1 %v15130_v61 }
 0x924   : > { %8364 = vmatprep.subr.bf16.mxu1 %v14786_v53  ;;  %v11634_v53 = vld [vmem:[%s15698_s4 + $0x1e0] sm:$0xff]  }
 0x925   : > { %10586 = vmatpush3.bf16.msra.mxu0 %v11633_v62 }
 0x926   : > { %10587 = vmatprep.subr.bf16.mxu0 %v11634_v53 }
 0x927   : > { %8365 = vmatpush1.bf16.msra.mxu1 %v14791_v45  ;;  %v11635_v45 = vld [vmem:[%s15698_s4 + $0x1e8] sm:$0xff]  }
 0x928   : > { %8366 = vmatprep.subr.bf16.mxu1 %v14801_v35  ;;  %v11636_v35 = vld [vmem:[%s15698_s4 + $0x1f0] sm:$0xff]  }
 0x929   : > { %10588 = vmatpush3.bf16.msra.mxu0 %v11634_v53 }
 0x92a   : > { %10589 = vmatprep.subr.bf16.mxu0 %v11635_v45 }
 0x92b   : > { %8367 = vmatpush1.bf16.msra.mxu1 %v14806_v18  ;;  %v11637_v18 = vld [vmem:[%s15698_s4 + $0x1f8] sm:$0xff]  }
 0x92c   : > { %9163 = vmatprep.subr.bf16.mxu1 %v11614_v34 }
 0x92d   : > { %10590 = vmatpush3.bf16.msra.mxu0 %v11635_v45  ;;  %v15918_v45 = vld [vmem:[#allocation35_spill] sm:$0xff] }
 0x92e   : > { %10591 = vmatprep.subr.bf16.mxu0 %v11636_v35 }
 0x931   : > { %10592 = vmatpush3.bf16.msra.mxu0 %v11636_v35  ;;  %v1042_v35 = vadd.f32 %v15918_v45, %v15833_v11  ;;  %v15921_v45 = vld [vmem:[#allocation38_spill] sm:$0xff] }
 0x932   : > { %10593 = vmatprep.subr.bf16.mxu0 %v11637_v18 }
 0x935   : > { %10594 = vmatpush3.bf16.msra.mxu0 %v11637_v18 }
 0x936   : > { %8279 = vmatprep.subr.bf16.mxu0 %v14828_v57 }
 0x9aa   : > { %v7575_v15 = vpop.f32.mrb[188].mxu1 }
 0x9ab   : > { %v7577_v37 = vpop.f32.mrb[189].mxu1  ;;  %v10971_v42 = vadd.f32 %v7575_v15, %v13327_v16 }
 0x9ac   : > { %v7579_v60 = vpop.f32.mrb[190].mxu1  ;;  %v10972_v57 = vadd.f32 %v7577_v37, %v13329_v55 }
 0x9ad   : > { %v7581_v51 = vpop.f32.mrb[191].mxu1  ;;  %v10973_v19 = vadd.f32 %v7579_v60, %v13327_v16  ;;  %12356 = vtanh.f32 %v10971_v42  ;;  %v1048_v42 = vadd.f32 %v15921_v45, %v15834_v36  ;;  %v15922_v45 = vld [vmem:[#allocation39_spill] sm:$0xff] }
 0x9ae   : > { %v10974_v3 = vadd.f32 %v7581_v51, %v13329_v55  ;;  %v7782_v62 = vmul.f32 0.5, %v10972_v57  ;;  %v15920_v51 = vld [vmem:[#allocation37_spill] sm:$0xff] }
 0x9af   : > { %12358 = vtanh.f32 %v10973_v19  ;;  %v1046_v15 = vadd.f32 %v15920_v51, %v15833_v11 }
 0x9b0   : > { %v7783_v53 = vmul.f32 0.5, %v10974_v3  ;;  %12360 = vtanh.f32 %v7782_v62 }
 0x9b2   : > { %v7585_v24 = vpop.f32.mrb[192].mxu1  ;;  %12362 = vtanh.f32 %v7783_v53  ;;  %v1052_v53 = vadd.f32 %v15922_v45, %v15833_v11 }
 0x9b3   : > { %v7587_v28 = vpop.f32.mrb[193].mxu1  ;;  %v10975_v18 = vadd.f32 %v7585_v24, %v13327_v16 }
 0x9b4   : > { %v7589_v26 = vpop.f32.mrb[194].mxu1  ;;  %v10976_v60 = vadd.f32 %v7587_v28, %v13329_v55 }
 0x9b5   : > { %v7591_v22 = vpop.f32.mrb[195].mxu1  ;;  %v10977_v37 = vadd.f32 %v7589_v26, %v13327_v16  ;;  %12364 = vtanh.f32 %v10975_v18 }
 0x9b6   : > { %v10978_v24 = vadd.f32 %v7591_v22, %v13329_v55  ;;  %v7784_v62 = vmul.f32 0.5, %v10976_v60 }
 0x9b7   : > { %12366 = vtanh.f32 %v10977_v37  ;;  %v15924_v37 = vld [vmem:[#allocation41_spill] sm:$0xff] }
 0x9b8   : > { %v1056_v60 = vadd.f32 %v15924_v37, %v15833_v11 }
 0x9ba   : > { %v7595_v10 = vpop.f32.mrb[196].mxu1 }
 0x9bb   : > { %v7597_v7 = vpop.f32.mrb[197].mxu1  ;;  %v10979_v22 = vadd.f32 %v7595_v10, %v13327_v16  ;;  %v15925_v10 = vld [vmem:[#allocation42_spill] sm:$0xff] }
 0x9bc   : > { %v7599_v6 = vpop.f32.mrb[198].mxu1 }
 0x9bd   : > { %v7601_v1 = vpop.f32.mrb[199].mxu1 }
 0x9c4   : > { %v15160_v17 = vpop.f32.mrb[200].mxu1 }
 0x9c5   : > { %v15162_v43 = vpop.f32.mrb[201].mxu1 }
 0x9c6   : > { %v15164_v12 = vpop.f32.mrb[202].mxu1 }
 0x9c7   : > { %v15166_v34 = vpop.f32.mrb[203].mxu1 }
 0x9dd   : > { %v7502_v49 = vpop.f32.mrb[120].mxu0 }
 0x9de   : > { %v7614_v57 = vadd.f32 %v7502_v49, %v1042_v35  ;;  %v7504_v3 = vpop.f32.mrb[121].mxu0  ;;  %v7785_v49 = vmul.f32 0.5, %v10978_v24  ;;  %v1058_v24 = vadd.f32 %v15925_v10, %v15834_v36  ;;  %v15928_v10 = vld [vmem:[#allocation45_spill] sm:$0xff] }
 0x9df   : > { %v7615_v4 = vadd.f32 %v7504_v3, %v1044_v63  ;;  %v7506_v14 = vpop.f32.mrb[122].mxu0  ;;  %v15923_v63 = vld [vmem:[#allocation40_spill] sm:$0xff] }
 0x9e0   : > { %v7686_v19 = vmul.f32 0.5, %v7614_v57  ;;  %v7618_v26 = vadd.f32 %v7506_v14, %v1046_v15  ;;  %v7508_v41 = vpop.f32.mrb[123].mxu0  ;;  %v1054_v18 = vadd.f32 %v15923_v63, %v15834_v36  ;;  %v10981_v15 = vadd.f32 %v7599_v6, %v13327_v16 }
 0x9e1   : > { %v7726_v50 = vmul.f32 0.5, %v7615_v4  ;;  %v7619_v51 = vadd.f32 %v7508_v41, %v1048_v42  ;;  %v12357_v41 = vpop.eup %12356  ;;  %v10982_v14 = vadd.f32 %v7601_v1, %v13329_v55 }
 0x9e2   : > { %12368 = vtanh.f32 %v7686_v19  ;;  %v7687_v28 = vmul.f32 0.5, %v7618_v26  ;;  %v15193_v42 = vpop.eup %12358 }
 0x9e3   : > { %12370 = vtanh.f32 %v7726_v50  ;;  %v7727_v35 = vmul.f32 0.5, %v7619_v51  ;;  %v10980_v50 = vadd.f32 %v7597_v7, %v13329_v55  ;;  %v15198_v26 = vpop.eup %12360  ;;  %v7787_v1 = vmul.f32 0.5, %v10982_v14 }
 0x9e4   : > { %12372 = vtanh.f32 %v7687_v28 }
 0x9e5   : > { %12374 = vtanh.f32 %v7727_v35  ;;  %v7512_v4 = vpop.f32.mrb[124].mxu0  ;;  %v15200_v35 = vpop.eup %12362  ;;  %v7786_v63 = vmul.f32 0.5, %v10980_v50  ;;  %v15929_v50 = vld [vmem:[#allocation46_spill] sm:$0xff] }
 0x9e6   : > { %12376 = vtanh.f32 %v7784_v62  ;;  %v7622_v57 = vadd.f32 %v7512_v4, %v1052_v53  ;;  %v7514_v3 = vpop.f32.mrb[125].mxu0  ;;  %v15202_v53 = vpop.eup %12364 }
 0x9e7   : > { %12378 = vtanh.f32 %v7785_v49  ;;  %v7623_v6 = vadd.f32 %v7514_v3, %v1054_v18  ;;  %v7516_v19 = vpop.f32.mrb[126].mxu0  ;;  %v15204_v4 = vpop.eup %12366 }
 0x9e8   : > { %12380 = vtanh.f32 %v10979_v22  ;;  %v7688_v51 = vmul.f32 0.5, %v7622_v57  ;;  %v7626_v28 = vadd.f32 %v7516_v19, %v1056_v60  ;;  %v7518_v62 = vpop.f32.mrb[127].mxu0  ;;  %v15926_v22 = vld [vmem:[#allocation43_spill] sm:$0xff]  ;;  %v15927_v57 = vld [vmem:[#allocation44_spill] sm:$0xff] }
 0x9e9   : > { %12382 = vtanh.f32 %v10981_v15  ;;  %v7728_v7 = vmul.f32 0.5, %v7623_v6  ;;  %v7627_v45 = vadd.f32 %v7518_v62, %v1058_v24  ;;  %v1062_v60 = vadd.f32 %v15926_v22, %v15833_v11 }
 0x9ea   : > { %12384 = vtanh.f32 %v7688_v51  ;;  %v7689_v49 = vmul.f32 0.5, %v7626_v28  ;;  %v1064_v3 = vadd.f32 %v15927_v57, %v15834_v36  ;;  %v1066_v24 = vadd.f32 %v15928_v10, %v15833_v11  ;;  %v15930_v28 = vld [vmem:[#allocation47_spill] sm:$0xff] }
 0x9eb   : > { %12386 = vtanh.f32 %v7728_v7  ;;  %v7729_v18 = vmul.f32 0.5, %v7627_v45  ;;  %v1068_v6 = vadd.f32 %v15929_v50, %v15834_v36  ;;  %v1072_v62 = vadd.f32 %v15930_v28, %v15833_v11 }
 0x9ec   : > { %v12369_v37 = vpop.eup %12368  ;;  %12388 = vtanh.f32 %v7689_v49 }
 0x9ed   : > { %v12371_v15 = vpop.eup %12370  ;;  %v7702_v19 = vmul.f32 0.5, %v12369_v37  ;;  %12390 = vtanh.f32 %v7729_v18  ;;  %v7522_v14 = vpop.f32.mrb[128].mxu0 }
 0x9ee   : > { %v12373_v51 = vpop.eup %12372  ;;  %12392 = vtanh.f32 %v7786_v63  ;;  %v7742_v7 = vmul.f32 0.5, %v12371_v15  ;;  %v7630_v45 = vadd.f32 %v7522_v14, %v1062_v60  ;;  %v7524_v22 = vpop.f32.mrb[129].mxu0 }
 0x9ef   : > { %v12375_v57 = vpop.eup %12374  ;;  %12394 = vtanh.f32 %v7787_v1  ;;  %v7710_v49 = vadd.f32 0.5, %v7702_v19  ;;  %v7703_v58 = vmul.f32 0.5, %v12373_v51  ;;  %v7631_v20 = vadd.f32 %v7524_v22, %v1064_v3  ;;  %v7526_v10 = vpop.f32.mrb[130].mxu0 }
 0x9f0   : > { %v15216_v40 = vpop.eup %12376  ;;  %v7750_v50 = vadd.f32 0.5, %v7742_v7  ;;  %v7743_v37 = vmul.f32 0.5, %v12375_v57  ;;  %v7690_v18 = vmul.f32 0.5, %v7630_v45  ;;  %v7634_v29 = vadd.f32 %v7526_v10, %v1066_v24  ;;  %v7528_v23 = vpop.f32.mrb[131].mxu0  ;;  %v15931_v7 = vld [vmem:[#allocation48_spill] sm:$0xff] }
 0x9f1   : > { %v15218_v30 = vpop.eup %12378  ;;  %v7830_v28 = vmul.f32 %v12357_v41, %v7710_v49  ;;  %v7711_v63 = vadd.f32 0.5, %v7703_v58  ;;  %v7730_v15 = vmul.f32 0.5, %v7631_v20  ;;  %v7635_v60 = vadd.f32 %v7528_v23, %v1068_v6  ;;  %v15932_v20 = vld [vmem:[#allocation49_spill] sm:$0xff] }
 0x9f2   : > { %v15220_v14 = vpop.eup %12380  ;;  %v7822_v1 = vmul.f32 %v7750_v50, %v14901_v48  ;;  %v7751_v19 = vadd.f32 0.5, %v7743_v37  ;;  %12396 = vtanh.f32 %v7690_v18  ;;  %v7691_v3 = vmul.f32 0.5, %v7634_v29  ;;  %v15933_v29 = vld [vmem:[#allocation50_spill] sm:$0xff] }
 0x9f3   : > { %v15223_v51 = vpop.eup %12382  ;;  %v1074_v45 = vadd.f32 %v15931_v7, %v15834_v36  ;;  %v7831_v24 = vmul.f32 %v15193_v42, %v7711_v63  ;;  %12398 = vtanh.f32 %v7730_v15  ;;  %v7731_v22 = vmul.f32 0.5, %v7635_v60 }
 0x9f4   : > { %v12385_v41 = vpop.eup %12384  ;;  %v1076_v23 = vadd.f32 %v15932_v20, %v15833_v11  ;;  %v15230_v58 = vadd.f32 %v7830_v28, %v7822_v1  ;;  %v7823_v48 = vmul.f32 %v7751_v19, %v14908_v0  ;;  %12400 = vtanh.f32 %v7691_v3 }
 0x9f5   : > { %v12387_v6 = vpop.eup %12386  ;;  %v1078_v57 = vadd.f32 %v15933_v29, %v15834_v36  ;;  %v7798_v49 = vmul.f32 0.5, %v15198_v26  ;;  %v7704_v10 = vmul.f32 0.5, %v12385_v41  ;;  %12402 = vtanh.f32 %v7731_v22  ;;  %v7532_v42 = vpop.f32.mrb[132].mxu0 }
 0x9f6   : > { %v12389_v50 = vpop.eup %12388  ;;  %12404 = vtanh.f32 %v15230_v58  ;;  %v15237_v37 = vadd.f32 %v7831_v24, %v7823_v48  ;;  %v7744_v18 = vmul.f32 0.5, %v12387_v6  ;;  %v7638_v28 = vadd.f32 %v7532_v42, %v1072_v62  ;;  %v7534_v63 = vpop.f32.mrb[133].mxu0 }
 0x9f7   : > { %v12391_v15 = vpop.eup %12390  ;;  %v10983_v0 = vadd.f32 %v15160_v17, %v13327_v16  ;;  %v7712_v60 = vadd.f32 0.5, %v7704_v10  ;;  %v7705_v1 = vmul.f32 0.5, %v12389_v50  ;;  %v7639_v19 = vadd.f32 %v7534_v63, %v1074_v45  ;;  %v7536_v3 = vpop.f32.mrb[134].mxu0 }
 0x9f8   : > { %v15241_v26 = vpop.eup %12392  ;;  %12406 = vtanh.f32 %v15237_v37  ;;  %v7752_v7 = vadd.f32 0.5, %v7744_v18  ;;  %v7745_v22 = vmul.f32 0.5, %v12391_v15  ;;  %v7692_v41 = vmul.f32 0.5, %v7638_v28  ;;  %v7538_v24 = vpop.f32.mrb[135].mxu0 }
 0x9f9   : > { %v15244_v20 = vpop.eup %12394  ;;  %v7832_v62 = vmul.f32 %v15202_v53, %v7712_v60  ;;  %v7713_v48 = vadd.f32 0.5, %v7705_v1  ;;  %v7732_v6 = vmul.f32 0.5, %v7639_v19  ;;  %v7642_v29 = vadd.f32 %v7536_v3, %v1076_v23 }
 0x9fa   : > { %v7824_v17 = vmul.f32 %v7752_v7, %v14921_v39  ;;  %v7753_v10 = vadd.f32 0.5, %v7745_v22  ;;  %12408 = vtanh.f32 %v7692_v41  ;;  %v7643_v45 = vadd.f32 %v7538_v24, %v1078_v57 }
 0x9fb   : > { %v7799_v42 = vmul.f32 0.5, %v15200_v35  ;;  %v7833_v50 = vmul.f32 %v15204_v4, %v7713_v48  ;;  %12410 = vtanh.f32 %v7732_v6  ;;  %v7693_v18 = vmul.f32 0.5, %v7642_v29 }
 0x9fc   : > { %v12397_v28 = vpop.eup %12396  ;;  %12412 = vtanh.f32 %v10983_v0  ;;  %v15250_v63 = vadd.f32 %v7832_v62, %v7824_v17  ;;  %v7825_v53 = vmul.f32 %v7753_v10, %v14927_v54  ;;  %v7733_v15 = vmul.f32 0.5, %v7643_v45 }
 0x9fd   : > { %v12399_v60 = vpop.eup %12398  ;;  %v10985_v39 = vadd.f32 %v15164_v12, %v13327_v16  ;;  %v7706_v23 = vmul.f32 0.5, %v12397_v28  ;;  %12414 = vtanh.f32 %v7693_v18  ;;  %v7806_v1 = vadd.f32 0.5, %v7798_v49 }
 0x9fe   : > { %v12401_v57 = vpop.eup %12400  ;;  %12416 = vtanh.f32 %v15250_v63  ;;  %v15256_v35 = vadd.f32 %v7833_v50, %v7825_v53  ;;  %v7746_v4 = vmul.f32 0.5, %v12399_v60  ;;  %v10984_v0 = vadd.f32 %v15162_v43, %v13329_v55 }
 0x9ff   : > { %v12403_v19 = vpop.eup %12402  ;;  %v7714_v3 = vadd.f32 0.5, %v7706_v23  ;;  %v7707_v54 = vmul.f32 0.5, %v12401_v57  ;;  %12418 = vtanh.f32 %v7733_v15  ;;  %v7807_v22 = vadd.f32 0.5, %v7799_v42 }
 0xa00   : > { %v12405_v7 = vpop.eup %12404  ;;  %12420 = vtanh.f32 %v15256_v35  ;;  %v7754_v12 = vadd.f32 0.5, %v7746_v4  ;;  %v7747_v41 = vmul.f32 0.5, %v12403_v19  ;;  %v10986_v6 = vadd.f32 %v15166_v34, %v13329_v55 }
 0xa01   : > { %12422 = vtanh.f32 %v10985_v39  ;;  %v7834_v49 = vmul.f32 %v15220_v14, %v7714_v3  ;;  %v7715_v24 = vadd.f32 0.5, %v7707_v54  ;;  %v7854_v62 = vmul.f32 %v12405_v7, %v7806_v1 }
 0xa02   : > { %v12407_v48 = vpop.eup %12406  ;;  %v7826_v43 = vmul.f32 %v7754_v12, %v14938_v47  ;;  %v7755_v29 = vadd.f32 0.5, %v7747_v41  ;;  %v7800_v17 = vmul.f32 0.5, %v15216_v40  ;;  %v7788_v10 = vmul.f32 0.5, %v10984_v0 }
 0xa03   : > { %v7835_v45 = vmul.f32 %v15223_v51, %v7715_v24  ;;  %v7855_v42 = vmul.f32 %v12407_v48, %v7807_v22  ;;  %12424 = vtanh.f32 %v7854_v62  ;;  %v7801_v53 = vmul.f32 0.5, %v15218_v30 }
 0xa04   : > { %v12409_v50 = vpop.eup %12408  ;;  %v15267_v18 = vadd.f32 %v7834_v49, %v7826_v43  ;;  %v7827_v14 = vmul.f32 %v7755_v29, %v14945_v31  ;;  %v7789_v60 = vmul.f32 0.5, %v10986_v6  ;;  %v7808_v23 = vadd.f32 0.5, %v7800_v17 }
 0xa05   : > { %v12411_v28 = vpop.eup %12410  ;;  %v7708_v15 = vmul.f32 0.5, %v12409_v50  ;;  %v15271_v34 = vpack.c.bf16 %v7855_v42, %v7854_v62  ;;  %12426 = vtanh.f32 %v7855_v42  ;;  %v7809_v19 = vadd.f32 0.5, %v7801_v53 }
 0xa06   : > { %v12413_v47 = vpop.eup %12412  ;;  %12428 = vtanh.f32 %v15267_v18  ;;  %v15274_v40 = vadd.f32 %v7835_v45, %v7827_v14  ;;  %v7748_v51 = vmul.f32 0.5, %v12411_v28  ;;  %v7802_v49 = vmul.f32 0.5, %v15241_v26 }
 0xa07   : > { %v12415_v39 = vpop.eup %12414  ;;  %12430 = vtanh.f32 %v7788_v10  ;;  %v7716_v57 = vadd.f32 0.5, %v7708_v15  ;;  %8385 = vmatmul.mubr.bf16.vlgmr.msra.gmra.mrb[204].mxu1 %v15271_v34  ;;  %v7803_v6 = vmul.f32 0.5, %v15244_v20 }
 0xa08   : > { %v12417_v31 = vpop.eup %12416  ;;  %12432 = vtanh.f32 %v15274_v40  ;;  %v7756_v30 = vadd.f32 0.5, %v7748_v51  ;;  %v7709_v1 = vmul.f32 0.5, %v12415_v39  ;;  %8394 = vmatprep.mubr.bf16.mxu1 %v15815_v9  ;;  %9164 = vmatpush1.bf16.msra.mxu1 %v15068_v8  ;;  %v7810_v29 = vadd.f32 0.5, %v7802_v49  ;;  %v11642_v49 = vld [vmem:[%s15696_s2 + $0xcc] ss:$16 sps:$4 sm:$0xff]  }
 0xa09   : > { %v12419_v4 = vpop.eup %12418  ;;  %v7836_v0 = vmul.f32 %v12413_v47, %v7716_v57  ;;  %v7856_v3 = vmul.f32 %v12417_v31, %v7808_v23  ;;  %9165 = vmatprep.subr.bf16.mxu1 %v15074_v44  ;;  %12434 = vtanh.f32 %v7789_v60  ;;  %v7811_v45 = vadd.f32 0.5, %v7803_v6  ;;  %v15934_v31 = vld [vmem:[#allocation7_spill] sm:$0xff]  ;;  %v11644_v6 = vld [vmem:[%s15696_s2 + $0xe8] ss:$16 sps:$4 sm:$0xff]  }
 0xa0a   : > { %v12421_v54 = vpop.eup %12420  ;;  %v7828_v7 = vmul.f32 %v7756_v30, %v14952_v38  ;;  %v7717_v22 = vadd.f32 0.5, %v7709_v1  ;;  %v7749_v12 = vmul.f32 0.5, %v12419_v4  ;;  %v15938_v1 = vld [vmem:[#allocation11_spill] sm:$0xff] }
 0xa0b   : > { %v12423_v41 = vpop.eup %12422  ;;  %v7857_v24 = vmul.f32 %v12421_v54, %v7809_v19  ;;  %12436 = vtanh.f32 %v7856_v3  ;;  %v15939_v19 = vld [vmem:[#allocation12_spill] sm:$0xff]  ;;  %v15942_v54 = vld [vmem:[#allocation15_spill] sm:$0xff] }
 0xa0c   : > { %v15283_v62 = vadd.f32 %v7836_v0, %v7828_v7  ;;  %v7837_v48 = vmul.f32 %v12423_v41, %v7717_v22  ;;  %v7757_v8 = vadd.f32 0.5, %v7749_v12  ;;  %9166 = vmatpush1.bf16.msra.mxu1 %v15079_v21  ;;  %v15940_v0 = vld [vmem:[#allocation13_spill] sm:$0xff]  ;;  %v15943_v7 = vld [vmem:[#allocation16_spill] sm:$0xff]  ;;  %v15945_v12 = vld [vmem:[#allocation18_spill] sm:$0xff] }
 0xa0d   : > { %12438 = vtanh.f32 %v7857_v24  ;;  %v15287_v44 = vpack.c.bf16 %v7857_v24, %v7856_v3  ;;  %9167 = vmatprep.subr.bf16.mxu1 %v15086_v56  ;;  %v12425_v38 = vpop.eup %12424  ;;  %v15941_v3 = vld [vmem:[#allocation14_spill] sm:$0xff]  ;;  %v15944_v22 = vld [vmem:[#allocation17_spill] sm:$0xff]  ;;  %v11638_v41 = vld [vmem:[%s15698_s4 + $0x200] sm:$0xff]  }
 0xa0e   : > { %12440 = vtanh.f32 %v15283_v62  ;;  %v7829_v26 = vmul.f32 %v7757_v8, %v14960_v5  ;;  %v11640_v24 = vld [vmem:[%s15696_s2 + $0xc8] ss:$16 sps:$4 sm:$0xff]   ;;  %v11646_v8 = vld [vmem:[%s15696_s2 + $0xec] ss:$16 sps:$4 sm:$0xff]  }
 0xa0f   : > { %v12427_v43 = vpop.eup %12426  ;;  %8395 = vmatmul.mubr.bf16.gmra.mrb[208].mxu1 %v15287_v44 }
 0xa10   : > { %v12429_v17 = vpop.eup %12428  ;;  %v15293_v10 = vadd.f32 %v7837_v48, %v7829_v26  ;;  %v7894_v21 = vpack.c.bf16 %v12427_v43, %v12425_v38  ;;  %8404 = vmatprep.mubr.bf16.mxu1 %v15815_v9  ;;  %9168 = vmatpush1.bf16.msra.mxu1 %v15091_v32  ;;  %v11643_v48 = vld [vmem:[%s15698_s4 + $0x210] sm:$0xff]   ;;  %v11648_v38 = vld [vmem:[%s15698_s4 + $0x220] sm:$0xff]   ;;  %v11649_v26 = vld [vmem:[%s15698_s4 + $0x228] sm:$0xff]  }
 0xa11   : > { %v12431_v20 = vpop.eup %12430  ;;  %v7858_v56 = vmul.f32 %v12429_v17, %v7810_v29  ;;  %9169 = vmatprep.subr.bf16.mxu1 %v15098_v52  ;;  %v11650_v43 = vld [vmem:[%s15698_s4 + $0x230] sm:$0xff]   ;;  %v11651_v29 = vld [vmem:[%s15698_s4 + $0x238] sm:$0xff]  }
 0xa12   : > { %v12433_v42 = vpop.eup %12432  ;;  %12442 = vtanh.f32 %v15293_v10  ;;  %10595 = vmatprep.mubr.bf16.mxu0 %v7894_v21  ;;  %v7804_v14 = vmul.f32 0.5, %v12431_v20  ;;  %v11654_v17 = vld [vmem:[%s15696_s2 + $0x4] ss:$16 sps:$4 sm:$0xff]  }
 0xa13   : > { %v7859_v5 = vmul.f32 %v12433_v42, %v7811_v45  ;;  %v12435_v50 = vpop.eup %12434  ;;  %12444 = vtanh.f32 %v7858_v56 }
 0xa14   : > { %9170 = vmatpush1.bf16.msra.mxu1 %v15103_v33  ;;  %v7805_v15 = vmul.f32 0.5, %v12435_v50  ;;  %v7812_v52 = vadd.f32 0.5, %v7804_v14 }
 0xa15   : > { %12446 = vtanh.f32 %v7859_v5  ;;  %v8085_v28 = vpack.c.bf16 %v7859_v5, %v7858_v56  ;;  %9171 = vmatprep.subr.bf16.mxu1 %v15110_v59  ;;  %v12437_v32 = vpop.eup %12436 }
 0xa16   : > { %v7813_v33 = vadd.f32 0.5, %v7805_v15 }
 0xa17   : > { %v12439_v53 = vpop.eup %12438  ;;  %8405 = vmatmul.mubr.bf16.gmra.mrb[212].mxu1 %v8085_v28 }
 0xa18   : > { %v12441_v47 = vpop.eup %12440  ;;  %v7895_v60 = vpack.c.bf16 %v12439_v53, %v12437_v32  ;;  %8414 = vmatprep.mubr.bf16.mxu1 %v15815_v9  ;;  %9172 = vmatpush1.bf16.msra.mxu1 %v15115_v25 }
 0xa19   : > { %9173 = vmatprep.subr.bf16.mxu1 %v15125_v46  ;;  %v7860_v51 = vmul.f32 %v12441_v47, %v7812_v52 }
 0xa1a   : > { %10596 = vmatmul.mubr.bf16.vlgmr.msra.gmra.mrb[84].mxu0 %v7895_v60 }
 0xa1b   : > { %8280 = vmatpush1.bf16.msra.mxu0 %v14967_v2  ;;  %12448 = vtanh.f32 %v7860_v51  ;;  %v15935_v2 = vld [vmem:[#allocation8_spill] sm:$0xff] }
 0xa1c   : > { %v12443_v39 = vpop.eup %12442  ;;  %8281 = vmatprep.subr.bf16.mxu0 %v14972_v13  ;;  %9174 = vmatpush1.bf16.msra.mxu1 %v15130_v61  ;;  %v15936_v13 = vld [vmem:[#allocation9_spill] sm:$0xff]  ;;  %v15937_v61 = vld [vmem:[#allocation10_spill] sm:$0xff] }
 0xa1d   : > { %v7861_v59 = vmul.f32 %v12443_v39, %v7813_v33  ;;  %v12445_v23 = vpop.eup %12444  ;;  %9175 = vmatprep.subr.bf16.mxu1 %v11642_v49 }
 0xa1f   : > { %v12447_v57 = vpop.eup %12446  ;;  %8282 = vmatpush1.bf16.msra.mxu0 %v14979_v27  ;;  %12450 = vtanh.f32 %v7861_v59  ;;  %v8086_v25 = vpack.c.bf16 %v7861_v59, %v7860_v51 }
 0xa20   : > { %8283 = vmatprep.subr.bf16.mxu0 %v15934_v31  ;;  %v7896_v46 = vpack.c.bf16 %v12447_v57, %v12445_v23  ;;  %9176 = vmatpush1.bf16.msra.mxu1 %v11640_v24  ;;  %v15946_v31 = vld [vmem:[#allocation51_spill] sm:$0xff] }
 0xa21   : > { %8415 = vmatmul.mubr.bf16.gmra.mrb[216].mxu1 %v8086_v25  ;;  %9177 = vmatprep.subr.bf16.mxu1 %v11646_v8 }
 0xa22   : > { %10599 = vmatprep.mubr.bf16.mxu0 %v7896_v46  ;;  %9195 = vmatprep.mubr.bf16.mxu1 %v15815_v9  ;;  %v1082_v46 = vadd.f32 %v15946_v31, %v15833_v11 }
 0xa23   : > { %8284 = vmatpush1.bf16.msra.mxu0 %v15935_v2 }
 0xa24   : > { %8285 = vmatprep.subr.bf16.mxu0 %v15936_v13  ;;  %9178 = vmatpush1.bf16.msra.mxu1 %v11644_v6  ;;  %v15947_v13 = vld [vmem:[#allocation52_spill] sm:$0xff] }
 0xa25   : > { %v12449_v30 = vpop.eup %12448 }
 0xa27   : > { %8286 = vmatpush1.bf16.msra.mxu0 %v15937_v61  ;;  %v1084_v61 = vadd.f32 %v15947_v13, %v15834_v36 }
 0xa28   : > { %8287 = vmatprep.subr.bf16.mxu0 %v15938_v1 }
 0xa29   : > { %v12451_v4 = vpop.eup %12450 }
 0xa2a   : > { %v7897_v27 = vpack.c.bf16 %v12451_v4, %v12449_v30  ;;  %v15948_v4 = vld [vmem:[#allocation53_spill] sm:$0xff] }
 0xa2b   : > { %8288 = vmatpush1.bf16.msra.mxu0 %v15939_v19 }
 0xa2c   : > { %10600 = vmatmul.mubr.bf16.gmra.mrb[88].mxu0 %v7897_v27  ;;  %8289 = vmatprep.subr.bf16.mxu0 %v15940_v0  ;;  %v1086_v27 = vadd.f32 %v15948_v4, %v15833_v11 }
 0xa2d   : > { %8311 = vmatprep.mubr.bf16.mxu0 %v15815_v9 }
 0xa2f   : > { %8290 = vmatpush1.bf16.msra.mxu0 %v15941_v3 }
 0xa30   : > { %8291 = vmatprep.subr.bf16.mxu0 %v15942_v54  ;;  %v15949_v54 = vld [vmem:[#allocation54_spill] sm:$0xff] }
 0xa33   : > { %8292 = vmatpush1.bf16.msra.mxu0 %v15943_v7  ;;  %v1088_v7 = vadd.f32 %v15949_v54, %v15834_v36  ;;  %v15954_v54 = vld [vmem:[#allocation59_spill] sm:$0xff] }
 0xa34   : > { %8293 = vmatprep.subr.bf16.mxu0 %v15944_v22 }
 0xa37   : > { %8294 = vmatpush1.bf16.msra.mxu0 %v15945_v12 }
 0xa38   : > { %10603 = vmatprep.subr.bf16.mxu0 %v11638_v41 }
 0xa3a   : > { %8312 = vmatmul.mubr.bf16.vlgmr.msra.gmra.mrb[136].mxu0 %v15271_v34  ;;  %v11639_v34 = vld [vmem:[%s15698_s4 + $0x208] sm:$0xff]  }
 0xa3b   : > { %8321 = vmatprep.mubr.bf16.mxu0 %v15815_v9  ;;  %10604 = vmatpush3.bf16.msra.mxu0 %v11638_v41 }
 0xa3c   : > { %10605 = vmatprep.subr.bf16.mxu0 %v11639_v34 }
 0xa3f   : > { %10606 = vmatpush3.bf16.msra.mxu0 %v11639_v34 }
 0xa40   : > { %10607 = vmatprep.subr.bf16.mxu0 %v11643_v48 }
 0xa42   : > { %8322 = vmatmul.mubr.bf16.gmra.mrb[140].mxu0 %v15287_v44  ;;  %v11647_v44 = vld [vmem:[%s15698_s4 + $0x218] sm:$0xff]  }
 0xa43   : > { %8331 = vmatprep.mubr.bf16.mxu0 %v15815_v9  ;;  %10608 = vmatpush3.bf16.msra.mxu0 %v11643_v48 }
 0xa44   : > { %10609 = vmatprep.subr.bf16.mxu0 %v11647_v44 }
 0xa47   : > { %10610 = vmatpush3.bf16.msra.mxu0 %v11647_v44 }
 0xa48   : > { %10611 = vmatprep.subr.bf16.mxu0 %v11648_v38 }
 0xa4a   : > { %8332 = vmatmul.mubr.bf16.gmra.mrb[144].mxu0 %v8085_v28 }
 0xa4b   : > { %8341 = vmatprep.mubr.bf16.mxu0 %v15815_v9  ;;  %10612 = vmatpush3.bf16.msra.mxu0 %v11648_v38 }
 0xa4c   : > { %10613 = vmatprep.subr.bf16.mxu0 %v11649_v26 }
 0xa4f   : > { %10614 = vmatpush3.bf16.msra.mxu0 %v11649_v26 }
 0xa50   : > { %10615 = vmatprep.subr.bf16.mxu0 %v11650_v43 }
 0xa52   : > { %8342 = vmatmul.mubr.bf16.gmra.mrb[148].mxu0 %v8086_v25 }
 0xa53   : > { %10616 = vmatpush3.bf16.msra.mxu0 %v11650_v43  ;;  %v15950_v43 = vld [vmem:[#allocation55_spill] sm:$0xff] }
 0xa54   : > { %10617 = vmatprep.subr.bf16.mxu0 %v11651_v29 }
 0xa57   : > { %10618 = vmatpush3.bf16.msra.mxu0 %v11651_v29  ;;  %v1092_v29 = vadd.f32 %v15950_v43, %v15833_v11 }
 0xa58   : > { %9090 = vmatprep.subr.bf16.mxu0 %v11654_v17 }
 0xada   : > { %v8386_v21 = vpop.f32.mrb[204].mxu1 }
 0xadb   : > { %v8388_v20 = vpop.f32.mrb[205].mxu1  ;;  %v10987_v59 = vadd.f32 %v8386_v21, %v13327_v16  ;;  %v15951_v21 = vld [vmem:[#allocation56_spill] sm:$0xff] }
 0xadc   : > { %v8390_v45 = vpop.f32.mrb[206].mxu1  ;;  %v10988_v33 = vadd.f32 %v8388_v20, %v13329_v55  ;;  %v1094_v20 = vadd.f32 %v15951_v21, %v15834_v36 }
 0xadd   : > { %v8392_v56 = vpop.f32.mrb[207].mxu1  ;;  %v10989_v23 = vadd.f32 %v8390_v45, %v13327_v16  ;;  %12452 = vtanh.f32 %v10987_v59 }
 0xade   : > { %v10990_v39 = vadd.f32 %v8392_v56, %v13329_v55  ;;  %v8593_v57 = vmul.f32 0.5, %v10988_v33 }
 0xadf   : > { %12454 = vtanh.f32 %v10989_v23 }
 0xae0   : > { %v8594_v25 = vmul.f32 0.5, %v10990_v39  ;;  %12456 = vtanh.f32 %v8593_v57 }
 0xae2   : > { %v8396_v42 = vpop.f32.mrb[208].mxu1  ;;  %12458 = vtanh.f32 %v8594_v25 }
 0xae3   : > { %v8398_v5 = vpop.f32.mrb[209].mxu1  ;;  %v10991_v2 = vadd.f32 %v8396_v42, %v13327_v16 }
 0xae4   : > { %v8400_v50 = vpop.f32.mrb[210].mxu1  ;;  %v10992_v19 = vadd.f32 %v8398_v5, %v13329_v55  ;;  %v15952_v5 = vld [vmem:[#allocation57_spill] sm:$0xff] }
 0xae5   : > { %v8402_v14 = vpop.f32.mrb[211].mxu1  ;;  %v10993_v30 = vadd.f32 %v8400_v50, %v13327_v16  ;;  %12460 = vtanh.f32 %v10991_v2  ;;  %v1096_v50 = vadd.f32 %v15952_v5, %v15833_v11 }
 0xae6   : > { %v10994_v22 = vadd.f32 %v8402_v14, %v13329_v55  ;;  %v8595_v6 = vmul.f32 0.5, %v10992_v19 }
 0xae7   : > { %12462 = vtanh.f32 %v10993_v30  ;;  %v12453_v42 = vpop.eup %12452 }
 0xae8   : > { %v8596_v38 = vmul.f32 0.5, %v10994_v22  ;;  %v15955_v22 = vld [vmem:[#allocation60_spill] sm:$0xff] }
 0xae9   : > { %v15399_v59 = vpop.eup %12454 }
 0xaea   : > { %v8406_v28 = vpop.f32.mrb[212].mxu1  ;;  %v15404_v31 = vpop.eup %12456 }
 0xaeb   : > { %v8408_v32 = vpop.f32.mrb[213].mxu1  ;;  %v10995_v17 = vadd.f32 %v8406_v28, %v13327_v16  ;;  %v15953_v28 = vld [vmem:[#allocation58_spill] sm:$0xff] }
 0xaec   : > { %v8410_v53 = vpop.f32.mrb[214].mxu1  ;;  %v10996_v14 = vadd.f32 %v8408_v32, %v13329_v55  ;;  %v1098_v23 = vadd.f32 %v15953_v28, %v15834_v36 }
 0xaed   : > { %v8412_v15 = vpop.f32.mrb[215].mxu1  ;;  %v10997_v45 = vadd.f32 %v8410_v53, %v13327_v16 }
 0xaee   : > { %v10998_v57 = vadd.f32 %v8412_v15, %v13329_v55  ;;  %v8597_v4 = vmul.f32 0.5, %v10996_v14 }
 0xaf0   : > { %v8598_v15 = vmul.f32 0.5, %v10998_v57 }
 0xaf4   : > { %v15366_v47 = vpop.f32.mrb[216].mxu1 }
 0xaf5   : > { %v15368_v52 = vpop.f32.mrb[217].mxu1 }
 0xaf6   : > { %v15370_v60 = vpop.f32.mrb[218].mxu1 }
 0xaf7   : > { %v15372_v51 = vpop.f32.mrb[219].mxu1 }
 0xb0d   : > { %v8313_v1 = vpop.f32.mrb[136].mxu0 }
 0xb0e   : > { %v8425_v0 = vadd.f32 %v8313_v1, %v1082_v46  ;;  %v8315_v3 = vpop.f32.mrb[137].mxu0 }
 0xb0f   : > { %v8426_v12 = vadd.f32 %v8315_v3, %v1084_v61  ;;  %v8317_v41 = vpop.f32.mrb[138].mxu0  ;;  %v15406_v61 = vpop.eup %12458 }
 0xb10   : > { %v8497_v34 = vmul.f32 0.5, %v8425_v0  ;;  %v8429_v49 = vadd.f32 %v8317_v41, %v1086_v27  ;;  %v8319_v24 = vpop.f32.mrb[139].mxu0  ;;  %v15408_v1 = vpop.eup %12460 }
 0xb11   : > { %v8537_v48 = vmul.f32 0.5, %v8426_v12  ;;  %v8430_v8 = vadd.f32 %v8319_v24, %v1088_v7  ;;  %v15410_v19 = vpop.eup %12462  ;;  %v1102_v7 = vadd.f32 %v15954_v54, %v15833_v11  ;;  %v1104_v12 = vadd.f32 %v15955_v22, %v15834_v36  ;;  %v15957_v24 = vld [vmem:[#allocation62_spill] sm:$0xff] }
 0xb12   : > { %12464 = vtanh.f32 %v8497_v34  ;;  %v8498_v44 = vmul.f32 0.5, %v8429_v49  ;;  %v15956_v34 = vld [vmem:[#allocation61_spill] sm:$0xff] }
 0xb13   : > { %12466 = vtanh.f32 %v8537_v48  ;;  %v8538_v26 = vmul.f32 0.5, %v8430_v8  ;;  %v1106_v49 = vadd.f32 %v15956_v34, %v15833_v11  ;;  %v1108_v48 = vadd.f32 %v15957_v24, %v15834_v36  ;;  %v15961_v34 = vld [vmem:[#allocation66_spill] sm:$0xff] }
 0xb14   : > { %12468 = vtanh.f32 %v8498_v44  ;;  %v8609_v24 = vmul.f32 0.5, %v15404_v31 }
 0xb15   : > { %12470 = vtanh.f32 %v8538_v26  ;;  %v8323_v56 = vpop.f32.mrb[140].mxu0 }
 0xb16   : > { %12472 = vtanh.f32 %v8595_v6  ;;  %v8433_v33 = vadd.f32 %v8323_v56, %v1092_v29  ;;  %v8325_v39 = vpop.f32.mrb[141].mxu0 }
 0xb17   : > { %12474 = vtanh.f32 %v8596_v38  ;;  %v8434_v53 = vadd.f32 %v8325_v39, %v1094_v20  ;;  %v8327_v25 = vpop.f32.mrb[142].mxu0  ;;  %v15958_v38 = vld [vmem:[#allocation63_spill] sm:$0xff] }
 0xb18   : > { %12476 = vtanh.f32 %v10995_v17  ;;  %v8499_v46 = vmul.f32 0.5, %v8433_v33  ;;  %v8437_v2 = vadd.f32 %v8327_v25, %v1096_v50  ;;  %v8329_v13 = vpop.f32.mrb[143].mxu0  ;;  %v1112_v26 = vadd.f32 %v15958_v38, %v15833_v11 }
 0xb19   : > { %12478 = vtanh.f32 %v10997_v45  ;;  %v8539_v32 = vmul.f32 0.5, %v8434_v53  ;;  %v8438_v30 = vadd.f32 %v8329_v13, %v1098_v23 }
 0xb1a   : > { %12480 = vtanh.f32 %v8499_v46  ;;  %v8500_v27 = vmul.f32 0.5, %v8437_v2 }
 0xb1b   : > { %12482 = vtanh.f32 %v8539_v32  ;;  %v8540_v0 = vmul.f32 0.5, %v8438_v30 }
 0xb1c   : > { %v12465_v3 = vpop.eup %12464  ;;  %12484 = vtanh.f32 %v8500_v27 }
 0xb1d   : > { %v12467_v41 = vpop.eup %12466  ;;  %v8513_v8 = vmul.f32 0.5, %v12465_v3  ;;  %12486 = vtanh.f32 %v8540_v0  ;;  %v8333_v6 = vpop.f32.mrb[144].mxu0 }
 0xb1e   : > { %v12469_v44 = vpop.eup %12468  ;;  %12488 = vtanh.f32 %v8597_v4  ;;  %v8553_v43 = vmul.f32 0.5, %v12467_v41  ;;  %v8441_v29 = vadd.f32 %v8333_v6, %v1102_v7  ;;  %v8335_v17 = vpop.f32.mrb[145].mxu0  ;;  %v15960_v7 = vld [vmem:[#allocation65_spill] sm:$0xff] }
 0xb1f   : > { %v12471_v21 = vpop.eup %12470  ;;  %12490 = vtanh.f32 %v8598_v15  ;;  %v8521_v20 = vadd.f32 0.5, %v8513_v8  ;;  %v8514_v45 = vmul.f32 0.5, %v12469_v44  ;;  %v8442_v56 = vadd.f32 %v8335_v17, %v1104_v12  ;;  %v8337_v5 = vpop.f32.mrb[146].mxu0  ;;  %v15959_v15 = vld [vmem:[#allocation64_spill] sm:$0xff] }
 0xb20   : > { %v15422_v50 = vpop.eup %12472  ;;  %v8561_v14 = vadd.f32 0.5, %v8553_v43  ;;  %v8554_v33 = vmul.f32 0.5, %v12471_v21  ;;  %v8501_v39 = vmul.f32 0.5, %v8441_v29  ;;  %v8445_v28 = vadd.f32 %v8337_v5, %v1106_v49  ;;  %v8339_v23 = vpop.f32.mrb[147].mxu0 }
 0xb21   : > { %v15424_v57 = vpop.eup %12474  ;;  %v8641_v53 = vmul.f32 %v12453_v42, %v8521_v20  ;;  %v8522_v25 = vadd.f32 0.5, %v8514_v45  ;;  %v8541_v46 = vmul.f32 0.5, %v8442_v56  ;;  %v8446_v2 = vadd.f32 %v8339_v23, %v1108_v48 }
 0xb22   : > { %v15426_v13 = vpop.eup %12476  ;;  %v8633_v32 = vmul.f32 %v8561_v14, %v15230_v58  ;;  %v8562_v30 = vadd.f32 0.5, %v8554_v33  ;;  %12492 = vtanh.f32 %v8501_v39  ;;  %v8502_v4 = vmul.f32 0.5, %v8445_v28 }
 0xb23   : > { %v15429_v27 = vpop.eup %12478  ;;  %v1114_v0 = vadd.f32 %v15959_v15, %v15834_v36  ;;  %v8642_v3 = vmul.f32 %v15399_v59, %v8522_v25  ;;  %12494 = vtanh.f32 %v8541_v46  ;;  %v8542_v54 = vmul.f32 0.5, %v8446_v2 }
 0xb24   : > { %v12481_v42 = vpop.eup %12480  ;;  %v1116_v22 = vadd.f32 %v15960_v7, %v15833_v11  ;;  %v15436_v12 = vadd.f32 %v8641_v53, %v8633_v32  ;;  %v8634_v58 = vmul.f32 %v8562_v30, %v15237_v37  ;;  %12496 = vtanh.f32 %v8502_v4 }
 0xb25   : > { %v12483_v41 = vpop.eup %12482  ;;  %v1118_v49 = vadd.f32 %v15961_v34, %v15834_v36  ;;  %v8515_v48 = vmul.f32 0.5, %v12481_v42  ;;  %12498 = vtanh.f32 %v8542_v54  ;;  %v8343_v59 = vpop.f32.mrb[148].mxu0  ;;  %v10999_v37 = vadd.f32 %v15366_v47, %v13327_v16 }
 0xb26   : > { %v12485_v8 = vpop.eup %12484  ;;  %12500 = vtanh.f32 %v15436_v12  ;;  %v15443_v6 = vadd.f32 %v8642_v3, %v8634_v58  ;;  %v8555_v44 = vmul.f32 0.5, %v12483_v41  ;;  %v8449_v38 = vadd.f32 %v8343_v59, %v1112_v26  ;;  %v8345_v43 = vpop.f32.mrb[149].mxu0 }
 0xb27   : > { %v12487_v29 = vpop.eup %12486  ;;  %v8523_v17 = vadd.f32 0.5, %v8515_v48  ;;  %v8516_v21 = vmul.f32 0.5, %v12485_v8  ;;  %v8450_v20 = vadd.f32 %v8345_v43, %v1114_v0  ;;  %v8347_v45 = vpop.f32.mrb[150].mxu0  ;;  %v8610_v2 = vmul.f32 0.5, %v15406_v61 }
 0xb28   : > { %v15447_v31 = vpop.eup %12488  ;;  %12502 = vtanh.f32 %v15443_v6  ;;  %v8563_v56 = vadd.f32 0.5, %v8555_v44  ;;  %v8556_v5 = vmul.f32 0.5, %v12487_v29  ;;  %v8503_v14 = vmul.f32 0.5, %v8449_v38  ;;  %v8349_v33 = vpop.f32.mrb[151].mxu0 }
 0xb29   : > { %v15450_v39 = vpop.eup %12490  ;;  %v8643_v26 = vmul.f32 %v15408_v1, %v8523_v17  ;;  %v8524_v28 = vadd.f32 0.5, %v8516_v21  ;;  %v8543_v23 = vmul.f32 0.5, %v8450_v20  ;;  %v8453_v53 = vadd.f32 %v8347_v45, %v1116_v22 }
 0xb2a   : > { %v8635_v47 = vmul.f32 %v8563_v56, %v15250_v63  ;;  %v8564_v25 = vadd.f32 0.5, %v8556_v5  ;;  %12504 = vtanh.f32 %v8503_v14  ;;  %v8454_v46 = vadd.f32 %v8349_v33, %v1118_v49 }
 0xb2b   : > { %v8644_v32 = vmul.f32 %v15410_v19, %v8524_v28  ;;  %12506 = vtanh.f32 %v8543_v23  ;;  %v8504_v30 = vmul.f32 0.5, %v8453_v53  ;;  %v11001_v63 = vadd.f32 %v15370_v60, %v13327_v16 }
 0xb2c   : > { %v12493_v4 = vpop.eup %12492  ;;  %12508 = vtanh.f32 %v10999_v37  ;;  %v15456_v15 = vadd.f32 %v8643_v26, %v8635_v47  ;;  %v8636_v1 = vmul.f32 %v8564_v25, %v15256_v35  ;;  %v8544_v0 = vmul.f32 0.5, %v8454_v46 }
 0xb2d   : > { %v12495_v3 = vpop.eup %12494  ;;  %v8517_v54 = vmul.f32 0.5, %v12493_v4  ;;  %12510 = vtanh.f32 %v8504_v30  ;;  %v8617_v7 = vadd.f32 0.5, %v8609_v24  ;;  %v11000_v58 = vadd.f32 %v15368_v52, %v13329_v55 }
 0xb2e   : > { %v12497_v42 = vpop.eup %12496  ;;  %12512 = vtanh.f32 %v15456_v15  ;;  %v15462_v61 = vadd.f32 %v8644_v32, %v8636_v1  ;;  %v8557_v19 = vmul.f32 0.5, %v12495_v3  ;;  %v8618_v49 = vadd.f32 0.5, %v8610_v2 }
 0xb2f   : > { %v12499_v22 = vpop.eup %12498  ;;  %v8525_v41 = vadd.f32 0.5, %v8517_v54  ;;  %v8518_v35 = vmul.f32 0.5, %v12497_v42  ;;  %12514 = vtanh.f32 %v8544_v0  ;;  %v11002_v38 = vadd.f32 %v15372_v51, %v13329_v55 }
 0xb30   : > { %v12501_v34 = vpop.eup %12500  ;;  %12516 = vtanh.f32 %v15462_v61  ;;  %v8565_v60 = vadd.f32 0.5, %v8557_v19  ;;  %v8558_v48 = vmul.f32 0.5, %v12499_v22  ;;  %v8611_v29 = vmul.f32 0.5, %v15422_v50 }
 0xb31   : > { %12518 = vtanh.f32 %v11001_v63  ;;  %v8645_v24 = vmul.f32 %v15426_v13, %v8525_v41  ;;  %v8526_v59 = vadd.f32 0.5, %v8518_v35  ;;  %v8665_v8 = vmul.f32 %v12501_v34, %v8617_v7 }
 0xb32   : > { %v12503_v44 = vpop.eup %12502  ;;  %v8637_v52 = vmul.f32 %v8565_v60, %v15267_v18  ;;  %v8566_v43 = vadd.f32 0.5, %v8558_v48  ;;  %v8599_v37 = vmul.f32 0.5, %v11000_v58  ;;  %v8612_v5 = vmul.f32 0.5, %v15424_v57 }
 0xb33   : > { %v8646_v17 = vmul.f32 %v15429_v27, %v8526_v59  ;;  %v8666_v21 = vmul.f32 %v12503_v44, %v8618_v49  ;;  %12520 = vtanh.f32 %v8665_v8  ;;  %v8600_v33 = vmul.f32 0.5, %v11002_v38 }
 0xb34   : > { %v12505_v20 = vpop.eup %12504  ;;  %v15473_v45 = vadd.f32 %v8645_v24, %v8637_v52  ;;  %v8638_v13 = vmul.f32 %v8566_v43, %v15274_v40  ;;  %v8619_v28 = vadd.f32 0.5, %v8611_v29  ;;  %v8620_v25 = vadd.f32 0.5, %v8612_v5  ;;  %v11652_v29 = vld [vmem:[%s15696_s2] ss:$16 sps:$4 sm:$0xff]  }
 0xb35   : > { %v12507_v56 = vpop.eup %12506  ;;  %v8519_v14 = vmul.f32 0.5, %v12505_v20  ;;  %v15477_v51 = vpack.c.bf16 %v8666_v21, %v8665_v8  ;;  %12522 = vtanh.f32 %v8666_v21  ;;  %v8613_v3 = vmul.f32 0.5, %v15447_v31  ;;  %v11657_v20 = vld [vmem:[%s15696_s2 + $0x24] ss:$16 sps:$4 sm:$0xff]   ;;  %v11655_v5 = vld [vmem:[%s15696_s2 + $0x20] ss:$16 sps:$4 sm:$0xff]  }
 0xb36   : > { %v12509_v18 = vpop.eup %12508  ;;  %12524 = vtanh.f32 %v15473_v45  ;;  %v15480_v50 = vadd.f32 %v8646_v17, %v8638_v13  ;;  %v8559_v27 = vmul.f32 0.5, %v12507_v56  ;;  %v8614_v19 = vmul.f32 0.5, %v15450_v39 }
 0xb37   : > { %v12511_v26 = vpop.eup %12510  ;;  %12526 = vtanh.f32 %v8599_v37  ;;  %v8527_v23 = vadd.f32 0.5, %v8519_v14  ;;  %9196 = vmatmul.mubr.bf16.vlgmr.msra.gmra.mrb[220].mxu1 %v15477_v51  ;;  %v8621_v35 = vadd.f32 0.5, %v8613_v3  ;;  %v11675_v3 = vld [vmem:[%s15696_s2 + $0xe4] ss:$16 sps:$4 sm:$0xff]  }
 0xb38   : > { %v12513_v40 = vpop.eup %12512  ;;  %12528 = vtanh.f32 %v15480_v50  ;;  %v8567_v57 = vadd.f32 0.5, %v8559_v27  ;;  %v8520_v53 = vmul.f32 0.5, %v12511_v26  ;;  %9205 = vmatprep.mubr.bf16.mxu1 %v15815_v9  ;;  %v8622_v39 = vadd.f32 0.5, %v8614_v19  ;;  %v11680_v19 = vld [vmem:[%s15698_s4 + $0x260] sm:$0xff]  }
 0xb39   : > { %v12515_v47 = vpop.eup %12514  ;;  %v8647_v46 = vmul.f32 %v12509_v18, %v8527_v23  ;;  %v8667_v2 = vmul.f32 %v12513_v40, %v8619_v28  ;;  %12530 = vtanh.f32 %v8600_v33  ;;  %v11660_v18 = vld [vmem:[%s15696_s2 + $0x44] ss:$16 sps:$4 sm:$0xff]   ;;  %v11658_v23 = vld [vmem:[%s15696_s2 + $0x40] ss:$16 sps:$4 sm:$0xff]  }
 0xb3a   : > { %v12517_v32 = vpop.eup %12516  ;;  %v8639_v30 = vmul.f32 %v8567_v57, %v15283_v62  ;;  %v8528_v4 = vadd.f32 0.5, %v8520_v53  ;;  %v8560_v1 = vmul.f32 0.5, %v12515_v47  ;;  %v11663_v57 = vld [vmem:[%s15696_s2 + $0x64] ss:$16 sps:$4 sm:$0xff]   ;;  %v11661_v53 = vld [vmem:[%s15696_s2 + $0x60] ss:$16 sps:$4 sm:$0xff]  }
 0xb3b   : > { %v12519_v0 = vpop.eup %12518  ;;  %v8668_v63 = vmul.f32 %v12517_v32, %v8620_v25  ;;  %12532 = vtanh.f32 %v8667_v2  ;;  %v11666_v47 = vld [vmem:[%s15696_s2 + $0x84] ss:$16 sps:$4 sm:$0xff]   ;;  %v11664_v25 = vld [vmem:[%s15696_s2 + $0x80] ss:$16 sps:$4 sm:$0xff]  }
 0xb3c   : > { %v15487_v54 = vadd.f32 %v8647_v46, %v8639_v30  ;;  %v8648_v42 = vmul.f32 %v12519_v0, %v8528_v4  ;;  %v8568_v7 = vadd.f32 0.5, %v8560_v1  ;;  %v11667_v4 = vld [vmem:[%s15696_s2 + $0xa0] ss:$16 sps:$4 sm:$0xff]   ;;  %v11672_v1 = vld [vmem:[%s15696_s2 + $0xc4] ss:$16 sps:$4 sm:$0xff]  }
 0xb3d   : > { %12534 = vtanh.f32 %v8668_v63  ;;  %v15490_v22 = vpack.c.bf16 %v8668_v63, %v8667_v2  ;;  %v12521_v58 = vpop.eup %12520  ;;  %v11669_v2 = vld [vmem:[%s15696_s2 + $0xa4] ss:$16 sps:$4 sm:$0xff]   ;;  %v11670_v0 = vld [vmem:[%s15696_s2 + $0xc0] ss:$16 sps:$4 sm:$0xff]  }
 0xb3e   : > { %12536 = vtanh.f32 %v15487_v54  ;;  %v8640_v62 = vmul.f32 %v8568_v7, %v15293_v10  ;;  %v11673_v63 = vld [vmem:[%s15696_s2 + $0xe0] ss:$16 sps:$4 sm:$0xff]  }
 0xb3f   : > { %v12523_v41 = vpop.eup %12522  ;;  %9206 = vmatmul.mubr.bf16.gmra.mrb[224].mxu1 %v15490_v22  ;;  %v11678_v7 = vld [vmem:[%s15698_s4 + $0x250] sm:$0xff]  }
 0xb40   : > { %v12525_v31 = vpop.eup %12524  ;;  %v15495_v34 = vadd.f32 %v8648_v42, %v8640_v62  ;;  %v8705_v49 = vpack.c.bf16 %v12523_v41, %v12521_v58  ;;  %9215 = vmatprep.mubr.bf16.mxu1 %v15815_v9  ;;  %v11676_v42 = vld [vmem:[%s15698_s4 + $0x240] sm:$0xff]   ;;  %v11682_v58 = vld [vmem:[%s15698_s4 + $0x270] sm:$0xff]   ;;  %v11683_v62 = vld [vmem:[%s15698_s4 + $0x278] sm:$0xff]  }
 0xb41   : > { %v12527_v60 = vpop.eup %12526  ;;  %v8669_v48 = vmul.f32 %v12525_v31, %v8621_v35 }
 0xb42   : > { %v12529_v24 = vpop.eup %12528  ;;  %12538 = vtanh.f32 %v15495_v34  ;;  %10619 = vmatprep.mubr.bf16.mxu0 %v8705_v49  ;;  %v8615_v10 = vmul.f32 0.5, %v12527_v60 }
 0xb43   : > { %v8670_v59 = vmul.f32 %v12529_v24, %v8622_v39  ;;  %v12531_v8 = vpop.eup %12530  ;;  %12540 = vtanh.f32 %v8669_v48 }
 0xb44   : > { %v8616_v43 = vmul.f32 0.5, %v12531_v8  ;;  %v8623_v17 = vadd.f32 0.5, %v8615_v10 }
 0xb45   : > { %12542 = vtanh.f32 %v8670_v59  ;;  %v8896_v44 = vpack.c.bf16 %v8670_v59, %v8669_v48  ;;  %v12533_v38 = vpop.eup %12532 }
 0xb46   : > { %v8624_v56 = vadd.f32 0.5, %v8616_v43 }
 0xb47   : > { %v12535_v52 = vpop.eup %12534  ;;  %9216 = vmatmul.mubr.bf16.gmra.mrb[228].mxu1 %v8896_v44 }
 0xb48   : > { %v12537_v37 = vpop.eup %12536  ;;  %v8706_v21 = vpack.c.bf16 %v12535_v52, %v12533_v38  ;;  %9225 = vmatprep.mubr.bf16.mxu1 %v15815_v9 }
 0xb49   : > { %v8671_v13 = vmul.f32 %v12537_v37, %v8623_v17 }
 0xb4a   : > { %10620 = vmatmul.mubr.bf16.vlgmr.msra.gmra.mrb[84].mxu0 %v8706_v21 }
 0xb4b   : > { %9091 = vmatpush1.bf16.msra.mxu0 %v11652_v29  ;;  %12544 = vtanh.f32 %v8671_v13 }
 0xb4c   : > { %v12539_v14 = vpop.eup %12538  ;;  %9092 = vmatprep.subr.bf16.mxu0 %v11657_v20 }
 0xb4d   : > { %v8672_v33 = vmul.f32 %v12539_v14, %v8624_v56  ;;  %v12541_v27 = vpop.eup %12540 }
 0xb4f   : > { %v12543_v26 = vpop.eup %12542  ;;  %9093 = vmatpush1.bf16.msra.mxu0 %v11655_v5  ;;  %12546 = vtanh.f32 %v8672_v33  ;;  %v8897_v28 = vpack.c.bf16 %v8672_v33, %v8671_v13  ;;  %v15962_v5 = vld [vmem:[#allocation67_spill] sm:$0xff]  ;;  %v15963_v33 = vld [vmem:[#allocation68_spill] sm:$0xff] }
 0xb50   : > { %9094 = vmatprep.subr.bf16.mxu0 %v11660_v18  ;;  %v8707_v40 = vpack.c.bf16 %v12543_v26, %v12541_v27  ;;  %v1122_v14 = vadd.f32 %v15962_v5, %v15833_v11  ;;  %v1124_v27 = vadd.f32 %v15963_v33, %v15834_v36 }
 0xb51   : > { %9226 = vmatmul.mubr.bf16.gmra.mrb[232].mxu1 %v8897_v28 }
 0xb52   : > { %10623 = vmatprep.mubr.bf16.mxu0 %v8707_v40 }
 0xb53   : > { %9095 = vmatpush1.bf16.msra.mxu0 %v11658_v23  ;;  %v15964_v23 = vld [vmem:[#allocation69_spill] sm:$0xff] }
 0xb54   : > { %9096 = vmatprep.subr.bf16.mxu0 %v11663_v57  ;;  %v1126_v40 = vadd.f32 %v15964_v23, %v15833_v11 }
 0xb55   : > { %v12545_v46 = vpop.eup %12544 }
 0xb57   : > { %9097 = vmatpush1.bf16.msra.mxu0 %v11661_v53 }
 0xb58   : > { %9098 = vmatprep.subr.bf16.mxu0 %v11666_v47 }
 0xb59   : > { %v12547_v32 = vpop.eup %12546 }
 0xb5a   : > { %v8708_v30 = vpack.c.bf16 %v12547_v32, %v12545_v46 }
 0xb5b   : > { %9099 = vmatpush1.bf16.msra.mxu0 %v11664_v25  ;;  %v15965_v25 = vld [vmem:[#allocation70_spill] sm:$0xff] }
 0xb5c   : > { %10624 = vmatmul.mubr.bf16.gmra.mrb[88].mxu0 %v8708_v30  ;;  %9100 = vmatprep.subr.bf16.mxu0 %v11669_v2  ;;  %v1128_v46 = vadd.f32 %v15965_v25, %v15834_v36 }
 0xb5d   : > { %9122 = vmatprep.mubr.bf16.mxu0 %v15815_v9 }
 0xb5f   : > { %9101 = vmatpush1.bf16.msra.mxu0 %v11667_v4 }
 0xb60   : > { %9102 = vmatprep.subr.bf16.mxu0 %v11672_v1 }
 0xb63   : > { %9103 = vmatpush1.bf16.msra.mxu0 %v11670_v0 }
 0xb64   : > { %9104 = vmatprep.subr.bf16.mxu0 %v11675_v3 }
 0xb67   : > { %9105 = vmatpush1.bf16.msra.mxu0 %v11673_v63 }
 0xb68   : > { %10627 = vmatprep.subr.bf16.mxu0 %v11676_v42 }
 0xb6a   : > { %9123 = vmatmul.mubr.bf16.vlgmr.msra.gmra.mrb[152].mxu0 %v15477_v51  ;;  %v11677_v51 = vld [vmem:[%s15698_s4 + $0x248] sm:$0xff]  }
 0xb6b   : > { %9132 = vmatprep.mubr.bf16.mxu0 %v15815_v9  ;;  %10628 = vmatpush3.bf16.msra.mxu0 %v11676_v42 }
 0xb6c   : > { %10629 = vmatprep.subr.bf16.mxu0 %v11677_v51 }
 0xb6f   : > { %10630 = vmatpush3.bf16.msra.mxu0 %v11677_v51 }
 0xb70   : > { %10631 = vmatprep.subr.bf16.mxu0 %v11678_v7 }
 0xb72   : > { %9133 = vmatmul.mubr.bf16.gmra.mrb[156].mxu0 %v15490_v22  ;;  %v11681_v22 = vld [vmem:[%s15698_s4 + $0x268] sm:$0xff]  }
 0xb73   : > { %9142 = vmatprep.mubr.bf16.mxu0 %v15815_v9  ;;  %10632 = vmatpush3.bf16.msra.mxu0 %v11678_v7 }
 0xb7a   : > { %9143 = vmatmul.mubr.bf16.gmra.mrb[160].mxu0 %v8896_v44 }
 0xb7b   : > { %9152 = vmatprep.mubr.bf16.mxu0 %v15815_v9  ;;  %v11679_v9 = vld [vmem:[%s15698_s4 + $0x258] sm:$0xff]  }
 0xb7c   : > { %10633 = vmatprep.subr.bf16.mxu0 %v11679_v9 }
 0xb7d   : > { %10634 = vmatpush3.bf16.msra.mxu0 %v11679_v9 }
 0xb7e   : > { %10635 = vmatprep.subr.bf16.mxu0 %v11680_v19 }
 0xb81   : > { %10636 = vmatpush3.bf16.msra.mxu0 %v11680_v19  ;;  %v15966_v19 = vld [vmem:[#allocation71_spill] sm:$0xff] }
 0xb82   : > { %9153 = vmatmul.mubr.bf16.gmra.mrb[164].mxu0 %v8897_v28  ;;  %10637 = vmatprep.subr.bf16.mxu0 %v11681_v22 }
 0xb85   : > { %10638 = vmatpush3.bf16.msra.mxu0 %v11681_v22  ;;  %v1132_v22 = vadd.f32 %v15966_v19, %v15833_v11 }
 0xb86   : > { %10639 = vmatprep.subr.bf16.mxu0 %v11682_v58 }
 0xb89   : > { %10640 = vmatpush3.bf16.msra.mxu0 %v11682_v58 }
 0xb8a   : > { %10641 = vmatprep.subr.bf16.mxu0 %v11683_v62 }
 0xb8d   : > { %10642 = vmatpush3.bf16.msra.mxu0 %v11683_v62  ;;  %v15967_v62 = vld [vmem:[#allocation72_spill] sm:$0xff] }
 0xc0a   : > { %v9197_v41 = vpop.f32.mrb[220].mxu1 }
 0xc0b   : > { %v9199_v35 = vpop.f32.mrb[221].mxu1  ;;  %v11003_v21 = vadd.f32 %v9197_v41, %v13327_v16  ;;  %v1134_v41 = vadd.f32 %v15967_v62, %v15834_v36 }
 0xc0c   : > { %v9201_v31 = vpop.f32.mrb[222].mxu1  ;;  %v11004_v37 = vadd.f32 %v9199_v35, %v13329_v55 }
 0xc0d   : > { %v9203_v49 = vpop.f32.mrb[223].mxu1  ;;  %v11005_v20 = vadd.f32 %v9201_v31, %v13327_v16  ;;  %12548 = vtanh.f32 %v11003_v21 }
 0xc0e   : > { %v11006_v17 = vadd.f32 %v9203_v49, %v13329_v55  ;;  %v9404_v13 = vmul.f32 0.5, %v11004_v37 }
 0xc0f   : > { %12550 = vtanh.f32 %v11005_v20 }
 0xc10   : > { %v9405_v56 = vmul.f32 0.5, %v11006_v17  ;;  %12552 = vtanh.f32 %v9404_v13 }
 0xc12   : > { %v9207_v60 = vpop.f32.mrb[224].mxu1  ;;  %12554 = vtanh.f32 %v9405_v56 }
 0xc13   : > { %v9209_v39 = vpop.f32.mrb[225].mxu1  ;;  %v11007_v18 = vadd.f32 %v9207_v60, %v13327_v16  ;;  %v15968_v60 = vld [vmem:[#allocation73_spill] sm:$0xff] }
 0xc14   : > { %v9211_v48 = vpop.f32.mrb[226].mxu1  ;;  %v11008_v57 = vadd.f32 %v9209_v39, %v13329_v55  ;;  %v1136_v39 = vadd.f32 %v15968_v60, %v15833_v11 }
 0xc15   : > { %v9213_v24 = vpop.f32.mrb[227].mxu1  ;;  %v11009_v26 = vadd.f32 %v9211_v48, %v13327_v16  ;;  %12556 = vtanh.f32 %v11007_v18 }
 0xc16   : > { %v11010_v2 = vadd.f32 %v9213_v24, %v13329_v55  ;;  %v9406_v42 = vmul.f32 0.5, %v11008_v57 }
 0xc17   : > { %12558 = vtanh.f32 %v11009_v26  ;;  %v12549_v49 = vpop.eup %12548 }
 0xc18   : > { %v9407_v7 = vmul.f32 0.5, %v11010_v2 }
 0xc19   : > { %v15608_v17 = vpop.eup %12550 }
 0xc1a   : > { %v9217_v59 = vpop.f32.mrb[228].mxu1  ;;  %v15613_v56 = vpop.eup %12552 }
 0xc1b   : > { %v9219_v8 = vpop.f32.mrb[229].mxu1  ;;  %v11011_v58 = vadd.f32 %v9217_v59, %v13327_v16  ;;  %v15969_v59 = vld [vmem:[#allocation74_spill] sm:$0xff] }
 0xc1c   : > { %v9221_v10 = vpop.f32.mrb[230].mxu1  ;;  %v11012_v48 = vadd.f32 %v9219_v8, %v13329_v55  ;;  %v1138_v21 = vadd.f32 %v15969_v59, %v15834_v36  ;;  %v12555_v33 = vpop.eup %12554 }
 0xc1d   : > { %v9223_v44 = vpop.f32.mrb[231].mxu1  ;;  %v11013_v35 = vadd.f32 %v9221_v10, %v13327_v16 }
 0xc1e   : > { %v11014_v20 = vadd.f32 %v9223_v44, %v13329_v55 }
 0xc1f   : > { %v15615_v26 = vpop.eup %12556 }
 0xc20   : > { %v9409_v44 = vmul.f32 0.5, %v11014_v20 }
 0xc24   : > { %v15575_v38 = vpop.f32.mrb[232].mxu1 }
 0xc25   : > { %v15577_v52 = vpop.f32.mrb[233].mxu1 }
 0xc26   : > { %v15579_v43 = vpop.f32.mrb[234].mxu1 }
 0xc27   : > { %v15581_v29 = vpop.f32.mrb[235].mxu1 }
 0xc3d   : > { %v9124_v28 = vpop.f32.mrb[152].mxu0 }
 0xc3e   : > { %v9236_v53 = vadd.f32 %v9124_v28, %v1122_v14  ;;  %v9126_v47 = vpop.f32.mrb[153].mxu0  ;;  %v9408_v28 = vmul.f32 0.5, %v11012_v48 }
 0xc3f   : > { %v9237_v32 = vadd.f32 %v9126_v47, %v1124_v27  ;;  %v9128_v30 = vpop.f32.mrb[154].mxu0  ;;  %v15970_v47 = vld [vmem:[#allocation77_spill] sm:$0xff] }
 0xc40   : > { %v9308_v4 = vmul.f32 0.5, %v9236_v53  ;;  %v9240_v1 = vadd.f32 %v9128_v30, %v1126_v40  ;;  %v9130_v0 = vpop.f32.mrb[155].mxu0  ;;  %v15617_v40 = vpop.eup %12558  ;;  %v1142_v25 = vadd.f32 %v15970_v47, %v15833_v11 }
 0xc41   : > { %v9348_v3 = vmul.f32 0.5, %v9237_v32  ;;  %v9241_v63 = vadd.f32 %v9130_v0, %v1128_v46  ;;  %v15971_v46 = vld [vmem:[#allocation78_spill] sm:$0xff]  ;;  %v15972_v32 = vld [vmem:[#allocation79_spill] sm:$0xff] }
 0xc42   : > { %12560 = vtanh.f32 %v9308_v4  ;;  %v9309_v51 = vmul.f32 0.5, %v9240_v1  ;;  %v1144_v2 = vadd.f32 %v15971_v46, %v15834_v36  ;;  %v1146_v30 = vadd.f32 %v15972_v32, %v15833_v11  ;;  %v15973_v1 = vld [vmem:[#allocation80_spill] sm:$0xff] }
 0xc43   : > { %12562 = vtanh.f32 %v9348_v3  ;;  %v9349_v9 = vmul.f32 0.5, %v9241_v63  ;;  %v1148_v0 = vadd.f32 %v15973_v1, %v15834_v36  ;;  %v15974_v3 = vld [vmem:[#allocation81_spill] sm:$0xff]  ;;  %v15977_v46 = vld [vmem:[#allocation84_spill] sm:$0xff]  ;;  %v9421_v1 = vmul.f32 0.5, %v12555_v33 }
 0xc44   : > { %12564 = vtanh.f32 %v9309_v51  ;;  %v1152_v63 = vadd.f32 %v15974_v3, %v15833_v11 }
 0xc45   : > { %12566 = vtanh.f32 %v9349_v9  ;;  %v9134_v31 = vpop.f32.mrb[156].mxu0  ;;  %v15975_v9 = vld [vmem:[#allocation82_spill] sm:$0xff] }
 0xc46   : > { %12568 = vtanh.f32 %v9406_v42  ;;  %v9244_v24 = vadd.f32 %v9134_v31, %v1132_v22  ;;  %v9136_v37 = vpop.f32.mrb[157].mxu0  ;;  %v1154_v19 = vadd.f32 %v15975_v9, %v15834_v36 }
 0xc47   : > { %12570 = vtanh.f32 %v9407_v7  ;;  %v9245_v10 = vadd.f32 %v9136_v37, %v1134_v41  ;;  %v9138_v13 = vpop.f32.mrb[158].mxu0 }
 0xc48   : > { %12572 = vtanh.f32 %v11011_v58  ;;  %v9310_v5 = vmul.f32 0.5, %v9244_v24  ;;  %v9248_v14 = vadd.f32 %v9138_v13, %v1136_v39  ;;  %v9140_v18 = vpop.f32.mrb[159].mxu0 }
 0xc49   : > { %12574 = vtanh.f32 %v11013_v35  ;;  %v9350_v8 = vmul.f32 0.5, %v9245_v10  ;;  %v9249_v27 = vadd.f32 %v9140_v18, %v1138_v21 }
 0xc4a   : > { %12576 = vtanh.f32 %v9310_v5  ;;  %v9311_v23 = vmul.f32 0.5, %v9248_v14 }
 0xc4b   : > { %12578 = vtanh.f32 %v9350_v8  ;;  %v9351_v57 = vmul.f32 0.5, %v9249_v27 }
 0xc4c   : > { %v12561_v53 = vpop.eup %12560  ;;  %12580 = vtanh.f32 %v9311_v23 }
 0xc4d   : > { %v12563_v4 = vpop.eup %12562  ;;  %v9324_v42 = vmul.f32 0.5, %v12561_v53  ;;  %12582 = vtanh.f32 %v9351_v57  ;;  %v9144_v51 = vpop.f32.mrb[160].mxu0  ;;  %v15976_v57 = vld [vmem:[#allocation83_spill] sm:$0xff] }
 0xc4e   : > { %v12565_v7 = vpop.eup %12564  ;;  %12584 = vtanh.f32 %v9408_v28  ;;  %v9364_v22 = vmul.f32 0.5, %v12563_v4  ;;  %v9252_v58 = vadd.f32 %v9144_v51, %v1142_v25  ;;  %v9146_v62 = vpop.f32.mrb[161].mxu0  ;;  %v1156_v53 = vadd.f32 %v15976_v57, %v15833_v11 }
 0xc4f   : > { %v12567_v41 = vpop.eup %12566  ;;  %12586 = vtanh.f32 %v9409_v44  ;;  %v9332_v35 = vadd.f32 0.5, %v9324_v42  ;;  %v9325_v31 = vmul.f32 0.5, %v12565_v7  ;;  %v9253_v60 = vadd.f32 %v9146_v62, %v1144_v2  ;;  %v9148_v39 = vpop.f32.mrb[162].mxu0 }
 0xc50   : > { %v15631_v48 = vpop.eup %12568  ;;  %v9372_v24 = vadd.f32 0.5, %v9364_v22  ;;  %v9365_v37 = vmul.f32 0.5, %v12567_v41  ;;  %v9312_v59 = vmul.f32 0.5, %v9252_v58  ;;  %v9256_v21 = vadd.f32 %v9148_v39, %v1146_v30  ;;  %v9150_v20 = vpop.f32.mrb[163].mxu0 }
 0xc51   : > { %v15633_v10 = vpop.eup %12570  ;;  %v9452_v13 = vmul.f32 %v12549_v49, %v9332_v35  ;;  %v9333_v5 = vadd.f32 0.5, %v9325_v31  ;;  %v9352_v14 = vmul.f32 0.5, %v9253_v60  ;;  %v9257_v18 = vadd.f32 %v9150_v20, %v1148_v0 }
 0xc52   : > { %v15635_v8 = vpop.eup %12572  ;;  %v9444_v27 = vmul.f32 %v9372_v24, %v15436_v12  ;;  %v9373_v28 = vadd.f32 0.5, %v9365_v37  ;;  %12588 = vtanh.f32 %v9312_v59  ;;  %v9313_v23 = vmul.f32 0.5, %v9256_v21 }
 0xc53   : > { %v15638_v44 = vpop.eup %12574  ;;  %v9453_v47 = vmul.f32 %v15608_v17, %v9333_v5  ;;  %12590 = vtanh.f32 %v9352_v14  ;;  %v9353_v25 = vmul.f32 0.5, %v9257_v18  ;;  %v1158_v2 = vadd.f32 %v15977_v46, %v15834_v36 }
 0xc54   : > { %v12577_v49 = vpop.eup %12576  ;;  %v9460_v32 = vadd.f32 %v9452_v13, %v9444_v27  ;;  %v9445_v30 = vmul.f32 %v9373_v28, %v15443_v6  ;;  %12592 = vtanh.f32 %v9313_v23  ;;  %v9420_v4 = vmul.f32 0.5, %v15613_v56 }
 0xc55   : > { %v12579_v12 = vpop.eup %12578  ;;  %v9326_v0 = vmul.f32 0.5, %v12577_v49  ;;  %12594 = vtanh.f32 %v9353_v25  ;;  %v9154_v3 = vpop.f32.mrb[164].mxu0  ;;  %v11015_v36 = vadd.f32 %v15575_v38, %v13327_v16  ;;  %v11016_v21 = vadd.f32 %v15577_v52, %v13329_v55 }
 0xc56   : > { %v12581_v11 = vpop.eup %12580  ;;  %12596 = vtanh.f32 %v9460_v32  ;;  %v9461_v17 = vadd.f32 %v9453_v47, %v9445_v30  ;;  %v9366_v42 = vmul.f32 0.5, %v12579_v12  ;;  %v9260_v51 = vadd.f32 %v9154_v3, %v1152_v63  ;;  %v9156_v7 = vpop.f32.mrb[165].mxu0 }
 0xc57   : > { %v12583_v9 = vpop.eup %12582  ;;  %v9334_v22 = vadd.f32 0.5, %v9326_v0  ;;  %v9327_v6 = vmul.f32 0.5, %v12581_v11  ;;  %v9261_v58 = vadd.f32 %v9156_v7, %v1154_v19  ;;  %v9158_v62 = vpop.f32.mrb[166].mxu0  ;;  %v9428_v57 = vadd.f32 0.5, %v9420_v4 }
 0xc58   : > { %v15649_v41 = vpop.eup %12584  ;;  %12598 = vtanh.f32 %v9461_v17  ;;  %v9374_v56 = vadd.f32 0.5, %v9366_v42  ;;  %v9367_v33 = vmul.f32 0.5, %v12583_v9  ;;  %v9314_v35 = vmul.f32 0.5, %v9260_v51  ;;  %v9160_v31 = vpop.f32.mrb[167].mxu0 }
 0xc59   : > { %v15651_v60 = vpop.eup %12586  ;;  %v9454_v63 = vmul.f32 %v15615_v26, %v9334_v22  ;;  %v9335_v39 = vadd.f32 0.5, %v9327_v6  ;;  %v9354_v24 = vmul.f32 0.5, %v9261_v58  ;;  %v9264_v37 = vadd.f32 %v9158_v62, %v1156_v53 }
 0xc5a   : > { %v9446_v38 = vmul.f32 %v9374_v56, %v15456_v15  ;;  %v9375_v59 = vadd.f32 0.5, %v9367_v33  ;;  %12600 = vtanh.f32 %v9314_v35  ;;  %v9265_v19 = vadd.f32 %v9160_v31, %v1158_v2 }
 0xc5b   : > { %v9455_v20 = vmul.f32 %v15617_v40, %v9335_v39  ;;  %12602 = vtanh.f32 %v9354_v24  ;;  %v9315_v13 = vmul.f32 0.5, %v9264_v37  ;;  %v11017_v15 = vadd.f32 %v15579_v43, %v13327_v16 }
 0xc5c   : > { %v12589_v5 = vpop.eup %12588  ;;  %12604 = vtanh.f32 %v11015_v36  ;;  %v9462_v14 = vadd.f32 %v9454_v63, %v9446_v38  ;;  %v9447_v26 = vmul.f32 %v9375_v59, %v15462_v61  ;;  %v9355_v18 = vmul.f32 0.5, %v9265_v19 }
 0xc5d   : > { %v12591_v27 = vpop.eup %12590  ;;  %v9328_v28 = vmul.f32 0.5, %v12589_v5  ;;  %12606 = vtanh.f32 %v9315_v13  ;;  %v9410_v47 = vmul.f32 0.5, %v11016_v21  ;;  %v9429_v2 = vadd.f32 0.5, %v9421_v1 }
 0xc5e   : > { %v12593_v23 = vpop.eup %12592  ;;  %12608 = vtanh.f32 %v9462_v14  ;;  %v9463_v52 = vadd.f32 %v9455_v20, %v9447_v26  ;;  %v9368_v53 = vmul.f32 0.5, %v12591_v27  ;;  %v11018_v4 = vadd.f32 %v15581_v29, %v13329_v55 }
 0xc5f   : > { %v12595_v40 = vpop.eup %12594  ;;  %v9336_v25 = vadd.f32 0.5, %v9328_v28  ;;  %v9329_v49 = vmul.f32 0.5, %v12593_v23  ;;  %12610 = vtanh.f32 %v9355_v18  ;;  %v9422_v11 = vmul.f32 0.5, %v15631_v48 }
 0xc60   : > { %v12597_v46 = vpop.eup %12596  ;;  %12612 = vtanh.f32 %v9463_v52  ;;  %v9376_v61 = vadd.f32 0.5, %v9368_v53  ;;  %v9369_v32 = vmul.f32 0.5, %v12595_v40  ;;  %v9423_v9 = vmul.f32 0.5, %v15633_v10 }
 0xc61   : > { %12614 = vtanh.f32 %v11017_v15  ;;  %v9456_v16 = vmul.f32 %v15635_v8, %v9336_v25  ;;  %v9337_v43 = vadd.f32 0.5, %v9329_v49  ;;  %v9476_v30 = vmul.f32 %v12597_v46, %v9428_v57 }
 0xc62   : > { %v12599_v12 = vpop.eup %12598  ;;  %v9448_v0 = vmul.f32 %v9376_v61, %v15473_v45  ;;  %v9377_v3 = vadd.f32 0.5, %v9369_v32  ;;  %12616 = vtanh.f32 %v9410_v47  ;;  %v9411_v29 = vmul.f32 0.5, %v11018_v4 }
 0xc63   : > { %v9457_v1 = vmul.f32 %v15638_v44, %v9337_v43  ;;  %v9477_v17 = vmul.f32 %v12599_v12, %v9429_v2  ;;  %12618 = vtanh.f32 %v9476_v30  ;;  %v9430_v6 = vadd.f32 0.5, %v9422_v11  ;;  %v10288_v11 = vld [vmem:[%s15699_s5] ss:$0 sm:$0xff] }
 0xc64   : > { %v12601_v42 = vpop.eup %12600  ;;  %v9464_v51 = vadd.f32 %v9456_v16, %v9448_v0  ;;  %v9449_v7 = vmul.f32 %v9377_v3, %v15480_v50  ;;  %v9431_v50 = vadd.f32 0.5, %v9423_v9  ;;  %v9424_v38 = vmul.f32 0.5, %v15649_v41 }
 0xc65   : > { %v12603_v8 = vpop.eup %12602  ;;  %v9330_v36 = vmul.f32 0.5, %v12601_v42  ;;  %12620 = vtanh.f32 %v9477_v17  ;;  %v9425_v5 = vmul.f32 0.5, %v15651_v60 }
 0xc66   : > { %v12605_v55 = vpop.eup %12604  ;;  %12622 = vtanh.f32 %v9464_v51  ;;  %v9465_v45 = vadd.f32 %v9457_v1, %v9449_v7  ;;  %v9370_v22 = vmul.f32 0.5, %v12603_v8 }
 0xc67   : > { %v12607_v48 = vpop.eup %12606  ;;  %v9338_v58 = vadd.f32 0.5, %v9330_v36  ;;  %v9433_v23 = vadd.f32 0.5, %v9425_v5 }
 0xc68   : > { %v12609_v44 = vpop.eup %12608  ;;  %12624 = vtanh.f32 %v9465_v45  ;;  %v9378_v62 = vadd.f32 0.5, %v9370_v22  ;;  %v9331_v56 = vmul.f32 0.5, %v12607_v48 }
 0xc69   : > { %v12611_v33 = vpop.eup %12610  ;;  %v9478_v35 = vmul.f32 %v12609_v44, %v9430_v6  ;;  %v9458_v31 = vmul.f32 %v12605_v55, %v9338_v58  ;;  %12626 = vtanh.f32 %v9411_v29 }
 0xc6a   : > { %v12613_v63 = vpop.eup %12612  ;;  %v9450_v10 = vmul.f32 %v9378_v62, %v15487_v54  ;;  %v9339_v39 = vadd.f32 0.5, %v9331_v56  ;;  %v9371_v24 = vmul.f32 0.5, %v12611_v33  ;;  %v9432_v54 = vadd.f32 0.5, %v9424_v38 }
 0xc6b   : > { %v12615_v37 = vpop.eup %12614  ;;  %v9479_v59 = vmul.f32 %v12613_v63, %v9431_v50  ;;  %12628 = vtanh.f32 %v9478_v35 }
 0xc6c   : > { %v9466_v19 = vadd.f32 %v9458_v31, %v9450_v10  ;;  %v9459_v21 = vmul.f32 %v12615_v37, %v9339_v39  ;;  %v9379_v20 = vadd.f32 0.5, %v9371_v24  ;;  %v12617_v13 = vpop.eup %12616 }
 0xc6d   : > { %12630 = vtanh.f32 %v9479_v59  ;;  %v12619_v14 = vpop.eup %12618  ;;  %v9426_v52 = vmul.f32 0.5, %v12617_v13 }
 0xc6e   : > { %12632 = vtanh.f32 %v9466_v19  ;;  %v9451_v26 = vmul.f32 %v9379_v20, %v15495_v34 }
 0xc6f   : > { %v12621_v18 = vpop.eup %12620  ;;  %v9434_v25 = vadd.f32 0.5, %v9426_v52 }
 0xc70   : > { %v12623_v27 = vpop.eup %12622  ;;  %v9467_v15 = vadd.f32 %v9459_v21, %v9451_v26  ;;  %v9516_v28 = vpack.c.bf16 %v12621_v18, %v12619_v14 }
 0xc71   : > { %v9480_v41 = vmul.f32 %v12623_v27, %v9432_v54 }
 0xc72   : > { %v12625_v57 = vpop.eup %12624  ;;  %12634 = vtanh.f32 %v9467_v15  ;;  %10643 = vmatprep.mubr.bf16.mxu0 %v9516_v28 }
 0xc73   : > { %v9481_v53 = vmul.f32 %v12625_v57, %v9433_v23  ;;  %v12627_v40 = vpop.eup %12626  ;;  %12636 = vtanh.f32 %v9480_v41 }
 0xc74   : > { %v9427_v49 = vmul.f32 0.5, %v12627_v40 }
 0xc75   : > { %12638 = vtanh.f32 %v9481_v53  ;;  %v12629_v60 = vpop.eup %12628 }
 0xc76   : > { %v9435_v61 = vadd.f32 0.5, %v9427_v49 }
 0xc77   : > { %v12631_v47 = vpop.eup %12630 }
 0xc78   : > { %v12633_v34 = vpop.eup %12632  ;;  %v9517_v46 = vpack.c.bf16 %v12631_v47, %v12629_v60 }
 0xc79   : > { %v9482_v2 = vmul.f32 %v12633_v34, %v9434_v25 }
 0xc7a   : > { %10644 = vmatmul.mubr.bf16.vlgmr.msra.gmra.mrb[84].mxu0 %v9517_v46 }
 0xc7b   : > { %12640 = vtanh.f32 %v9482_v2 }
 0xc7c   : > { %v12635_v32 = vpop.eup %12634 }
 0xc7d   : > { %v9483_v16 = vmul.f32 %v12635_v32, %v9435_v61  ;;  %v12637_v43 = vpop.eup %12636 }
 0xc7f   : > { %v12639_v30 = vpop.eup %12638  ;;  %12642 = vtanh.f32 %v9483_v16 }
 0xc80   : > { %v9518_v12 = vpack.c.bf16 %v12639_v30, %v12637_v43 }
 0xc82   : > { %10647 = vmatprep.mubr.bf16.mxu0 %v9518_v12 }
 0xc85   : > { %v12641_v4 = vpop.eup %12640 }
 0xc89   : > { %v12643_v0 = vpop.eup %12642 }
 0xc8a   : > { %v9519_v3 = vpack.c.bf16 %v12643_v0, %v12641_v4 }
 0xc8c   : > { %10648 = vmatmul.mubr.bf16.gmra.mrb[88].mxu0 %v9519_v3 }
 0xd4d   : > { %v10645_v1 = vpop.f32.mrb[84].mxu0 }
 0xd4e   : > { %v9682_v17 = vadd.f32 %v10645_v1, %v10288_v11  ;;  %v9618_v42 = vpop.f32.mrb[85].mxu0 }
 0xd4f   : > { %v9680_v51 = vadd.f32 %v10288_v11, %v9618_v42  ;;  %v10646_v7 = vpop.f32.mrb[86].mxu0 }
 0xd50   : > { %v9690_v8 = vmul.f32 0.5, %v9682_v17  ;;  %v9683_v9 = vadd.f32 %v10646_v7, %v10288_v11  ;;  %v9621_v36 = vpop.f32.mrb[87].mxu0 }
 0xd51   : > { %v9688_v55 = vmul.f32 0.5, %v9680_v51  ;;  %v9681_v29 = vadd.f32 %v10288_v11, %v9621_v36 }
 0xd52   : > { %12644 = vtanh.f32 %v9690_v8  ;;  %v9691_v45 = vmul.f32 0.5, %v9683_v9 }
 0xd53   : > { %12646 = vtanh.f32 %v9688_v55  ;;  %v9689_v22 = vmul.f32 0.5, %v9681_v29 }
 0xd54   : > { %12648 = vtanh.f32 %v9691_v45 }
 0xd55   : > { %12650 = vtanh.f32 %v9689_v22 }
 0xd5c   : > { %v12645_v48 = vpop.eup %12644 }
 0xd5d   : > { %v12647_v6 = vpop.eup %12646  ;;  %v9706_v58 = vmul.f32 0.5, %v12645_v48 }
 0xd5e   : > { %v12649_v44 = vpop.eup %12648  ;;  %v9704_v62 = vmul.f32 0.5, %v12647_v6 }
 0xd5f   : > { %v12651_v56 = vpop.eup %12650  ;;  %v9714_v33 = vadd.f32 0.5, %v9706_v58  ;;  %v9707_v50 = vmul.f32 0.5, %v12649_v44  ;;  %v10649_v35 = vpop.f32.mrb[88].mxu0 }
 0xd60   : > { %v9712_v31 = vadd.f32 0.5, %v9704_v62  ;;  %v9705_v63 = vmul.f32 0.5, %v12651_v56  ;;  %v9686_v10 = vadd.f32 %v10649_v35, %v10288_v11  ;;  %v9634_v39 = vpop.f32.mrb[89].mxu0 }
 0xd61   : > { %9722 = vst [vmem:[%s15681_s28 + $0x10] sm:$0xff] %v9714_v33  ;;  %v9715_v24 = vadd.f32 0.5, %v9707_v50  ;;  %v9684_v37 = vadd.f32 %v10288_v11, %v9634_v39  ;;  %v10650_v38 = vpop.f32.mrb[90].mxu0 }
 0xd62   : > { %9720 = vst [vmem:[%s15681_s28] sm:$0xff] %v9712_v31  ;;  %v9713_v59 = vadd.f32 0.5, %v9705_v63  ;;  %v9694_v19 = vmul.f32 0.5, %v9686_v10  ;;  %v9687_v21 = vadd.f32 %v10650_v38, %v10288_v11  ;;  %v9637_v20 = vpop.f32.mrb[91].mxu0 }
 0xd63   : > { %9723 = vst [vmem:[%s15681_s28 + $0x18] sm:$0xff] %v9715_v24  ;;  %v9692_v13 = vmul.f32 0.5, %v9684_v37  ;;  %v9685_v5 = vadd.f32 %v10288_v11, %v9637_v20 }
 0xd64   : > { %9721 = vst [vmem:[%s15681_s28 + $0x8] sm:$0xff] %v9713_v59  ;;  %12652 = vtanh.f32 %v9694_v19  ;;  %v9695_v14 = vmul.f32 0.5, %v9687_v21 }
 0xd65   : > { %12654 = vtanh.f32 %v9692_v13  ;;  %v9693_v26 = vmul.f32 0.5, %v9685_v5 }
 0xd66   : > { %12656 = vtanh.f32 %v9695_v14 }
 0xd67   : > { %12658 = vtanh.f32 %v9693_v26 }
 0xd6e   : > { %v12653_v18 = vpop.eup %12652 }
 0xd6f   : > { %v12655_v54 = vpop.eup %12654  ;;  %v9710_v27 = vmul.f32 0.5, %v12653_v18 }
 0xd70   : > { %v12657_v15 = vpop.eup %12656  ;;  %v9708_v28 = vmul.f32 0.5, %v12655_v54 }
 0xd71   : > { %v12659_v23 = vpop.eup %12658  ;;  %v9718_v41 = vadd.f32 0.5, %v9710_v27  ;;  %v9711_v57 = vmul.f32 0.5, %v12657_v15 }
 0xd72   : > { %v9716_v52 = vadd.f32 0.5, %v9708_v28  ;;  %v9709_v53 = vmul.f32 0.5, %v12659_v23 }
 0xd73   : > { %9726 = vst [vmem:[%s15681_s28 + $0x30] sm:$0xff] %v9718_v41  ;;  %v9719_v40 = vadd.f32 0.5, %v9711_v57 }
 0xd74   : > { %9724 = vst [vmem:[%s15681_s28 + $0x20] sm:$0xff] %v9716_v52  ;;  %v9717_v60 = vadd.f32 0.5, %v9709_v53 }
 0xd75   : > { %9727 = vst [vmem:[%s15681_s28 + $0x38] sm:$0xff] %v9719_v40 }
 0xd76   : > { %9725 = vst [vmem:[%s15681_s28 + $0x28] sm:$0xff] %v9717_v60 }
 0xd77 PF: > { %s16_s21 = sadd.s32 1, %s12685_s21  }
 0xd78   : > { %p13_p5 = scmp.ge.s32.totalorder %s16_s21, 4  }
 0xd7a   :  { %15 = sbr.rel (!%p13_p5) target bundleno = 1 (0x1), region = 74 }

</bundles_post_ra>
